<compile_context>
chip_gen: v7x
topology: tpu7x:2x2x1
jax: 0.10.0
libtpu: 0.0.40
codegen_flags: <defaults>
</compile_context>

<pallas_src>
import jax
import jax.numpy as jnp
from jax.experimental import pallas as pl
from jax.experimental.pallas import tpu as pltpu


# Geometry implied by the module (fc1 = 128*3*3  =>  28x28 single-channel input).
_H = 28
_C1, _C2, _C3 = 32, 64, 128
_HO1, _HP1 = 26, 13          # conv1 output / pool1 output spatial size
_HO2, _HP2 = 11, 5           # conv2 output / pool2 output spatial size
_HO3 = 3                     # conv3 output spatial size

_PARAM_ORDER = (
    "conv1_banded", "conv1_bias_row",
    "pool1_rowsel", "pool1_colsel_even", "pool1_colsel_odd",
    "conv2_banded", "conv2_bias_row",
    "pool2_rowsel", "pool2_colsel_even", "pool2_colsel_odd",
    "conv3_banded", "conv3_bias_row",
    "fc1_w", "fc1_b", "fc2_w", "fc2_b",
)


# ----------------------------------------------------------------------------
# In-kernel building blocks (values / refs only; traced inside the Pallas kernel)
# ----------------------------------------------------------------------------

def _conv3x3_banded(x2d, bmat_ref, bias_ref, ho):
    """x2d: (ho+2, W*Cin) bf16; bmat_ref: (3, W*Cin, Wo*Cout) bf16 banded matrices;
    bias_ref: (1, Wo*Cout) f32.  Returns relu(conv3x3(x)) as (ho, Wo*Cout) f32 with
    the (w, cout) channels-last packing on the lane dim."""
    acc = jnp.dot(x2d[0:ho, :], bmat_ref[0], preferred_element_type=jnp.float32)
    acc = acc + jnp.dot(x2d[1:ho + 1, :], bmat_ref[1], preferred_element_type=jnp.float32)
    acc = acc + jnp.dot(x2d[2:ho + 2, :], bmat_ref[2], preferred_element_type=jnp.float32)
    return jnp.maximum(acc + bias_ref[...], 0.0)


def _maxpool2x2(c, rowsel_ref, colsel_even_ref, colsel_odd_ref, hp):
    """2x2 stride-2 max-pool of c: (Ho, Wo*Cout) f32  ->  (hp, wp*Cout) bf16.
    Row-pair max via a shifted element-wise max; the stride-2 row/column decimation
    is done with constant 0/1 selector matmuls (exact copies in f32 accumulation)."""
    mh = jnp.maximum(c[:2 * hp - 1, :], c[1:2 * hp, :]).astype(jnp.bfloat16)
    rows = jnp.dot(rowsel_ref[...], mh,
                   preferred_element_type=jnp.float32).astype(jnp.bfloat16)
    left = jnp.dot(rows, colsel_even_ref[...], preferred_element_type=jnp.float32)
    right = jnp.dot(rows, colsel_odd_ref[...], preferred_element_type=jnp.float32)
    return jnp.maximum(left, right).astype(jnp.bfloat16)


def _fc_head(c3, wfc1_ref, bfc1_ref, wfc2_ref, bfc2_ref):
    """c3: (3, 3*128) f32 conv3 output -> relu(fc2(relu(fc1(flatten)))) as (1,128) f32.
    fc1 is summed over the 3 output rows (contraction split over h); fc2 is N-padded
    10 -> 128 (extra columns are exactly 0 and sliced off outside)."""
    c3b = c3.astype(jnp.bfloat16)
    h = jnp.dot(c3b[0:1, :], wfc1_ref[0], preferred_element_type=jnp.float32)
    h = h + jnp.dot(c3b[1:2, :], wfc1_ref[1], preferred_element_type=jnp.float32)
    h = h + jnp.dot(c3b[2:3, :], wfc1_ref[2], preferred_element_type=jnp.float32)
    h = jnp.maximum(h + bfc1_ref[...], 0.0)
    o = jnp.dot(h.astype(jnp.bfloat16), wfc2_ref[...], preferred_element_type=jnp.float32)
    return jnp.maximum(o + bfc2_ref[...], 0.0)


def _net_kernel(x_ref,
                b1_ref, bias1_ref, rs1_ref, cse1_ref, cso1_ref,
                b2_ref, bias2_ref, rs2_ref, cse2_ref, cso2_ref,
                b3_ref, bias3_ref,
                wfc1_ref, bfc1_ref, wfc2_ref, bfc2_ref,
                out_ref):
    # TODO(synk): Dropout2d layers are identity here (inference/eval-mode forward).
    bt = x_ref.shape[0]
    for s in range(bt):                                           # static unroll over batch tile
        x2d = x_ref[s]                                            # (28, 28) bf16
        c1 = _conv3x3_banded(x2d, b1_ref, bias1_ref, _HO1)        # (26, 26*32) f32
        p1 = _maxpool2x2(c1, rs1_ref, cse1_ref, cso1_ref, _HP1)   # (13, 13*32) bf16
        c2 = _conv3x3_banded(p1, b2_ref, bias2_ref, _HO2)         # (11, 11*64) f32
        p2 = _maxpool2x2(c2, rs2_ref, cse2_ref, cso2_ref, _HP2)   # (5,  5*64)  bf16
        c3 = _conv3x3_banded(p2, b3_ref, bias3_ref, _HO3)         # (3,  3*128) f32
        out_ref[s] = _fc_head(c3, wfc1_ref, bfc1_ref, wfc2_ref, bfc2_ref)  # (1, 128) f32


# ----------------------------------------------------------------------------
# Weight packing (done ONCE at init, outside the kernel)
# ----------------------------------------------------------------------------

def _banded_conv_mats(w4, width):
    """w4: (3, 3, Cin, Cout) f32 -> (3, width*Cin, (width-2)*Cout) bf16 banded matrices.
    mats[kh][(w, cin), (j, cout)] = w4[kh, w-j, cin, cout] for 0 <= w-j <= 2, else 0,
    so that sum_kh x[i+kh, :] @ mats[kh] == conv3x3_valid(x)[i, :] in (w, c) lane order."""
    _, _, cin, cout = w4.shape
    wo = width - 2
    mats = []
    for kh in range(3):
        m = jnp.zeros((width, cin, wo, cout), jnp.float32)
        for j in range(wo):
            m = m.at[j:j + 3, :, j, :].set(w4[kh])
        mats.append(m.reshape(width * cin, wo * cout))
    return jnp.stack(mats).astype(jnp.bfloat16)


def _pool_rowsel(hp):
    """(hp, 2*hp-1) 0/1 matrix selecting rows 0, 2, ..., 2*(hp-1)."""
    r = jnp.zeros((hp, 2 * hp - 1), jnp.float32)
    r = r.at[jnp.arange(hp), 2 * jnp.arange(hp)].set(1.0)
    return r.astype(jnp.bfloat16)


def _pool_colsel(wo, wp, cout, parity):
    """(wo*cout, wp*cout) 0/1 matrix selecting lane chunk w = 2*j + parity for each j."""
    s = jnp.zeros((wo * cout, wp * cout), jnp.float32)
    eye = jnp.eye(cout, dtype=jnp.float32)
    for j in range(wp):
        w = 2 * j + parity
        s = s.at[w * cout:(w + 1) * cout, j * cout:(j + 1) * cout].set(eye)
    return s.astype(jnp.bfloat16)


def init_params(key):
    """PyTorch-default-style init U(+-1/sqrt(fan_in)); weights stored ONCE in the
    layouts the megakernel consumes (banded conv matmuls, pooling selectors, bf16
    MXU operands, fc2 N-padded 10->128 for a lane-dense final store)."""
    def uniform(k, shape, fan_in):
        bound = 1.0 / float(fan_in) ** 0.5
        return jax.random.uniform(k, shape, jnp.float32, -bound, bound)

    ks = jax.random.split(key, 10)
    # Canonical weights: conv as (kh, kw, cin, cout); fc1 input features in (h, w, c)
    # order (equivalent to the PyTorch module with fc1 columns permuted NCHW->NHWC).
    w1 = uniform(ks[0], (3, 3, 1, _C1), 9 * 1)
    b1 = uniform(ks[1], (_C1,), 9 * 1)
    w2 = uniform(ks[2], (3, 3, _C1, _C2), 9 * _C1)
    b2 = uniform(ks[3], (_C2,), 9 * _C1)
    w3 = uniform(ks[4], (3, 3, _C2, _C3), 9 * _C2)
    b3 = uniform(ks[5], (_C3,), 9 * _C2)
    wf1 = uniform(ks[6], (3, 3, _C3, 128), 9 * _C3)
    bf1 = uniform(ks[7], (128,), 9 * _C3)
    wf2 = uniform(ks[8], (128, 10), 128)
    bf2 = uniform(ks[9], (10,), 128)

    return {
        "conv1_banded": _banded_conv_mats(w1, _H),                     # (3, 28, 832)
        "conv1_bias_row": jnp.tile(b1, _HO1).reshape(1, _HO1 * _C1),   # (1, 832) f32
        "pool1_rowsel": _pool_rowsel(_HP1),                            # (13, 25)
        "pool1_colsel_even": _pool_colsel(_HO1, _HP1, _C1, 0),         # (832, 416)
        "pool1_colsel_odd": _pool_colsel(_HO1, _HP1, _C1, 1),          # (832, 416)
        "conv2_banded": _banded_conv_mats(w2, _HP1),                   # (3, 416, 704)
        "conv2_bias_row": jnp.tile(b2, _HO2).reshape(1, _HO2 * _C2),   # (1, 704) f32
        "pool2_rowsel": _pool_rowsel(_HP2),                            # (5, 9)
        "pool2_colsel_even": _pool_colsel(_HO2, _HP2, _C2, 0),         # (704, 320)
        "pool2_colsel_odd": _pool_colsel(_HO2, _HP2, _C2, 1),          # (704, 320)
        "conv3_banded": _banded_conv_mats(w3, _HP2),                   # (3, 320, 384)
        "conv3_bias_row": jnp.tile(b3, _HO3).reshape(1, _HO3 * _C3),   # (1, 384) f32
        "fc1_w": wf1.reshape(3, 3 * _C3, 128).astype(jnp.bfloat16),    # (3, 384, 128)
        "fc1_b": bf1.reshape(1, 128),                                  # (1, 128) f32
        "fc2_w": jnp.pad(wf2, ((0, 0), (0, 118))).astype(jnp.bfloat16),  # (128, 128)
        "fc2_b": jnp.pad(bf2, ((0, 118),)).reshape(1, 128),              # (1, 128) f32
    }


# ----------------------------------------------------------------------------
# Forward: one fused pallas_call, gridded over batch tiles
# ----------------------------------------------------------------------------

def _const_spec(a):
    zeros = (0,) * a.ndim
    return pl.BlockSpec(a.shape, lambda i, _z=zeros: _z)   # resident (VMEM) weight block


def net_forward(params, x):
    """x: (N, 1, 28, 28) f32, NCHW like the PyTorch module -> (N, 10) f32 logits."""
    n = x.shape[0]
    assert x.shape[1:] == (1, _H, _H), "module implies a (N, 1, 28, 28) input"
    xs = x.reshape(n, _H, _H).astype(jnp.bfloat16)   # C==1 squeeze is free; bf16 MXU operand

    # Samples per grid step (statically unrolled in-kernel).  Keep the 'parallel'
    # grid >= 2 steps so both v7x TensorCores get work even at small batch.
    bt = int(min(4, max(1, n // 2)))
    npad = -(-n // bt) * bt
    if npad != n:
        xs = jnp.pad(xs, ((0, npad - n), (0, 0), (0, 0)))

    weights = [params[k] for k in _PARAM_ORDER]
    w_bytes = sum(int(w.size) * w.dtype.itemsize for w in weights)

    out = pl.pallas_call(
        _net_kernel,
        out_shape=jax.ShapeDtypeStruct((npad, 1, 128), jnp.float32),
        grid=(npad // bt,),
        in_specs=[pl.BlockSpec((bt, _H, _H), lambda i: (i, 0, 0))]
                 + [_const_spec(w) for w in weights],
        out_specs=pl.BlockSpec((bt, 1, 128), lambda i: (i, 0, 0)),
        compiler_params=pltpu.CompilerParams(dimension_semantics=("parallel",)),
        cost_estimate=pl.CostEstimate(
            flops=49_000_000 * npad,          # inflated banded/selector matmul FLOPs
            transcendentals=0,
            bytes_accessed=int(xs.size) * 2 + w_bytes + npad * 128 * 4),
    )(xs, *weights)

    # relu(fc2) logits, as in the module; drop the 118 padded lane-dense columns.
    return out.reshape(npad, 128)[:n, :10]


if __name__ == "__main__":
    key = jax.random.PRNGKey(0)
    pkey, xkey = jax.random.split(key)
    params = init_params(pkey)
    # 28x28 single-channel input is implied by fc1 expecting 128*3*3 features.
    x = jax.random.normal(xkey, (2, 1, 28, 28), jnp.float32)
    fwd = jax.jit(net_forward)
    out = fwd(params, x)
    jax.block_until_ready(out)
    assert out.shape == (2, 10) and out.dtype == jnp.float32
    assert bool(jnp.all(jnp.isfinite(out)))
    print("KERNEL_OK")
</pallas_src>

<mosaic_0001>
module attributes {stable_mosaic.version = 11 : i64} {
  func.func @_net_kernel(%arg0: i32, %arg1: memref<1x28x28xbf16, #tpu.memory_space<vmem>>, %arg2: memref<3x28x832xbf16, #tpu.memory_space<vmem>>, %arg3: memref<1x832xf32, #tpu.memory_space<vmem>>, %arg4: memref<13x25xbf16, #tpu.memory_space<vmem>>, %arg5: memref<832x416xbf16, #tpu.memory_space<vmem>>, %arg6: memref<832x416xbf16, #tpu.memory_space<vmem>>, %arg7: memref<3x416x704xbf16, #tpu.memory_space<vmem>>, %arg8: memref<1x704xf32, #tpu.memory_space<vmem>>, %arg9: memref<5x9xbf16, #tpu.memory_space<vmem>>, %arg10: memref<704x320xbf16, #tpu.memory_space<vmem>>, %arg11: memref<704x320xbf16, #tpu.memory_space<vmem>>, %arg12: memref<3x320x384xbf16, #tpu.memory_space<vmem>>, %arg13: memref<1x384xf32, #tpu.memory_space<vmem>>, %arg14: memref<3x384x128xbf16, #tpu.memory_space<vmem>>, %arg15: memref<1x128xf32, #tpu.memory_space<vmem>>, %arg16: memref<128x128xbf16, #tpu.memory_space<vmem>>, %arg17: memref<1x128xf32, #tpu.memory_space<vmem>>, %arg18: memref<1x1x128xf32, #tpu.memory_space<vmem>>) attributes {dimension_semantics = [#tpu.dimension_semantics<parallel>], iteration_bounds = array<i64: 2>, scalar_prefetch = 0 : i64, scratch_operands = 0 : i64, tpu.core_type = #tpu.core_type<tc>, window_params = [{transform_indices = @transform_0, window_bounds = array<i64: 1, 28, 28>}, {pipeline_mode = #tpu.pipeline_mode<synchronous>, transform_indices = @transform_1, window_bounds = array<i64: 3, 28, 832>}, {pipeline_mode = #tpu.pipeline_mode<synchronous>, transform_indices = @transform_2, window_bounds = array<i64: 1, 832>}, {pipeline_mode = #tpu.pipeline_mode<synchronous>, transform_indices = @transform_3, window_bounds = array<i64: 13, 25>}, {pipeline_mode = #tpu.pipeline_mode<synchronous>, transform_indices = @transform_4, window_bounds = array<i64: 832, 416>}, {pipeline_mode = #tpu.pipeline_mode<synchronous>, transform_indices = @transform_5, window_bounds = array<i64: 832, 416>}, {pipeline_mode = #tpu.pipeline_mode<synchronous>, transform_indices = @transform_6, window_bounds = array<i64: 3, 416, 704>}, {pipeline_mode = #tpu.pipeline_mode<synchronous>, transform_indices = @transform_7, window_bounds = array<i64: 1, 704>}, {pipeline_mode = #tpu.pipeline_mode<synchronous>, transform_indices = @transform_8, window_bounds = array<i64: 5, 9>}, {pipeline_mode = #tpu.pipeline_mode<synchronous>, transform_indices = @transform_9, window_bounds = array<i64: 704, 320>}, {pipeline_mode = #tpu.pipeline_mode<synchronous>, transform_indices = @transform_10, window_bounds = array<i64: 704, 320>}, {pipeline_mode = #tpu.pipeline_mode<synchronous>, transform_indices = @transform_11, window_bounds = array<i64: 3, 320, 384>}, {pipeline_mode = #tpu.pipeline_mode<synchronous>, transform_indices = @transform_12, window_bounds = array<i64: 1, 384>}, {pipeline_mode = #tpu.pipeline_mode<synchronous>, transform_indices = @transform_13, window_bounds = array<i64: 3, 384, 128>}, {pipeline_mode = #tpu.pipeline_mode<synchronous>, transform_indices = @transform_14, window_bounds = array<i64: 1, 128>}, {pipeline_mode = #tpu.pipeline_mode<synchronous>, transform_indices = @transform_15, window_bounds = array<i64: 128, 128>}, {pipeline_mode = #tpu.pipeline_mode<synchronous>, transform_indices = @transform_16, window_bounds = array<i64: 1, 128>}, {transform_indices = @transform_17, window_bounds = array<i64: 1, 1, 128>}]} {
    %c0 = arith.constant 0 : index
    %c0_0 = arith.constant 0 : index
    %c0_1 = arith.constant 0 : index
    %0 = vector.load %arg1[%c0, %c0_0, %c0_1] : memref<1x28x28xbf16, #tpu.memory_space<vmem>>, vector<1x28x28xbf16>
    %1 = vector.shape_cast %0 : vector<1x28x28xbf16> to vector<28x28xbf16>
    %2 = vector.extract_strided_slice %1 {offsets = [0, 0], sizes = [26, 28], strides = [1, 1]} : vector<28x28xbf16> to vector<26x28xbf16>
    %c0_2 = arith.constant 0 : index
    %c0_3 = arith.constant 0 : index
    %c0_4 = arith.constant 0 : index
    %3 = vector.load %arg2[%c0_2, %c0_3, %c0_4] : memref<3x28x832xbf16, #tpu.memory_space<vmem>>, vector<1x28x832xbf16>
    %4 = vector.shape_cast %3 : vector<1x28x832xbf16> to vector<28x832xbf16>
    %cst = arith.constant dense<0.000000e+00> : vector<26x832xf32>
    %5 = tpu.matmul %2, %4, %cst {dimension_numbers = #tpu.dot_dimension_numbers<[1], [0], [0], [1], [0, 0, 1, 1], [], []>} : vector<26x28xbf16>, vector<28x832xbf16>, vector<26x832xf32> -> vector<26x832xf32>
    %6 = vector.extract_strided_slice %1 {offsets = [1, 0], sizes = [26, 28], strides = [1, 1]} : vector<28x28xbf16> to vector<26x28xbf16>
    %c1 = arith.constant 1 : index
    %c0_5 = arith.constant 0 : index
    %c0_6 = arith.constant 0 : index
    %7 = vector.load %arg2[%c1, %c0_5, %c0_6] : memref<3x28x832xbf16, #tpu.memory_space<vmem>>, vector<1x28x832xbf16>
    %8 = vector.shape_cast %7 : vector<1x28x832xbf16> to vector<28x832xbf16>
    %cst_7 = arith.constant dense<0.000000e+00> : vector<26x832xf32>
    %9 = tpu.matmul %6, %8, %cst_7 {dimension_numbers = #tpu.dot_dimension_numbers<[1], [0], [0], [1], [0, 0, 1, 1], [], []>} : vector<26x28xbf16>, vector<28x832xbf16>, vector<26x832xf32> -> vector<26x832xf32>
    %10 = arith.addf %5, %9 : vector<26x832xf32>
    %11 = vector.extract_strided_slice %1 {offsets = [2, 0], sizes = [26, 28], strides = [1, 1]} : vector<28x28xbf16> to vector<26x28xbf16>
    %c2 = arith.constant 2 : index
    %c0_8 = arith.constant 0 : index
    %c0_9 = arith.constant 0 : index
    %12 = vector.load %arg2[%c2, %c0_8, %c0_9] : memref<3x28x832xbf16, #tpu.memory_space<vmem>>, vector<1x28x832xbf16>
    %13 = vector.shape_cast %12 : vector<1x28x832xbf16> to vector<28x832xbf16>
    %cst_10 = arith.constant dense<0.000000e+00> : vector<26x832xf32>
    %14 = tpu.matmul %11, %13, %cst_10 {dimension_numbers = #tpu.dot_dimension_numbers<[1], [0], [0], [1], [0, 0, 1, 1], [], []>} : vector<26x28xbf16>, vector<28x832xbf16>, vector<26x832xf32> -> vector<26x832xf32>
    %15 = arith.addf %10, %14 : vector<26x832xf32>
    %c0_11 = arith.constant 0 : index
    %c0_12 = arith.constant 0 : index
    %16 = vector.load %arg3[%c0_11, %c0_12] : memref<1x832xf32, #tpu.memory_space<vmem>>, vector<1x832xf32>
    %17 = vector.broadcast %16 : vector<1x832xf32> to vector<26x832xf32>
    %18 = arith.addf %15, %17 : vector<26x832xf32>
    %cst_13 = arith.constant 0.000000e+00 : f32
    %19 = vector.broadcast %cst_13 : f32 to vector<26x832xf32>
    %20 = arith.maximumf %18, %19 : vector<26x832xf32>
    %21 = vector.extract_strided_slice %20 {offsets = [0, 0], sizes = [25, 832], strides = [1, 1]} : vector<26x832xf32> to vector<25x832xf32>
    %22 = vector.extract_strided_slice %20 {offsets = [1, 0], sizes = [25, 832], strides = [1, 1]} : vector<26x832xf32> to vector<25x832xf32>
    %23 = arith.maximumf %21, %22 : vector<25x832xf32>
    %24 = arith.truncf %23 : vector<25x832xf32> to vector<25x832xbf16>
    %c0_14 = arith.constant 0 : index
    %c0_15 = arith.constant 0 : index
    %25 = vector.load %arg4[%c0_14, %c0_15] : memref<13x25xbf16, #tpu.memory_space<vmem>>, vector<13x25xbf16>
    %cst_16 = arith.constant dense<0.000000e+00> : vector<13x832xf32>
    %26 = tpu.matmul %25, %24, %cst_16 {dimension_numbers = #tpu.dot_dimension_numbers<[1], [0], [0], [1], [0, 0, 1, 1], [], []>} : vector<13x25xbf16>, vector<25x832xbf16>, vector<13x832xf32> -> vector<13x832xf32>
    %27 = arith.truncf %26 : vector<13x832xf32> to vector<13x832xbf16>
    %c0_17 = arith.constant 0 : index
    %c0_18 = arith.constant 0 : index
    %28 = vector.load %arg5[%c0_17, %c0_18] : memref<832x416xbf16, #tpu.memory_space<vmem>>, vector<832x416xbf16>
    %cst_19 = arith.constant dense<0.000000e+00> : vector<13x416xf32>
    %29 = tpu.matmul %27, %28, %cst_19 {dimension_numbers = #tpu.dot_dimension_numbers<[1], [0], [0], [1], [0, 0, 1, 1], [], []>} : vector<13x832xbf16>, vector<832x416xbf16>, vector<13x416xf32> -> vector<13x416xf32>
    %c0_20 = arith.constant 0 : index
    %c0_21 = arith.constant 0 : index
    %30 = vector.load %arg6[%c0_20, %c0_21] : memref<832x416xbf16, #tpu.memory_space<vmem>>, vector<832x416xbf16>
    %cst_22 = arith.constant dense<0.000000e+00> : vector<13x416xf32>
    %31 = tpu.matmul %27, %30, %cst_22 {dimension_numbers = #tpu.dot_dimension_numbers<[1], [0], [0], [1], [0, 0, 1, 1], [], []>} : vector<13x832xbf16>, vector<832x416xbf16>, vector<13x416xf32> -> vector<13x416xf32>
    %32 = arith.maximumf %29, %31 : vector<13x416xf32>
    %33 = arith.truncf %32 : vector<13x416xf32> to vector<13x416xbf16>
    %34 = vector.extract_strided_slice %33 {offsets = [0, 0], sizes = [11, 416], strides = [1, 1]} : vector<13x416xbf16> to vector<11x416xbf16>
    %c0_23 = arith.constant 0 : index
    %c0_24 = arith.constant 0 : index
    %c0_25 = arith.constant 0 : index
    %35 = vector.load %arg7[%c0_23, %c0_24, %c0_25] : memref<3x416x704xbf16, #tpu.memory_space<vmem>>, vector<1x416x704xbf16>
    %36 = vector.shape_cast %35 : vector<1x416x704xbf16> to vector<416x704xbf16>
    %cst_26 = arith.constant dense<0.000000e+00> : vector<11x704xf32>
    %37 = tpu.matmul %34, %36, %cst_26 {dimension_numbers = #tpu.dot_dimension_numbers<[1], [0], [0], [1], [0, 0, 1, 1], [], []>} : vector<11x416xbf16>, vector<416x704xbf16>, vector<11x704xf32> -> vector<11x704xf32>
    %38 = vector.extract_strided_slice %33 {offsets = [1, 0], sizes = [11, 416], strides = [1, 1]} : vector<13x416xbf16> to vector<11x416xbf16>
    %c1_27 = arith.constant 1 : index
    %c0_28 = arith.constant 0 : index
    %c0_29 = arith.constant 0 : index
    %39 = vector.load %arg7[%c1_27, %c0_28, %c0_29] : memref<3x416x704xbf16, #tpu.memory_space<vmem>>, vector<1x416x704xbf16>
    %40 = vector.shape_cast %39 : vector<1x416x704xbf16> to vector<416x704xbf16>
    %cst_30 = arith.constant dense<0.000000e+00> : vector<11x704xf32>
    %41 = tpu.matmul %38, %40, %cst_30 {dimension_numbers = #tpu.dot_dimension_numbers<[1], [0], [0], [1], [0, 0, 1, 1], [], []>} : vector<11x416xbf16>, vector<416x704xbf16>, vector<11x704xf32> -> vector<11x704xf32>
    %42 = arith.addf %37, %41 : vector<11x704xf32>
    %43 = vector.extract_strided_slice %33 {offsets = [2, 0], sizes = [11, 416], strides = [1, 1]} : vector<13x416xbf16> to vector<11x416xbf16>
    %c2_31 = arith.constant 2 : index
    %c0_32 = arith.constant 0 : index
    %c0_33 = arith.constant 0 : index
    %44 = vector.load %arg7[%c2_31, %c0_32, %c0_33] : memref<3x416x704xbf16, #tpu.memory_space<vmem>>, vector<1x416x704xbf16>
    %45 = vector.shape_cast %44 : vector<1x416x704xbf16> to vector<416x704xbf16>
    %cst_34 = arith.constant dense<0.000000e+00> : vector<11x704xf32>
    %46 = tpu.matmul %43, %45, %cst_34 {dimension_numbers = #tpu.dot_dimension_numbers<[1], [0], [0], [1], [0, 0, 1, 1], [], []>} : vector<11x416xbf16>, vector<416x704xbf16>, vector<11x704xf32> -> vector<11x704xf32>
    %47 = arith.addf %42, %46 : vector<11x704xf32>
    %c0_35 = arith.constant 0 : index
    %c0_36 = arith.constant 0 : index
    %48 = vector.load %arg8[%c0_35, %c0_36] : memref<1x704xf32, #tpu.memory_space<vmem>>, vector<1x704xf32>
    %49 = vector.broadcast %48 : vector<1x704xf32> to vector<11x704xf32>
    %50 = arith.addf %47, %49 : vector<11x704xf32>
    %cst_37 = arith.constant 0.000000e+00 : f32
    %51 = vector.broadcast %cst_37 : f32 to vector<11x704xf32>
    %52 = arith.maximumf %50, %51 : vector<11x704xf32>
    %53 = vector.extract_strided_slice %52 {offsets = [0, 0], sizes = [9, 704], strides = [1, 1]} : vector<11x704xf32> to vector<9x704xf32>
    %54 = vector.extract_strided_slice %52 {offsets = [1, 0], sizes = [9, 704], strides = [1, 1]} : vector<11x704xf32> to vector<9x704xf32>
    %55 = arith.maximumf %53, %54 : vector<9x704xf32>
    %56 = arith.truncf %55 : vector<9x704xf32> to vector<9x704xbf16>
    %c0_38 = arith.constant 0 : index
    %c0_39 = arith.constant 0 : index
    %57 = vector.load %arg9[%c0_38, %c0_39] : memref<5x9xbf16, #tpu.memory_space<vmem>>, vector<5x9xbf16>
    %cst_40 = arith.constant dense<0.000000e+00> : vector<5x704xf32>
    %58 = tpu.matmul %57, %56, %cst_40 {dimension_numbers = #tpu.dot_dimension_numbers<[1], [0], [0], [1], [0, 0, 1, 1], [], []>} : vector<5x9xbf16>, vector<9x704xbf16>, vector<5x704xf32> -> vector<5x704xf32>
    %59 = arith.truncf %58 : vector<5x704xf32> to vector<5x704xbf16>
    %c0_41 = arith.constant 0 : index
    %c0_42 = arith.constant 0 : index
    %60 = vector.load %arg10[%c0_41, %c0_42] : memref<704x320xbf16, #tpu.memory_space<vmem>>, vector<704x320xbf16>
    %cst_43 = arith.constant dense<0.000000e+00> : vector<5x320xf32>
    %61 = tpu.matmul %59, %60, %cst_43 {dimension_numbers = #tpu.dot_dimension_numbers<[1], [0], [0], [1], [0, 0, 1, 1], [], []>} : vector<5x704xbf16>, vector<704x320xbf16>, vector<5x320xf32> -> vector<5x320xf32>
    %c0_44 = arith.constant 0 : index
    %c0_45 = arith.constant 0 : index
    %62 = vector.load %arg11[%c0_44, %c0_45] : memref<704x320xbf16, #tpu.memory_space<vmem>>, vector<704x320xbf16>
    %cst_46 = arith.constant dense<0.000000e+00> : vector<5x320xf32>
    %63 = tpu.matmul %59, %62, %cst_46 {dimension_numbers = #tpu.dot_dimension_numbers<[1], [0], [0], [1], [0, 0, 1, 1], [], []>} : vector<5x704xbf16>, vector<704x320xbf16>, vector<5x320xf32> -> vector<5x320xf32>
    %64 = arith.maximumf %61, %63 : vector<5x320xf32>
    %65 = arith.truncf %64 : vector<5x320xf32> to vector<5x320xbf16>
    %66 = vector.extract_strided_slice %65 {offsets = [0, 0], sizes = [3, 320], strides = [1, 1]} : vector<5x320xbf16> to vector<3x320xbf16>
    %c0_47 = arith.constant 0 : index
    %c0_48 = arith.constant 0 : index
    %c0_49 = arith.constant 0 : index
    %67 = vector.load %arg12[%c0_47, %c0_48, %c0_49] : memref<3x320x384xbf16, #tpu.memory_space<vmem>>, vector<1x320x384xbf16>
    %68 = vector.shape_cast %67 : vector<1x320x384xbf16> to vector<320x384xbf16>
    %cst_50 = arith.constant dense<0.000000e+00> : vector<3x384xf32>
    %69 = tpu.matmul %66, %68, %cst_50 {dimension_numbers = #tpu.dot_dimension_numbers<[1], [0], [0], [1], [0, 0, 1, 1], [], []>} : vector<3x320xbf16>, vector<320x384xbf16>, vector<3x384xf32> -> vector<3x384xf32>
    %70 = vector.extract_strided_slice %65 {offsets = [1, 0], sizes = [3, 320], strides = [1, 1]} : vector<5x320xbf16> to vector<3x320xbf16>
    %c1_51 = arith.constant 1 : index
    %c0_52 = arith.constant 0 : index
    %c0_53 = arith.constant 0 : index
    %71 = vector.load %arg12[%c1_51, %c0_52, %c0_53] : memref<3x320x384xbf16, #tpu.memory_space<vmem>>, vector<1x320x384xbf16>
    %72 = vector.shape_cast %71 : vector<1x320x384xbf16> to vector<320x384xbf16>
    %cst_54 = arith.constant dense<0.000000e+00> : vector<3x384xf32>
    %73 = tpu.matmul %70, %72, %cst_54 {dimension_numbers = #tpu.dot_dimension_numbers<[1], [0], [0], [1], [0, 0, 1, 1], [], []>} : vector<3x320xbf16>, vector<320x384xbf16>, vector<3x384xf32> -> vector<3x384xf32>
    %74 = arith.addf %69, %73 : vector<3x384xf32>
    %75 = vector.extract_strided_slice %65 {offsets = [2, 0], sizes = [3, 320], strides = [1, 1]} : vector<5x320xbf16> to vector<3x320xbf16>
    %c2_55 = arith.constant 2 : index
    %c0_56 = arith.constant 0 : index
    %c0_57 = arith.constant 0 : index
    %76 = vector.load %arg12[%c2_55, %c0_56, %c0_57] : memref<3x320x384xbf16, #tpu.memory_space<vmem>>, vector<1x320x384xbf16>
    %77 = vector.shape_cast %76 : vector<1x320x384xbf16> to vector<320x384xbf16>
    %cst_58 = arith.constant dense<0.000000e+00> : vector<3x384xf32>
    %78 = tpu.matmul %75, %77, %cst_58 {dimension_numbers = #tpu.dot_dimension_numbers<[1], [0], [0], [1], [0, 0, 1, 1], [], []>} : vector<3x320xbf16>, vector<320x384xbf16>, vector<3x384xf32> -> vector<3x384xf32>
    %79 = arith.addf %74, %78 : vector<3x384xf32>
    %c0_59 = arith.constant 0 : index
    %c0_60 = arith.constant 0 : index
    %80 = vector.load %arg13[%c0_59, %c0_60] : memref<1x384xf32, #tpu.memory_space<vmem>>, vector<1x384xf32>
    %81 = vector.broadcast %80 : vector<1x384xf32> to vector<3x384xf32>
    %82 = arith.addf %79, %81 : vector<3x384xf32>
    %cst_61 = arith.constant 0.000000e+00 : f32
    %83 = vector.broadcast %cst_61 : f32 to vector<3x384xf32>
    %84 = arith.maximumf %82, %83 : vector<3x384xf32>
    %85 = arith.truncf %84 : vector<3x384xf32> to vector<3x384xbf16>
    %86 = vector.extract_strided_slice %85 {offsets = [0, 0], sizes = [1, 384], strides = [1, 1]} : vector<3x384xbf16> to vector<1x384xbf16>
    %c0_62 = arith.constant 0 : index
    %c0_63 = arith.constant 0 : index
    %c0_64 = arith.constant 0 : index
    %87 = vector.load %arg14[%c0_62, %c0_63, %c0_64] : memref<3x384x128xbf16, #tpu.memory_space<vmem>>, vector<1x384x128xbf16>
    %88 = vector.shape_cast %87 : vector<1x384x128xbf16> to vector<384x128xbf16>
    %cst_65 = arith.constant dense<0.000000e+00> : vector<1x128xf32>
    %89 = tpu.matmul %86, %88, %cst_65 {dimension_numbers = #tpu.dot_dimension_numbers<[1], [0], [0], [1], [0, 0, 1, 1], [], []>} : vector<1x384xbf16>, vector<384x128xbf16>, vector<1x128xf32> -> vector<1x128xf32>
    %90 = vector.extract_strided_slice %85 {offsets = [1, 0], sizes = [1, 384], strides = [1, 1]} : vector<3x384xbf16> to vector<1x384xbf16>
    %c1_66 = arith.constant 1 : index
    %c0_67 = arith.constant 0 : index
    %c0_68 = arith.constant 0 : index
    %91 = vector.load %arg14[%c1_66, %c0_67, %c0_68] : memref<3x384x128xbf16, #tpu.memory_space<vmem>>, vector<1x384x128xbf16>
    %92 = vector.shape_cast %91 : vector<1x384x128xbf16> to vector<384x128xbf16>
    %cst_69 = arith.constant dense<0.000000e+00> : vector<1x128xf32>
    %93 = tpu.matmul %90, %92, %cst_69 {dimension_numbers = #tpu.dot_dimension_numbers<[1], [0], [0], [1], [0, 0, 1, 1], [], []>} : vector<1x384xbf16>, vector<384x128xbf16>, vector<1x128xf32> -> vector<1x128xf32>
    %94 = arith.addf %89, %93 : vector<1x128xf32>
    %95 = vector.extract_strided_slice %85 {offsets = [2, 0], sizes = [1, 384], strides = [1, 1]} : vector<3x384xbf16> to vector<1x384xbf16>
    %c2_70 = arith.constant 2 : index
    %c0_71 = arith.constant 0 : index
    %c0_72 = arith.constant 0 : index
    %96 = vector.load %arg14[%c2_70, %c0_71, %c0_72] : memref<3x384x128xbf16, #tpu.memory_space<vmem>>, vector<1x384x128xbf16>
    %97 = vector.shape_cast %96 : vector<1x384x128xbf16> to vector<384x128xbf16>
    %cst_73 = arith.constant dense<0.000000e+00> : vector<1x128xf32>
    %98 = tpu.matmul %95, %97, %cst_73 {dimension_numbers = #tpu.dot_dimension_numbers<[1], [0], [0], [1], [0, 0, 1, 1], [], []>} : vector<1x384xbf16>, vector<384x128xbf16>, vector<1x128xf32> -> vector<1x128xf32>
    %99 = arith.addf %94, %98 : vector<1x128xf32>
    %c0_74 = arith.constant 0 : index
    %c0_75 = arith.constant 0 : index
    %100 = vector.load %arg15[%c0_74, %c0_75] : memref<1x128xf32, #tpu.memory_space<vmem>>, vector<1x128xf32>
    %101 = arith.addf %99, %100 : vector<1x128xf32>
    %cst_76 = arith.constant 0.000000e+00 : f32
    %102 = vector.broadcast %cst_76 : f32 to vector<1x128xf32>
    %103 = arith.maximumf %101, %102 : vector<1x128xf32>
    %104 = arith.truncf %103 : vector<1x128xf32> to vector<1x128xbf16>
    %c0_77 = arith.constant 0 : index
    %c0_78 = arith.constant 0 : index
    %105 = vector.load %arg16[%c0_77, %c0_78] : memref<128x128xbf16, #tpu.memory_space<vmem>>, vector<128x128xbf16>
    %cst_79 = arith.constant dense<0.000000e+00> : vector<1x128xf32>
    %106 = tpu.matmul %104, %105, %cst_79 {dimension_numbers = #tpu.dot_dimension_numbers<[1], [0], [0], [1], [0, 0, 1, 1], [], []>} : vector<1x128xbf16>, vector<128x128xbf16>, vector<1x128xf32> -> vector<1x128xf32>
    %c0_80 = arith.constant 0 : index
    %c0_81 = arith.constant 0 : index
    %107 = vector.load %arg17[%c0_80, %c0_81] : memref<1x128xf32, #tpu.memory_space<vmem>>, vector<1x128xf32>
    %108 = arith.addf %106, %107 : vector<1x128xf32>
    %cst_82 = arith.constant 0.000000e+00 : f32
    %109 = vector.broadcast %cst_82 : f32 to vector<1x128xf32>
    %110 = arith.maximumf %108, %109 : vector<1x128xf32>
    %c0_83 = arith.constant 0 : index
    %c0_84 = arith.constant 0 : index
    %c0_85 = arith.constant 0 : index
    %111 = vector.load %arg18[%c0_83, %c0_84, %c0_85] : memref<1x1x128xf32, #tpu.memory_space<vmem>>, vector<1x1x128xf32>
    %112 = vector.shape_cast %111 : vector<1x1x128xf32> to vector<1x128xf32>
    %113 = vector.shape_cast %110 : vector<1x128xf32> to vector<1x1x128xf32>
    tpu.vector_store %arg18[%c0_83, %c0_84, %c0_85], %113 {strides = array<i32>} : memref<1x1x128xf32, #tpu.memory_space<vmem>>, vector<1x1x128xf32>,
    return
  }
  func.func @transform_0(%arg0: i32) -> (i32, i32, i32) {
    %c0_i32 = arith.constant 0 : i32
    %c0_i32_0 = arith.constant 0 : i32
    %c0_i32_1 = arith.constant 0 : i32
    return %arg0, %c0_i32, %c0_i32_0 : i32, i32, i32
  }
  func.func @transform_1(%arg0: i32) -> (i32, i32, i32) {
    %c0_i32 = arith.constant 0 : i32
    %c0_i32_0 = arith.constant 0 : i32
    %c0_i32_1 = arith.constant 0 : i32
    %c0_i32_2 = arith.constant 0 : i32
    return %c0_i32, %c0_i32_0, %c0_i32_1 : i32, i32, i32
  }
  func.func @transform_2(%arg0: i32) -> (i32, i32) {
    %c0_i32 = arith.constant 0 : i32
    %c0_i32_0 = arith.constant 0 : i32
    %c0_i32_1 = arith.constant 0 : i32
    return %c0_i32, %c0_i32_0 : i32, i32
  }
  func.func @transform_3(%arg0: i32) -> (i32, i32) {
    %c0_i32 = arith.constant 0 : i32
    %c0_i32_0 = arith.constant 0 : i32
    %c0_i32_1 = arith.constant 0 : i32
    return %c0_i32, %c0_i32_0 : i32, i32
  }
  func.func @transform_4(%arg0: i32) -> (i32, i32) {
    %c0_i32 = arith.constant 0 : i32
    %c0_i32_0 = arith.constant 0 : i32
    %c0_i32_1 = arith.constant 0 : i32
    return %c0_i32, %c0_i32_0 : i32, i32
  }
  func.func @transform_5(%arg0: i32) -> (i32, i32) {
    %c0_i32 = arith.constant 0 : i32
    %c0_i32_0 = arith.constant 0 : i32
    %c0_i32_1 = arith.constant 0 : i32
    return %c0_i32, %c0_i32_0 : i32, i32
  }
  func.func @transform_6(%arg0: i32) -> (i32, i32, i32) {
    %c0_i32 = arith.constant 0 : i32
    %c0_i32_0 = arith.constant 0 : i32
    %c0_i32_1 = arith.constant 0 : i32
    %c0_i32_2 = arith.constant 0 : i32
    return %c0_i32, %c0_i32_0, %c0_i32_1 : i32, i32, i32
  }
  func.func @transform_7(%arg0: i32) -> (i32, i32) {
    %c0_i32 = arith.constant 0 : i32
    %c0_i32_0 = arith.constant 0 : i32
    %c0_i32_1 = arith.constant 0 : i32
    return %c0_i32, %c0_i32_0 : i32, i32
  }
  func.func @transform_8(%arg0: i32) -> (i32, i32) {
    %c0_i32 = arith.constant 0 : i32
    %c0_i32_0 = arith.constant 0 : i32
    %c0_i32_1 = arith.constant 0 : i32
    return %c0_i32, %c0_i32_0 : i32, i32
  }
  func.func @transform_9(%arg0: i32) -> (i32, i32) {
    %c0_i32 = arith.constant 0 : i32
    %c0_i32_0 = arith.constant 0 : i32
    %c0_i32_1 = arith.constant 0 : i32
    return %c0_i32, %c0_i32_0 : i32, i32
  }
  func.func @transform_10(%arg0: i32) -> (i32, i32) {
    %c0_i32 = arith.constant 0 : i32
    %c0_i32_0 = arith.constant 0 : i32
    %c0_i32_1 = arith.constant 0 : i32
    return %c0_i32, %c0_i32_0 : i32, i32
  }
  func.func @transform_11(%arg0: i32) -> (i32, i32, i32) {
    %c0_i32 = arith.constant 0 : i32
    %c0_i32_0 = arith.constant 0 : i32
    %c0_i32_1 = arith.constant 0 : i32
    %c0_i32_2 = arith.constant 0 : i32
    return %c0_i32, %c0_i32_0, %c0_i32_1 : i32, i32, i32
  }
  func.func @transform_12(%arg0: i32) -> (i32, i32) {
    %c0_i32 = arith.constant 0 : i32
    %c0_i32_0 = arith.constant 0 : i32
    %c0_i32_1 = arith.constant 0 : i32
    return %c0_i32, %c0_i32_0 : i32, i32
  }
  func.func @transform_13(%arg0: i32) -> (i32, i32, i32) {
    %c0_i32 = arith.constant 0 : i32
    %c0_i32_0 = arith.constant 0 : i32
    %c0_i32_1 = arith.constant 0 : i32
    %c0_i32_2 = arith.constant 0 : i32
    return %c0_i32, %c0_i32_0, %c0_i32_1 : i32, i32, i32
  }
  func.func @transform_14(%arg0: i32) -> (i32, i32) {
    %c0_i32 = arith.constant 0 : i32
    %c0_i32_0 = arith.constant 0 : i32
    %c0_i32_1 = arith.constant 0 : i32
    return %c0_i32, %c0_i32_0 : i32, i32
  }
  func.func @transform_15(%arg0: i32) -> (i32, i32) {
    %c0_i32 = arith.constant 0 : i32
    %c0_i32_0 = arith.constant 0 : i32
    %c0_i32_1 = arith.constant 0 : i32
    return %c0_i32, %c0_i32_0 : i32, i32
  }
  func.func @transform_16(%arg0: i32) -> (i32, i32) {
    %c0_i32 = arith.constant 0 : i32
    %c0_i32_0 = arith.constant 0 : i32
    %c0_i32_1 = arith.constant 0 : i32
    return %c0_i32, %c0_i32_0 : i32, i32
  }
  func.func @transform_17(%arg0: i32) -> (i32, i32, i32) {
    %c0_i32 = arith.constant 0 : i32
    %c0_i32_0 = arith.constant 0 : i32
    %c0_i32_1 = arith.constant 0 : i32
    return %arg0, %c0_i32, %c0_i32_0 : i32, i32, i32
  }
}

</mosaic_0001>

<bundles_post_ra>
// kernel: net_forward.1
= control target key start
LH: loop header
LB: loop body
LE: loop exit
PB: predicated region body
PF: predicated region fallthrough
CT: control target
= control target key end

     0   :  { %s24288_s0 = inlined_call_operand.vmem [shape: bf16[2,28,28], index: 0, kind: input, shape index: {}]   ;;  %s24289_s1 = inlined_call_operand.vmem [shape: bf16[3,28,832], index: 1, kind: input, shape index: {}]   ;;  %s24290_s2 = inlined_call_operand.vmem [shape: f32[1,832], index: 2, kind: input, shape index: {}]   ;;  %s24291_s3 = inlined_call_operand.vmem [shape: bf16[13,25], index: 3, kind: input, shape index: {}]   ;;  %s24292_s4 = inlined_call_operand.vmem [shape: bf16[832,416], index: 4, kind: input, shape index: {}]   ;;  %s24293_s5 = inlined_call_operand.vmem [shape: bf16[832,416], index: 5, kind: input, shape index: {}]   ;;  %s24294_s6 = inlined_call_operand.vmem [shape: bf16[3,416,704], index: 6, kind: input, shape index: {}]   ;;  %s24295_s7 = inlined_call_operand.vmem [shape: f32[1,704], index: 7, kind: input, shape index: {}]   ;;  %s24296_s8 = inlined_call_operand.vmem [shape: bf16[5,9], index: 8, kind: input, shape index: {}]   ;;  %s24297_s9 = inlined_call_operand.vmem [shape: bf16[704,320], index: 9, kind: input, shape index: {}]   ;;  %s24298_s10 = inlined_call_operand.vmem [shape: bf16[704,320], index: 10, kind: input, shape index: {}]   ;;  %s24299_s11 = inlined_call_operand.vmem [shape: bf16[3,320,384], index: 11, kind: input, shape index: {}]   ;;  %s24300_s12 = inlined_call_operand.vmem [shape: f32[1,384], index: 12, kind: input, shape index: {}]   ;;  %s24301_s13 = inlined_call_operand.vmem [shape: bf16[3,384,128], index: 13, kind: input, shape index: {}]   ;;  %s24302_s14 = inlined_call_operand.vmem [shape: f32[1,128], index: 14, kind: input, shape index: {}]   ;;  %s24303_s15 = inlined_call_operand.vmem [shape: bf16[128,128], index: 15, kind: input, shape index: {}]   ;;  %s24304_s16 = inlined_call_operand.vmem [shape: f32[1,128], index: 16, kind: input, shape index: {}]   ;;  %s24305_s17 = inlined_call_operand.hbm [shape: f32[2,1,128], index: 17, kind: output, shape index: {}]  }
   0x1   :  { %24312 = sst [smem:[#allocation10_spill]] %s24288_s0 }
   0x2   :  { %24313 = sst [smem:[#allocation11_spill]] %s24289_s1 }
   0x3   :  { %24314 = sst [smem:[#allocation12_spill]] %s24290_s2 }
   0x4   :  { %24315 = sst [smem:[#allocation13_spill]] %s24291_s3 }
   0x5   :  { %22 = vsyncpa [#allocation3], 0 }
   0x6   :  { %24 = vsyncpa [#allocation3 + $0x1], 0  ;;  %s19164_s24 = smov 0   ;;  %s19166_s25 = smov 0  }
   0x7   :  { %s19168_s26 = smov 0   ;;  %s19170_s27 = smov 0  }
   0x8 LB: > { %24316 = sst [smem:[#allocation5_spill]] %s19055_s24  ;;  %s19185_s28 = sadd.s32 4294967295, %s19067_s27   ;;  %s19067_s27 = sphi %s19170_s27, %s24329_s27   ;;  %s19063_s26 = sphi %s19168_s26, %s24334_s26   ;;  %s19059_s25 = sphi %s19166_s25, %s24333_s25   ;;  %s19055_s24 = sphi %s19164_s24, %s24332_s24  }
   0x9   : > { %24317 = sst [smem:[#allocation6_spill]] %s19063_s26  ;;  %s14158_s29 = sadd.s32 4294967294, %s19067_s27  }
   0xa   : > { %s19189_s0 = sadd.s32 1, %s19067_s27   ;;  %s399_s30 = sadd.s32 1, %s19063_s26 }
   0xb   : > { %24318 = sst [smem:[#allocation7_spill]] %s19189_s0  ;;  %s396_s18 = ssub.s32 %s19067_s27, %s19189_s0 }
   0xc   : > { %p409_p0 = scmp.ne.s32.totalorder %s19063_s26, %s19059_s25  ;;  %p397_p1 = scmp.eq.s32.totalorder %s396_s18, 0 }
   0xd   : > { %p410_p2 = scmp.eq.s32.totalorder %s19185_s28, 1  ;;  %p415_p3 = scmp.ne.s32.totalorder %s19059_s25, %s19055_s24 }
   0xe   : > { %p416_p4 = scmp.eq.s32.totalorder %s14158_s29, 1  ;;  %p14161_p7 = scmp.ge.s32.totalorder %s19067_s27, 1 }
   0xf   : > { %s19200_s19 = scalar_select %p397_p1, %s19063_s26, %s399_s30  }
  0x10   : > { %p19202_p5 = por %p410_p2, %p409_p0  ;;  %p19206_p6 = por %p416_p4, %p415_p3 }
  0x11   : > { %24319 = sst [smem:[#allocation8_spill]] %s19200_s19  ;;  %p490_p8 = scmp.lt.s32.totalorder %s19067_s27, 3 }
  0x12   : > { %s24321_s20 = scalar_select %p19206_p6, 1, 0 }
  0x13   : > { %p491_p9 = pnand %p14161_p7, %p490_p8 }
  0x14   : > { %24322 = sst [smem:[#allocation9_spill]] %s24321_s20  ;;  %s24323_s23 = sld [smem:[#allocation11_spill]] (!%p491_p9)  ;;  %vm682_vm0 = vcmask (!%p491_p9), 1045504   ;;  %v19069_v2 = vmov (!%p491_p9), 0   ;;  %vm594_vm1 = vsmask.f32 (!%p491_p9), 7424 }
  0x15   : > { %494 = sbr.rel (%p491_p9) target bundleno = 3509 (0xdb5), region = 88  ;;  %736 = vmatprep.mubr.bf16.mxu0 (!%p491_p9), %v19069_v2  ;;  %p541_p10 = scmp.lt.s32.totalorder (!%p491_p9), %s19185_s28, 1  ;;  %vm675_vm2 = vcmask (!%p491_p9), 228352   ;;  %vm1227_vm3 = vcmask (!%p491_p9), 1046528   ;;  %vm19071_vm4 = vmmov (!%p491_p9), 0   ;;  %vm1811_vm5 = vcmask (!%p491_p9), 1043456  }
  0x16   : > { %s24324_s21 = sld [smem:[#allocation10_spill]] (!%p491_p9)  ;;  %s24325_s2 = sld [smem:[#allocation12_spill]] (!%p491_p9)  ;;  %vm1812_vm6 = vcmask (!%p491_p9), 1044480   ;;  %vm1807_vm7 = vcmask (!%p491_p9), 203776   ;;  %vm3261_vm8 = vcmask (!%p491_p9), 523264   ;;  %vm6337_vm9 = vcmask (!%p491_p9), 261120  }
  0x17   : > { %s24326_s3 = sld [smem:[#allocation13_spill]] (!%p491_p9)  ;;  %vm8977_vm10 = vcmask (!%p491_p9), 72704   ;;  %s539_s26 = sand.u32 (!%p491_p9), 1, %s19059_s25  }
  0x18   : > { %s14091_s20 = scalar_lea.sflag (!%p491_p9), [#allocation3], %s539_s26  ;;  %s19073_s19 = smov (!%p491_p9), [#allocation2]  }
  0x1a   : > { %v16944_v0 = vld [vmem:[%s24323_s23 + $0x74] ss:$28 sps:$4 sm:$0xff] (!%p491_p9)   ;;  %v16947_v3 = vld [vmem:[%s24323_s23 + $0x88] ss:$28 sps:$4 sm:$0xff] (!%p491_p9)   ;;  %v16959_v12 = vld [vmem:[%s24323_s23 + $0x7c] ss:$28 sps:$4 sm:$0xff] (!%p491_p9)  }
  0x1b   : > { %v16946_v1 = vld [vmem:[%s24323_s23 + $0x70] ss:$28 sps:$4 sm:$0xff] (!%p491_p9)   ;;  %704 = vmatprep.subr.bf16.mxu0 (!%p491_p9), %v16944_v0  ;;  %v16950_v5 = vld [vmem:[%s24323_s23 + $0xa8] ss:$28 sps:$4 sm:$0x3f] (!%p491_p9)   ;;  %16570 = vmatprep.subr.bf16.mxu1 (!%p491_p9), %v16947_v3 }
  0x1c   : > { %705 = vmatpush1.bf16.msra.mxu0 %v16946_v1  ;;  %v16948_v4 = vld [vmem:[%s24323_s23 + $0xac] ss:$28 sps:$4 sm:$0x3f]   ;;  %s542_s29 = scalar_select %p541_p10, %s19185_s28, 1  ;;  %16571 = vmatpush3.bf16.msra.mxu1 %v16947_v3  ;;  %v684_v6 = vsel %vm682_vm0, %v16950_v5, 0 }
  0x1d   : > { %14196 = vmatprep.subr.msk.bf16.mxu0 %vm682_vm0, %v16948_v4  ;;  %v16951_v7 = vld [vmem:[%s24323_s23 + $0xc0] ss:$28 sps:$4 sm:$0x3f]   ;;  %v16956_v9 = vld [vmem:[%s24323_s23 + $0xc] ss:$28 sps:$4 sm:$0xff]  }
  0x1e   : > { %s16283_s18 = sshll.u32 %s542_s29, 4  ;;  %16898 = vmatprep.subr.msk.bf16.mxu1 %vm682_vm0, %v16951_v7  ;;  %v702_v8 = vsel %vm682_vm0, %v16951_v7, 0  ;;  %v16954_v19 = vld [vmem:[%s24323_s23 + $0x8] ss:$28 sps:$4 sm:$0xff]   ;;  %v16957_v20 = vld [vmem:[%s24323_s23 + $0x78] ss:$28 sps:$4 sm:$0xff]  }
  0x1f   : > { %s545_s22 = scalar_lea.vmem %s24324_s21, %s16283_s18  ;;  %v16960_v23 = vld [vmem:[%s24323_s23 + $0x44] ss:$28 sps:$4 sm:$0x3f]   ;;  %v16965_v25 = vld [vmem:[%s24323_s23 + $0xb0] ss:$28 sps:$4 sm:$0x3f]  }
  0x20   : > { %707 = vmatpush1.bf16.msra.mxu0 %v684_v6  ;;  %16573 = vmatpush3.bf16.msra.mxu1 %v702_v8  ;;  %v19243_v10 = vld [vmem:[%s545_s22] sm:$0xff]   ;;  %v19245_v11 = vld [vmem:[%s545_s22 + $0x8] sm:$0x3f]   ;;  %v16963_v27 = vld [vmem:[%s24323_s23 + $0xb4] ss:$28 sps:$4 sm:$0x3f]  }
  0x21   : > { %1055 = vmatprep.subr.bf16.mxu1 %v16956_v9  ;;  %v596_v13 = vshrl.u32 %v19243_v10, 16  ;;  %v598_v14 = vshll.u32 %v19243_v10, 16  ;;  %v603_v15 = vshll.u32 %v19245_v11, 16  ;;  %v607_v16 = vshrl.u32 %v19245_v11, 16  ;;  %757 = vmatprep.subr.bf16.mxu0 %v16959_v12  ;;  %v16969_v29 = vld [vmem:[%s24323_s23 + $0x84] ss:$28 sps:$4 sm:$0xff]  }
  0x22   : > { %v16962_v24 = vld [vmem:[%s24323_s23 + $0x40] ss:$28 sps:$4 sm:$0x3f]   ;;  %v690_v28 = vsel %vm682_vm0, %v16965_v25, 0  ;;  %v16966_v31 = vld [vmem:[%s24323_s23 + $0x18] ss:$28 sps:$4 sm:$0xff]  }
  0x23   : > { %v600_v17 = vrot.slane %v598_v14, 1  ;;  %v605_v18 = vrot.slane %v603_v15, 1  ;;  %v988_v30 = vsel %vm682_vm0, %v16962_v24, 0  ;;  %v16970_v32 = vld [vmem:[%s24323_s23 + $0x50] ss:$28 sps:$4 sm:$0x3f]  }
  0x24   : > { %v1000_v33 = vsel %vm682_vm0, %v16970_v32, 0  ;;  %v16973_v34 = vld [vmem:[%s24323_s23 + $0xec] ss:$28 sps:$4 sm:$0xff]   ;;  %v16967_v35 = vld [vmem:[%s24323_s23 + $0x80] ss:$28 sps:$4 sm:$0xff]   ;;  %v1228_v44 = vrot.slane %v19243_v10, 1 }
  0x25   : > { %v601_v21 = vor.u32 %v600_v17, %v596_v13  ;;  %v19260_v22 = vor.u32 %v607_v16, %v605_v18  ;;  %v16974_v36 = vld [vmem:[%s24323_s23 + $0xbc] ss:$28 sps:$4 sm:$0x3f]   ;;  %v16982_v39 = vld [vmem:[%s24323_s23 + $0x4] ss:$28 sps:$4 sm:$0xff]   ;;  %v19349_v45 = vrot.slane %v19245_v11, 1 }
  0x26   : > { %v16976_v37 = vld [vmem:[%s24323_s23 + $0xb8] ss:$28 sps:$4 sm:$0x3f]   ;;  %v16971_v40 = vld [vmem:[%s24323_s23 + $0xe8] ss:$28 sps:$4 sm:$0xff]   ;;  %v19070_v6 = vmov 0.0  }
  0x27   : > { %v19271_v26 = vsel %vm594_vm1, %v601_v21, %v605_v18  ;;  %v696_v38 = vsel %vm682_vm0, %v16976_v37, 0  ;;  %v16977_v41 = vld [vmem:[%s24323_s23 + $0x124] ss:$28 sps:$4 sm:$0x3f]   ;;  %v17004_v43 = vld [vmem:[%s24323_s23 + $0xf8] ss:$28 sps:$4 sm:$0xff]   ;;  %v1230_v50 = vsel %vm1227_vm3, %v1228_v44, %v19349_v45 }
  0x28   : > { %14197 = vmatmul.mubr.msk.bf16.vlgmr.msra.gmra.mrb[0].mxu0 %vm675_vm2, %v19271_v26  ;;  %16574 = vmatprep.mubr.msk.bf16.mxu1 %vm675_vm2, %v19271_v26  ;;  %v16979_v42 = vld [vmem:[%s24323_s23 + $0x120] ss:$28 sps:$4 sm:$0x3f]   ;;  %v16985_v48 = vld [vmem:[%s24323_s23 + $0x38] ss:$28 sps:$4 sm:$0x3f]  }
  0x29   : > { %16575 = vmatmul.mubr.msk.bf16.vlgmr.msra.gmra.mrb[0].mxu1 %vm675_vm2, %v19260_v22  ;;  %758 = vmatpush1.bf16.msra.mxu0 %v16957_v20  ;;  %v1309_v46 = vsel %vm682_vm0, %v16979_v42, 0  ;;  %v16980_v47 = vld [vmem:[%s24323_s23] ss:$28 sps:$4 sm:$0xff]   ;;  %v17005_v51 = vld [vmem:[%s24323_s23 + $0x130] ss:$28 sps:$4 sm:$0x3f]  }
  0x2a   : > { %1056 = vmatpush1.bf16.msra.mxu1 %v16954_v19  ;;  %746 = vmatprep.mubr.bf16.mxu0 %v19069_v2  ;;  %v16983_v49 = vld [vmem:[%s24323_s23 + $0x3c] ss:$28 sps:$4 sm:$0x3f]   ;;  %v16988_v52 = vld [vmem:[%s24323_s23 + $0x14] ss:$28 sps:$4 sm:$0xff]   ;;  %v982_v53 = vsel %vm682_vm0, %v16985_v48, 0 }
  0x2b   : > { %14224 = vmatprep.subr.msk.bf16.mxu1 %vm682_vm0, %v16960_v23  ;;  %1087 = vmatprep.mubr.bf16.mxu1 %v19069_v2  ;;  %v1321_v54 = vsel %vm682_vm0, %v17005_v51, 0  ;;  %v16986_v55 = vld [vmem:[%s24323_s23 + $0x10] ss:$28 sps:$4 sm:$0xff]   ;;  %v16991_v57 = vld [vmem:[%s24323_s23 + $0x48] ss:$28 sps:$4 sm:$0x3f]  }
  0x2c   : > { %14199 = vmatprep.subr.msk.bf16.mxu0 %vm682_vm0, %v16963_v27  ;;  %v16989_v56 = vld [vmem:[%s24323_s23 + $0x4c] ss:$28 sps:$4 sm:$0x3f]   ;;  %v16994_v58 = vld [vmem:[%s24323_s23 + $0xe4] ss:$28 sps:$4 sm:$0xff]   ;;  %v994_v59 = vsel %vm682_vm0, %v16991_v57, 0 }
  0x2d   : > { %760 = vmatpush1.bf16.msra.mxu0 %v690_v28  ;;  %v16992_v60 = vld [vmem:[%s24323_s23 + $0xe0] ss:$28 sps:$4 sm:$0xff]   ;;  %v16997_v62 = vld [vmem:[%s24323_s23 + $0x118] ss:$28 sps:$4 sm:$0x3f]   ;;  %s16280_s22 = sshll.u32 %s19185_s28, 4 }
  0x2e   : > { %1058 = vmatpush1.bf16.msra.mxu1 %v988_v30  ;;  %810 = vmatprep.subr.bf16.mxu0 %v16969_v29  ;;  %v16995_v61 = vld [vmem:[%s24323_s23 + $0x11c] ss:$28 sps:$4 sm:$0x3f]   ;;  %v17000_v63 = vld [vmem:[%s24323_s23 + $0xf4] ss:$28 sps:$4 sm:$0xff]   ;;  %v1303_v0 = vsel %vm682_vm0, %v16997_v62, 0  ;;  %s24246_s24 = scalar_lea.hbm %s24305_s17, %s16280_s22 }
  0x2f   : > { %16578 = vmatprep.subr.bf16.mxu1 %v16966_v31  ;;  %v16998_v1 = vld [vmem:[%s24323_s23 + $0xf0] ss:$28 sps:$4 sm:$0xff]   ;;  %v17003_v4 = vld [vmem:[%s24323_s23 + $0x128] ss:$28 sps:$4 sm:$0x3f]   ;;  %s19009_s18 = sshll.u32 %s19073_s19, 4  ;;  %s19010_s18 = int_to_ptr.vmem [resolvable:$false] %s19009_s18 }
  0x30   : > { %14198 = vmatmul.mubr.msk.bf16.gmra.mrb[4].mxu0 %vm675_vm2, %v19260_v22  ;;  %v17001_v3 = vld [vmem:[%s24323_s23 + $0x12c] ss:$28 sps:$4 sm:$0x3f]   ;;  %v1315_v5 = vsel %vm682_vm0, %v17003_v4, 0  ;;  %v19456_v17 = vld [vmem:[%s24325_s2] sm:$0x7f] }
  0x31   : > { %14225 = vmatmul.mubr.msk.bf16.vlgmr.msra.gmra.mrb[4].mxu1 %vm675_vm2, %v19243_v10  ;;  %789 = vmatprep.mubr.bf16.mxu0 %v19069_v2  ;;  %s540_s2 = scalar_lea.vmem [#allocation2], %s539_s26  ;;  %s19011_s0 = scalar_lea.vmem %s19010_s18, 32 }
  0x32   : > { %1097 = vmatprep.mubr.bf16.mxu1 %v19069_v2  ;;  %16579 = vmatpush3.bf16.msra.mxu1 %v16966_v31 }
  0x33   : > { %16899 = vmatprep.subr.msk.bf16.mxu1 %vm682_vm0, %v16970_v32 }
  0x36   : > { %16581 = vmatpush3.bf16.msra.mxu1 %v1000_v33 }
  0x37   : > { %1376 = vmatprep.subr.bf16.mxu1 %v16973_v34 }
  0x38   : > { %14200 = vmatmul.mubr.msk.bf16.vlgmr.msra.gmra.mrb[8].mxu0 %vm675_vm2, %v19271_v26 }
  0x39   : > { %14226 = vmatmul.mubr.msk.bf16.gmra.mrb[8].mxu1 %vm675_vm2, %v19245_v11  ;;  %811 = vmatpush1.bf16.msra.mxu0 %v16967_v35 }
  0x3a   : > { %799 = vmatprep.mubr.bf16.mxu0 %v19069_v2  ;;  %16582 = vmatprep.mubr.msk.bf16.mxu1 %vm675_vm2, %v19243_v10 }
  0x3b   : > { %14202 = vmatprep.subr.msk.bf16.mxu0 %vm682_vm0, %v16974_v36 }
  0x3d   : > { %813 = vmatpush1.bf16.msra.mxu0 %v696_v38 }
  0x3e   : > { %1002 = vmatprep.subr.bf16.mxu0 %v16982_v39 }
  0x40   : > { %14201 = vmatmul.mubr.msk.bf16.gmra.mrb[12].mxu0 %vm675_vm2, %v19260_v22 }
  0x41   : > { %16583 = vmatmul.mubr.msk.bf16.vlgmr.msra.gmra.mrb[0].mxu1 %vm675_vm2, %v19245_v11  ;;  %842 = vmatprep.mubr.bf16.mxu0 %v19069_v2 }
  0x42   : > { %1377 = vmatpush1.bf16.msra.mxu1 %v16971_v40  ;;  %1408 = vmatprep.mubr.bf16.mxu1 %v19069_v2 }
  0x43   : > { %14265 = vmatprep.subr.msk.bf16.mxu1 %vm682_vm0, %v16977_v41 }
  0x46   : > { %1379 = vmatpush1.bf16.msra.mxu1 %v1309_v46 }
  0x47   : > { %16586 = vmatprep.subr.bf16.mxu1 %v17004_v43 }
  0x48   : > { %14203 = vmatmul.mubr.msk.bf16.vlgmr.msra.gmra.mrb[16].mxu0 %vm675_vm2, %v19271_v26 }
  0x49   : > { %14266 = vmatmul.mubr.msk.bf16.vlgmr.msra.gmra.mrb[4].mxu1 %vm675_vm2, %v1230_v50  ;;  %1003 = vmatpush1.bf16.msra.mxu0 %v16980_v47 }
  0x4a   : > { %852 = vmatprep.mubr.bf16.mxu0 %v19069_v2  ;;  %1418 = vmatprep.mubr.bf16.mxu1 %v19069_v2 }
  0x4b   : > { %14221 = vmatprep.subr.msk.bf16.mxu0 %vm682_vm0, %v16983_v49  ;;  %16587 = vmatpush3.bf16.msra.mxu1 %v17004_v43 }
  0x4c   : > { %16900 = vmatprep.subr.msk.bf16.mxu1 %vm682_vm0, %v17005_v51 }
  0x4d   : > { %1005 = vmatpush1.bf16.msra.mxu0 %v982_v53 }
  0x4e   : > { %1108 = vmatprep.subr.bf16.mxu0 %v16988_v52 }
  0x4f   : > { %16589 = vmatpush3.bf16.msra.mxu1 %v1321_v54 }
  0x50   : > { %14204 = vmatmul.mubr.msk.bf16.gmra.mrb[20].mxu0 %vm675_vm2, %v19260_v22 }
  0x51   : > { %14267 = vmatmul.mubr.msk.bf16.gmra.mrb[8].mxu1 %vm675_vm2, %v19349_v45  ;;  %1034 = vmatprep.mubr.bf16.mxu0 %v19069_v2 }
  0x52   : > { %16590 = vmatprep.mubr.msk.bf16.mxu1 %vm675_vm2, %v1230_v50 }
  0x58   : > { %14222 = vmatmul.mubr.msk.bf16.vlgmr.msra.gmra.mrb[0].mxu0 %vm675_vm2, %v19243_v10 }
  0x59   : > { %1109 = vmatpush1.bf16.msra.mxu0 %v16986_v55  ;;  %1044 = vmatprep.mubr.bf16.mxu0 %v19069_v2 }
  0x5a   : > { %14227 = vmatprep.subr.msk.bf16.mxu0 %vm682_vm0, %v16989_v56  ;;  %16591 = vmatmul.mubr.msk.bf16.vlgmr.msra.gmra.mrb[0].mxu1 %vm675_vm2, %v19349_v45 }
  0x5b   : > { %1868 = vmatprep.mubr.bf16.mxu1 %v19069_v2 }
  0x5d   : > { %1111 = vmatpush1.bf16.msra.mxu0 %v994_v59 }
  0x5e   : > { %1323 = vmatprep.subr.bf16.mxu0 %v16994_v58 }
  0x60   : > { %14223 = vmatmul.mubr.msk.bf16.gmra.mrb[4].mxu0 %vm675_vm2, %v19245_v11 }
  0x61   : > { %1140 = vmatprep.mubr.bf16.mxu0 %v19069_v2 }
  0x68   : > { %14228 = vmatmul.mubr.msk.bf16.vlgmr.msra.gmra.mrb[16].mxu0 %vm675_vm2, %v19243_v10 }
  0x69   : > { %1324 = vmatpush1.bf16.msra.mxu0 %v16992_v60  ;;  %1150 = vmatprep.mubr.bf16.mxu0 %v19069_v2 }
  0x6a   : > { %14262 = vmatprep.subr.msk.bf16.mxu0 %vm682_vm0, %v16995_v61 }
  0x6d   : > { %1326 = vmatpush1.bf16.msra.mxu0 %v1303_v0 }
  0x6e   : > { %1429 = vmatprep.subr.bf16.mxu0 %v17000_v63 }
  0x70   : > { %14229 = vmatmul.mubr.msk.bf16.gmra.mrb[20].mxu0 %vm675_vm2, %v19245_v11  ;;  %v1561_v11 = vlaneseq }
  0x71   : > { %1355 = vmatprep.mubr.bf16.mxu0 %v19069_v2 }
  0x72   : > { %v19451_v13 = vshrl.u32 %v1561_v11, 7 }
  0x74   : > { %v19459_v18 = vsub.s32 2, %v19451_v13  ;;  %v1575_v19 = vsub.s32 3, %v19451_v13  ;;  %v1587_v47 = vsub.s32 6, %v19451_v13 }
  0x76   : > { %v1572_v20 = vrot.slane %v19456_v17, %v19459_v18  ;;  %v1576_v22 = vrot.slane %v19456_v17, %v1575_v19  ;;  %v1588_v61 = vrot.slane %v19456_v17, %v1587_v47 }
  0x78   : > { %14263 = vmatmul.mubr.msk.bf16.vlgmr.msra.gmra.mrb[0].mxu0 %vm675_vm2, %v1230_v50 }
  0x79   : > { %1365 = vmatprep.mubr.bf16.mxu0 %v19069_v2  ;;  %1430 = vmatpush1.bf16.msra.mxu0 %v16998_v1 }
  0x7a   : > { %14268 = vmatprep.subr.msk.bf16.mxu0 %vm682_vm0, %v17001_v3 }
  0x7d   : > { %1432 = vmatpush1.bf16.msra.mxu0 %v1315_v5 }
  0x7e   : > { %16594 = vmatprep.subr.bf16.mxu0 %v19070_v6 }
  0x80   : > { %14264 = vmatmul.mubr.msk.bf16.gmra.mrb[4].mxu0 %vm675_vm2, %v19349_v45 }
  0x81   : > { %1461 = vmatprep.mubr.bf16.mxu0 %v19069_v2 }
  0x88   : > { %14269 = vmatmul.mubr.msk.bf16.vlgmr.msra.gmra.mrb[16].mxu0 %vm675_vm2, %v1230_v50 }
  0x89   : > { %1471 = vmatprep.mubr.bf16.mxu0 %v19069_v2 }
  0x90   : > { %14270 = vmatmul.mubr.msk.bf16.gmra.mrb[20].mxu0 %vm675_vm2, %v19349_v45 }
  0x91   : > { %16598 = vmatprep.mubr.msk.bf16.mxu0 %vm19071_vm4, %v19070_v6 }
 0x10b   : > { %v791_v7 = vpop.f32.mrb[8].mxu0 }
 0x10c   : > { %v793_v8 = vpop.f32.mrb[9].mxu0 }
 0x10d   : > { %v795_v9 = vpop.f32.mrb[10].mxu0 }
 0x10e   : > { %v797_v10 = vpop.f32.mrb[11].mxu0 }
 0x113   : > { %v801_v12 = vpop.f32.mrb[12].mxu0 }
 0x114   : > { %v803_v14 = vpop.f32.mrb[13].mxu0 }
 0x115   : > { %v805_v15 = vpop.f32.mrb[14].mxu0 }
 0x116   : > { %v807_v16 = vpop.f32.mrb[15].mxu0 }
 0x11c   : > { %v1410_v21 = vpop.f32.mrb[4].mxu1 }
 0x11d   : > { %v16718_v23 = vadd.f32 %v1410_v21, %v791_v7  ;;  %v1412_v24 = vpop.f32.mrb[5].mxu1 }
 0x11e   : > { %v16719_v25 = vadd.f32 %v1412_v24, %v793_v8  ;;  %v1414_v26 = vpop.f32.mrb[6].mxu1 }
 0x11f   : > { %v1598_v27 = vadd.f32 %v16718_v23, %v1572_v20  ;;  %v16720_v28 = vadd.f32 %v1414_v26, %v795_v9  ;;  %v1416_v29 = vpop.f32.mrb[7].mxu1 }
 0x120   : > { %v1599_v30 = vadd.f32 %v16719_v25, %v1576_v22  ;;  %v16721_v31 = vadd.f32 %v1416_v29, %v797_v10 }
 0x121   : > { %v1626_v32 = vmax.f32 %v1598_v27, 0.0  ;;  %v1605_v33 = vadd.f32 %v16720_v28, %v1572_v20 }
 0x122   : > { %v1627_v34 = vmax.f32 %v1599_v30, 0.0  ;;  %v1606_v35 = vadd.f32 %v16721_v31, %v1576_v22 }
 0x123   : > { %v1633_v36 = vmax.f32 %v1605_v33, 0.0  ;;  %v1687_v39 = vrot.slane %v1626_v32, 1 }
 0x124   : > { %v1634_v37 = vmax.f32 %v1606_v35, 0.0  ;;  %v1420_v38 = vpop.f32.mrb[8].mxu1  ;;  %v1690_v43 = vrot.slane %v1627_v34, 1 }
 0x125   : > { %v1688_v40 = vrot.slane %v1633_v36, 1  ;;  %v16722_v41 = vadd.f32 %v1420_v38, %v801_v12  ;;  %v1422_v42 = vpop.f32.mrb[9].mxu1 }
 0x126   : > { %v1691_v44 = vrot.slane %v1634_v37, 1  ;;  %v16723_v45 = vadd.f32 %v1422_v42, %v803_v14  ;;  %v1424_v46 = vpop.f32.mrb[10].mxu1 }
 0x127   : > { %v1689_v48 = vsel %vm1227_vm3, %v1687_v39, %v1688_v40  ;;  %v1612_v49 = vadd.f32 %v16722_v41, %v1572_v20  ;;  %v16724_v50 = vadd.f32 %v1424_v46, %v805_v15  ;;  %v1426_v51 = vpop.f32.mrb[11].mxu1 }
 0x128   : > { %v1613_v52 = vadd.f32 %v16723_v45, %v1576_v22  ;;  %v16725_v53 = vadd.f32 %v1426_v51, %v807_v16  ;;  %v1692_v54 = vsel %vm1227_vm3, %v1690_v43, %v1691_v44  ;;  %v19470_v55 = vmax.f32 %v1626_v32, %v1689_v48 }
 0x129   : > { %v1640_v56 = vmax.f32 %v1612_v49, 0.0  ;;  %v1619_v57 = vadd.f32 %v16724_v50, %v1572_v20  ;;  %v19472_v58 = vmax.f32 %v1627_v34, %v1692_v54  ;;  %v19072_v45 = vmov 65535   ;;  %v17010_v54 = vld [vmem:[%s24292_s4 + $0x8] ss:$16 sps:$4 sm:$0xff]  }
 0x12a   : > { %v1641_v59 = vmax.f32 %v1613_v52, 0.0  ;;  %v1620_v60 = vadd.f32 %v16725_v53, %v1576_v22  ;;  %v1813_v46 = vsel %vm1811_vm5, 4294967295, %v19072_v45  ;;  %v17012_v52 = vld [vmem:[%s24292_s4 + $0xc] ss:$16 sps:$4 sm:$0xff]   ;;  %v1579_v45 = vsub.s32 4, %v19451_v13 }
 0x12b   : > { %v1706_v62 = vrot.slane %v1640_v56, 1  ;;  %v1647_v63 = vmax.f32 %v1619_v57, 0.0  ;;  %v19502_v51 = vsel %vm1812_vm6, %v1813_v46, 0  ;;  %v17018_v57 = vld [vmem:[%s24292_s4 + $0x2c] ss:$16 sps:$4 sm:$0xff]  }
 0x12c   : > { %v1708_v0 = vrot.slane %v1641_v59, 1  ;;  %v1648_v1 = vmax.f32 %v1620_v60, 0.0  ;;  %v17024_v60 = vld [vmem:[%s24292_s4 + $0x4c] ss:$16 sps:$4 sm:$0xff]  }
 0x12d   : > { %v1707_v3 = vsel %vm1227_vm3, %v1688_v40, %v1706_v62  ;;  %v1720_v4 = vrot.slane %v1647_v63, 1  ;;  %v16592_v5 = vpop.f32.mrb[0].mxu1 }
 0x12e   : > { %v1722_v7 = vrot.slane %v1648_v1, 1  ;;  %v1616_v8 = vadd.f32 %v16592_v5, %v1588_v61  ;;  %v1516_v9 = vpop.f32.mrb[1].mxu1  ;;  %v1709_v10 = vsel %vm1227_vm3, %v1691_v44, %v1708_v0  ;;  %v19477_v11 = vmax.f32 %v1633_v36, %v1707_v3 }
 0x12f   : > { %v1721_v12 = vsel %vm1227_vm3, %v1706_v62, %v1720_v4  ;;  %v19480_v14 = vmax.f32 %v1647_v63, %v1720_v4  ;;  %v1602_v15 = vadd.f32 %v1588_v61, %v1516_v9  ;;  %v16593_v16 = vpop.f32.mrb[2].mxu1  ;;  %v19482_v20 = vmax.f32 %v1634_v37, %v1709_v10  ;;  %v17022_v63 = vld [vmem:[%s24292_s4 + $0x48] ss:$16 sps:$4 sm:$0xff]  }
 0x130   : > { %v19484_v21 = vmax.f32 %v1640_v56, %v1721_v12  ;;  %v19486_v22 = vmax.f32 %v1648_v1, %v1722_v7  ;;  %v1644_v23 = vmax.f32 %v1616_v8, 0.0  ;;  %v1623_v24 = vadd.f32 %v16593_v16, %v1588_v61  ;;  %v1519_v25 = vpop.f32.mrb[3].mxu1  ;;  %v19515_v56 = vld [vmem:[%s24326_s3] sm:$0x7f]   ;;  %v17028_v4 = vld [vmem:[%s24292_s4 + $0x68] ss:$16 sps:$4 sm:$0xff]  }
 0x131   : > { %v1630_v26 = vmax.f32 %v1602_v15, 0.0  ;;  %v1609_v27 = vadd.f32 %v1588_v61, %v1519_v25  ;;  %v1789_v28 = vpack.c.bf16 %v19482_v20, %v19472_v58  ;;  %v1788_v29 = vpack.c.bf16 %v19477_v11, %v19470_v55  ;;  %v17078_v58 = vld [vmem:[%s24292_s4 + $0x16c] ss:$16 sps:$4 sm:$0xff]   ;;  %s14103_s3 = sshll.u32 %s540_s2, 4  ;;  %s24248_s3 = int_to_ptr.vmem [resolvable:$true] %s14103_s3 }
 0x132   : > { %v1795_v30 = vpack.c.bf16 %v19480_v14, %v19484_v21  ;;  %v1651_v31 = vmax.f32 %v1623_v24, 0.0  ;;  %v1723_v32 = vsel %vm1227_vm3, %v1708_v0, %v1722_v7  ;;  %v1714_v33 = vrot.slane %v1644_v23, 1  ;;  %v17030_v0 = vld [vmem:[%s24292_s4 + $0x6c] ss:$16 sps:$4 sm:$0xff]   ;;  %v17034_v24 = vld [vmem:[%s24292_s4 + $0x88] ss:$16 sps:$4 sm:$0xff]   ;;  %p19012_p0 = scmp.lt.s32.totalorder %s24248_s3, %s19010_s18 }
 0x133   : > { %v1699_v34 = vrot.slane %v1630_v26, 1  ;;  %v1637_v35 = vmax.f32 %v1609_v27, 0.0  ;;  %v19495_v36 = vmax.f32 %v1641_v59, %v1723_v32  ;;  %v17016_v59 = vld [vmem:[%s24292_s4 + $0x28] ss:$16 sps:$4 sm:$0xff]   ;;  %v19529_v61 = vsub.s32 0, %v19451_v13  ;;  %s19005_s28 = scalar_lea.vmem %s24248_s3, 16 }
 0x134   : > { %v1728_v37 = vrot.slane %v1651_v31, 1  ;;  %v19532_v62 = vsub.s32 1, %v19451_v13  ;;  %v17036_v7 = vld [vmem:[%s24292_s4 + $0x8c] ss:$16 sps:$4 sm:$0xff]   ;;  %p19006_p11 = scmp.ne.s32.totalorder %s24248_s3, %s19005_s28  ;;  %p19013_p1 = scmp.lt.s32.totalorder %s19011_s0, %s19005_s28 }
 0x135   : > { %v1700_v38 = vrot.slane %v1637_v35, 1  ;;  %v1796_v39 = vpack.c.bf16 %v19486_v22, %v19495_v36  ;;  %v1564_v1 = vrot.slane %v19456_v17, %v19529_v61  ;;  %v17042_v27 = vld [vmem:[%s24292_s4 + $0xac] ss:$16 sps:$4 sm:$0xff]  }
 0x136   : > { %v1729_v40 = vsel %vm1227_vm3, %v1714_v33, %v1728_v37  ;;  %v1785_v41 = vmax.f32 %v1651_v31, %v1728_v37  ;;  %v1568_v3 = vrot.slane %v19456_v17, %v19532_v62  ;;  %v17084_v14 = vld [vmem:[%s24292_s4 + $0x18c] ss:$16 sps:$4 sm:$0xff]   ;;  %p19007_p12 = pnand %p19006_p11, %p19202_p5  ;;  %p19014_p2 = por %p19013_p1, %p19012_p0 }
 0x137   : > { %v1778_v42 = vmax.f32 %v1644_v23, %v1729_v40  ;;  %v1701_v43 = vsel %vm1227_vm3, %v1699_v34, %v1700_v38  ;;  %v1715_v44 = vsel %vm1227_vm3, %v1700_v38, %v1714_v33 }
 0x138   : > { %v1764_v47 = vmax.f32 %v1630_v26, %v1701_v43  ;;  %v1771_v48 = vmax.f32 %v1637_v35, %v1715_v44  ;;  %v17040_v35 = vld [vmem:[%s24292_s4 + $0xa8] ss:$16 sps:$4 sm:$0xff]   ;;  %p19008_p13 = pneg %p19007_p12 }
 0x139   : > { %v1799_v49 = vpack.c.bf16 %v1785_v41, %v1778_v42  ;;  %v17048_v41 = vld [vmem:[%s24292_s4 + $0xcc] ss:$16 sps:$4 sm:$0xff]  }
 0x13a   : > { %v1792_v50 = vpack.c.bf16 %v1771_v48, %v1764_v47  ;;  %p19015_p3 = pnand %p19014_p2, %p19008_p13 }
 0x13b   : > { %v1834_v53 = vand.u32 %v19502_v51, %v1799_v49  ;;  %v1583_v49 = vsub.s32 5, %v19451_v13 }
 0x13c   : > { %16595 = vmatpush3.bf16.msra.mxu0 %v1792_v50 }
 0x13d   : > { %16596 = vmatprep.subr.bf16.mxu0 %v19070_v6 }
 0x140   : > { %16597 = vmatpush3.bf16.msra.mxu0 %v1834_v53 }
 0x141   : > { %3437 = vmatprep.subr.bf16.mxu0 %v17012_v52 }
 0x143   : > { %16599 = vmatmul.mubr.msk.bf16.vlgmr.msra.gmra.mrb[24].mxu0 %vm1807_vm7, %v19515_v56 }
 0x144   : > { %3438 = vmatpush1.bf16.msra.mxu0 %v17010_v54 }
 0x145   : > { %3439 = vmatprep.subr.bf16.mxu0 %v17018_v57 }
 0x148   : > { %3440 = vmatpush1.bf16.msra.mxu0 %v17016_v59  ;;  %v17046_v59 = vld [vmem:[%s24292_s4 + $0xc8] ss:$16 sps:$4 sm:$0xff]  }
 0x149   : > { %3441 = vmatprep.subr.bf16.mxu0 %v17024_v60 }
 0x14b   : > { %v1357_v5 = vpop.f32.mrb[0].mxu0 }
 0x14c   : > { %v1596_v8 = vadd.f32 %v1564_v1, %v1357_v5  ;;  %v1359_v9 = vpop.f32.mrb[1].mxu0  ;;  %3442 = vmatpush1.bf16.msra.mxu0 %v17022_v63 }
 0x14d   : > { %v1597_v10 = vadd.f32 %v1568_v3, %v1359_v9  ;;  %v1361_v12 = vpop.f32.mrb[2].mxu0  ;;  %3443 = vmatprep.subr.bf16.mxu0 %v17030_v0  ;;  %v17054_v0 = vld [vmem:[%s24292_s4 + $0xec] ss:$16 sps:$4 sm:$0xff]   ;;  %v19580_v9 = vrot.slane %v19456_v17, %v1583_v49 }
 0x14e   : > { %v1624_v15 = vmax.f32 %v1596_v8, 0.0  ;;  %v1603_v16 = vadd.f32 %v1564_v1, %v1361_v12  ;;  %v1363_v23 = vpop.f32.mrb[3].mxu0  ;;  %v17052_v12 = vld [vmem:[%s24292_s4 + $0xe8] ss:$16 sps:$4 sm:$0xff]  }
 0x14f   : > { %v1625_v25 = vmax.f32 %v1597_v10, 0.0  ;;  %v1604_v26 = vadd.f32 %v1568_v3, %v1363_v23 }
 0x150   : > { %v1631_v31 = vmax.f32 %v1603_v16, 0.0  ;;  %3444 = vmatpush1.bf16.msra.mxu0 %v17028_v4  ;;  %v1681_v33 = vrot.slane %v1624_v15, 1 }
 0x151   : > { %v1632_v32 = vmax.f32 %v1604_v26, 0.0  ;;  %3445 = vmatprep.subr.bf16.mxu0 %v17036_v7  ;;  %v1684_v37 = vrot.slane %v1625_v25, 1  ;;  %v19575_v7 = vrot.slane %v19456_v17, %v1579_v45 }
 0x152   : > { %v1682_v34 = vrot.slane %v1631_v31, 1 }
 0x153   : > { %v1685_v38 = vrot.slane %v1632_v32, 1  ;;  %v1367_v40 = vpop.f32.mrb[4].mxu0 }
 0x154   : > { %v1683_v42 = vsel %vm1227_vm3, %v1681_v33, %v1682_v34  ;;  %v1610_v43 = vadd.f32 %v1564_v1, %v1367_v40  ;;  %v1369_v44 = vpop.f32.mrb[5].mxu0  ;;  %3446 = vmatpush1.bf16.msra.mxu0 %v17034_v24 }
 0x155   : > { %v1758_v46 = vmax.f32 %v1624_v15, %v1683_v42  ;;  %v1611_v47 = vadd.f32 %v1568_v3, %v1369_v44  ;;  %v1371_v48 = vpop.f32.mrb[6].mxu0  ;;  %v1686_v50 = vsel %vm1227_vm3, %v1684_v37, %v1685_v38  ;;  %3447 = vmatprep.subr.bf16.mxu0 %v17042_v27 }
 0x156   : > { %v1638_v52 = vmax.f32 %v1610_v43, 0.0  ;;  %v1617_v53 = vadd.f32 %v1564_v1, %v1371_v48  ;;  %v1373_v54 = vpop.f32.mrb[7].mxu0  ;;  %v1759_v57 = vmax.f32 %v1625_v25, %v1686_v50  ;;  %v17060_v25 = vld [vmem:[%s24292_s4 + $0x10c] ss:$16 sps:$4 sm:$0xff]   ;;  %v17058_v48 = vld [vmem:[%s24292_s4 + $0x108] ss:$16 sps:$4 sm:$0xff]  }
 0x157   : > { %v1639_v60 = vmax.f32 %v1611_v47, 0.0  ;;  %v1618_v63 = vadd.f32 %v1568_v3, %v1373_v54  ;;  %v17066_v54 = vld [vmem:[%s24292_s4 + $0x12c] ss:$16 sps:$4 sm:$0xff]  }
 0x158   : > { %v1702_v4 = vrot.slane %v1638_v52, 1  ;;  %v1645_v5 = vmax.f32 %v1617_v53, 0.0  ;;  %3448 = vmatpush1.bf16.msra.mxu0 %v17040_v35 }
 0x159   : > { %v1704_v1 = vrot.slane %v1639_v60, 1  ;;  %v1646_v8 = vmax.f32 %v1618_v63, 0.0  ;;  %3449 = vmatprep.subr.bf16.mxu0 %v17048_v41 }
 0x15a   : > { %v1703_v3 = vsel %vm1227_vm3, %v1682_v34, %v1702_v4  ;;  %v1716_v10 = vrot.slane %v1645_v5, 1 }
 0x15b   : > { %v1765_v15 = vmax.f32 %v1631_v31, %v1703_v3  ;;  %v1718_v16 = vrot.slane %v1646_v8, 1  ;;  %v1463_v23 = vpop.f32.mrb[16].mxu0  ;;  %v1705_v24 = vsel %vm1227_vm3, %v1685_v38, %v1704_v1 }
 0x15c   : > { %v1717_v17 = vsel %vm1227_vm3, %v1702_v4, %v1716_v10  ;;  %v1779_v26 = vmax.f32 %v1645_v5, %v1716_v10  ;;  %v1600_v27 = vadd.f32 %v19575_v7, %v1463_v23  ;;  %v1465_v33 = vpop.f32.mrb[17].mxu0  ;;  %v1766_v34 = vmax.f32 %v1632_v32, %v1705_v24  ;;  %3450 = vmatpush1.bf16.msra.mxu0 %v17046_v59  ;;  %v17064_v5 = vld [vmem:[%s24292_s4 + $0x128] ss:$16 sps:$4 sm:$0xff]  }
 0x15d   : > { %v1772_v35 = vmax.f32 %v1638_v52, %v1717_v17  ;;  %v1719_v37 = vsel %vm1227_vm3, %v1704_v1, %v1718_v16  ;;  %v1780_v31 = vmax.f32 %v1646_v8, %v1718_v16  ;;  %v1601_v40 = vadd.f32 %v19580_v9, %v1465_v33  ;;  %v1467_v41 = vpop.f32.mrb[18].mxu0  ;;  %3451 = vmatprep.subr.bf16.mxu0 %v17054_v0  ;;  %v17072_v16 = vld [vmem:[%s24292_s4 + $0x14c] ss:$16 sps:$4 sm:$0xff]  }
 0x15e   : > { %v1773_v38 = vmax.f32 %v1639_v60, %v1719_v37  ;;  %v1628_v42 = vmax.f32 %v1600_v27, 0.0  ;;  %v1607_v43 = vadd.f32 %v19575_v7, %v1467_v41  ;;  %v1469_v44 = vpop.f32.mrb[19].mxu0  ;;  %v1787_v47 = vpack.c.bf16 %v1766_v34, %v1759_v57 }
 0x15f   : > { %v1793_v32 = vpack.c.bf16 %v1779_v26, %v1772_v35  ;;  %v1629_v50 = vmax.f32 %v1601_v40, 0.0  ;;  %v1608_v52 = vadd.f32 %v19580_v9, %v1469_v44  ;;  %v1786_v53 = vpack.c.bf16 %v1765_v15, %v1758_v46  ;;  %v17070_v35 = vld [vmem:[%s24292_s4 + $0x148] ss:$16 sps:$4 sm:$0xff]  }
 0x160   : > { %v1794_v59 = vpack.c.bf16 %v1780_v31, %v1773_v38  ;;  %v1635_v60 = vmax.f32 %v1607_v43, 0.0  ;;  %1836 = vmatprep.subr.bf16.mxu1 %v1787_v47  ;;  %3452 = vmatpush1.bf16.msra.mxu0 %v17052_v12  ;;  %v1693_v57 = vrot.slane %v1628_v42, 1 }
 0x161   : > { %v1636_v63 = vmax.f32 %v1608_v52, 0.0  ;;  %1837 = vmatpush1.bf16.msra.mxu1 %v1786_v53  ;;  %3453 = vmatprep.subr.bf16.mxu0 %v17060_v25  ;;  %v1816_v46 = vand.u32 %v19502_v51, %v1793_v32  ;;  %v1696_v1 = vrot.slane %v1629_v50, 1  ;;  %v17009_v53 = vld [vmem:[%s24292_s4 + $0x4] ss:$16 sps:$4 sm:$0xff]  }
 0x162   : > { %v1694_v0 = vrot.slane %v1635_v60, 1  ;;  %v1819_v4 = vand.u32 %v19502_v51, %v1794_v59  ;;  %v17090_v59 = vld [vmem:[%s24292_s4 + $0x1ac] ss:$16 sps:$4 sm:$0xff]  }
 0x163   : > { %v1697_v8 = vrot.slane %v1636_v63, 1  ;;  %v1473_v3 = vpop.f32.mrb[20].mxu0 }
 0x164   : > { %v1695_v10 = vsel %vm1227_vm3, %v1693_v57, %v1694_v0  ;;  %v1614_v12 = vadd.f32 %v19575_v7, %v1473_v3  ;;  %v1475_v15 = vpop.f32.mrb[21].mxu0  ;;  %1838 = vmatprep.subr.bf16.mxu1 %v1819_v4  ;;  %3454 = vmatpush1.bf16.msra.mxu0 %v17058_v48  ;;  %v17007_v57 = vld [vmem:[%s24292_s4] ss:$16 sps:$4 sm:$0xff]   ;;  %v17088_v4 = vld [vmem:[%s24292_s4 + $0x1a8] ss:$16 sps:$4 sm:$0xff]  }
 0x165   : > { %v1762_v23 = vmax.f32 %v1628_v42, %v1695_v10  ;;  %v1615_v24 = vadd.f32 %v19580_v9, %v1475_v15  ;;  %v1477_v25 = vpop.f32.mrb[22].mxu0  ;;  %1839 = vmatpush1.bf16.msra.mxu1 %v1816_v46  ;;  %v1698_v17 = vsel %vm1227_vm3, %v1696_v1, %v1697_v8  ;;  %3455 = vmatprep.subr.bf16.mxu0 %v17066_v54  ;;  %v17082_v54 = vld [vmem:[%s24292_s4 + $0x188] ss:$16 sps:$4 sm:$0xff]   ;;  %v17013_v46 = vld [vmem:[%s24292_s4 + $0x20] ss:$16 sps:$4 sm:$0xff]  }
 0x166   : > { %v1642_v26 = vmax.f32 %v1614_v12, 0.0  ;;  %v1621_v27 = vadd.f32 %v19575_v7, %v1477_v25  ;;  %v1479_v33 = vpop.f32.mrb[23].mxu0  ;;  %1879 = vmatprep.subr.bf16.mxu1 %v1789_v28  ;;  %v1763_v34 = vmax.f32 %v1629_v50, %v1698_v17  ;;  %v1825_v7 = vand.u32 %v19502_v51, %v1796_v39  ;;  %v17021_v1 = vld [vmem:[%s24292_s4 + $0x44] ss:$16 sps:$4 sm:$0xff]   ;;  %v17019_v3 = vld [vmem:[%s24292_s4 + $0x40] ss:$16 sps:$4 sm:$0xff]  }
 0x167   : > { %v1643_v37 = vmax.f32 %v1615_v24, 0.0  ;;  %v1622_v31 = vadd.f32 %v19580_v9, %v1479_v33  ;;  %v1822_v39 = vand.u32 %v19502_v51, %v1795_v30  ;;  %v17025_v10 = vld [vmem:[%s24292_s4 + $0x60] ss:$16 sps:$4 sm:$0xff]   ;;  %v17033_v12 = vld [vmem:[%s24292_s4 + $0x84] ss:$16 sps:$4 sm:$0xff]  }
 0x168   : > { %v1710_v40 = vrot.slane %v1642_v26, 1  ;;  %v1649_v41 = vmax.f32 %v1621_v27, 0.0  ;;  %14274 = vmatmul.mubr.msk.bf16.vlgmr.msra.gmra.mrb[12].mxu1 %vm1807_vm7, %v19515_v56  ;;  %3456 = vmatpush1.bf16.msra.mxu0 %v17064_v5  ;;  %v17096_v5 = vld [vmem:[%s24292_s4 + $0x1cc] ss:$16 sps:$4 sm:$0xff]   ;;  %v17031_v15 = vld [vmem:[%s24292_s4 + $0x80] ss:$16 sps:$4 sm:$0xff]  }
 0x169   : > { %v1712_v20 = vrot.slane %v1643_v37, 1  ;;  %v1650_v28 = vmax.f32 %v1622_v31, 0.0  ;;  %1880 = vmatpush1.bf16.msra.mxu1 %v1788_v29  ;;  %1911 = vmatprep.mubr.bf16.mxu1 %v19069_v2  ;;  %v17076_v29 = vld [vmem:[%s24292_s4 + $0x168] ss:$16 sps:$4 sm:$0xff]   ;;  %v17045_v24 = vld [vmem:[%s24292_s4 + $0xc4] ss:$16 sps:$4 sm:$0xff]  }
 0x16a   : > { %v1711_v9 = vsel %vm1227_vm3, %v1694_v0, %v1710_v40  ;;  %v1724_v38 = vrot.slane %v1649_v41, 1  ;;  %1881 = vmatprep.subr.bf16.mxu1 %v1825_v7  ;;  %3457 = vmatprep.subr.bf16.mxu0 %v17072_v16  ;;  %v17015_v0 = vld [vmem:[%s24292_s4 + $0x24] ss:$16 sps:$4 sm:$0xff]   ;;  %v17043_v25 = vld [vmem:[%s24292_s4 + $0xc0] ss:$16 sps:$4 sm:$0xff]  }
 0x16b   : > { %v1769_v22 = vmax.f32 %v1635_v60, %v1711_v9  ;;  %v1726_v36 = vrot.slane %v1650_v28, 1  ;;  %v1713_v42 = vsel %vm1227_vm3, %v1697_v8, %v1712_v20  ;;  %v17094_v8 = vld [vmem:[%s24292_s4 + $0x1c8] ss:$16 sps:$4 sm:$0xff]   ;;  %v17039_v16 = vld [vmem:[%s24292_s4 + $0xa4] ss:$16 sps:$4 sm:$0xff]  }
 0x16c   : > { %v1725_v43 = vsel %vm1227_vm3, %v1710_v40, %v1724_v38  ;;  %v1783_v55 = vmax.f32 %v1649_v41, %v1724_v38  ;;  %v1770_v11 = vmax.f32 %v1636_v63, %v1713_v42  ;;  %3458 = vmatpush1.bf16.msra.mxu0 %v17070_v35  ;;  %v17051_v17 = vld [vmem:[%s24292_s4 + $0xe4] ss:$16 sps:$4 sm:$0xff]   ;;  %v17055_v33 = vld [vmem:[%s24292_s4 + $0x100] ss:$16 sps:$4 sm:$0xff]   ;;  %v17100_v42 = vld [vmem:[%s24292_s4 + $0x1e8] ss:$16 sps:$4 sm:$0xff]  }
 0x16d   : > { %v1776_v44 = vmax.f32 %v1642_v26, %v1725_v43  ;;  %v1727_v47 = vsel %vm1227_vm3, %v1712_v20, %v1726_v36  ;;  %v1784_v48 = vmax.f32 %v1650_v28, %v1726_v36  ;;  %1882 = vmatpush1.bf16.msra.mxu1 %v1822_v39  ;;  %v1790_v32 = vpack.c.bf16 %v1769_v22, %v1762_v23  ;;  %v17037_v23 = vld [vmem:[%s24292_s4 + $0xa0] ss:$16 sps:$4 sm:$0xff]   ;;  %v17057_v27 = vld [vmem:[%s24292_s4 + $0x104] ss:$16 sps:$4 sm:$0xff]   ;;  %v17102_v36 = vld [vmem:[%s24292_s4 + $0x1ec] ss:$16 sps:$4 sm:$0xff]  }
 0x16e   : > { %v1777_v21 = vmax.f32 %v1643_v37, %v1727_v47  ;;  %v1791_v30 = vpack.c.bf16 %v1770_v11, %v1763_v34  ;;  %3459 = vmatprep.subr.bf16.mxu0 %v17078_v58  ;;  %v17049_v26 = vld [vmem:[%s24292_s4 + $0xe0] ss:$16 sps:$4 sm:$0xff]   ;;  %v17063_v34 = vld [vmem:[%s24292_s4 + $0x124] ss:$16 sps:$4 sm:$0xff]  }
 0x16f   : > { %v1797_v50 = vpack.c.bf16 %v1783_v55, %v1776_v44  ;;  %v17061_v35 = vld [vmem:[%s24292_s4 + $0x120] ss:$16 sps:$4 sm:$0xff]   ;;  %v17069_v37 = vld [vmem:[%s24292_s4 + $0x144] ss:$16 sps:$4 sm:$0xff]   ;;  %v17108_v55 = vld [vmem:[%s24292_s4 + $0x20c] ss:$16 sps:$4 sm:$0xff]  }
 0x170   : > { %v1798_v52 = vpack.c.bf16 %v1784_v48, %v1777_v21  ;;  %1922 = vmatprep.subr.bf16.mxu1 %v1791_v30  ;;  %14275 = vmatmul.mubr.msk.bf16.vlgmr.msra.gmra.mrb[16].mxu1 %vm1807_vm7, %v19515_v56  ;;  %v17067_v31 = vld [vmem:[%s24292_s4 + $0x140] ss:$16 sps:$4 sm:$0xff]   ;;  %v17075_v40 = vld [vmem:[%s24292_s4 + $0x164] ss:$16 sps:$4 sm:$0xff]   ;;  %v17106_v48 = vld [vmem:[%s24292_s4 + $0x208] ss:$16 sps:$4 sm:$0xff]  }
 0x171   : > { %1923 = vmatpush1.bf16.msra.mxu1 %v1790_v32  ;;  %1954 = vmatprep.mubr.bf16.mxu1 %v19069_v2  ;;  %v1828_v63 = vand.u32 %v19502_v51, %v1797_v50  ;;  %v17073_v41 = vld [vmem:[%s24292_s4 + $0x160] ss:$16 sps:$4 sm:$0xff]   ;;  %v17081_v7 = vld [vmem:[%s24292_s4 + $0x184] ss:$16 sps:$4 sm:$0xff]   ;;  %v17114_v30 = vld [vmem:[%s24292_s4 + $0x22c] ss:$16 sps:$4 sm:$0xff]  }
 0x172   : > { %v1831_v60 = vand.u32 %v19502_v51, %v1798_v52  ;;  %3460 = vmatpush1.bf16.msra.mxu0 %v17076_v29  ;;  %v17079_v58 = vld [vmem:[%s24292_s4 + $0x180] ss:$16 sps:$4 sm:$0xff]   ;;  %v17087_v20 = vld [vmem:[%s24292_s4 + $0x1a4] ss:$16 sps:$4 sm:$0xff]  }
 0x173   : > { %3461 = vmatprep.subr.bf16.mxu0 %v17084_v14  ;;  %v17085_v28 = vld [vmem:[%s24292_s4 + $0x1a0] ss:$16 sps:$4 sm:$0xff]   ;;  %v17093_v9 = vld [vmem:[%s24292_s4 + $0x1c4] ss:$16 sps:$4 sm:$0xff]  }
 0x174   : > { %1924 = vmatprep.subr.bf16.mxu1 %v1831_v60  ;;  %v17091_v38 = vld [vmem:[%s24292_s4 + $0x1c0] ss:$16 sps:$4 sm:$0xff]   ;;  %v17099_v22 = vld [vmem:[%s24292_s4 + $0x1e4] ss:$16 sps:$4 sm:$0xff]   ;;  %v17120_v60 = vld [vmem:[%s24292_s4 + $0x24c] ss:$16 sps:$4 sm:$0xff]  }
 0x175   : > { %1925 = vmatpush1.bf16.msra.mxu1 %v1828_v63  ;;  %v17097_v39 = vld [vmem:[%s24292_s4 + $0x1e0] ss:$16 sps:$4 sm:$0xff]   ;;  %v17105_v43 = vld [vmem:[%s24292_s4 + $0x204] ss:$16 sps:$4 sm:$0xff]  }
 0x176   : > { %3265 = vmatprep.subr.bf16.mxu1 %v17009_v53  ;;  %3462 = vmatpush1.bf16.msra.mxu0 %v17082_v54  ;;  %v17103_v47 = vld [vmem:[%s24292_s4 + $0x200] ss:$16 sps:$4 sm:$0xff]   ;;  %v17111_v21 = vld [vmem:[%s24292_s4 + $0x224] ss:$16 sps:$4 sm:$0xff]   ;;  %v17112_v53 = vld [vmem:[%s24292_s4 + $0x228] ss:$16 sps:$4 sm:$0xff]  }
 0x177   : > { %3463 = vmatprep.subr.bf16.mxu0 %v17090_v59  ;;  %v17109_v52 = vld [vmem:[%s24292_s4 + $0x220] ss:$16 sps:$4 sm:$0xff]   ;;  %v17117_v59 = vld [vmem:[%s24292_s4 + $0x244] ss:$16 sps:$4 sm:$0xff]  }
 0x178   : > { %14276 = vmatmul.mubr.msk.bf16.vlgmr.msra.gmra.mrb[20].mxu1 %vm1807_vm7, %v19515_v56  ;;  %v17027_v56 = vld [vmem:[%s24292_s4 + $0x64] ss:$16 sps:$4 sm:$0xff]  }
 0x179   : > { %3266 = vmatpush1.bf16.msra.mxu1 %v17007_v57 }
 0x17a   : > { %3267 = vmatprep.subr.bf16.mxu1 %v17015_v0  ;;  %3464 = vmatpush1.bf16.msra.mxu0 %v17088_v4 }
 0x17b   : > { %3465 = vmatprep.subr.bf16.mxu0 %v17096_v5  ;;  %v17115_v5 = vld [vmem:[%s24292_s4 + $0x240] ss:$16 sps:$4 sm:$0xff]  }
 0x17d   : > { %3268 = vmatpush1.bf16.msra.mxu1 %v17013_v46  ;;  %v17118_v46 = vld [vmem:[%s24292_s4 + $0x248] ss:$16 sps:$4 sm:$0xff]  }
 0x17e   : > { %3269 = vmatprep.subr.bf16.mxu1 %v17021_v1  ;;  %3466 = vmatpush1.bf16.msra.mxu0 %v17094_v8  ;;  %v17123_v8 = vld [vmem:[%s24292_s4 + $0x264] ss:$16 sps:$4 sm:$0xff]  }
 0x17f   : > { %3467 = vmatprep.subr.bf16.mxu0 %v17102_v36  ;;  %v17147_v36 = vld [vmem:[%s24292_s4 + $0x2e4] ss:$16 sps:$4 sm:$0xff]  }
 0x181   : > { %3270 = vmatpush1.bf16.msra.mxu1 %v17019_v3  ;;  %v17126_v3 = vld [vmem:[%s24292_s4 + $0x26c] ss:$16 sps:$4 sm:$0xff]  }
 0x182   : > { %3271 = vmatprep.subr.bf16.mxu1 %v17027_v56  ;;  %3468 = vmatpush1.bf16.msra.mxu0 %v17100_v42  ;;  %v17145_v42 = vld [vmem:[%s24292_s4 + $0x2e0] ss:$16 sps:$4 sm:$0xff]  }
 0x183   : > { %3480 = vmatprep.subr.bf16.mxu0 %v17108_v55  ;;  %v17153_v55 = vld [vmem:[%s24292_s4 + $0x304] ss:$16 sps:$4 sm:$0xff]  }
 0x185   : > { %3272 = vmatpush1.bf16.msra.mxu1 %v17025_v10 }
 0x186   : > { %3273 = vmatprep.subr.bf16.mxu1 %v17033_v12  ;;  %v17121_v12 = vld [vmem:[%s24292_s4 + $0x260] ss:$16 sps:$4 sm:$0xff]  }
 0x189   : > { %3274 = vmatpush1.bf16.msra.mxu1 %v17031_v15  ;;  %v17124_v15 = vld [vmem:[%s24292_s4 + $0x268] ss:$16 sps:$4 sm:$0xff]  }
 0x18a   : > { %3275 = vmatprep.subr.bf16.mxu1 %v17039_v16 }
 0x18d   : > { %3276 = vmatpush1.bf16.msra.mxu1 %v17037_v23 }
 0x18e   : > { %3277 = vmatprep.subr.bf16.mxu1 %v17045_v24  ;;  %v17129_v24 = vld [vmem:[%s24292_s4 + $0x284] ss:$16 sps:$4 sm:$0xff]  }
 0x191   : > { %3278 = vmatpush1.bf16.msra.mxu1 %v17043_v25  ;;  %v17132_v25 = vld [vmem:[%s24292_s4 + $0x28c] ss:$16 sps:$4 sm:$0xff]  }
 0x192   : > { %3279 = vmatprep.subr.bf16.mxu1 %v17051_v17 }
 0x195   : > { %3280 = vmatpush1.bf16.msra.mxu1 %v17049_v26 }
 0x196   : > { %3281 = vmatprep.subr.bf16.mxu1 %v17057_v27 }
 0x199   : > { %3282 = vmatpush1.bf16.msra.mxu1 %v17055_v33  ;;  %v17127_v33 = vld [vmem:[%s24292_s4 + $0x280] ss:$16 sps:$4 sm:$0xff]  }
 0x19a   : > { %3283 = vmatprep.subr.bf16.mxu1 %v17063_v34  ;;  %v17130_v34 = vld [vmem:[%s24292_s4 + $0x288] ss:$16 sps:$4 sm:$0xff]  }
 0x19d   : > { %3284 = vmatpush1.bf16.msra.mxu1 %v17061_v35 }
 0x19e   : > { %3285 = vmatprep.subr.bf16.mxu1 %v17069_v37  ;;  %v17135_v37 = vld [vmem:[%s24292_s4 + $0x2a4] ss:$16 sps:$4 sm:$0xff]  }
 0x1a1   : > { %3286 = vmatpush1.bf16.msra.mxu1 %v17067_v31  ;;  %v17138_v31 = vld [vmem:[%s24292_s4 + $0x2ac] ss:$16 sps:$4 sm:$0xff]  }
 0x1a2   : > { %3287 = vmatprep.subr.bf16.mxu1 %v17075_v40 }
 0x1a5   : > { %3288 = vmatpush1.bf16.msra.mxu1 %v17073_v41 }
 0x1a6   : > { %3289 = vmatprep.subr.bf16.mxu1 %v17081_v7 }
 0x1a9   : > { %3290 = vmatpush1.bf16.msra.mxu1 %v17079_v58  ;;  %v17133_v58 = vld [vmem:[%s24292_s4 + $0x2a0] ss:$16 sps:$4 sm:$0xff]  }
 0x1aa   : > { %3291 = vmatprep.subr.bf16.mxu1 %v17087_v20  ;;  %v17136_v20 = vld [vmem:[%s24292_s4 + $0x2a8] ss:$16 sps:$4 sm:$0xff]  }
 0x1ad   : > { %3292 = vmatpush1.bf16.msra.mxu1 %v17085_v28  ;;  %v17141_v28 = vld [vmem:[%s24292_s4 + $0x2c4] ss:$16 sps:$4 sm:$0xff]  }
 0x1ae   : > { %3293 = vmatprep.subr.bf16.mxu1 %v17093_v9  ;;  %v17144_v9 = vld [vmem:[%s24292_s4 + $0x2cc] ss:$16 sps:$4 sm:$0xff]  }
 0x1b1   : > { %3294 = vmatpush1.bf16.msra.mxu1 %v17091_v38  ;;  %v17139_v38 = vld [vmem:[%s24292_s4 + $0x2c0] ss:$16 sps:$4 sm:$0xff]  }
 0x1b2   : > { %3295 = vmatprep.subr.bf16.mxu1 %v17099_v22  ;;  %v17142_v22 = vld [vmem:[%s24292_s4 + $0x2c8] ss:$16 sps:$4 sm:$0xff]  }
 0x1b5   : > { %3296 = vmatpush1.bf16.msra.mxu1 %v17097_v39  ;;  %v17150_v39 = vld [vmem:[%s24292_s4 + $0x2ec] ss:$16 sps:$4 sm:$0xff]  }
 0x1b6   : > { %3308 = vmatprep.subr.bf16.mxu1 %v17105_v43  ;;  %v17148_v43 = vld [vmem:[%s24292_s4 + $0x2e8] ss:$16 sps:$4 sm:$0xff]  }
 0x216   : > { %v1999_v56 = vpop.f32.mrb[24].mxu0 }
 0x217   : > { %v16600_v10 = vpop.f32.mrb[25].mxu0 }
 0x218   : > { %v2002_v23 = vpop.f32.mrb[26].mxu0  ;;  %v17181_v10 = vld [vmem:[%s24292_s4 + $0x3a0] ss:$16 sps:$4 sm:$0xff]  }
 0x219   : > { %v19841_v26 = vpack.c.bf16 %v2002_v23, %v1999_v56  ;;  %v16601_v27 = vpop.f32.mrb[27].mxu0  ;;  %v17186_v56 = vld [vmem:[%s24292_s4 + $0x3ac] ss:$16 sps:$4 sm:$0xff]   ;;  %v17187_v23 = vld [vmem:[%s24292_s4 + $0x3c0] ss:$16 sps:$4 sm:$0xff]  }
 0x21a   : > { %v17193_v27 = vld [vmem:[%s24292_s4 + $0x3e0] ss:$16 sps:$4 sm:$0xff]  }
 0x23b   : > { %v1870_v11 = vpop.f32.mrb[12].mxu1 }
 0x23c   : > { %v1872_v29 = vpop.f32.mrb[13].mxu1 }
 0x23d   : > { %v1874_v44 = vpop.f32.mrb[14].mxu1 }
 0x23e   : > { %v19785_v32 = vpack.c.bf16 %v1874_v44, %v1870_v11  ;;  %v1876_v14 = vpop.f32.mrb[15].mxu1  ;;  %v17156_v11 = vld [vmem:[%s24292_s4 + $0x30c] ss:$16 sps:$4 sm:$0xff]   ;;  %v17154_v44 = vld [vmem:[%s24292_s4 + $0x308] ss:$16 sps:$4 sm:$0xff]  }
 0x23f   : > { %v19793_v50 = vpack.c.bf16 %v1876_v14, %v1872_v29  ;;  %v17151_v29 = vld [vmem:[%s24292_s4 + $0x300] ss:$16 sps:$4 sm:$0xff]  }
 0x240   : > { %v17157_v14 = vld [vmem:[%s24292_s4 + $0x320] ss:$16 sps:$4 sm:$0xff]  }
 0x241   : > { %3297 = vmatprep.mubr.bf16.mxu1 %v19793_v50  ;;  %3469 = vmatprep.mubr.bf16.mxu0 %v19793_v50 }
 0x242   : > { %3298 = vmatmul.mubr.bf16.vlgmr.msra.gmra.mrb[24].mxu1 %v19785_v32  ;;  %3470 = vmatmul.mubr.bf16.vlgmr.msra.gmra.mrb[28].mxu0 %v19785_v32 }
 0x243   : > { %3309 = vmatpush1.bf16.msra.mxu1 %v17103_v47  ;;  %3481 = vmatpush1.bf16.msra.mxu0 %v17106_v48  ;;  %v1913_v54 = vpop.f32.mrb[16].mxu1  ;;  %v17159_v47 = vld [vmem:[%s24292_s4 + $0x324] ss:$16 sps:$4 sm:$0xff]   ;;  %v17162_v48 = vld [vmem:[%s24292_s4 + $0x32c] ss:$16 sps:$4 sm:$0xff]  }
 0x244   : > { %3310 = vmatprep.subr.bf16.mxu1 %v17111_v21  ;;  %3482 = vmatprep.subr.bf16.mxu0 %v17114_v30  ;;  %v1915_v63 = vpop.f32.mrb[17].mxu1  ;;  %v17160_v21 = vld [vmem:[%s24292_s4 + $0x328] ss:$16 sps:$4 sm:$0xff]   ;;  %v17165_v30 = vld [vmem:[%s24292_s4 + $0x344] ss:$16 sps:$4 sm:$0xff]  }
 0x245   : > { %v1917_v57 = vpop.f32.mrb[18].mxu1 }
 0x246   : > { %v19811_v0 = vpack.c.bf16 %v1917_v57, %v1913_v54  ;;  %v1919_v4 = vpop.f32.mrb[19].mxu1  ;;  %v17166_v54 = vld [vmem:[%s24292_s4 + $0x348] ss:$16 sps:$4 sm:$0xff]  }
 0x247   : > { %3311 = vmatpush1.bf16.msra.mxu1 %v17109_v52  ;;  %3483 = vmatpush1.bf16.msra.mxu0 %v17112_v53  ;;  %v19819_v1 = vpack.c.bf16 %v1919_v4, %v1915_v63  ;;  %v17168_v52 = vld [vmem:[%s24292_s4 + $0x34c] ss:$16 sps:$4 sm:$0xff]   ;;  %v17163_v53 = vld [vmem:[%s24292_s4 + $0x340] ss:$16 sps:$4 sm:$0xff]   ;;  %v17172_v57 = vld [vmem:[%s24292_s4 + $0x368] ss:$16 sps:$4 sm:$0xff]  }
 0x248   : > { %3312 = vmatprep.subr.bf16.mxu1 %v17117_v59  ;;  %3484 = vmatprep.subr.bf16.mxu0 %v17120_v60  ;;  %v17171_v59 = vld [vmem:[%s24292_s4 + $0x364] ss:$16 sps:$4 sm:$0xff]   ;;  %v17174_v60 = vld [vmem:[%s24292_s4 + $0x36c] ss:$16 sps:$4 sm:$0xff]   ;;  %v17169_v63 = vld [vmem:[%s24292_s4 + $0x360] ss:$16 sps:$4 sm:$0xff]  }
 0x249   : > { %3340 = vmatprep.mubr.bf16.mxu1 %v19819_v1  ;;  %3512 = vmatprep.mubr.bf16.mxu0 %v19819_v1  ;;  %v17177_v4 = vld [vmem:[%s24292_s4 + $0x384] ss:$16 sps:$4 sm:$0xff]  }
 0x24b   : > { %3313 = vmatpush1.bf16.msra.mxu1 %v17115_v5  ;;  %3485 = vmatpush1.bf16.msra.mxu0 %v17118_v46  ;;  %v1956_v16 = vpop.f32.mrb[20].mxu1  ;;  %v17180_v5 = vld [vmem:[%s24292_s4 + $0x38c] ss:$16 sps:$4 sm:$0xff]   ;;  %v17175_v46 = vld [vmem:[%s24292_s4 + $0x380] ss:$16 sps:$4 sm:$0xff]  }
 0x24c   : > { %3314 = vmatprep.subr.bf16.mxu1 %v17123_v8  ;;  %3486 = vmatprep.subr.bf16.mxu0 %v17126_v3  ;;  %v1958_v17 = vpop.f32.mrb[21].mxu1  ;;  %v17178_v8 = vld [vmem:[%s24292_s4 + $0x388] ss:$16 sps:$4 sm:$0xff]   ;;  %v17183_v3 = vld [vmem:[%s24292_s4 + $0x3a4] ss:$16 sps:$4 sm:$0xff]  }
 0x24d   : > { %v1960_v35 = vpop.f32.mrb[22].mxu1 }
 0x24e   : > { %v19855_v40 = vpack.c.bf16 %v1960_v35, %v1956_v16  ;;  %v1962_v41 = vpop.f32.mrb[23].mxu1  ;;  %v17192_v16 = vld [vmem:[%s24292_s4 + $0x3cc] ss:$16 sps:$4 sm:$0xff]  }
 0x24f   : > { %3315 = vmatpush1.bf16.msra.mxu1 %v17121_v12  ;;  %3487 = vmatpush1.bf16.msra.mxu0 %v17124_v15  ;;  %v19857_v7 = vpack.c.bf16 %v1962_v41, %v1958_v17  ;;  %v17184_v12 = vld [vmem:[%s24292_s4 + $0x3a8] ss:$16 sps:$4 sm:$0xff]   ;;  %v17189_v15 = vld [vmem:[%s24292_s4 + $0x3c4] ss:$16 sps:$4 sm:$0xff]   ;;  %v17198_v17 = vld [vmem:[%s24292_s4 + $0x3ec] ss:$16 sps:$4 sm:$0xff]  }
 0x250   : > { %3316 = vmatprep.subr.bf16.mxu1 %v17129_v24  ;;  %3488 = vmatprep.subr.bf16.mxu0 %v17132_v25  ;;  %v17190_v24 = vld [vmem:[%s24292_s4 + $0x3c8] ss:$16 sps:$4 sm:$0xff]   ;;  %v17195_v25 = vld [vmem:[%s24292_s4 + $0x3e4] ss:$16 sps:$4 sm:$0xff]   ;;  %v17204_v35 = vld [vmem:[%s24292_s4 + $0x40c] ss:$16 sps:$4 sm:$0xff]  }
 0x251   : > { %v17207_v41 = vld [vmem:[%s24292_s4 + $0x424] ss:$16 sps:$4 sm:$0xff]  }
 0x253   : > { %3317 = vmatpush1.bf16.msra.mxu1 %v17127_v33  ;;  %3489 = vmatpush1.bf16.msra.mxu0 %v17130_v34  ;;  %v17196_v33 = vld [vmem:[%s24292_s4 + $0x3e8] ss:$16 sps:$4 sm:$0xff]   ;;  %v17201_v34 = vld [vmem:[%s24292_s4 + $0x404] ss:$16 sps:$4 sm:$0xff]  }
 0x254   : > { %3318 = vmatprep.subr.bf16.mxu1 %v17135_v37  ;;  %3490 = vmatprep.subr.bf16.mxu0 %v17138_v31  ;;  %v17199_v37 = vld [vmem:[%s24292_s4 + $0x400] ss:$16 sps:$4 sm:$0xff]   ;;  %v17202_v31 = vld [vmem:[%s24292_s4 + $0x408] ss:$16 sps:$4 sm:$0xff]  }
 0x257   : > { %3319 = vmatpush1.bf16.msra.mxu1 %v17133_v58  ;;  %3491 = vmatpush1.bf16.msra.mxu0 %v17136_v20  ;;  %v17210_v58 = vld [vmem:[%s24292_s4 + $0x42c] ss:$16 sps:$4 sm:$0xff]   ;;  %v17205_v20 = vld [vmem:[%s24292_s4 + $0x420] ss:$16 sps:$4 sm:$0xff]  }
 0x258   : > { %3320 = vmatprep.subr.bf16.mxu1 %v17141_v28  ;;  %3492 = vmatprep.subr.bf16.mxu0 %v17144_v9  ;;  %v17208_v28 = vld [vmem:[%s24292_s4 + $0x428] ss:$16 sps:$4 sm:$0xff]   ;;  %v17213_v9 = vld [vmem:[%s24292_s4 + $0x444] ss:$16 sps:$4 sm:$0xff]  }
 0x25b   : > { %3321 = vmatpush1.bf16.msra.mxu1 %v17139_v38  ;;  %3493 = vmatpush1.bf16.msra.mxu0 %v17142_v22  ;;  %v17216_v38 = vld [vmem:[%s24292_s4 + $0x44c] ss:$16 sps:$4 sm:$0xff]   ;;  %v17211_v22 = vld [vmem:[%s24292_s4 + $0x440] ss:$16 sps:$4 sm:$0xff]  }
 0x25c   : > { %3322 = vmatprep.subr.bf16.mxu1 %v17147_v36  ;;  %3494 = vmatprep.subr.bf16.mxu0 %v17150_v39  ;;  %v17214_v36 = vld [vmem:[%s24292_s4 + $0x448] ss:$16 sps:$4 sm:$0xff]   ;;  %v17219_v39 = vld [vmem:[%s24292_s4 + $0x464] ss:$16 sps:$4 sm:$0xff]  }
 0x25f   : > { %3323 = vmatpush1.bf16.msra.mxu1 %v17145_v42  ;;  %3495 = vmatpush1.bf16.msra.mxu0 %v17148_v43  ;;  %v17222_v42 = vld [vmem:[%s24292_s4 + $0x46c] ss:$16 sps:$4 sm:$0xff]   ;;  %v17217_v43 = vld [vmem:[%s24292_s4 + $0x460] ss:$16 sps:$4 sm:$0xff]  }
 0x260   : > { %3324 = vmatprep.subr.bf16.mxu1 %v17153_v55  ;;  %3496 = vmatprep.subr.bf16.mxu0 %v17156_v11  ;;  %v17220_v55 = vld [vmem:[%s24292_s4 + $0x468] ss:$16 sps:$4 sm:$0xff]   ;;  %v17225_v11 = vld [vmem:[%s24292_s4 + $0x484] ss:$16 sps:$4 sm:$0xff]  }
 0x263   : > { %3325 = vmatpush1.bf16.msra.mxu1 %v17151_v29  ;;  %3497 = vmatpush1.bf16.msra.mxu0 %v17154_v44  ;;  %v17228_v29 = vld [vmem:[%s24292_s4 + $0x48c] ss:$16 sps:$4 sm:$0xff]   ;;  %v17223_v44 = vld [vmem:[%s24292_s4 + $0x480] ss:$16 sps:$4 sm:$0xff]  }
 0x264   : > { %3326 = vmatprep.subr.bf16.mxu1 %v17159_v47  ;;  %3498 = vmatprep.subr.bf16.mxu0 %v17162_v48  ;;  %v17226_v47 = vld [vmem:[%s24292_s4 + $0x488] ss:$16 sps:$4 sm:$0xff]   ;;  %v17231_v48 = vld [vmem:[%s24292_s4 + $0x4a4] ss:$16 sps:$4 sm:$0xff]  }
 0x267   : > { %3327 = vmatpush1.bf16.msra.mxu1 %v17157_v14  ;;  %3499 = vmatpush1.bf16.msra.mxu0 %v17160_v21  ;;  %v17234_v14 = vld [vmem:[%s24292_s4 + $0x4ac] ss:$16 sps:$4 sm:$0xff]   ;;  %v17229_v21 = vld [vmem:[%s24292_s4 + $0x4a0] ss:$16 sps:$4 sm:$0xff]  }
 0x268   : > { %3328 = vmatprep.subr.bf16.mxu1 %v17165_v30  ;;  %3500 = vmatprep.subr.bf16.mxu0 %v17168_v52  ;;  %v17232_v30 = vld [vmem:[%s24292_s4 + $0x4a8] ss:$16 sps:$4 sm:$0xff]   ;;  %v17237_v52 = vld [vmem:[%s24292_s4 + $0x4c4] ss:$16 sps:$4 sm:$0xff]  }
 0x26b   : > { %3329 = vmatpush1.bf16.msra.mxu1 %v17163_v53  ;;  %3501 = vmatpush1.bf16.msra.mxu0 %v17166_v54  ;;  %v17240_v53 = vld [vmem:[%s24292_s4 + $0x4cc] ss:$16 sps:$4 sm:$0xff]   ;;  %v17235_v54 = vld [vmem:[%s24292_s4 + $0x4c0] ss:$16 sps:$4 sm:$0xff]  }
 0x26c   : > { %3330 = vmatprep.subr.bf16.mxu1 %v17171_v59  ;;  %3502 = vmatprep.subr.bf16.mxu0 %v17174_v60  ;;  %v17238_v59 = vld [vmem:[%s24292_s4 + $0x4c8] ss:$16 sps:$4 sm:$0xff]   ;;  %v17243_v60 = vld [vmem:[%s24292_s4 + $0x4e4] ss:$16 sps:$4 sm:$0xff]  }
 0x26f   : > { %3331 = vmatpush1.bf16.msra.mxu1 %v17169_v63  ;;  %3503 = vmatpush1.bf16.msra.mxu0 %v17172_v57  ;;  %v17246_v63 = vld [vmem:[%s24292_s4 + $0x4ec] ss:$16 sps:$4 sm:$0xff]   ;;  %v17241_v57 = vld [vmem:[%s24292_s4 + $0x4e0] ss:$16 sps:$4 sm:$0xff]  }
 0x270   : > { %3332 = vmatprep.subr.bf16.mxu1 %v17177_v4  ;;  %3504 = vmatprep.subr.bf16.mxu0 %v17180_v5  ;;  %v17244_v4 = vld [vmem:[%s24292_s4 + $0x4e8] ss:$16 sps:$4 sm:$0xff]   ;;  %v17249_v5 = vld [vmem:[%s24292_s4 + $0x504] ss:$16 sps:$4 sm:$0xff]  }
 0x273   : > { %3333 = vmatpush1.bf16.msra.mxu1 %v17175_v46  ;;  %3505 = vmatpush1.bf16.msra.mxu0 %v17178_v8  ;;  %v17252_v46 = vld [vmem:[%s24292_s4 + $0x50c] ss:$16 sps:$4 sm:$0xff]   ;;  %v17247_v8 = vld [vmem:[%s24292_s4 + $0x500] ss:$16 sps:$4 sm:$0xff]  }
 0x274   : > { %3334 = vmatprep.subr.bf16.mxu1 %v17183_v3  ;;  %3506 = vmatprep.subr.bf16.mxu0 %v17186_v56  ;;  %v17250_v3 = vld [vmem:[%s24292_s4 + $0x508] ss:$16 sps:$4 sm:$0xff]   ;;  %v17255_v56 = vld [vmem:[%s24292_s4 + $0x524] ss:$16 sps:$4 sm:$0xff]  }
 0x277   : > { %3335 = vmatpush1.bf16.msra.mxu1 %v17181_v10  ;;  %3507 = vmatpush1.bf16.msra.mxu0 %v17184_v12  ;;  %v17258_v10 = vld [vmem:[%s24292_s4 + $0x52c] ss:$16 sps:$4 sm:$0xff]   ;;  %v17253_v12 = vld [vmem:[%s24292_s4 + $0x520] ss:$16 sps:$4 sm:$0xff]  }
 0x278   : > { %3336 = vmatprep.subr.bf16.mxu1 %v17189_v15  ;;  %3508 = vmatprep.subr.bf16.mxu0 %v17192_v16  ;;  %v17256_v15 = vld [vmem:[%s24292_s4 + $0x528] ss:$16 sps:$4 sm:$0xff]   ;;  %v17261_v16 = vld [vmem:[%s24292_s4 + $0x544] ss:$16 sps:$4 sm:$0xff]  }
 0x27b   : > { %3337 = vmatpush1.bf16.msra.mxu1 %v17187_v23  ;;  %3509 = vmatpush1.bf16.msra.mxu0 %v17190_v24  ;;  %v17264_v23 = vld [vmem:[%s24292_s4 + $0x54c] ss:$16 sps:$4 sm:$0xff]   ;;  %v17259_v24 = vld [vmem:[%s24292_s4 + $0x540] ss:$16 sps:$4 sm:$0xff]  }
 0x27c   : > { %3338 = vmatprep.subr.bf16.mxu1 %v17195_v25  ;;  %3510 = vmatprep.subr.bf16.mxu0 %v17198_v17  ;;  %v17262_v25 = vld [vmem:[%s24292_s4 + $0x548] ss:$16 sps:$4 sm:$0xff]   ;;  %v17267_v17 = vld [vmem:[%s24292_s4 + $0x564] ss:$16 sps:$4 sm:$0xff]  }
 0x27f   : > { %3339 = vmatpush1.bf16.msra.mxu1 %v17193_v27  ;;  %3511 = vmatpush1.bf16.msra.mxu0 %v17196_v33  ;;  %v17270_v27 = vld [vmem:[%s24292_s4 + $0x56c] ss:$16 sps:$4 sm:$0xff]   ;;  %v17265_v33 = vld [vmem:[%s24292_s4 + $0x560] ss:$16 sps:$4 sm:$0xff]  }
 0x280   : > { %3351 = vmatprep.subr.bf16.mxu1 %v17201_v34  ;;  %3523 = vmatprep.subr.bf16.mxu0 %v17204_v35  ;;  %v17268_v34 = vld [vmem:[%s24292_s4 + $0x568] ss:$16 sps:$4 sm:$0xff]   ;;  %v17273_v35 = vld [vmem:[%s24292_s4 + $0x584] ss:$16 sps:$4 sm:$0xff]  }
 0x282   : > { %3341 = vmatmul.mubr.bf16.vlgmr.msra.gmra.mrb[24].mxu1 %v19811_v0  ;;  %3513 = vmatmul.mubr.bf16.vlgmr.msra.gmra.mrb[28].mxu0 %v19811_v0 }
 0x283   : > { %3352 = vmatpush1.bf16.msra.mxu1 %v17199_v37  ;;  %3524 = vmatpush1.bf16.msra.mxu0 %v17202_v31  ;;  %v17276_v37 = vld [vmem:[%s24292_s4 + $0x58c] ss:$16 sps:$4 sm:$0xff]   ;;  %v17271_v31 = vld [vmem:[%s24292_s4 + $0x580] ss:$16 sps:$4 sm:$0xff]  }
 0x284   : > { %3353 = vmatprep.subr.bf16.mxu1 %v17207_v41  ;;  %3525 = vmatprep.subr.bf16.mxu0 %v17210_v58  ;;  %v17274_v41 = vld [vmem:[%s24292_s4 + $0x588] ss:$16 sps:$4 sm:$0xff]   ;;  %v17279_v58 = vld [vmem:[%s24292_s4 + $0x5a4] ss:$16 sps:$4 sm:$0xff]  }
 0x285   : > { %3383 = vmatprep.mubr.bf16.mxu1 %v19857_v7  ;;  %3555 = vmatprep.mubr.bf16.mxu0 %v19857_v7 }
 0x287   : > { %3354 = vmatpush1.bf16.msra.mxu1 %v17205_v20  ;;  %3526 = vmatpush1.bf16.msra.mxu0 %v17208_v28  ;;  %v17282_v20 = vld [vmem:[%s24292_s4 + $0x5ac] ss:$16 sps:$4 sm:$0xff]   ;;  %v17277_v28 = vld [vmem:[%s24292_s4 + $0x5a0] ss:$16 sps:$4 sm:$0xff]  }
 0x288   : > { %3355 = vmatprep.subr.bf16.mxu1 %v17213_v9  ;;  %3527 = vmatprep.subr.bf16.mxu0 %v17216_v38  ;;  %v17280_v9 = vld [vmem:[%s24292_s4 + $0x5a8] ss:$16 sps:$4 sm:$0xff]   ;;  %v17285_v38 = vld [vmem:[%s24292_s4 + $0x5c4] ss:$16 sps:$4 sm:$0xff]  }
 0x28b   : > { %3356 = vmatpush1.bf16.msra.mxu1 %v17211_v22  ;;  %3528 = vmatpush1.bf16.msra.mxu0 %v17214_v36  ;;  %v17288_v22 = vld [vmem:[%s24292_s4 + $0x5cc] ss:$16 sps:$4 sm:$0xff]   ;;  %v17283_v36 = vld [vmem:[%s24292_s4 + $0x5c0] ss:$16 sps:$4 sm:$0xff]  }
 0x28c   : > { %3357 = vmatprep.subr.bf16.mxu1 %v17219_v39  ;;  %3529 = vmatprep.subr.bf16.mxu0 %v17222_v42  ;;  %v17286_v39 = vld [vmem:[%s24292_s4 + $0x5c8] ss:$16 sps:$4 sm:$0xff]   ;;  %v17291_v42 = vld [vmem:[%s24292_s4 + $0x5e4] ss:$16 sps:$4 sm:$0xff]  }
 0x28f   : > { %3358 = vmatpush1.bf16.msra.mxu1 %v17217_v43  ;;  %3530 = vmatpush1.bf16.msra.mxu0 %v17220_v55  ;;  %v17294_v43 = vld [vmem:[%s24292_s4 + $0x5ec] ss:$16 sps:$4 sm:$0xff]   ;;  %v17289_v55 = vld [vmem:[%s24292_s4 + $0x5e0] ss:$16 sps:$4 sm:$0xff]  }
 0x290   : > { %3359 = vmatprep.subr.bf16.mxu1 %v17225_v11  ;;  %3531 = vmatprep.subr.bf16.mxu0 %v17228_v29  ;;  %v17292_v11 = vld [vmem:[%s24292_s4 + $0x5e8] ss:$16 sps:$4 sm:$0xff]   ;;  %v17297_v29 = vld [vmem:[%s24292_s4 + $0x604] ss:$16 sps:$4 sm:$0xff]  }
 0x293   : > { %3360 = vmatpush1.bf16.msra.mxu1 %v17223_v44  ;;  %3532 = vmatpush1.bf16.msra.mxu0 %v17226_v47  ;;  %v17300_v44 = vld [vmem:[%s24292_s4 + $0x60c] ss:$16 sps:$4 sm:$0xff]   ;;  %v17295_v47 = vld [vmem:[%s24292_s4 + $0x600] ss:$16 sps:$4 sm:$0xff]  }
 0x294   : > { %3361 = vmatprep.subr.bf16.mxu1 %v17231_v48  ;;  %3533 = vmatprep.subr.bf16.mxu0 %v17234_v14  ;;  %v17298_v48 = vld [vmem:[%s24292_s4 + $0x608] ss:$16 sps:$4 sm:$0xff]   ;;  %v17303_v14 = vld [vmem:[%s24292_s4 + $0x624] ss:$16 sps:$4 sm:$0xff]  }
 0x297   : > { %3362 = vmatpush1.bf16.msra.mxu1 %v17229_v21  ;;  %3534 = vmatpush1.bf16.msra.mxu0 %v17232_v30  ;;  %v17306_v21 = vld [vmem:[%s24292_s4 + $0x62c] ss:$16 sps:$4 sm:$0xff]   ;;  %v17301_v30 = vld [vmem:[%s24292_s4 + $0x620] ss:$16 sps:$4 sm:$0xff]  }
 0x298   : > { %3363 = vmatprep.subr.bf16.mxu1 %v17237_v52  ;;  %3535 = vmatprep.subr.bf16.mxu0 %v17240_v53  ;;  %v17304_v52 = vld [vmem:[%s24292_s4 + $0x628] ss:$16 sps:$4 sm:$0xff]   ;;  %v17309_v53 = vld [vmem:[%s24292_s4 + $0x644] ss:$16 sps:$4 sm:$0xff]  }
 0x29b   : > { %3364 = vmatpush1.bf16.msra.mxu1 %v17235_v54  ;;  %3536 = vmatpush1.bf16.msra.mxu0 %v17238_v59  ;;  %v17312_v54 = vld [vmem:[%s24292_s4 + $0x64c] ss:$16 sps:$4 sm:$0xff]   ;;  %v17307_v59 = vld [vmem:[%s24292_s4 + $0x640] ss:$16 sps:$4 sm:$0xff]  }
 0x29c   : > { %3365 = vmatprep.subr.bf16.mxu1 %v17243_v60  ;;  %3537 = vmatprep.subr.bf16.mxu0 %v17246_v63  ;;  %v17310_v60 = vld [vmem:[%s24292_s4 + $0x648] ss:$16 sps:$4 sm:$0xff]   ;;  %v17315_v63 = vld [vmem:[%s24292_s4 + $0x664] ss:$16 sps:$4 sm:$0xff]  }
 0x29f   : > { %3366 = vmatpush1.bf16.msra.mxu1 %v17241_v57  ;;  %3538 = vmatpush1.bf16.msra.mxu0 %v17244_v4  ;;  %v17318_v57 = vld [vmem:[%s24292_s4 + $0x66c] ss:$16 sps:$4 sm:$0xff]   ;;  %v17313_v4 = vld [vmem:[%s24292_s4 + $0x660] ss:$16 sps:$4 sm:$0xff]  }
 0x2a0   : > { %3367 = vmatprep.subr.bf16.mxu1 %v17249_v5  ;;  %3539 = vmatprep.subr.bf16.mxu0 %v17252_v46  ;;  %v17316_v5 = vld [vmem:[%s24292_s4 + $0x668] ss:$16 sps:$4 sm:$0xff]   ;;  %v17321_v46 = vld [vmem:[%s24293_s5 + $0x4] ss:$16 sps:$4 sm:$0xff]  }
 0x2a3   : > { %3368 = vmatpush1.bf16.msra.mxu1 %v17247_v8  ;;  %3540 = vmatpush1.bf16.msra.mxu0 %v17250_v3  ;;  %v17324_v8 = vld [vmem:[%s24293_s5 + $0xc] ss:$16 sps:$4 sm:$0xff]   ;;  %v17319_v3 = vld [vmem:[%s24293_s5] ss:$16 sps:$4 sm:$0xff]  }
 0x2a4   : > { %3369 = vmatprep.subr.bf16.mxu1 %v17255_v56  ;;  %3541 = vmatprep.subr.bf16.mxu0 %v17258_v10  ;;  %v17322_v56 = vld [vmem:[%s24293_s5 + $0x8] ss:$16 sps:$4 sm:$0xff]   ;;  %v17327_v10 = vld [vmem:[%s24293_s5 + $0x24] ss:$16 sps:$4 sm:$0xff]  }
 0x2a7   : > { %3370 = vmatpush1.bf16.msra.mxu1 %v17253_v12  ;;  %3542 = vmatpush1.bf16.msra.mxu0 %v17256_v15  ;;  %v17330_v12 = vld [vmem:[%s24293_s5 + $0x2c] ss:$16 sps:$4 sm:$0xff]   ;;  %v17325_v15 = vld [vmem:[%s24293_s5 + $0x20] ss:$16 sps:$4 sm:$0xff]  }
 0x2a8   : > { %3371 = vmatprep.subr.bf16.mxu1 %v17261_v16  ;;  %3543 = vmatprep.subr.bf16.mxu0 %v17264_v23  ;;  %v17328_v16 = vld [vmem:[%s24293_s5 + $0x28] ss:$16 sps:$4 sm:$0xff]   ;;  %v17333_v23 = vld [vmem:[%s24293_s5 + $0x44] ss:$16 sps:$4 sm:$0xff]  }
 0x2ab   : > { %3372 = vmatpush1.bf16.msra.mxu1 %v17259_v24  ;;  %3544 = vmatpush1.bf16.msra.mxu0 %v17262_v25  ;;  %v17336_v24 = vld [vmem:[%s24293_s5 + $0x4c] ss:$16 sps:$4 sm:$0xff]   ;;  %v17331_v25 = vld [vmem:[%s24293_s5 + $0x40] ss:$16 sps:$4 sm:$0xff]  }
 0x2ac   : > { %3373 = vmatprep.subr.bf16.mxu1 %v17267_v17  ;;  %3545 = vmatprep.subr.bf16.mxu0 %v17270_v27  ;;  %v17339_v17 = vld [vmem:[%s24293_s5 + $0x64] ss:$16 sps:$4 sm:$0xff]   ;;  %v17342_v27 = vld [vmem:[%s24293_s5 + $0x6c] ss:$16 sps:$4 sm:$0xff]  }
 0x2af   : > { %3374 = vmatpush1.bf16.msra.mxu1 %v17265_v33  ;;  %3546 = vmatpush1.bf16.msra.mxu0 %v17268_v34  ;;  %v17337_v33 = vld [vmem:[%s24293_s5 + $0x60] ss:$16 sps:$4 sm:$0xff]   ;;  %v17340_v34 = vld [vmem:[%s24293_s5 + $0x68] ss:$16 sps:$4 sm:$0xff]  }
 0x2b0   : > { %3375 = vmatprep.subr.bf16.mxu1 %v17273_v35  ;;  %3547 = vmatprep.subr.bf16.mxu0 %v17276_v37  ;;  %v17345_v35 = vld [vmem:[%s24293_s5 + $0x84] ss:$16 sps:$4 sm:$0xff]   ;;  %v17348_v37 = vld [vmem:[%s24293_s5 + $0x8c] ss:$16 sps:$4 sm:$0xff]  }
 0x2b3   : > { %3376 = vmatpush1.bf16.msra.mxu1 %v17271_v31  ;;  %3548 = vmatpush1.bf16.msra.mxu0 %v17274_v41  ;;  %v17343_v31 = vld [vmem:[%s24293_s5 + $0x80] ss:$16 sps:$4 sm:$0xff]   ;;  %v17346_v41 = vld [vmem:[%s24293_s5 + $0x88] ss:$16 sps:$4 sm:$0xff]  }
 0x2b4   : > { %3377 = vmatprep.subr.bf16.mxu1 %v17279_v58  ;;  %3549 = vmatprep.subr.bf16.mxu0 %v17282_v20  ;;  %v17351_v58 = vld [vmem:[%s24293_s5 + $0xa4] ss:$16 sps:$4 sm:$0xff]   ;;  %v17354_v20 = vld [vmem:[%s24293_s5 + $0xac] ss:$16 sps:$4 sm:$0xff]  }
 0x2b7   : > { %3378 = vmatpush1.bf16.msra.mxu1 %v17277_v28  ;;  %3550 = vmatpush1.bf16.msra.mxu0 %v17280_v9  ;;  %v17349_v28 = vld [vmem:[%s24293_s5 + $0xa0] ss:$16 sps:$4 sm:$0xff]   ;;  %v17352_v9 = vld [vmem:[%s24293_s5 + $0xa8] ss:$16 sps:$4 sm:$0xff]  }
 0x2b8   : > { %3379 = vmatprep.subr.bf16.mxu1 %v17285_v38  ;;  %3551 = vmatprep.subr.bf16.mxu0 %v17288_v22  ;;  %v17357_v38 = vld [vmem:[%s24293_s5 + $0xc4] ss:$16 sps:$4 sm:$0xff]   ;;  %v17360_v22 = vld [vmem:[%s24293_s5 + $0xcc] ss:$16 sps:$4 sm:$0xff]  }
 0x2bb   : > { %3380 = vmatpush1.bf16.msra.mxu1 %v17283_v36  ;;  %3552 = vmatpush1.bf16.msra.mxu0 %v17286_v39  ;;  %v17355_v36 = vld [vmem:[%s24293_s5 + $0xc0] ss:$16 sps:$4 sm:$0xff]   ;;  %v17358_v39 = vld [vmem:[%s24293_s5 + $0xc8] ss:$16 sps:$4 sm:$0xff]  }
 0x2bc   : > { %3381 = vmatprep.subr.bf16.mxu1 %v17291_v42  ;;  %3553 = vmatprep.subr.bf16.mxu0 %v17294_v43  ;;  %v17363_v42 = vld [vmem:[%s24293_s5 + $0xe4] ss:$16 sps:$4 sm:$0xff]   ;;  %v17366_v43 = vld [vmem:[%s24293_s5 + $0xec] ss:$16 sps:$4 sm:$0xff]  }
 0x2bf   : > { %3382 = vmatpush1.bf16.msra.mxu1 %v17289_v55  ;;  %3554 = vmatpush1.bf16.msra.mxu0 %v17292_v11  ;;  %v17361_v55 = vld [vmem:[%s24293_s5 + $0xe0] ss:$16 sps:$4 sm:$0xff]   ;;  %v17364_v11 = vld [vmem:[%s24293_s5 + $0xe8] ss:$16 sps:$4 sm:$0xff]  }
 0x2c0   : > { %3394 = vmatprep.subr.bf16.mxu1 %v17297_v29  ;;  %3566 = vmatprep.subr.bf16.mxu0 %v17300_v44  ;;  %v17369_v29 = vld [vmem:[%s24293_s5 + $0x104] ss:$16 sps:$4 sm:$0xff]   ;;  %v17372_v44 = vld [vmem:[%s24293_s5 + $0x10c] ss:$16 sps:$4 sm:$0xff]  }
 0x2c2   : > { %3384 = vmatmul.mubr.bf16.vlgmr.msra.gmra.mrb[24].mxu1 %v19855_v40  ;;  %3556 = vmatmul.mubr.bf16.vlgmr.msra.gmra.mrb[28].mxu0 %v19855_v40 }
 0x2c3   : > { %3395 = vmatpush1.bf16.msra.mxu1 %v17295_v47  ;;  %3567 = vmatpush1.bf16.msra.mxu0 %v17298_v48  ;;  %v17367_v47 = vld [vmem:[%s24293_s5 + $0x100] ss:$16 sps:$4 sm:$0xff]   ;;  %v17370_v48 = vld [vmem:[%s24293_s5 + $0x108] ss:$16 sps:$4 sm:$0xff]  }
 0x2c4   : > { %3396 = vmatprep.subr.bf16.mxu1 %v17303_v14  ;;  %3568 = vmatprep.subr.bf16.mxu0 %v17306_v21  ;;  %v17375_v14 = vld [vmem:[%s24293_s5 + $0x124] ss:$16 sps:$4 sm:$0xff]   ;;  %v17378_v21 = vld [vmem:[%s24293_s5 + $0x12c] ss:$16 sps:$4 sm:$0xff]  }
 0x2c5   : > { %3426 = vmatprep.mubr.bf16.mxu1 %v19069_v2  ;;  %3598 = vmatprep.mubr.bf16.mxu0 %v19069_v2 }
 0x2c7   : > { %3397 = vmatpush1.bf16.msra.mxu1 %v17301_v30  ;;  %3569 = vmatpush1.bf16.msra.mxu0 %v17304_v52  ;;  %v17373_v30 = vld [vmem:[%s24293_s5 + $0x120] ss:$16 sps:$4 sm:$0xff]   ;;  %v17376_v52 = vld [vmem:[%s24293_s5 + $0x128] ss:$16 sps:$4 sm:$0xff]  }
 0x2c8   : > { %3398 = vmatprep.subr.bf16.mxu1 %v17309_v53  ;;  %3570 = vmatprep.subr.bf16.mxu0 %v17312_v54  ;;  %v17381_v53 = vld [vmem:[%s24293_s5 + $0x144] ss:$16 sps:$4 sm:$0xff]   ;;  %v17384_v54 = vld [vmem:[%s24293_s5 + $0x14c] ss:$16 sps:$4 sm:$0xff]  }
 0x2cb   : > { %3399 = vmatpush1.bf16.msra.mxu1 %v17307_v59  ;;  %3571 = vmatpush1.bf16.msra.mxu0 %v17310_v60  ;;  %v17379_v59 = vld [vmem:[%s24293_s5 + $0x140] ss:$16 sps:$4 sm:$0xff]   ;;  %v17382_v60 = vld [vmem:[%s24293_s5 + $0x148] ss:$16 sps:$4 sm:$0xff]  }
 0x2cc   : > { %3400 = vmatprep.subr.bf16.mxu1 %v17315_v63  ;;  %3572 = vmatprep.subr.bf16.mxu0 %v17318_v57  ;;  %v17387_v63 = vld [vmem:[%s24293_s5 + $0x164] ss:$16 sps:$4 sm:$0xff]   ;;  %v17390_v57 = vld [vmem:[%s24293_s5 + $0x16c] ss:$16 sps:$4 sm:$0xff]  }
 0x2cf   : > { %3401 = vmatpush1.bf16.msra.mxu1 %v17313_v4  ;;  %3573 = vmatpush1.bf16.msra.mxu0 %v17316_v5  ;;  %v17385_v4 = vld [vmem:[%s24293_s5 + $0x160] ss:$16 sps:$4 sm:$0xff]   ;;  %v17388_v5 = vld [vmem:[%s24293_s5 + $0x168] ss:$16 sps:$4 sm:$0xff]  }
 0x2d0   : > { %4857 = vmatprep.subr.bf16.mxu1 %v17321_v46  ;;  %5029 = vmatprep.subr.bf16.mxu0 %v17324_v8  ;;  %v17393_v46 = vld [vmem:[%s24293_s5 + $0x184] ss:$16 sps:$4 sm:$0xff]   ;;  %v17396_v8 = vld [vmem:[%s24293_s5 + $0x18c] ss:$16 sps:$4 sm:$0xff]  }
 0x2d2   : > { %14486 = vmatmul.mubr.msk.bf16.vlgmr.msra.gmra.mrb[24].mxu1 %vm3261_vm8, %v19841_v26  ;;  %14487 = vmatmul.mubr.msk.bf16.vlgmr.msra.gmra.mrb[28].mxu0 %vm3261_vm8, %v19841_v26 }
 0x2d3   : > { %4858 = vmatpush1.bf16.msra.mxu1 %v17319_v3  ;;  %4889 = vmatprep.mubr.bf16.mxu1 %v19793_v50  ;;  %v17391_v3 = vld [vmem:[%s24293_s5 + $0x180] ss:$16 sps:$4 sm:$0xff]  }
 0x2d4   : > { %5030 = vmatpush1.bf16.msra.mxu0 %v17322_v56  ;;  %5061 = vmatprep.mubr.bf16.mxu0 %v19793_v50  ;;  %v17334_v50 = vld [vmem:[%s24293_s5 + $0x48] ss:$16 sps:$4 sm:$0xff]  }
 0x2d5   : > { %4859 = vmatprep.subr.bf16.mxu1 %v17327_v10  ;;  %5031 = vmatprep.subr.bf16.mxu0 %v17330_v12  ;;  %v17394_v56 = vld [vmem:[%s24293_s5 + $0x188] ss:$16 sps:$4 sm:$0xff]   ;;  %v17399_v10 = vld [vmem:[%s24293_s5 + $0x1a4] ss:$16 sps:$4 sm:$0xff]   ;;  %v17402_v12 = vld [vmem:[%s24293_s5 + $0x1ac] ss:$16 sps:$4 sm:$0xff]  }
 0x2d7   : > { %4860 = vmatpush1.bf16.msra.mxu1 %v17325_v15  ;;  %v17397_v15 = vld [vmem:[%s24293_s5 + $0x1a0] ss:$16 sps:$4 sm:$0xff]  }
 0x2d8   : > { %5032 = vmatpush1.bf16.msra.mxu0 %v17328_v16  ;;  %4861 = vmatprep.subr.bf16.mxu1 %v17333_v23  ;;  %v17400_v16 = vld [vmem:[%s24293_s5 + $0x1a8] ss:$16 sps:$4 sm:$0xff]   ;;  %v17405_v23 = vld [vmem:[%s24293_s5 + $0x1c4] ss:$16 sps:$4 sm:$0xff]  }
 0x2d9   : > { %5033 = vmatprep.subr.bf16.mxu0 %v17336_v24  ;;  %v17408_v24 = vld [vmem:[%s24293_s5 + $0x1cc] ss:$16 sps:$4 sm:$0xff]  }
 0x2db   : > { %4862 = vmatpush1.bf16.msra.mxu1 %v17331_v25  ;;  %v17403_v25 = vld [vmem:[%s24293_s5 + $0x1c0] ss:$16 sps:$4 sm:$0xff]  }
 0x2dc   : > { %5034 = vmatpush1.bf16.msra.mxu0 %v17334_v50  ;;  %4863 = vmatprep.subr.bf16.mxu1 %v17339_v17  ;;  %v17406_v50 = vld [vmem:[%s24293_s5 + $0x1c8] ss:$16 sps:$4 sm:$0xff]   ;;  %v17411_v17 = vld [vmem:[%s24293_s5 + $0x1e4] ss:$16 sps:$4 sm:$0xff]  }
 0x2dd   : > { %5035 = vmatprep.subr.bf16.mxu0 %v17342_v27  ;;  %v17414_v27 = vld [vmem:[%s24293_s5 + $0x1ec] ss:$16 sps:$4 sm:$0xff]  }
 0x2df   : > { %4864 = vmatpush1.bf16.msra.mxu1 %v17337_v33  ;;  %v17409_v33 = vld [vmem:[%s24293_s5 + $0x1e0] ss:$16 sps:$4 sm:$0xff]  }
 0x2e0   : > { %5036 = vmatpush1.bf16.msra.mxu0 %v17340_v34  ;;  %4865 = vmatprep.subr.bf16.mxu1 %v17345_v35  ;;  %v17412_v34 = vld [vmem:[%s24293_s5 + $0x1e8] ss:$16 sps:$4 sm:$0xff]   ;;  %v17417_v35 = vld [vmem:[%s24293_s5 + $0x204] ss:$16 sps:$4 sm:$0xff]  }
 0x2e1   : > { %5037 = vmatprep.subr.bf16.mxu0 %v17348_v37  ;;  %v17420_v37 = vld [vmem:[%s24293_s5 + $0x20c] ss:$16 sps:$4 sm:$0xff]  }
 0x2e3   : > { %4866 = vmatpush1.bf16.msra.mxu1 %v17343_v31  ;;  %v17415_v31 = vld [vmem:[%s24293_s5 + $0x200] ss:$16 sps:$4 sm:$0xff]  }
 0x2e4   : > { %5038 = vmatpush1.bf16.msra.mxu0 %v17346_v41  ;;  %4867 = vmatprep.subr.bf16.mxu1 %v17351_v58  ;;  %v17418_v41 = vld [vmem:[%s24293_s5 + $0x208] ss:$16 sps:$4 sm:$0xff]   ;;  %v17423_v58 = vld [vmem:[%s24293_s5 + $0x224] ss:$16 sps:$4 sm:$0xff]  }
 0x2e5   : > { %5039 = vmatprep.subr.bf16.mxu0 %v17354_v20  ;;  %v17426_v20 = vld [vmem:[%s24293_s5 + $0x22c] ss:$16 sps:$4 sm:$0xff]  }
 0x2e7   : > { %4868 = vmatpush1.bf16.msra.mxu1 %v17349_v28  ;;  %v17421_v28 = vld [vmem:[%s24293_s5 + $0x220] ss:$16 sps:$4 sm:$0xff]  }
 0x2e8   : > { %5040 = vmatpush1.bf16.msra.mxu0 %v17352_v9  ;;  %4869 = vmatprep.subr.bf16.mxu1 %v17357_v38  ;;  %v17424_v9 = vld [vmem:[%s24293_s5 + $0x228] ss:$16 sps:$4 sm:$0xff]   ;;  %v17429_v38 = vld [vmem:[%s24293_s5 + $0x244] ss:$16 sps:$4 sm:$0xff]  }
 0x2e9   : > { %5041 = vmatprep.subr.bf16.mxu0 %v17360_v22  ;;  %v17427_v22 = vld [vmem:[%s24293_s5 + $0x240] ss:$16 sps:$4 sm:$0xff]  }
 0x2eb   : > { %4870 = vmatpush1.bf16.msra.mxu1 %v17355_v36  ;;  %v17430_v36 = vld [vmem:[%s24293_s5 + $0x248] ss:$16 sps:$4 sm:$0xff]  }
 0x2ec   : > { %5042 = vmatpush1.bf16.msra.mxu0 %v17358_v39  ;;  %4871 = vmatprep.subr.bf16.mxu1 %v17363_v42  ;;  %v17438_v39 = vld [vmem:[%s24293_s5 + $0x26c] ss:$16 sps:$4 sm:$0xff]   ;;  %v17433_v42 = vld [vmem:[%s24293_s5 + $0x260] ss:$16 sps:$4 sm:$0xff]  }
 0x2ed   : > { %5043 = vmatprep.subr.bf16.mxu0 %v17366_v43  ;;  %v17436_v43 = vld [vmem:[%s24293_s5 + $0x268] ss:$16 sps:$4 sm:$0xff]  }
 0x2ef   : > { %4872 = vmatpush1.bf16.msra.mxu1 %v17361_v55  ;;  %v17441_v55 = vld [vmem:[%s24293_s5 + $0x284] ss:$16 sps:$4 sm:$0xff]  }
 0x2f0   : > { %5044 = vmatpush1.bf16.msra.mxu0 %v17364_v11  ;;  %4873 = vmatprep.subr.bf16.mxu1 %v17369_v29  ;;  %v17444_v11 = vld [vmem:[%s24293_s5 + $0x28c] ss:$16 sps:$4 sm:$0xff]   ;;  %v17439_v29 = vld [vmem:[%s24293_s5 + $0x280] ss:$16 sps:$4 sm:$0xff]  }
 0x2f1   : > { %5045 = vmatprep.subr.bf16.mxu0 %v17372_v44  ;;  %v17442_v44 = vld [vmem:[%s24293_s5 + $0x288] ss:$16 sps:$4 sm:$0xff]  }
 0x2f3   : > { %4874 = vmatpush1.bf16.msra.mxu1 %v17367_v47  ;;  %v17447_v47 = vld [vmem:[%s24293_s5 + $0x2a4] ss:$16 sps:$4 sm:$0xff]  }
 0x2f4   : > { %5046 = vmatpush1.bf16.msra.mxu0 %v17370_v48  ;;  %4875 = vmatprep.subr.bf16.mxu1 %v17375_v14  ;;  %v17450_v48 = vld [vmem:[%s24293_s5 + $0x2ac] ss:$16 sps:$4 sm:$0xff]   ;;  %v17445_v14 = vld [vmem:[%s24293_s5 + $0x2a0] ss:$16 sps:$4 sm:$0xff]  }
 0x2f5   : > { %5047 = vmatprep.subr.bf16.mxu0 %v17378_v21  ;;  %v17448_v21 = vld [vmem:[%s24293_s5 + $0x2a8] ss:$16 sps:$4 sm:$0xff]  }
 0x2f7   : > { %4876 = vmatpush1.bf16.msra.mxu1 %v17373_v30  ;;  %v17453_v30 = vld [vmem:[%s24293_s5 + $0x2c4] ss:$16 sps:$4 sm:$0xff]  }
 0x2f8   : > { %5048 = vmatpush1.bf16.msra.mxu0 %v17376_v52  ;;  %4877 = vmatprep.subr.bf16.mxu1 %v17381_v53  ;;  %v17456_v52 = vld [vmem:[%s24293_s5 + $0x2cc] ss:$16 sps:$4 sm:$0xff]   ;;  %v17451_v53 = vld [vmem:[%s24293_s5 + $0x2c0] ss:$16 sps:$4 sm:$0xff]  }
 0x2f9   : > { %5049 = vmatprep.subr.bf16.mxu0 %v17384_v54  ;;  %v17454_v54 = vld [vmem:[%s24293_s5 + $0x2c8] ss:$16 sps:$4 sm:$0xff]  }
 0x2fb   : > { %4878 = vmatpush1.bf16.msra.mxu1 %v17379_v59  ;;  %v17459_v59 = vld [vmem:[%s24293_s5 + $0x2e4] ss:$16 sps:$4 sm:$0xff]  }
 0x2fc   : > { %5050 = vmatpush1.bf16.msra.mxu0 %v17382_v60  ;;  %4879 = vmatprep.subr.bf16.mxu1 %v17387_v63  ;;  %v17462_v60 = vld [vmem:[%s24293_s5 + $0x2ec] ss:$16 sps:$4 sm:$0xff]   ;;  %v17457_v63 = vld [vmem:[%s24293_s5 + $0x2e0] ss:$16 sps:$4 sm:$0xff]  }
 0x2fd   : > { %5051 = vmatprep.subr.bf16.mxu0 %v17390_v57  ;;  %v17460_v57 = vld [vmem:[%s24293_s5 + $0x2e8] ss:$16 sps:$4 sm:$0xff]  }
 0x2ff   : > { %4880 = vmatpush1.bf16.msra.mxu1 %v17385_v4  ;;  %v17465_v4 = vld [vmem:[%s24293_s5 + $0x304] ss:$16 sps:$4 sm:$0xff]  }
 0x300   : > { %5052 = vmatpush1.bf16.msra.mxu0 %v17388_v5  ;;  %4881 = vmatprep.subr.bf16.mxu1 %v17393_v46  ;;  %v17468_v5 = vld [vmem:[%s24293_s5 + $0x30c] ss:$16 sps:$4 sm:$0xff]   ;;  %v17463_v46 = vld [vmem:[%s24293_s5 + $0x300] ss:$16 sps:$4 sm:$0xff]  }
 0x301   : > { %5053 = vmatprep.subr.bf16.mxu0 %v17396_v8  ;;  %v17466_v8 = vld [vmem:[%s24293_s5 + $0x308] ss:$16 sps:$4 sm:$0xff]  }
 0x303   : > { %4882 = vmatpush1.bf16.msra.mxu1 %v17391_v3  ;;  %v17471_v3 = vld [vmem:[%s24293_s5 + $0x324] ss:$16 sps:$4 sm:$0xff]  }
 0x304   : > { %5054 = vmatpush1.bf16.msra.mxu0 %v17394_v56  ;;  %4883 = vmatprep.subr.bf16.mxu1 %v17399_v10  ;;  %v17474_v56 = vld [vmem:[%s24293_s5 + $0x32c] ss:$16 sps:$4 sm:$0xff]   ;;  %v17469_v10 = vld [vmem:[%s24293_s5 + $0x320] ss:$16 sps:$4 sm:$0xff]  }
 0x305   : > { %5055 = vmatprep.subr.bf16.mxu0 %v17402_v12  ;;  %v17472_v12 = vld [vmem:[%s24293_s5 + $0x328] ss:$16 sps:$4 sm:$0xff]  }
 0x307   : > { %4884 = vmatpush1.bf16.msra.mxu1 %v17397_v15  ;;  %v17477_v15 = vld [vmem:[%s24293_s5 + $0x344] ss:$16 sps:$4 sm:$0xff]  }
 0x308   : > { %5056 = vmatpush1.bf16.msra.mxu0 %v17400_v16  ;;  %4885 = vmatprep.subr.bf16.mxu1 %v17405_v23  ;;  %v17480_v16 = vld [vmem:[%s24293_s5 + $0x34c] ss:$16 sps:$4 sm:$0xff]   ;;  %v17475_v23 = vld [vmem:[%s24293_s5 + $0x340] ss:$16 sps:$4 sm:$0xff]  }
 0x309   : > { %5057 = vmatprep.subr.bf16.mxu0 %v17408_v24  ;;  %v17478_v24 = vld [vmem:[%s24293_s5 + $0x348] ss:$16 sps:$4 sm:$0xff]  }
 0x30b   : > { %4886 = vmatpush1.bf16.msra.mxu1 %v17403_v25  ;;  %v17483_v25 = vld [vmem:[%s24293_s5 + $0x364] ss:$16 sps:$4 sm:$0xff]  }
 0x30c   : > { %5058 = vmatpush1.bf16.msra.mxu0 %v17406_v50  ;;  %4887 = vmatprep.subr.bf16.mxu1 %v17411_v17  ;;  %v17486_v50 = vld [vmem:[%s24293_s5 + $0x36c] ss:$16 sps:$4 sm:$0xff]   ;;  %v17481_v17 = vld [vmem:[%s24293_s5 + $0x360] ss:$16 sps:$4 sm:$0xff]  }
 0x30d   : > { %5059 = vmatprep.subr.bf16.mxu0 %v17414_v27  ;;  %v17484_v27 = vld [vmem:[%s24293_s5 + $0x368] ss:$16 sps:$4 sm:$0xff]  }
 0x30f   : > { %4888 = vmatpush1.bf16.msra.mxu1 %v17409_v33  ;;  %v17489_v33 = vld [vmem:[%s24293_s5 + $0x384] ss:$16 sps:$4 sm:$0xff]  }
 0x310   : > { %5060 = vmatpush1.bf16.msra.mxu0 %v17412_v34  ;;  %4900 = vmatprep.subr.bf16.mxu1 %v17417_v35  ;;  %v17492_v34 = vld [vmem:[%s24293_s5 + $0x38c] ss:$16 sps:$4 sm:$0xff]   ;;  %v17487_v35 = vld [vmem:[%s24293_s5 + $0x380] ss:$16 sps:$4 sm:$0xff]  }
 0x311   : > { %5072 = vmatprep.subr.bf16.mxu0 %v17420_v37  ;;  %v17490_v37 = vld [vmem:[%s24293_s5 + $0x388] ss:$16 sps:$4 sm:$0xff]  }
 0x312   : > { %4890 = vmatmul.mubr.bf16.vlgmr.msra.gmra.mrb[28].mxu1 %v19785_v32 }
 0x313   : > { %5062 = vmatmul.mubr.bf16.vlgmr.msra.gmra.mrb[32].mxu0 %v19785_v32  ;;  %4901 = vmatpush1.bf16.msra.mxu1 %v17415_v31  ;;  %v17432_v32 = vld [vmem:[%s24293_s5 + $0x24c] ss:$16 sps:$4 sm:$0xff]   ;;  %v17495_v31 = vld [vmem:[%s24293_s5 + $0x3a4] ss:$16 sps:$4 sm:$0xff]  }
 0x314   : > { %4932 = vmatprep.mubr.bf16.mxu1 %v19819_v1  ;;  %5073 = vmatpush1.bf16.msra.mxu0 %v17418_v41  ;;  %v17498_v41 = vld [vmem:[%s24293_s5 + $0x3ac] ss:$16 sps:$4 sm:$0xff]  }
 0x315   : > { %5104 = vmatprep.mubr.bf16.mxu0 %v19819_v1  ;;  %4902 = vmatprep.subr.bf16.mxu1 %v17423_v58  ;;  %v17435_v1 = vld [vmem:[%s24293_s5 + $0x264] ss:$16 sps:$4 sm:$0xff]   ;;  %v17493_v58 = vld [vmem:[%s24293_s5 + $0x3a0] ss:$16 sps:$4 sm:$0xff]  }
 0x316   : > { %5074 = vmatprep.subr.bf16.mxu0 %v17426_v20  ;;  %v17496_v20 = vld [vmem:[%s24293_s5 + $0x3a8] ss:$16 sps:$4 sm:$0xff]  }
 0x317   : > { %4903 = vmatpush1.bf16.msra.mxu1 %v17421_v28  ;;  %v17501_v28 = vld [vmem:[%s24293_s5 + $0x3c4] ss:$16 sps:$4 sm:$0xff]  }
 0x318   : > { %5075 = vmatpush1.bf16.msra.mxu0 %v17424_v9  ;;  %4904 = vmatprep.subr.bf16.mxu1 %v17429_v38  ;;  %v17504_v9 = vld [vmem:[%s24293_s5 + $0x3cc] ss:$16 sps:$4 sm:$0xff]   ;;  %v17499_v38 = vld [vmem:[%s24293_s5 + $0x3c0] ss:$16 sps:$4 sm:$0xff]  }
 0x319   : > { %5076 = vmatprep.subr.bf16.mxu0 %v17432_v32  ;;  %v17502_v32 = vld [vmem:[%s24293_s5 + $0x3c8] ss:$16 sps:$4 sm:$0xff]  }
 0x31b   : > { %4905 = vmatpush1.bf16.msra.mxu1 %v17427_v22  ;;  %v17507_v22 = vld [vmem:[%s24293_s5 + $0x3e4] ss:$16 sps:$4 sm:$0xff]  }
 0x31c   : > { %5077 = vmatpush1.bf16.msra.mxu0 %v17430_v36  ;;  %4906 = vmatprep.subr.bf16.mxu1 %v17435_v1  ;;  %v17510_v36 = vld [vmem:[%s24293_s5 + $0x3ec] ss:$16 sps:$4 sm:$0xff]   ;;  %v17505_v1 = vld [vmem:[%s24293_s5 + $0x3e0] ss:$16 sps:$4 sm:$0xff]  }
 0x31d   : > { %5078 = vmatprep.subr.bf16.mxu0 %v17438_v39  ;;  %v17508_v39 = vld [vmem:[%s24293_s5 + $0x3e8] ss:$16 sps:$4 sm:$0xff]  }
 0x31f   : > { %4907 = vmatpush1.bf16.msra.mxu1 %v17433_v42  ;;  %v17513_v42 = vld [vmem:[%s24293_s5 + $0x404] ss:$16 sps:$4 sm:$0xff]  }
 0x320   : > { %5079 = vmatpush1.bf16.msra.mxu0 %v17436_v43  ;;  %4908 = vmatprep.subr.bf16.mxu1 %v17441_v55  ;;  %v17516_v43 = vld [vmem:[%s24293_s5 + $0x40c] ss:$16 sps:$4 sm:$0xff]   ;;  %v17511_v55 = vld [vmem:[%s24293_s5 + $0x400] ss:$16 sps:$4 sm:$0xff]  }
 0x321   : > { %5080 = vmatprep.subr.bf16.mxu0 %v17444_v11  ;;  %v17514_v11 = vld [vmem:[%s24293_s5 + $0x408] ss:$16 sps:$4 sm:$0xff]  }
 0x323   : > { %4909 = vmatpush1.bf16.msra.mxu1 %v17439_v29  ;;  %v17519_v29 = vld [vmem:[%s24293_s5 + $0x424] ss:$16 sps:$4 sm:$0xff]  }
 0x324   : > { %5081 = vmatpush1.bf16.msra.mxu0 %v17442_v44  ;;  %4910 = vmatprep.subr.bf16.mxu1 %v17447_v47  ;;  %v17522_v44 = vld [vmem:[%s24293_s5 + $0x42c] ss:$16 sps:$4 sm:$0xff]   ;;  %v17517_v47 = vld [vmem:[%s24293_s5 + $0x420] ss:$16 sps:$4 sm:$0xff]  }
 0x325   : > { %5082 = vmatprep.subr.bf16.mxu0 %v17450_v48  ;;  %v17520_v48 = vld [vmem:[%s24293_s5 + $0x428] ss:$16 sps:$4 sm:$0xff]  }
 0x327   : > { %4911 = vmatpush1.bf16.msra.mxu1 %v17445_v14  ;;  %v17525_v14 = vld [vmem:[%s24293_s5 + $0x444] ss:$16 sps:$4 sm:$0xff]  }
 0x328   : > { %5083 = vmatpush1.bf16.msra.mxu0 %v17448_v21  ;;  %4912 = vmatprep.subr.bf16.mxu1 %v17453_v30  ;;  %v17523_v21 = vld [vmem:[%s24293_s5 + $0x440] ss:$16 sps:$4 sm:$0xff]   ;;  %v17526_v30 = vld [vmem:[%s24293_s5 + $0x448] ss:$16 sps:$4 sm:$0xff]  }
 0x329   : > { %5084 = vmatprep.subr.bf16.mxu0 %v17456_v52  ;;  %v17534_v52 = vld [vmem:[%s24293_s5 + $0x46c] ss:$16 sps:$4 sm:$0xff]  }
 0x32b   : > { %4913 = vmatpush1.bf16.msra.mxu1 %v17451_v53  ;;  %v17529_v53 = vld [vmem:[%s24293_s5 + $0x460] ss:$16 sps:$4 sm:$0xff]  }
 0x32c   : > { %5085 = vmatpush1.bf16.msra.mxu0 %v17454_v54  ;;  %4914 = vmatprep.subr.bf16.mxu1 %v17459_v59  ;;  %v17532_v54 = vld [vmem:[%s24293_s5 + $0x468] ss:$16 sps:$4 sm:$0xff]   ;;  %v17537_v59 = vld [vmem:[%s24293_s5 + $0x484] ss:$16 sps:$4 sm:$0xff]  }
 0x32d   : > { %5086 = vmatprep.subr.bf16.mxu0 %v17462_v60  ;;  %v17540_v60 = vld [vmem:[%s24293_s5 + $0x48c] ss:$16 sps:$4 sm:$0xff]  }
 0x32f   : > { %4915 = vmatpush1.bf16.msra.mxu1 %v17457_v63  ;;  %v17535_v63 = vld [vmem:[%s24293_s5 + $0x480] ss:$16 sps:$4 sm:$0xff]  }
 0x330   : > { %5087 = vmatpush1.bf16.msra.mxu0 %v17460_v57  ;;  %4916 = vmatprep.subr.bf16.mxu1 %v17465_v4  ;;  %v17538_v57 = vld [vmem:[%s24293_s5 + $0x488] ss:$16 sps:$4 sm:$0xff]   ;;  %v17543_v4 = vld [vmem:[%s24293_s5 + $0x4a4] ss:$16 sps:$4 sm:$0xff]  }
 0x331   : > { %5088 = vmatprep.subr.bf16.mxu0 %v17468_v5  ;;  %v17546_v5 = vld [vmem:[%s24293_s5 + $0x4ac] ss:$16 sps:$4 sm:$0xff]  }
 0x333   : > { %4917 = vmatpush1.bf16.msra.mxu1 %v17463_v46  ;;  %v17541_v46 = vld [vmem:[%s24293_s5 + $0x4a0] ss:$16 sps:$4 sm:$0xff]  }
 0x334   : > { %5089 = vmatpush1.bf16.msra.mxu0 %v17466_v8  ;;  %4918 = vmatprep.subr.bf16.mxu1 %v17471_v3  ;;  %v17544_v8 = vld [vmem:[%s24293_s5 + $0x4a8] ss:$16 sps:$4 sm:$0xff]   ;;  %v17549_v3 = vld [vmem:[%s24293_s5 + $0x4c4] ss:$16 sps:$4 sm:$0xff]  }
 0x335   : > { %5090 = vmatprep.subr.bf16.mxu0 %v17474_v56  ;;  %v17552_v56 = vld [vmem:[%s24293_s5 + $0x4cc] ss:$16 sps:$4 sm:$0xff]  }
 0x337   : > { %4919 = vmatpush1.bf16.msra.mxu1 %v17469_v10  ;;  %v17547_v10 = vld [vmem:[%s24293_s5 + $0x4c0] ss:$16 sps:$4 sm:$0xff]  }
 0x338   : > { %5091 = vmatpush1.bf16.msra.mxu0 %v17472_v12  ;;  %4920 = vmatprep.subr.bf16.mxu1 %v17477_v15  ;;  %v17550_v12 = vld [vmem:[%s24293_s5 + $0x4c8] ss:$16 sps:$4 sm:$0xff]   ;;  %v17555_v15 = vld [vmem:[%s24293_s5 + $0x4e4] ss:$16 sps:$4 sm:$0xff]  }
 0x339   : > { %5092 = vmatprep.subr.bf16.mxu0 %v17480_v16  ;;  %v17558_v16 = vld [vmem:[%s24293_s5 + $0x4ec] ss:$16 sps:$4 sm:$0xff]  }
 0x33b   : > { %4921 = vmatpush1.bf16.msra.mxu1 %v17475_v23  ;;  %v17553_v23 = vld [vmem:[%s24293_s5 + $0x4e0] ss:$16 sps:$4 sm:$0xff]  }
 0x33c   : > { %5093 = vmatpush1.bf16.msra.mxu0 %v17478_v24  ;;  %4922 = vmatprep.subr.bf16.mxu1 %v17483_v25  ;;  %v17556_v24 = vld [vmem:[%s24293_s5 + $0x4e8] ss:$16 sps:$4 sm:$0xff]   ;;  %v17561_v25 = vld [vmem:[%s24293_s5 + $0x504] ss:$16 sps:$4 sm:$0xff]  }
 0x33d   : > { %5094 = vmatprep.subr.bf16.mxu0 %v17486_v50  ;;  %v17564_v50 = vld [vmem:[%s24293_s5 + $0x50c] ss:$16 sps:$4 sm:$0xff]  }
 0x33f   : > { %4923 = vmatpush1.bf16.msra.mxu1 %v17481_v17  ;;  %v17559_v17 = vld [vmem:[%s24293_s5 + $0x500] ss:$16 sps:$4 sm:$0xff]  }
 0x340   : > { %5095 = vmatpush1.bf16.msra.mxu0 %v17484_v27  ;;  %4924 = vmatprep.subr.bf16.mxu1 %v17489_v33  ;;  %v17562_v27 = vld [vmem:[%s24293_s5 + $0x508] ss:$16 sps:$4 sm:$0xff]   ;;  %v17567_v33 = vld [vmem:[%s24293_s5 + $0x524] ss:$16 sps:$4 sm:$0xff]  }
 0x341   : > { %5096 = vmatprep.subr.bf16.mxu0 %v17492_v34  ;;  %v17570_v34 = vld [vmem:[%s24293_s5 + $0x52c] ss:$16 sps:$4 sm:$0xff]  }
 0x343   : > { %4925 = vmatpush1.bf16.msra.mxu1 %v17487_v35  ;;  %v17565_v35 = vld [vmem:[%s24293_s5 + $0x520] ss:$16 sps:$4 sm:$0xff]  }
 0x344   : > { %5097 = vmatpush1.bf16.msra.mxu0 %v17490_v37  ;;  %4926 = vmatprep.subr.bf16.mxu1 %v17495_v31  ;;  %v17568_v37 = vld [vmem:[%s24293_s5 + $0x528] ss:$16 sps:$4 sm:$0xff]   ;;  %v17573_v31 = vld [vmem:[%s24293_s5 + $0x544] ss:$16 sps:$4 sm:$0xff]  }
 0x345   : > { %5098 = vmatprep.subr.bf16.mxu0 %v17498_v41  ;;  %v17576_v41 = vld [vmem:[%s24293_s5 + $0x54c] ss:$16 sps:$4 sm:$0xff]  }
 0x347   : > { %4927 = vmatpush1.bf16.msra.mxu1 %v17493_v58  ;;  %v17571_v58 = vld [vmem:[%s24293_s5 + $0x540] ss:$16 sps:$4 sm:$0xff]  }
 0x348   : > { %5099 = vmatpush1.bf16.msra.mxu0 %v17496_v20  ;;  %4928 = vmatprep.subr.bf16.mxu1 %v17501_v28  ;;  %v17574_v20 = vld [vmem:[%s24293_s5 + $0x548] ss:$16 sps:$4 sm:$0xff]   ;;  %v17579_v28 = vld [vmem:[%s24293_s5 + $0x564] ss:$16 sps:$4 sm:$0xff]  }
 0x349   : > { %5100 = vmatprep.subr.bf16.mxu0 %v17504_v9  ;;  %v17582_v9 = vld [vmem:[%s24293_s5 + $0x56c] ss:$16 sps:$4 sm:$0xff]  }
 0x34b   : > { %4929 = vmatpush1.bf16.msra.mxu1 %v17499_v38  ;;  %v17577_v38 = vld [vmem:[%s24293_s5 + $0x560] ss:$16 sps:$4 sm:$0xff]  }
 0x34c   : > { %5101 = vmatpush1.bf16.msra.mxu0 %v17502_v32  ;;  %4930 = vmatprep.subr.bf16.mxu1 %v17507_v22  ;;  %v17580_v32 = vld [vmem:[%s24293_s5 + $0x568] ss:$16 sps:$4 sm:$0xff]   ;;  %v17585_v22 = vld [vmem:[%s24293_s5 + $0x584] ss:$16 sps:$4 sm:$0xff]  }
 0x34d   : > { %5102 = vmatprep.subr.bf16.mxu0 %v17510_v36  ;;  %v17588_v36 = vld [vmem:[%s24293_s5 + $0x58c] ss:$16 sps:$4 sm:$0xff]  }
 0x34f   : > { %4931 = vmatpush1.bf16.msra.mxu1 %v17505_v1  ;;  %v17583_v1 = vld [vmem:[%s24293_s5 + $0x580] ss:$16 sps:$4 sm:$0xff]  }
 0x350   : > { %5103 = vmatpush1.bf16.msra.mxu0 %v17508_v39  ;;  %4943 = vmatprep.subr.bf16.mxu1 %v17513_v42  ;;  %v17586_v39 = vld [vmem:[%s24293_s5 + $0x588] ss:$16 sps:$4 sm:$0xff]   ;;  %v17591_v42 = vld [vmem:[%s24293_s5 + $0x5a4] ss:$16 sps:$4 sm:$0xff]  }
 0x351   : > { %5115 = vmatprep.subr.bf16.mxu0 %v17516_v43  ;;  %v17594_v43 = vld [vmem:[%s24293_s5 + $0x5ac] ss:$16 sps:$4 sm:$0xff]  }
 0x352   : > { %4933 = vmatmul.mubr.bf16.vlgmr.msra.gmra.mrb[28].mxu1 %v19811_v0 }
 0x353   : > { %5105 = vmatmul.mubr.bf16.vlgmr.msra.gmra.mrb[32].mxu0 %v19811_v0  ;;  %4944 = vmatpush1.bf16.msra.mxu1 %v17511_v55  ;;  %v17528_v0 = vld [vmem:[%s24293_s5 + $0x44c] ss:$16 sps:$4 sm:$0xff]   ;;  %v17589_v55 = vld [vmem:[%s24293_s5 + $0x5a0] ss:$16 sps:$4 sm:$0xff]  }
 0x354   : > { %4975 = vmatprep.mubr.bf16.mxu1 %v19857_v7  ;;  %5116 = vmatpush1.bf16.msra.mxu0 %v17514_v11  ;;  %v17592_v11 = vld [vmem:[%s24293_s5 + $0x5a8] ss:$16 sps:$4 sm:$0xff]  }
 0x355   : > { %5147 = vmatprep.mubr.bf16.mxu0 %v19857_v7  ;;  %4945 = vmatprep.subr.bf16.mxu1 %v17519_v29  ;;  %v17531_v7 = vld [vmem:[%s24293_s5 + $0x464] ss:$16 sps:$4 sm:$0xff]  }
 0x356   : > { %5117 = vmatprep.subr.bf16.mxu0 %v17522_v44  ;;  %v17597_v29 = vld [vmem:[%s24293_s5 + $0x5c4] ss:$16 sps:$4 sm:$0xff]   ;;  %v17600_v44 = vld [vmem:[%s24293_s5 + $0x5cc] ss:$16 sps:$4 sm:$0xff]  }
 0x357   : > { %4946 = vmatpush1.bf16.msra.mxu1 %v17517_v47  ;;  %v17595_v47 = vld [vmem:[%s24293_s5 + $0x5c0] ss:$16 sps:$4 sm:$0xff]  }
 0x358   : > { %5118 = vmatpush1.bf16.msra.mxu0 %v17520_v48  ;;  %4947 = vmatprep.subr.bf16.mxu1 %v17525_v14  ;;  %v17598_v48 = vld [vmem:[%s24293_s5 + $0x5c8] ss:$16 sps:$4 sm:$0xff]   ;;  %v17603_v14 = vld [vmem:[%s24293_s5 + $0x5e4] ss:$16 sps:$4 sm:$0xff]  }
 0x359   : > { %5119 = vmatprep.subr.bf16.mxu0 %v17528_v0  ;;  %v17606_v0 = vld [vmem:[%s24293_s5 + $0x5ec] ss:$16 sps:$4 sm:$0xff]  }
 0x35b   : > { %4948 = vmatpush1.bf16.msra.mxu1 %v17523_v21  ;;  %v17601_v21 = vld [vmem:[%s24293_s5 + $0x5e0] ss:$16 sps:$4 sm:$0xff]  }
 0x35c   : > { %5120 = vmatpush1.bf16.msra.mxu0 %v17526_v30  ;;  %4949 = vmatprep.subr.bf16.mxu1 %v17531_v7  ;;  %v17604_v30 = vld [vmem:[%s24293_s5 + $0x5e8] ss:$16 sps:$4 sm:$0xff]   ;;  %v17609_v7 = vld [vmem:[%s24293_s5 + $0x604] ss:$16 sps:$4 sm:$0xff]  }
 0x35d   : > { %5121 = vmatprep.subr.bf16.mxu0 %v17534_v52  ;;  %v17612_v52 = vld [vmem:[%s24293_s5 + $0x60c] ss:$16 sps:$4 sm:$0xff]  }
 0x35f   : > { %4950 = vmatpush1.bf16.msra.mxu1 %v17529_v53  ;;  %v17607_v53 = vld [vmem:[%s24293_s5 + $0x600] ss:$16 sps:$4 sm:$0xff]  }
 0x360   : > { %5122 = vmatpush1.bf16.msra.mxu0 %v17532_v54  ;;  %4951 = vmatprep.subr.bf16.mxu1 %v17537_v59  ;;  %v17610_v54 = vld [vmem:[%s24293_s5 + $0x608] ss:$16 sps:$4 sm:$0xff]   ;;  %v17615_v59 = vld [vmem:[%s24293_s5 + $0x624] ss:$16 sps:$4 sm:$0xff]  }
 0x361   : > { %5123 = vmatprep.subr.bf16.mxu0 %v17540_v60  ;;  %v17618_v60 = vld [vmem:[%s24293_s5 + $0x62c] ss:$16 sps:$4 sm:$0xff]  }
 0x363   : > { %4952 = vmatpush1.bf16.msra.mxu1 %v17535_v63  ;;  %v17613_v63 = vld [vmem:[%s24293_s5 + $0x620] ss:$16 sps:$4 sm:$0xff]  }
 0x364   : > { %5124 = vmatpush1.bf16.msra.mxu0 %v17538_v57  ;;  %4953 = vmatprep.subr.bf16.mxu1 %v17543_v4  ;;  %v17616_v57 = vld [vmem:[%s24293_s5 + $0x628] ss:$16 sps:$4 sm:$0xff]   ;;  %v17621_v4 = vld [vmem:[%s24293_s5 + $0x644] ss:$16 sps:$4 sm:$0xff]  }
 0x365   : > { %5125 = vmatprep.subr.bf16.mxu0 %v17546_v5  ;;  %v17619_v5 = vld [vmem:[%s24293_s5 + $0x640] ss:$16 sps:$4 sm:$0xff]  }
 0x367   : > { %4954 = vmatpush1.bf16.msra.mxu1 %v17541_v46  ;;  %v17622_v46 = vld [vmem:[%s24293_s5 + $0x648] ss:$16 sps:$4 sm:$0xff]  }
 0x368   : > { %5126 = vmatpush1.bf16.msra.mxu0 %v17544_v8  ;;  %4955 = vmatprep.subr.bf16.mxu1 %v17549_v3  ;;  %v17627_v8 = vld [vmem:[%s24293_s5 + $0x664] ss:$16 sps:$4 sm:$0xff]   ;;  %v17630_v3 = vld [vmem:[%s24293_s5 + $0x66c] ss:$16 sps:$4 sm:$0xff]  }
 0x369   : > { %5127 = vmatprep.subr.bf16.mxu0 %v17552_v56  ;;  %v17625_v56 = vld [vmem:[%s24293_s5 + $0x660] ss:$16 sps:$4 sm:$0xff]  }
 0x36b   : > { %4956 = vmatpush1.bf16.msra.mxu1 %v17547_v10  ;;  %v17628_v10 = vld [vmem:[%s24293_s5 + $0x668] ss:$16 sps:$4 sm:$0xff]  }
 0x36c   : > { %5128 = vmatpush1.bf16.msra.mxu0 %v17550_v12  ;;  %4957 = vmatprep.subr.bf16.mxu1 %v17555_v15  ;;  %v17633_v12 = vld [vmem:[%s24294_s6 + $0x4e4] ss:$24 sps:$4 sm:$0xff]  }
 0x36d   : > { %5129 = vmatprep.subr.bf16.mxu0 %v17558_v16  ;;  %v17636_v15 = vld [vmem:[%s24294_s6 + $0x4ec] ss:$24 sps:$4 sm:$0xff]   ;;  %v17631_v16 = vld [vmem:[%s24294_s6 + $0x4e0] ss:$24 sps:$4 sm:$0xff]  }
 0x36f   : > { %4958 = vmatpush1.bf16.msra.mxu1 %v17553_v23  ;;  %v17634_v23 = vld [vmem:[%s24294_s6 + $0x4e8] ss:$24 sps:$4 sm:$0xff]  }
 0x370   : > { %5130 = vmatpush1.bf16.msra.mxu0 %v17556_v24  ;;  %4959 = vmatprep.subr.bf16.mxu1 %v17561_v25  ;;  %v17639_v24 = vld [vmem:[%s24294_s6 + $0x514] ss:$24 sps:$4 sm:$0xff]  }
 0x371   : > { %5131 = vmatprep.subr.bf16.mxu0 %v17564_v50  ;;  %v17642_v25 = vld [vmem:[%s24294_s6 + $0x51c] ss:$24 sps:$4 sm:$0xff]   ;;  %v17637_v50 = vld [vmem:[%s24294_s6 + $0x510] ss:$24 sps:$4 sm:$0xff]  }
 0x373   : > { %4960 = vmatpush1.bf16.msra.mxu1 %v17559_v17  ;;  %v17640_v17 = vld [vmem:[%s24294_s6 + $0x518] ss:$24 sps:$4 sm:$0xff]  }
 0x374   : > { %5132 = vmatpush1.bf16.msra.mxu0 %v17562_v27  ;;  %4961 = vmatprep.subr.bf16.mxu1 %v17567_v33  ;;  %v17645_v27 = vld [vmem:[%s24294_s6 + $0x544] ss:$24 sps:$4 sm:$0xff]  }
 0x375   : > { %5133 = vmatprep.subr.bf16.mxu0 %v17570_v34 }
 0x377   : > { %4962 = vmatpush1.bf16.msra.mxu1 %v17565_v35 }
 0x378   : > { %5134 = vmatpush1.bf16.msra.mxu0 %v17568_v37  ;;  %4963 = vmatprep.subr.bf16.mxu1 %v17573_v31 }
 0x379   : > { %5135 = vmatprep.subr.bf16.mxu0 %v17576_v41 }
 0x37b   : > { %4964 = vmatpush1.bf16.msra.mxu1 %v17571_v58  ;;  %v17643_v58 = vld [vmem:[%s24294_s6 + $0x540] ss:$24 sps:$4 sm:$0xff]  }
 0x37c   : > { %5136 = vmatpush1.bf16.msra.mxu0 %v17574_v20  ;;  %4965 = vmatprep.subr.bf16.mxu1 %v17579_v28 }
 0x37d   : > { %5137 = vmatprep.subr.bf16.mxu0 %v17582_v9  ;;  %v17646_v9 = vld [vmem:[%s24294_s6 + $0x548] ss:$24 sps:$4 sm:$0xff]  }
 0x37f   : > { %4966 = vmatpush1.bf16.msra.mxu1 %v17577_v38  ;;  %v17651_v38 = vld [vmem:[%s24294_s6 + $0x574] ss:$24 sps:$4 sm:$0xff]  }
 0x380   : > { %5138 = vmatpush1.bf16.msra.mxu0 %v17580_v32  ;;  %4967 = vmatprep.subr.bf16.mxu1 %v17585_v22  ;;  %v17654_v32 = vld [vmem:[%s24294_s6 + $0x57c] ss:$24 sps:$4 sm:$0xff]   ;;  %v17649_v22 = vld [vmem:[%s24294_s6 + $0x570] ss:$24 sps:$4 sm:$0xff]  }
 0x381   : > { %5139 = vmatprep.subr.bf16.mxu0 %v17588_v36  ;;  %v17652_v36 = vld [vmem:[%s24294_s6 + $0x578] ss:$24 sps:$4 sm:$0xff]  }
 0x383   : > { %4968 = vmatpush1.bf16.msra.mxu1 %v17583_v1  ;;  %v17657_v1 = vld [vmem:[%s24294_s6 + $0x5a4] ss:$24 sps:$4 sm:$0xff]  }
 0x384   : > { %5140 = vmatpush1.bf16.msra.mxu0 %v17586_v39  ;;  %4969 = vmatprep.subr.bf16.mxu1 %v17591_v42  ;;  %v17660_v39 = vld [vmem:[%s24294_s6 + $0x5ac] ss:$24 sps:$4 sm:$0xff]   ;;  %v17655_v42 = vld [vmem:[%s24294_s6 + $0x5a0] ss:$24 sps:$4 sm:$0xff]  }
 0x385   : > { %5141 = vmatprep.subr.bf16.mxu0 %v17594_v43  ;;  %v17658_v43 = vld [vmem:[%s24294_s6 + $0x5a8] ss:$24 sps:$4 sm:$0xff]  }
 0x387   : > { %4970 = vmatpush1.bf16.msra.mxu1 %v17589_v55  ;;  %v17663_v55 = vld [vmem:[%s24294_s6 + $0x5d4] ss:$24 sps:$4 sm:$0xff]  }
 0x388   : > { %5142 = vmatpush1.bf16.msra.mxu0 %v17592_v11  ;;  %4971 = vmatprep.subr.bf16.mxu1 %v17597_v29  ;;  %v17666_v11 = vld [vmem:[%s24294_s6 + $0x5dc] ss:$24 sps:$4 sm:$0xff]   ;;  %v17661_v29 = vld [vmem:[%s24294_s6 + $0x5d0] ss:$24 sps:$4 sm:$0xff]  }
 0x389   : > { %5143 = vmatprep.subr.bf16.mxu0 %v17600_v44  ;;  %v17664_v44 = vld [vmem:[%s24294_s6 + $0x5d8] ss:$24 sps:$4 sm:$0xff]  }
 0x38b   : > { %4972 = vmatpush1.bf16.msra.mxu1 %v17595_v47  ;;  %v17669_v47 = vld [vmem:[%s24294_s6 + $0x604] ss:$24 sps:$4 sm:$0xff]  }
 0x38c   : > { %5144 = vmatpush1.bf16.msra.mxu0 %v17598_v48  ;;  %4973 = vmatprep.subr.bf16.mxu1 %v17603_v14  ;;  %v17672_v48 = vld [vmem:[%s24294_s6 + $0x60c] ss:$24 sps:$4 sm:$0xff]   ;;  %v17667_v14 = vld [vmem:[%s24294_s6 + $0x600] ss:$24 sps:$4 sm:$0xff]  }
 0x38d   : > { %5145 = vmatprep.subr.bf16.mxu0 %v17606_v0  ;;  %v17670_v0 = vld [vmem:[%s24294_s6 + $0x608] ss:$24 sps:$4 sm:$0xff]  }
 0x38f   : > { %4974 = vmatpush1.bf16.msra.mxu1 %v17601_v21  ;;  %v17675_v21 = vld [vmem:[%s24294_s6 + $0x634] ss:$24 sps:$4 sm:$0xff]  }
 0x390   : > { %5146 = vmatpush1.bf16.msra.mxu0 %v17604_v30  ;;  %4986 = vmatprep.subr.bf16.mxu1 %v17609_v7  ;;  %v17678_v30 = vld [vmem:[%s24294_s6 + $0x63c] ss:$24 sps:$4 sm:$0xff]   ;;  %v17673_v7 = vld [vmem:[%s24294_s6 + $0x630] ss:$24 sps:$4 sm:$0xff]  }
 0x391   : > { %5158 = vmatprep.subr.bf16.mxu0 %v17612_v52  ;;  %v17676_v52 = vld [vmem:[%s24294_s6 + $0x638] ss:$24 sps:$4 sm:$0xff]  }
 0x392   : > { %4976 = vmatmul.mubr.bf16.vlgmr.msra.gmra.mrb[28].mxu1 %v19855_v40 }
 0x393   : > { %5148 = vmatmul.mubr.bf16.vlgmr.msra.gmra.mrb[32].mxu0 %v19855_v40  ;;  %4987 = vmatpush1.bf16.msra.mxu1 %v17607_v53  ;;  %v17624_v40 = vld [vmem:[%s24293_s5 + $0x64c] ss:$16 sps:$4 sm:$0xff]  }
 0x394   : > { %5159 = vmatpush1.bf16.msra.mxu0 %v17610_v54  ;;  %4988 = vmatprep.subr.bf16.mxu1 %v17615_v59  ;;  %v17681_v53 = vld [vmem:[%s24294_s6 + $0x664] ss:$24 sps:$4 sm:$0xff]   ;;  %v17679_v59 = vld [vmem:[%s24294_s6 + $0x660] ss:$24 sps:$4 sm:$0xff]  }
 0x395   : > { %5160 = vmatprep.subr.bf16.mxu0 %v17618_v60  ;;  %5018 = vmatprep.mubr.bf16.mxu1 %v19069_v2  ;;  %v17684_v54 = vld [vmem:[%s24294_s6 + $0x66c] ss:$24 sps:$4 sm:$0xff]   ;;  %v17682_v60 = vld [vmem:[%s24294_s6 + $0x668] ss:$24 sps:$4 sm:$0xff]  }
 0x396   : > { %5190 = vmatprep.mubr.bf16.mxu0 %v19069_v2 }
 0x397   : > { %4989 = vmatpush1.bf16.msra.mxu1 %v17613_v63  ;;  %v17687_v63 = vld [vmem:[%s24294_s6 + $0x694] ss:$24 sps:$4 sm:$0xff]  }
 0x398   : > { %5161 = vmatpush1.bf16.msra.mxu0 %v17616_v57  ;;  %4990 = vmatprep.subr.bf16.mxu1 %v17621_v4  ;;  %v17690_v57 = vld [vmem:[%s24294_s6 + $0x69c] ss:$24 sps:$4 sm:$0xff]   ;;  %v17685_v4 = vld [vmem:[%s24294_s6 + $0x690] ss:$24 sps:$4 sm:$0xff]  }
 0x399   : > { %5162 = vmatprep.subr.bf16.mxu0 %v17624_v40  ;;  %v17688_v40 = vld [vmem:[%s24294_s6 + $0x698] ss:$24 sps:$4 sm:$0xff]  }
 0x39b   : > { %4991 = vmatpush1.bf16.msra.mxu1 %v17619_v5  ;;  %v17693_v5 = vld [vmem:[%s24294_s6 + $0x6c4] ss:$24 sps:$4 sm:$0xff]  }
 0x39c   : > { %5163 = vmatpush1.bf16.msra.mxu0 %v17622_v46  ;;  %4992 = vmatprep.subr.bf16.mxu1 %v17627_v8  ;;  %v17696_v46 = vld [vmem:[%s24294_s6 + $0x6cc] ss:$24 sps:$4 sm:$0xff]   ;;  %v17691_v8 = vld [vmem:[%s24294_s6 + $0x6c0] ss:$24 sps:$4 sm:$0xff]  }
 0x39d   : > { %5164 = vmatprep.subr.bf16.mxu0 %v17630_v3  ;;  %v17694_v3 = vld [vmem:[%s24294_s6 + $0x6c8] ss:$24 sps:$4 sm:$0xff]  }
 0x39f   : > { %4993 = vmatpush1.bf16.msra.mxu1 %v17625_v56  ;;  %v17699_v56 = vld [vmem:[%s24294_s6 + $0x6f4] ss:$24 sps:$4 sm:$0xff]  }
 0x3a0   : > { %5165 = vmatpush1.bf16.msra.mxu0 %v17628_v10  ;;  %6341 = vmatprep.subr.bf16.mxu1 %v17633_v12  ;;  %v17702_v10 = vld [vmem:[%s24294_s6 + $0x6fc] ss:$24 sps:$4 sm:$0xff]   ;;  %v17697_v12 = vld [vmem:[%s24294_s6 + $0x6f0] ss:$24 sps:$4 sm:$0xff]  }
 0x3a1   : > { %6427 = vmatprep.subr.bf16.mxu0 %v17636_v15  ;;  %v17700_v15 = vld [vmem:[%s24294_s6 + $0x6f8] ss:$24 sps:$4 sm:$0xff]  }
 0x3a2   : > { %14696 = vmatmul.mubr.msk.bf16.vlgmr.msra.gmra.mrb[28].mxu1 %vm3261_vm8, %v19841_v26 }
 0x3a3   : > { %14697 = vmatmul.mubr.msk.bf16.vlgmr.msra.gmra.mrb[32].mxu0 %vm3261_vm8, %v19841_v26  ;;  %6342 = vmatpush1.bf16.msra.mxu1 %v17631_v16  ;;  %v17648_v26 = vld [vmem:[%s24294_s6 + $0x54c] ss:$24 sps:$4 sm:$0xff]  }
 0x3a4   : > { %6428 = vmatpush1.bf16.msra.mxu0 %v17634_v23  ;;  %6343 = vmatprep.subr.bf16.mxu1 %v17639_v24  ;;  %v17705_v16 = vld [vmem:[%s24294_s6 + $0x724] ss:$24 sps:$4 sm:$0xff]   ;;  %v17703_v24 = vld [vmem:[%s24294_s6 + $0x720] ss:$24 sps:$4 sm:$0xff]  }
 0x3a5   : > { %v20906_v33 = vpop.f32.mrb[24].mxu1  ;;  %v20908_v34 = vpop.f32.mrb[28].mxu0  ;;  %6429 = vmatprep.subr.bf16.mxu0 %v17642_v25  ;;  %v17708_v23 = vld [vmem:[%s24294_s6 + $0x72c] ss:$24 sps:$4 sm:$0xff]   ;;  %v17706_v25 = vld [vmem:[%s24294_s6 + $0x728] ss:$24 sps:$4 sm:$0xff]  }
 0x3a6   : > { %v20913_v35 = vpop.f32.mrb[25].mxu1  ;;  %v20915_v37 = vpop.f32.mrb[29].mxu0 }
 0x3a7   : > { %v20917_v31 = vpop.f32.mrb[26].mxu1  ;;  %v20919_v41 = vpop.f32.mrb[30].mxu0  ;;  %6344 = vmatpush1.bf16.msra.mxu1 %v17637_v50  ;;  %v17711_v50 = vld [vmem:[%s24294_s6 + $0x754] ss:$24 sps:$4 sm:$0xff]  }
 0x3a8   : > { %v20924_v20 = vpop.f32.mrb[27].mxu1  ;;  %v20926_v28 = vpop.f32.mrb[31].mxu0  ;;  %6430 = vmatpush1.bf16.msra.mxu0 %v17640_v17  ;;  %6345 = vmatprep.subr.bf16.mxu1 %v17645_v27  ;;  %v17714_v17 = vld [vmem:[%s24294_s6 + $0x75c] ss:$24 sps:$4 sm:$0xff]   ;;  %v17709_v27 = vld [vmem:[%s24294_s6 + $0x750] ss:$24 sps:$4 sm:$0xff]  }
 0x3a9   : > { %6431 = vmatprep.subr.bf16.mxu0 %v17648_v26  ;;  %v17712_v26 = vld [vmem:[%s24294_s6 + $0x758] ss:$24 sps:$4 sm:$0xff]  }
 0x3ab   : > { %6346 = vmatpush1.bf16.msra.mxu1 %v17643_v58  ;;  %v17717_v58 = vld [vmem:[%s24294_s6 + $0x784] ss:$24 sps:$4 sm:$0xff]  }
 0x3ac   : > { %6432 = vmatpush1.bf16.msra.mxu0 %v17646_v9  ;;  %6347 = vmatprep.subr.bf16.mxu1 %v17651_v38  ;;  %v17720_v9 = vld [vmem:[%s24294_s6 + $0x78c] ss:$24 sps:$4 sm:$0xff]   ;;  %v17715_v38 = vld [vmem:[%s24294_s6 + $0x780] ss:$24 sps:$4 sm:$0xff]  }
 0x3ad   : > { %6433 = vmatprep.subr.bf16.mxu0 %v17654_v32  ;;  %v17718_v32 = vld [vmem:[%s24294_s6 + $0x788] ss:$24 sps:$4 sm:$0xff]  }
 0x3af   : > { %6348 = vmatpush1.bf16.msra.mxu1 %v17649_v22  ;;  %v17723_v22 = vld [vmem:[%s24294_s6 + $0x7b4] ss:$24 sps:$4 sm:$0xff]  }
 0x3b0   : > { %6434 = vmatpush1.bf16.msra.mxu0 %v17652_v36  ;;  %6349 = vmatprep.subr.bf16.mxu1 %v17657_v1  ;;  %v17726_v36 = vld [vmem:[%s24294_s6 + $0x7bc] ss:$24 sps:$4 sm:$0xff]   ;;  %v17721_v1 = vld [vmem:[%s24294_s6 + $0x7b0] ss:$24 sps:$4 sm:$0xff]  }
 0x3b1   : > { %6435 = vmatprep.subr.bf16.mxu0 %v17660_v39  ;;  %v17724_v39 = vld [vmem:[%s24294_s6 + $0x7b8] ss:$24 sps:$4 sm:$0xff]  }
 0x3b3   : > { %6350 = vmatpush1.bf16.msra.mxu1 %v17655_v42  ;;  %v17729_v42 = vld [vmem:[%s24294_s6 + $0x7e4] ss:$24 sps:$4 sm:$0xff]  }
 0x3b4   : > { %6436 = vmatpush1.bf16.msra.mxu0 %v17658_v43  ;;  %6351 = vmatprep.subr.bf16.mxu1 %v17663_v55  ;;  %v17732_v43 = vld [vmem:[%s24294_s6 + $0x7ec] ss:$24 sps:$4 sm:$0xff]  }
 0x3b5   : > { %6437 = vmatprep.subr.bf16.mxu0 %v17666_v11 }
 0x3b7   : > { %6352 = vmatpush1.bf16.msra.mxu1 %v17661_v29 }
 0x3b8   : > { %6438 = vmatpush1.bf16.msra.mxu0 %v17664_v44  ;;  %6353 = vmatprep.subr.bf16.mxu1 %v17669_v47 }
 0x3b9   : > { %6439 = vmatprep.subr.bf16.mxu0 %v17672_v48 }
 0x3bb   : > { %6354 = vmatpush1.bf16.msra.mxu1 %v17667_v14 }
 0x3bc   : > { %6440 = vmatpush1.bf16.msra.mxu0 %v17670_v0  ;;  %6355 = vmatprep.subr.bf16.mxu1 %v17675_v21 }
 0x3bd   : > { %6441 = vmatprep.subr.bf16.mxu0 %v17678_v30 }
 0x3bf   : > { %6356 = vmatpush1.bf16.msra.mxu1 %v17673_v7 }
 0x3c0   : > { %6442 = vmatpush1.bf16.msra.mxu0 %v17676_v52  ;;  %6357 = vmatprep.subr.bf16.mxu1 %v17681_v53 }
 0x3c1   : > { %6443 = vmatprep.subr.bf16.mxu0 %v17684_v54 }
 0x3c3   : > { %6358 = vmatpush1.bf16.msra.mxu1 %v17679_v59 }
 0x3c4   : > { %6444 = vmatpush1.bf16.msra.mxu0 %v17682_v60  ;;  %6359 = vmatprep.subr.bf16.mxu1 %v17687_v63 }
 0x3c5   : > { %6445 = vmatprep.subr.bf16.mxu0 %v17690_v57 }
 0x3c7   : > { %6360 = vmatpush1.bf16.msra.mxu1 %v17685_v4 }
 0x3c8   : > { %6446 = vmatpush1.bf16.msra.mxu0 %v17688_v40  ;;  %6361 = vmatprep.subr.bf16.mxu1 %v17693_v5 }
 0x3c9   : > { %6447 = vmatprep.subr.bf16.mxu0 %v17696_v46  ;;  %v17727_v46 = vld [vmem:[%s24294_s6 + $0x7e0] ss:$24 sps:$4 sm:$0xff]  }
 0x3cb   : > { %6362 = vmatpush1.bf16.msra.mxu1 %v17691_v8  ;;  %v17730_v8 = vld [vmem:[%s24294_s6 + $0x7e8] ss:$24 sps:$4 sm:$0xff]  }
 0x3cc   : > { %6448 = vmatpush1.bf16.msra.mxu0 %v17694_v3  ;;  %6363 = vmatprep.subr.bf16.mxu1 %v17699_v56 }
 0x3cd   : > { %6449 = vmatprep.subr.bf16.mxu0 %v17702_v10  ;;  %v17735_v10 = vld [vmem:[%s24294_s6 + $0x814] ss:$24 sps:$4 sm:$0xff]  }
 0x3cf   : > { %6364 = vmatpush1.bf16.msra.mxu1 %v17697_v12  ;;  %v17738_v12 = vld [vmem:[%s24294_s6 + $0x81c] ss:$24 sps:$4 sm:$0xff]  }
 0x3d0   : > { %6450 = vmatpush1.bf16.msra.mxu0 %v17700_v15  ;;  %6365 = vmatprep.subr.bf16.mxu1 %v17705_v16  ;;  %v17733_v16 = vld [vmem:[%s24294_s6 + $0x810] ss:$24 sps:$4 sm:$0xff]  }
 0x3d1   : > { %6451 = vmatprep.subr.bf16.mxu0 %v17708_v23  ;;  %v17736_v23 = vld [vmem:[%s24294_s6 + $0x818] ss:$24 sps:$4 sm:$0xff]  }
 0x3d3   : > { %6366 = vmatpush1.bf16.msra.mxu1 %v17703_v24  ;;  %v17741_v24 = vld [vmem:[%s24294_s6 + $0x844] ss:$24 sps:$4 sm:$0xff]  }
 0x3d4   : > { %6452 = vmatpush1.bf16.msra.mxu0 %v17706_v25  ;;  %6367 = vmatprep.subr.bf16.mxu1 %v17711_v50  ;;  %v17744_v25 = vld [vmem:[%s24294_s6 + $0x84c] ss:$24 sps:$4 sm:$0xff]   ;;  %v17739_v50 = vld [vmem:[%s24294_s6 + $0x840] ss:$24 sps:$4 sm:$0xff]  }
 0x3d5   : > { %6453 = vmatprep.subr.bf16.mxu0 %v17714_v17  ;;  %v17742_v17 = vld [vmem:[%s24294_s6 + $0x848] ss:$24 sps:$4 sm:$0xff]  }
 0x3d7   : > { %6368 = vmatpush1.bf16.msra.mxu1 %v17709_v27  ;;  %v17747_v27 = vld [vmem:[%s24294_s6 + $0x874] ss:$24 sps:$4 sm:$0xff]  }
 0x3d8   : > { %6454 = vmatpush1.bf16.msra.mxu0 %v17712_v26  ;;  %6369 = vmatprep.subr.bf16.mxu1 %v17717_v58  ;;  %v17750_v26 = vld [vmem:[%s24294_s6 + $0x87c] ss:$24 sps:$4 sm:$0xff]   ;;  %v17745_v58 = vld [vmem:[%s24294_s6 + $0x870] ss:$24 sps:$4 sm:$0xff]  }
 0x3d9   : > { %6455 = vmatprep.subr.bf16.mxu0 %v17720_v9  ;;  %v17748_v9 = vld [vmem:[%s24294_s6 + $0x878] ss:$24 sps:$4 sm:$0xff]  }
 0x3db   : > { %6370 = vmatpush1.bf16.msra.mxu1 %v17715_v38  ;;  %v17753_v38 = vld [vmem:[%s24294_s6 + $0x8a4] ss:$24 sps:$4 sm:$0xff]  }
 0x3dc   : > { %6456 = vmatpush1.bf16.msra.mxu0 %v17718_v32  ;;  %6371 = vmatprep.subr.bf16.mxu1 %v17723_v22  ;;  %v17756_v32 = vld [vmem:[%s24294_s6 + $0x8ac] ss:$24 sps:$4 sm:$0xff]   ;;  %v17751_v22 = vld [vmem:[%s24294_s6 + $0x8a0] ss:$24 sps:$4 sm:$0xff]  }
 0x3dd   : > { %6457 = vmatprep.subr.bf16.mxu0 %v17726_v36  ;;  %v17754_v36 = vld [vmem:[%s24294_s6 + $0x8a8] ss:$24 sps:$4 sm:$0xff]  }
 0x3df   : > { %6372 = vmatpush1.bf16.msra.mxu1 %v17721_v1  ;;  %v17759_v1 = vld [vmem:[%s24294_s6 + $0x8d4] ss:$24 sps:$4 sm:$0xff]  }
 0x3e0   : > { %6458 = vmatpush1.bf16.msra.mxu0 %v17724_v39  ;;  %6384 = vmatprep.subr.bf16.mxu1 %v17729_v42  ;;  %v17762_v39 = vld [vmem:[%s24294_s6 + $0x8dc] ss:$24 sps:$4 sm:$0xff]   ;;  %v17757_v42 = vld [vmem:[%s24294_s6 + $0x8d0] ss:$24 sps:$4 sm:$0xff]  }
 0x3e1   : > { %6470 = vmatprep.subr.bf16.mxu0 %v17732_v43  ;;  %v17760_v43 = vld [vmem:[%s24294_s6 + $0x8d8] ss:$24 sps:$4 sm:$0xff]  }
 0x475   : > { %v5020_v55 = vpop.f32.mrb[28].mxu1 }
 0x476   : > { %v5201_v11 = vmax.f32 %v20906_v33, %v5020_v55  ;;  %v5192_v29 = vpop.f32.mrb[32].mxu0  ;;  %v5022_v44 = vpop.f32.mrb[29].mxu1  ;;  %v17765_v55 = vld [vmem:[%s24294_s6 + $0x904] ss:$24 sps:$4 sm:$0xff]  }
 0x477   : > { %v5203_v47 = vmax.f32 %v20908_v34, %v5192_v29  ;;  %v5202_v48 = vmax.f32 %v20913_v35, %v5022_v44  ;;  %v5194_v14 = vpop.f32.mrb[33].mxu0  ;;  %v5024_v0 = vpop.f32.mrb[30].mxu1  ;;  %v17763_v29 = vld [vmem:[%s24294_s6 + $0x900] ss:$24 sps:$4 sm:$0xff]  }
 0x478   : > { %v5204_v21 = vmax.f32 %v20915_v37, %v5194_v14  ;;  %v5205_v30 = vmax.f32 %v20917_v31, %v5024_v0  ;;  %v5196_v7 = vpop.f32.mrb[34].mxu0  ;;  %v5026_v52 = vpop.f32.mrb[31].mxu1  ;;  %v17766_v44 = vld [vmem:[%s24294_s6 + $0x908] ss:$24 sps:$4 sm:$0xff]   ;;  %v17772_v0 = vld [vmem:[%s24294_s6 + $0x938] ss:$24 sps:$4 sm:$0xff]  }
 0x479   : > { %v5207_v53 = vmax.f32 %v20919_v41, %v5196_v7  ;;  %v5206_v54 = vmax.f32 %v20924_v20, %v5026_v52  ;;  %v5198_v59 = vpop.f32.mrb[35].mxu0  ;;  %v17769_v14 = vld [vmem:[%s24294_s6 + $0x930] ss:$24 sps:$4 sm:$0xff]   ;;  %v17775_v7 = vld [vmem:[%s24294_s6 + $0x960] ss:$24 sps:$4 sm:$0xff]  }
 0x47a   : > { %v21100_v33 = vpack.c.bf16 %v5205_v30, %v5201_v11  ;;  %v5208_v60 = vmax.f32 %v20926_v28, %v5198_v59  ;;  %v17768_v11 = vld [vmem:[%s24294_s6 + $0x90c] ss:$24 sps:$4 sm:$0xff]   ;;  %v17778_v52 = vld [vmem:[%s24294_s6 + $0x968] ss:$24 sps:$4 sm:$0xff]  }
 0x47b   : > { %v21103_v34 = vpack.c.bf16 %v5207_v53, %v5203_v47  ;;  %v21105_v35 = vpack.c.bf16 %v5206_v54, %v5202_v48  ;;  %v17771_v47 = vld [vmem:[%s24294_s6 + $0x934] ss:$24 sps:$4 sm:$0xff]  }
 0x47c   : > { %v21107_v63 = vpack.c.bf16 %v5208_v60, %v5204_v21  ;;  %v5529_v37 = vshll.u32 %v21100_v33, 16  ;;  %v5527_v40 = vshrl.u32 %v21100_v33, 16  ;;  %v17774_v48 = vld [vmem:[%s24294_s6 + $0x93c] ss:$24 sps:$4 sm:$0xff]   ;;  %v17780_v30 = vld [vmem:[%s24294_s6 + $0x96c] ss:$24 sps:$4 sm:$0xff]  }
 0x47d   : > { %v5536_v31 = vshll.u32 %v21105_v35, 16  ;;  %v5534_v20 = vshrl.u32 %v21105_v35, 16  ;;  %v17777_v21 = vld [vmem:[%s24294_s6 + $0x964] ss:$24 sps:$4 sm:$0xff]   ;;  %v17783_v53 = vld [vmem:[%s24294_s6 + $0x994] ss:$24 sps:$4 sm:$0xff]  }
 0x47e   : > { %v5531_v57 = vrot.slane %v5529_v37, 1  ;;  %v5550_v41 = vshll.u32 %v21107_v63, 16  ;;  %v5548_v56 = vshrl.u32 %v21107_v63, 16  ;;  %v17786_v54 = vld [vmem:[%s24294_s6 + $0x99c] ss:$24 sps:$4 sm:$0xff]   ;;  %v5543_v59 = vshll.u32 %v21103_v34, 16 }
 0x47f   : > { %v5538_v4 = vrot.slane %v5536_v31, 1  ;;  %v17781_v60 = vld [vmem:[%s24294_s6 + $0x990] ss:$24 sps:$4 sm:$0xff]  }
 0x480   : > { %v5552_v5 = vrot.slane %v5550_v41, 1  ;;  %v21122_v3 = vor.u32 %v5531_v57, %v5527_v40  ;;  %v17784_v37 = vld [vmem:[%s24294_s6 + $0x998] ss:$24 sps:$4 sm:$0xff]   ;;  %v5545_v31 = vrot.slane %v5543_v59, 1  ;;  %v17789_v57 = vld [vmem:[%s24294_s6 + $0x4f4] ss:$24 sps:$4 sm:$0xff]  }
 0x481   : > { %v21114_v28 = vor.u32 %v5538_v4, %v5534_v20  ;;  %v17792_v41 = vld [vmem:[%s24294_s6 + $0xc] ss:$24 sps:$4 sm:$0xff]   ;;  %v5541_v20 = vshrl.u32 %v21103_v34, 16  ;;  %v17787_v4 = vld [vmem:[%s24294_s6 + $0x4f0] ss:$24 sps:$4 sm:$0xff]  }
 0x482   : > { %v21135_v15 = vor.u32 %v5552_v5, %v5548_v56  ;;  %v17790_v5 = vld [vmem:[%s24294_s6 + $0x8] ss:$24 sps:$4 sm:$0xff]  }
 0x483   : > { %6373 = vmatprep.mubr.bf16.mxu1 %v21114_v28  ;;  %6459 = vmatprep.mubr.bf16.mxu0 %v21114_v28  ;;  %v21254_v40 = vor.u32 %v5545_v31, %v5541_v20  ;;  %v17793_v56 = vld [vmem:[%s24294_s6 + $0x520] ss:$24 sps:$4 sm:$0xff]   ;;  %v17847_v59 = vld [vmem:[%s24294_s6 + $0x6d0] ss:$24 sps:$4 sm:$0xff]   ;;  %v17858_v31 = vld [vmem:[%s24294_s6 + $0x21c] ss:$24 sps:$4 sm:$0xff]  }
 0x484   : > { %6374 = vmatmul.mubr.bf16.vlgmr.msra.gmra.mrb[32].mxu1 %v21122_v3  ;;  %6460 = vmatmul.mubr.bf16.vlgmr.msra.gmra.mrb[36].mxu0 %v21122_v3  ;;  %v17861_v20 = vld [vmem:[%s24294_s6 + $0x734] ss:$24 sps:$4 sm:$0xff]  }
 0x485   : > { %6385 = vmatpush1.bf16.msra.mxu1 %v17727_v46  ;;  %6471 = vmatpush1.bf16.msra.mxu0 %v17730_v8  ;;  %v17795_v46 = vld [vmem:[%s24294_s6 + $0x524] ss:$24 sps:$4 sm:$0xff]  }
 0x486   : > { %15010 = vmatprep.mubr.msk.bf16.mxu1 %vm6337_vm9, %v21135_v15  ;;  %15011 = vmatprep.mubr.msk.bf16.mxu0 %vm6337_vm9, %v21135_v15  ;;  %v17798_v8 = vld [vmem:[%s24294_s6 + $0x3c] ss:$24 sps:$4 sm:$0xff]  }
 0x487   : > { %6386 = vmatprep.subr.bf16.mxu1 %v17735_v10  ;;  %6472 = vmatprep.subr.bf16.mxu0 %v17738_v12  ;;  %v17796_v10 = vld [vmem:[%s24294_s6 + $0x38] ss:$24 sps:$4 sm:$0xff]   ;;  %v17801_v12 = vld [vmem:[%s24294_s6 + $0x554] ss:$24 sps:$4 sm:$0xff]  }
 0x489   : > { %6387 = vmatpush1.bf16.msra.mxu1 %v17733_v16  ;;  %6473 = vmatpush1.bf16.msra.mxu0 %v17736_v23  ;;  %v17799_v16 = vld [vmem:[%s24294_s6 + $0x550] ss:$24 sps:$4 sm:$0xff]  }
 0x48a   : > { %6388 = vmatprep.subr.bf16.mxu1 %v17741_v24  ;;  %6474 = vmatprep.subr.bf16.mxu0 %v17744_v25  ;;  %v17802_v23 = vld [vmem:[%s24294_s6 + $0x68] ss:$24 sps:$4 sm:$0xff]   ;;  %v17807_v24 = vld [vmem:[%s24294_s6 + $0x584] ss:$24 sps:$4 sm:$0xff]  }
 0x48b   : > { %v17810_v25 = vld [vmem:[%s24294_s6 + $0x9c] ss:$24 sps:$4 sm:$0xff]  }
 0x48d   : > { %6389 = vmatpush1.bf16.msra.mxu1 %v17739_v50  ;;  %6475 = vmatpush1.bf16.msra.mxu0 %v17742_v17  ;;  %v17805_v50 = vld [vmem:[%s24294_s6 + $0x580] ss:$24 sps:$4 sm:$0xff]  }
 0x48e   : > { %6390 = vmatprep.subr.bf16.mxu1 %v17747_v27  ;;  %6476 = vmatprep.subr.bf16.mxu0 %v17750_v26  ;;  %v17808_v17 = vld [vmem:[%s24294_s6 + $0x98] ss:$24 sps:$4 sm:$0xff]   ;;  %v17813_v27 = vld [vmem:[%s24294_s6 + $0x5b4] ss:$24 sps:$4 sm:$0xff]  }
 0x48f   : > { %v17816_v26 = vld [vmem:[%s24294_s6 + $0xcc] ss:$24 sps:$4 sm:$0xff]  }
 0x491   : > { %6391 = vmatpush1.bf16.msra.mxu1 %v17745_v58  ;;  %6477 = vmatpush1.bf16.msra.mxu0 %v17748_v9  ;;  %v17811_v58 = vld [vmem:[%s24294_s6 + $0x5b0] ss:$24 sps:$4 sm:$0xff]  }
 0x492   : > { %6392 = vmatprep.subr.bf16.mxu1 %v17753_v38  ;;  %6478 = vmatprep.subr.bf16.mxu0 %v17756_v32  ;;  %v17814_v9 = vld [vmem:[%s24294_s6 + $0xc8] ss:$24 sps:$4 sm:$0xff]   ;;  %v17819_v38 = vld [vmem:[%s24294_s6 + $0x5e4] ss:$24 sps:$4 sm:$0xff]  }
 0x493   : > { %v17822_v32 = vld [vmem:[%s24294_s6 + $0xfc] ss:$24 sps:$4 sm:$0xff]  }
 0x495   : > { %6393 = vmatpush1.bf16.msra.mxu1 %v17751_v22  ;;  %6479 = vmatpush1.bf16.msra.mxu0 %v17754_v36  ;;  %v17817_v22 = vld [vmem:[%s24294_s6 + $0x5e0] ss:$24 sps:$4 sm:$0xff]  }
 0x496   : > { %6394 = vmatprep.subr.bf16.mxu1 %v17759_v1  ;;  %6480 = vmatprep.subr.bf16.mxu0 %v17762_v39  ;;  %v17820_v36 = vld [vmem:[%s24294_s6 + $0xf8] ss:$24 sps:$4 sm:$0xff]   ;;  %v17825_v1 = vld [vmem:[%s24294_s6 + $0x614] ss:$24 sps:$4 sm:$0xff]  }
 0x497   : > { %v17828_v39 = vld [vmem:[%s24294_s6 + $0x12c] ss:$24 sps:$4 sm:$0xff]  }
 0x499   : > { %6395 = vmatpush1.bf16.msra.mxu1 %v17757_v42  ;;  %6481 = vmatpush1.bf16.msra.mxu0 %v17760_v43  ;;  %v17823_v42 = vld [vmem:[%s24294_s6 + $0x610] ss:$24 sps:$4 sm:$0xff]  }
 0x49a   : > { %6396 = vmatprep.subr.bf16.mxu1 %v17765_v55  ;;  %6482 = vmatprep.subr.bf16.mxu0 %v17768_v11  ;;  %v17826_v43 = vld [vmem:[%s24294_s6 + $0x128] ss:$24 sps:$4 sm:$0xff]   ;;  %v17831_v55 = vld [vmem:[%s24294_s6 + $0x644] ss:$24 sps:$4 sm:$0xff]  }
 0x49b   : > { %v17834_v11 = vld [vmem:[%s24294_s6 + $0x15c] ss:$24 sps:$4 sm:$0xff]  }
 0x49d   : > { %6397 = vmatpush1.bf16.msra.mxu1 %v17763_v29  ;;  %6483 = vmatpush1.bf16.msra.mxu0 %v17766_v44  ;;  %v17829_v29 = vld [vmem:[%s24294_s6 + $0x640] ss:$24 sps:$4 sm:$0xff]  }
 0x49e   : > { %6398 = vmatprep.subr.bf16.mxu1 %v17771_v47  ;;  %6484 = vmatprep.subr.bf16.mxu0 %v17774_v48  ;;  %v17832_v44 = vld [vmem:[%s24294_s6 + $0x158] ss:$24 sps:$4 sm:$0xff]   ;;  %v17837_v47 = vld [vmem:[%s24294_s6 + $0x674] ss:$24 sps:$4 sm:$0xff]  }
 0x49f   : > { %v17840_v48 = vld [vmem:[%s24294_s6 + $0x18c] ss:$24 sps:$4 sm:$0xff]  }
 0x4a1   : > { %6399 = vmatpush1.bf16.msra.mxu1 %v17769_v14  ;;  %6485 = vmatpush1.bf16.msra.mxu0 %v17772_v0  ;;  %v17835_v14 = vld [vmem:[%s24294_s6 + $0x670] ss:$24 sps:$4 sm:$0xff]  }
 0x4a2   : > { %6400 = vmatprep.subr.bf16.mxu1 %v17777_v21  ;;  %6486 = vmatprep.subr.bf16.mxu0 %v17780_v30  ;;  %v17838_v0 = vld [vmem:[%s24294_s6 + $0x188] ss:$24 sps:$4 sm:$0xff]   ;;  %v17843_v21 = vld [vmem:[%s24294_s6 + $0x6a4] ss:$24 sps:$4 sm:$0xff]  }
 0x4a3   : > { %v17846_v30 = vld [vmem:[%s24294_s6 + $0x1bc] ss:$24 sps:$4 sm:$0xff]  }
 0x4a5   : > { %6401 = vmatpush1.bf16.msra.mxu1 %v17775_v7  ;;  %6487 = vmatpush1.bf16.msra.mxu0 %v17778_v52  ;;  %v17841_v7 = vld [vmem:[%s24294_s6 + $0x6a0] ss:$24 sps:$4 sm:$0xff]  }
 0x4a6   : > { %6402 = vmatprep.subr.bf16.mxu1 %v17783_v53  ;;  %6488 = vmatprep.subr.bf16.mxu0 %v17786_v54  ;;  %v17844_v52 = vld [vmem:[%s24294_s6 + $0x1b8] ss:$24 sps:$4 sm:$0xff]   ;;  %v17849_v53 = vld [vmem:[%s24294_s6 + $0x6d4] ss:$24 sps:$4 sm:$0xff]  }
 0x4a7   : > { %v17852_v54 = vld [vmem:[%s24294_s6 + $0x1ec] ss:$24 sps:$4 sm:$0xff]  }
 0x4a9   : > { %6403 = vmatpush1.bf16.msra.mxu1 %v17781_v60  ;;  %6489 = vmatpush1.bf16.msra.mxu0 %v17784_v37  ;;  %v17850_v60 = vld [vmem:[%s24294_s6 + $0x1e8] ss:$24 sps:$4 sm:$0xff]   ;;  %v17855_v37 = vld [vmem:[%s24294_s6 + $0x704] ss:$24 sps:$4 sm:$0xff]  }
 0x4aa   : > { %6513 = vmatprep.subr.bf16.mxu1 %v17789_v57  ;;  %7467 = vmatprep.subr.bf16.mxu0 %v17792_v41  ;;  %v17853_v57 = vld [vmem:[%s24294_s6 + $0x700] ss:$24 sps:$4 sm:$0xff]  }
 0x4ab   : > { %v17856_v41 = vld [vmem:[%s24294_s6 + $0x218] ss:$24 sps:$4 sm:$0xff]  }
 0x4ac   : > { %6417 = vmatmul.mubr.bf16.vlgmr.msra.gmra.mrb[32].mxu1 %v21254_v40  ;;  %6503 = vmatmul.mubr.bf16.vlgmr.msra.gmra.mrb[36].mxu0 %v21254_v40 }
 0x4ad   : > { %6514 = vmatpush1.bf16.msra.mxu1 %v17787_v4  ;;  %6545 = vmatprep.mubr.bf16.mxu1 %v21114_v28  ;;  %v17804_v28 = vld [vmem:[%s24294_s6 + $0x6c] ss:$24 sps:$4 sm:$0xff]  }
 0x4ae   : > { %7468 = vmatpush1.bf16.msra.mxu0 %v17790_v5  ;;  %7499 = vmatprep.mubr.bf16.mxu0 %v21105_v35  ;;  %v17864_v4 = vld [vmem:[%s24294_s6 + $0x24c] ss:$24 sps:$4 sm:$0xff]   ;;  %v17859_v5 = vld [vmem:[%s24294_s6 + $0x730] ss:$24 sps:$4 sm:$0xff]  }
 0x4af   : > { %6515 = vmatprep.subr.bf16.mxu1 %v17795_v46  ;;  %7469 = vmatprep.subr.bf16.mxu0 %v17798_v8  ;;  %v17862_v46 = vld [vmem:[%s24294_s6 + $0x248] ss:$24 sps:$4 sm:$0xff]   ;;  %v17867_v8 = vld [vmem:[%s24294_s6 + $0x764] ss:$24 sps:$4 sm:$0xff]  }
 0x4b1   : > { %6516 = vmatpush1.bf16.msra.mxu1 %v17793_v56  ;;  %v17870_v56 = vld [vmem:[%s24294_s6 + $0x27c] ss:$24 sps:$4 sm:$0xff]  }
 0x4b2   : > { %7470 = vmatpush1.bf16.msra.mxu0 %v17796_v10  ;;  %6517 = vmatprep.subr.bf16.mxu1 %v17801_v12  ;;  %v17865_v10 = vld [vmem:[%s24294_s6 + $0x760] ss:$24 sps:$4 sm:$0xff]  }
 0x4b3   : > { %7471 = vmatprep.subr.bf16.mxu0 %v17804_v28  ;;  %v17868_v12 = vld [vmem:[%s24294_s6 + $0x278] ss:$24 sps:$4 sm:$0xff]   ;;  %v17873_v28 = vld [vmem:[%s24294_s6 + $0x794] ss:$24 sps:$4 sm:$0xff]  }
 0x4b5   : > { %6518 = vmatpush1.bf16.msra.mxu1 %v17799_v16  ;;  %v17876_v16 = vld [vmem:[%s24294_s6 + $0x2ac] ss:$24 sps:$4 sm:$0xff]  }
 0x4b6   : > { %7472 = vmatpush1.bf16.msra.mxu0 %v17802_v23  ;;  %6519 = vmatprep.subr.bf16.mxu1 %v17807_v24  ;;  %v17871_v23 = vld [vmem:[%s24294_s6 + $0x790] ss:$24 sps:$4 sm:$0xff]  }
 0x4b7   : > { %7473 = vmatprep.subr.bf16.mxu0 %v17810_v25  ;;  %v17874_v24 = vld [vmem:[%s24294_s6 + $0x2a8] ss:$24 sps:$4 sm:$0xff]   ;;  %v17879_v25 = vld [vmem:[%s24294_s6 + $0x7c4] ss:$24 sps:$4 sm:$0xff]  }
 0x4b9   : > { %6520 = vmatpush1.bf16.msra.mxu1 %v17805_v50  ;;  %v17882_v50 = vld [vmem:[%s24294_s6 + $0x2dc] ss:$24 sps:$4 sm:$0xff]  }
 0x4ba   : > { %7474 = vmatpush1.bf16.msra.mxu0 %v17808_v17  ;;  %6521 = vmatprep.subr.bf16.mxu1 %v17813_v27  ;;  %v17877_v17 = vld [vmem:[%s24294_s6 + $0x7c0] ss:$24 sps:$4 sm:$0xff]  }
 0x4bb   : > { %7475 = vmatprep.subr.bf16.mxu0 %v17816_v26  ;;  %v17880_v27 = vld [vmem:[%s24294_s6 + $0x2d8] ss:$24 sps:$4 sm:$0xff]   ;;  %v17885_v26 = vld [vmem:[%s24294_s6 + $0x7f4] ss:$24 sps:$4 sm:$0xff]  }
 0x4bd   : > { %6522 = vmatpush1.bf16.msra.mxu1 %v17811_v58  ;;  %v17888_v58 = vld [vmem:[%s24294_s6 + $0x30c] ss:$24 sps:$4 sm:$0xff]  }
 0x4be   : > { %7476 = vmatpush1.bf16.msra.mxu0 %v17814_v9  ;;  %6523 = vmatprep.subr.bf16.mxu1 %v17819_v38  ;;  %v17883_v9 = vld [vmem:[%s24294_s6 + $0x7f0] ss:$24 sps:$4 sm:$0xff]  }
 0x4bf   : > { %7477 = vmatprep.subr.bf16.mxu0 %v17822_v32  ;;  %v17886_v38 = vld [vmem:[%s24294_s6 + $0x308] ss:$24 sps:$4 sm:$0xff]   ;;  %v17891_v32 = vld [vmem:[%s24294_s6 + $0x824] ss:$24 sps:$4 sm:$0xff]  }
 0x4c1   : > { %6524 = vmatpush1.bf16.msra.mxu1 %v17817_v22  ;;  %v17894_v22 = vld [vmem:[%s24294_s6 + $0x33c] ss:$24 sps:$4 sm:$0xff]  }
 0x4c2   : > { %7478 = vmatpush1.bf16.msra.mxu0 %v17820_v36  ;;  %6525 = vmatprep.subr.bf16.mxu1 %v17825_v1  ;;  %v17889_v36 = vld [vmem:[%s24294_s6 + $0x820] ss:$24 sps:$4 sm:$0xff]  }
 0x4c3   : > { %7479 = vmatprep.subr.bf16.mxu0 %v17828_v39  ;;  %v17892_v1 = vld [vmem:[%s24294_s6 + $0x338] ss:$24 sps:$4 sm:$0xff]   ;;  %v17900_v39 = vld [vmem:[%s24294_s6 + $0x36c] ss:$24 sps:$4 sm:$0xff]  }
 0x4c5   : > { %6526 = vmatpush1.bf16.msra.mxu1 %v17823_v42  ;;  %v17898_v42 = vld [vmem:[%s24294_s6 + $0x368] ss:$24 sps:$4 sm:$0xff]  }
 0x4c6   : > { %7480 = vmatpush1.bf16.msra.mxu0 %v17826_v43  ;;  %6527 = vmatprep.subr.bf16.mxu1 %v17831_v55  ;;  %v17903_v43 = vld [vmem:[%s24294_s6 + $0x884] ss:$24 sps:$4 sm:$0xff]  }
 0x4c7   : > { %7481 = vmatprep.subr.bf16.mxu0 %v17834_v11  ;;  %v17906_v55 = vld [vmem:[%s24294_s6 + $0x39c] ss:$24 sps:$4 sm:$0xff]   ;;  %v17901_v11 = vld [vmem:[%s24294_s6 + $0x880] ss:$24 sps:$4 sm:$0xff]  }
 0x4c9   : > { %6528 = vmatpush1.bf16.msra.mxu1 %v17829_v29  ;;  %v17904_v29 = vld [vmem:[%s24294_s6 + $0x398] ss:$24 sps:$4 sm:$0xff]  }
 0x4ca   : > { %7482 = vmatpush1.bf16.msra.mxu0 %v17832_v44  ;;  %6529 = vmatprep.subr.bf16.mxu1 %v17837_v47  ;;  %v17909_v44 = vld [vmem:[%s24294_s6 + $0x8b4] ss:$24 sps:$4 sm:$0xff]  }
 0x4cb   : > { %7483 = vmatprep.subr.bf16.mxu0 %v17840_v48  ;;  %v17912_v47 = vld [vmem:[%s24294_s6 + $0x3cc] ss:$24 sps:$4 sm:$0xff]   ;;  %v17907_v48 = vld [vmem:[%s24294_s6 + $0x8b0] ss:$24 sps:$4 sm:$0xff]  }
 0x4cd   : > { %6530 = vmatpush1.bf16.msra.mxu1 %v17835_v14  ;;  %v17910_v14 = vld [vmem:[%s24294_s6 + $0x3c8] ss:$24 sps:$4 sm:$0xff]  }
 0x4ce   : > { %7484 = vmatpush1.bf16.msra.mxu0 %v17838_v0  ;;  %6531 = vmatprep.subr.bf16.mxu1 %v17843_v21  ;;  %v17915_v0 = vld [vmem:[%s24294_s6 + $0x8e4] ss:$24 sps:$4 sm:$0xff]  }
 0x4cf   : > { %7485 = vmatprep.subr.bf16.mxu0 %v17846_v30  ;;  %v17918_v21 = vld [vmem:[%s24294_s6 + $0x3fc] ss:$24 sps:$4 sm:$0xff]   ;;  %v17913_v30 = vld [vmem:[%s24294_s6 + $0x8e0] ss:$24 sps:$4 sm:$0xff]  }
 0x4d1   : > { %6532 = vmatpush1.bf16.msra.mxu1 %v17841_v7  ;;  %v17916_v7 = vld [vmem:[%s24294_s6 + $0x3f8] ss:$24 sps:$4 sm:$0xff]  }
 0x4d2   : > { %7486 = vmatpush1.bf16.msra.mxu0 %v17844_v52  ;;  %6533 = vmatprep.subr.bf16.mxu1 %v17849_v53  ;;  %v17921_v52 = vld [vmem:[%s24294_s6 + $0x914] ss:$24 sps:$4 sm:$0xff]  }
 0x4d3   : > { %7487 = vmatprep.subr.bf16.mxu0 %v17852_v54  ;;  %v17924_v53 = vld [vmem:[%s24294_s6 + $0x42c] ss:$24 sps:$4 sm:$0xff]   ;;  %v17919_v54 = vld [vmem:[%s24294_s6 + $0x910] ss:$24 sps:$4 sm:$0xff]  }
 0x4d5   : > { %6534 = vmatpush1.bf16.msra.mxu1 %v17847_v59  ;;  %v17922_v59 = vld [vmem:[%s24294_s6 + $0x428] ss:$24 sps:$4 sm:$0xff]  }
 0x4d6   : > { %7488 = vmatpush1.bf16.msra.mxu0 %v17850_v60  ;;  %6535 = vmatprep.subr.bf16.mxu1 %v17855_v37  ;;  %v17927_v60 = vld [vmem:[%s24294_s6 + $0x944] ss:$24 sps:$4 sm:$0xff]  }
 0x4d7   : > { %7489 = vmatprep.subr.bf16.mxu0 %v17858_v31  ;;  %v17930_v37 = vld [vmem:[%s24294_s6 + $0x45c] ss:$24 sps:$4 sm:$0xff]   ;;  %v17925_v31 = vld [vmem:[%s24294_s6 + $0x940] ss:$24 sps:$4 sm:$0xff]  }
 0x4d9   : > { %6536 = vmatpush1.bf16.msra.mxu1 %v17853_v57  ;;  %v17928_v57 = vld [vmem:[%s24294_s6 + $0x458] ss:$24 sps:$4 sm:$0xff]  }
 0x4da   : > { %7490 = vmatpush1.bf16.msra.mxu0 %v17856_v41  ;;  %6537 = vmatprep.subr.bf16.mxu1 %v17861_v20  ;;  %v17933_v41 = vld [vmem:[%s24294_s6 + $0x974] ss:$24 sps:$4 sm:$0xff]  }
 0x4db   : > { %7491 = vmatprep.subr.bf16.mxu0 %v17864_v4  ;;  %v17936_v20 = vld [vmem:[%s24294_s6 + $0x48c] ss:$24 sps:$4 sm:$0xff]   ;;  %v17931_v4 = vld [vmem:[%s24294_s6 + $0x970] ss:$24 sps:$4 sm:$0xff]  }
 0x4dd   : > { %6538 = vmatpush1.bf16.msra.mxu1 %v17859_v5  ;;  %v17934_v5 = vld [vmem:[%s24294_s6 + $0x488] ss:$24 sps:$4 sm:$0xff]  }
 0x4de   : > { %7492 = vmatpush1.bf16.msra.mxu0 %v17862_v46  ;;  %6539 = vmatprep.subr.bf16.mxu1 %v17867_v8  ;;  %v17939_v46 = vld [vmem:[%s24294_s6 + $0x9a4] ss:$24 sps:$4 sm:$0xff]  }
 0x4df   : > { %7493 = vmatprep.subr.bf16.mxu0 %v17870_v56  ;;  %v17942_v8 = vld [vmem:[%s24294_s6 + $0x4bc] ss:$24 sps:$4 sm:$0xff]   ;;  %v17937_v56 = vld [vmem:[%s24294_s6 + $0x9a0] ss:$24 sps:$4 sm:$0xff]  }
 0x4e1   : > { %6540 = vmatpush1.bf16.msra.mxu1 %v17865_v10  ;;  %v17940_v10 = vld [vmem:[%s24294_s6 + $0x4b8] ss:$24 sps:$4 sm:$0xff]  }
 0x4e2   : > { %7494 = vmatpush1.bf16.msra.mxu0 %v17868_v12  ;;  %6541 = vmatprep.subr.bf16.mxu1 %v17873_v28  ;;  %v17945_v12 = vld [vmem:[%s24294_s6 + $0x4] ss:$24 sps:$4 sm:$0xff]  }
 0x4e3   : > { %7495 = vmatprep.subr.bf16.mxu0 %v17876_v16  ;;  %v17948_v28 = vld [vmem:[%s24294_s6 + $0x9cc] ss:$24 sps:$4 sm:$0xff]   ;;  %v17943_v16 = vld [vmem:[%s24294_s6] ss:$24 sps:$4 sm:$0xff]  }
 0x4e5   : > { %6542 = vmatpush1.bf16.msra.mxu1 %v17871_v23  ;;  %v17946_v23 = vld [vmem:[%s24294_s6 + $0x9c8] ss:$24 sps:$4 sm:$0xff]  }
 0x4e6   : > { %7496 = vmatpush1.bf16.msra.mxu0 %v17874_v24  ;;  %6543 = vmatprep.subr.bf16.mxu1 %v17879_v25  ;;  %v17951_v24 = vld [vmem:[%s24294_s6 + $0x34] ss:$24 sps:$4 sm:$0xff]  }
 0x4e7   : > { %7497 = vmatprep.subr.bf16.mxu0 %v17882_v50  ;;  %v17954_v25 = vld [vmem:[%s24294_s6 + $0x9fc] ss:$24 sps:$4 sm:$0xff]   ;;  %v21590_v50 = vrot.slane %v21105_v35, 1 }
 0x4e9   : > { %6544 = vmatpush1.bf16.msra.mxu1 %v17877_v17  ;;  %v17949_v17 = vld [vmem:[%s24294_s6 + $0x30] ss:$24 sps:$4 sm:$0xff]  }
 0x4ea   : > { %7498 = vmatpush1.bf16.msra.mxu0 %v17880_v27  ;;  %6556 = vmatprep.subr.bf16.mxu1 %v17885_v26  ;;  %v17957_v27 = vld [vmem:[%s24294_s6 + $0x64] ss:$24 sps:$4 sm:$0xff]  }
 0x4eb   : > { %7510 = vmatprep.subr.bf16.mxu0 %v17888_v58  ;;  %v17960_v26 = vld [vmem:[%s24294_s6 + $0xa2c] ss:$24 sps:$4 sm:$0xff]   ;;  %v17955_v58 = vld [vmem:[%s24294_s6 + $0x60] ss:$24 sps:$4 sm:$0xff]  }
 0x4ec   : > { %6546 = vmatmul.mubr.bf16.vlgmr.msra.gmra.mrb[36].mxu1 %v21122_v3  ;;  %v17897_v3 = vld [vmem:[%s24294_s6 + $0x854] ss:$24 sps:$4 sm:$0xff]  }
 0x4ed   : > { %7500 = vmatmul.mubr.bf16.vlgmr.msra.gmra.mrb[36].mxu0 %v21100_v33  ;;  %6557 = vmatpush1.bf16.msra.mxu1 %v17883_v9  ;;  %v17958_v9 = vld [vmem:[%s24294_s6 + $0xa28] ss:$24 sps:$4 sm:$0xff]  }
 0x4ee   : > { %15012 = vmatprep.mubr.msk.bf16.mxu1 %vm6337_vm9, %v21135_v15  ;;  %7511 = vmatpush1.bf16.msra.mxu0 %v17886_v38  ;;  %v17895_v15 = vld [vmem:[%s24294_s6 + $0x850] ss:$24 sps:$4 sm:$0xff]   ;;  %v17963_v38 = vld [vmem:[%s24294_s6 + $0x94] ss:$24 sps:$4 sm:$0xff]  }
 0x4ef   : > { %15170 = vmatprep.mubr.msk.bf16.mxu0 %vm6337_vm9, %v21107_v63  ;;  %6558 = vmatprep.subr.bf16.mxu1 %v17891_v32  ;;  %v17966_v32 = vld [vmem:[%s24294_s6 + $0xa5c] ss:$24 sps:$4 sm:$0xff]  }
 0x4f0   : > { %7512 = vmatprep.subr.bf16.mxu0 %v17894_v22  ;;  %v17961_v22 = vld [vmem:[%s24294_s6 + $0x90] ss:$24 sps:$4 sm:$0xff]  }
 0x4f1   : > { %6559 = vmatpush1.bf16.msra.mxu1 %v17889_v36  ;;  %v17964_v36 = vld [vmem:[%s24294_s6 + $0xa58] ss:$24 sps:$4 sm:$0xff]  }
 0x4f2   : > { %7513 = vmatpush1.bf16.msra.mxu0 %v17892_v1  ;;  %6560 = vmatprep.subr.bf16.mxu1 %v17897_v3  ;;  %v17969_v1 = vld [vmem:[%s24294_s6 + $0xc4] ss:$24 sps:$4 sm:$0xff]  }
 0x4f3   : > { %7514 = vmatprep.subr.bf16.mxu0 %v17900_v39  ;;  %v17972_v3 = vld [vmem:[%s24294_s6 + $0xa8c] ss:$24 sps:$4 sm:$0xff]   ;;  %v17967_v39 = vld [vmem:[%s24294_s6 + $0xc0] ss:$24 sps:$4 sm:$0xff]  }
 0x4f5   : > { %6561 = vmatpush1.bf16.msra.mxu1 %v17895_v15  ;;  %v17970_v15 = vld [vmem:[%s24294_s6 + $0xa88] ss:$24 sps:$4 sm:$0xff]  }
 0x4f6   : > { %7515 = vmatpush1.bf16.msra.mxu0 %v17898_v42  ;;  %6562 = vmatprep.subr.bf16.mxu1 %v17903_v43  ;;  %v17975_v42 = vld [vmem:[%s24294_s6 + $0xf4] ss:$24 sps:$4 sm:$0xff]  }
 0x4f7   : > { %7516 = vmatprep.subr.bf16.mxu0 %v17906_v55  ;;  %v17978_v43 = vld [vmem:[%s24294_s6 + $0xabc] ss:$24 sps:$4 sm:$0xff]   ;;  %v17973_v55 = vld [vmem:[%s24294_s6 + $0xf0] ss:$24 sps:$4 sm:$0xff]  }
 0x4f9   : > { %6563 = vmatpush1.bf16.msra.mxu1 %v17901_v11  ;;  %v17976_v11 = vld [vmem:[%s24294_s6 + $0xab8] ss:$24 sps:$4 sm:$0xff]  }
 0x4fa   : > { %7517 = vmatpush1.bf16.msra.mxu0 %v17904_v29  ;;  %6564 = vmatprep.subr.bf16.mxu1 %v17909_v44  ;;  %v17981_v29 = vld [vmem:[%s24294_s6 + $0x124] ss:$24 sps:$4 sm:$0xff]  }
 0x4fb   : > { %7518 = vmatprep.subr.bf16.mxu0 %v17912_v47  ;;  %v17984_v44 = vld [vmem:[%s24294_s6 + $0xaec] ss:$24 sps:$4 sm:$0xff]   ;;  %v17979_v47 = vld [vmem:[%s24294_s6 + $0x120] ss:$24 sps:$4 sm:$0xff]  }
 0x4fd   : > { %6565 = vmatpush1.bf16.msra.mxu1 %v17907_v48  ;;  %v17982_v48 = vld [vmem:[%s24294_s6 + $0xae8] ss:$24 sps:$4 sm:$0xff]  }
 0x4fe   : > { %7519 = vmatpush1.bf16.msra.mxu0 %v17910_v14  ;;  %6566 = vmatprep.subr.bf16.mxu1 %v17915_v0  ;;  %v17987_v14 = vld [vmem:[%s24294_s6 + $0x154] ss:$24 sps:$4 sm:$0xff]  }
 0x4ff   : > { %7520 = vmatprep.subr.bf16.mxu0 %v17918_v21  ;;  %v17990_v0 = vld [vmem:[%s24294_s6 + $0xb1c] ss:$24 sps:$4 sm:$0xff]   ;;  %v17985_v21 = vld [vmem:[%s24294_s6 + $0x150] ss:$24 sps:$4 sm:$0xff]  }
 0x501   : > { %6567 = vmatpush1.bf16.msra.mxu1 %v17913_v30  ;;  %v17988_v30 = vld [vmem:[%s24294_s6 + $0xb18] ss:$24 sps:$4 sm:$0xff]  }
 0x502   : > { %7521 = vmatpush1.bf16.msra.mxu0 %v17916_v7  ;;  %6568 = vmatprep.subr.bf16.mxu1 %v17921_v52  ;;  %v17993_v7 = vld [vmem:[%s24294_s6 + $0x184] ss:$24 sps:$4 sm:$0xff]  }
 0x503   : > { %7522 = vmatprep.subr.bf16.mxu0 %v17924_v53  ;;  %v17996_v52 = vld [vmem:[%s24294_s6 + $0xb4c] ss:$24 sps:$4 sm:$0xff]   ;;  %v17991_v53 = vld [vmem:[%s24294_s6 + $0x180] ss:$24 sps:$4 sm:$0xff]  }
 0x505   : > { %6569 = vmatpush1.bf16.msra.mxu1 %v17919_v54  ;;  %v17994_v54 = vld [vmem:[%s24294_s6 + $0xb48] ss:$24 sps:$4 sm:$0xff]  }
 0x506   : > { %7523 = vmatpush1.bf16.msra.mxu0 %v17922_v59  ;;  %6570 = vmatprep.subr.bf16.mxu1 %v17927_v60  ;;  %v17999_v59 = vld [vmem:[%s24294_s6 + $0x1b4] ss:$24 sps:$4 sm:$0xff]  }
 0x507   : > { %7524 = vmatprep.subr.bf16.mxu0 %v17930_v37  ;;  %v18002_v60 = vld [vmem:[%s24294_s6 + $0xb7c] ss:$24 sps:$4 sm:$0xff]   ;;  %v17997_v37 = vld [vmem:[%s24294_s6 + $0x1b0] ss:$24 sps:$4 sm:$0xff]  }
 0x509   : > { %6571 = vmatpush1.bf16.msra.mxu1 %v17925_v31  ;;  %v18000_v31 = vld [vmem:[%s24294_s6 + $0xb78] ss:$24 sps:$4 sm:$0xff]  }
 0x50a   : > { %7525 = vmatpush1.bf16.msra.mxu0 %v17928_v57  ;;  %6572 = vmatprep.subr.bf16.mxu1 %v17933_v41  ;;  %v18005_v57 = vld [vmem:[%s24294_s6 + $0x1e4] ss:$24 sps:$4 sm:$0xff]  }
 0x50b   : > { %7526 = vmatprep.subr.bf16.mxu0 %v17936_v20  ;;  %v18008_v41 = vld [vmem:[%s24294_s6 + $0xbac] ss:$24 sps:$4 sm:$0xff]   ;;  %v18003_v20 = vld [vmem:[%s24294_s6 + $0x1e0] ss:$24 sps:$4 sm:$0xff]  }
 0x50d   : > { %6573 = vmatpush1.bf16.msra.mxu1 %v17931_v4  ;;  %v18006_v4 = vld [vmem:[%s24294_s6 + $0xba8] ss:$24 sps:$4 sm:$0xff]  }
 0x50e   : > { %7527 = vmatpush1.bf16.msra.mxu0 %v17934_v5  ;;  %6574 = vmatprep.subr.bf16.mxu1 %v17939_v46  ;;  %v18011_v5 = vld [vmem:[%s24294_s6 + $0x214] ss:$24 sps:$4 sm:$0xff]  }
 0x50f   : > { %7528 = vmatprep.subr.bf16.mxu0 %v17942_v8  ;;  %v18014_v46 = vld [vmem:[%s24294_s6 + $0xbdc] ss:$24 sps:$4 sm:$0xff]   ;;  %v18009_v8 = vld [vmem:[%s24294_s6 + $0x210] ss:$24 sps:$4 sm:$0xff]  }
 0x511   : > { %6575 = vmatpush1.bf16.msra.mxu1 %v17937_v56  ;;  %v18012_v56 = vld [vmem:[%s24294_s6 + $0xbd8] ss:$24 sps:$4 sm:$0xff]  }
 0x512   : > { %7529 = vmatpush1.bf16.msra.mxu0 %v17940_v10  ;;  %7381 = vmatprep.subr.bf16.mxu1 %v17945_v12  ;;  %v18017_v10 = vld [vmem:[%s24294_s6 + $0x244] ss:$24 sps:$4 sm:$0xff]  }
 0x513   : > { %8676 = vmatprep.subr.bf16.mxu0 %v17948_v28  ;;  %v18020_v12 = vld [vmem:[%s24294_s6 + $0xc0c] ss:$24 sps:$4 sm:$0xff]   ;;  %v18015_v28 = vld [vmem:[%s24294_s6 + $0x240] ss:$24 sps:$4 sm:$0xff]  }
 0x514   : > { %6589 = vmatmul.mubr.bf16.vlgmr.msra.gmra.mrb[36].mxu1 %v21254_v40  ;;  %v17952_v40 = vld [vmem:[%s24294_s6 + $0x9f8] ss:$24 sps:$4 sm:$0xff]  }
 0x515   : > { %7543 = vmatmul.mubr.bf16.vlgmr.msra.gmra.mrb[36].mxu0 %v21103_v34  ;;  %7382 = vmatpush1.bf16.msra.mxu1 %v17943_v16  ;;  %v18018_v16 = vld [vmem:[%s24294_s6 + $0xc08] ss:$24 sps:$4 sm:$0xff]  }
 0x516   : > { %7413 = vmatprep.mubr.bf16.mxu1 %v21105_v35  ;;  %8677 = vmatpush1.bf16.msra.mxu0 %v17946_v23  ;;  %v18023_v23 = vld [vmem:[%s24294_s6 + $0x274] ss:$24 sps:$4 sm:$0xff]  }
 0x517   : > { %8708 = vmatprep.mubr.bf16.mxu0 %v21590_v50  ;;  %7383 = vmatprep.subr.bf16.mxu1 %v17951_v24  ;;  %v18026_v24 = vld [vmem:[%s24294_s6 + $0xc3c] ss:$24 sps:$4 sm:$0xff]  }
 0x518   : > { %8678 = vmatprep.subr.bf16.mxu0 %v17954_v25  ;;  %v18021_v25 = vld [vmem:[%s24294_s6 + $0x270] ss:$24 sps:$4 sm:$0xff]  }
 0x519   : > { %7384 = vmatpush1.bf16.msra.mxu1 %v17949_v17  ;;  %v18024_v17 = vld [vmem:[%s24294_s6 + $0xc38] ss:$24 sps:$4 sm:$0xff]  }
 0x51a   : > { %8679 = vmatpush1.bf16.msra.mxu0 %v17952_v40  ;;  %7385 = vmatprep.subr.bf16.mxu1 %v17957_v27  ;;  %v18029_v40 = vld [vmem:[%s24294_s6 + $0x2a4] ss:$24 sps:$4 sm:$0xff]  }
 0x51b   : > { %8680 = vmatprep.subr.bf16.mxu0 %v17960_v26  ;;  %v18032_v27 = vld [vmem:[%s24294_s6 + $0xc6c] ss:$24 sps:$4 sm:$0xff]   ;;  %v18027_v26 = vld [vmem:[%s24294_s6 + $0x2a0] ss:$24 sps:$4 sm:$0xff]  }
 0x51d   : > { %7386 = vmatpush1.bf16.msra.mxu1 %v17955_v58  ;;  %v18030_v58 = vld [vmem:[%s24294_s6 + $0xc68] ss:$24 sps:$4 sm:$0xff]  }
 0x51e   : > { %8681 = vmatpush1.bf16.msra.mxu0 %v17958_v9  ;;  %7387 = vmatprep.subr.bf16.mxu1 %v17963_v38  ;;  %v18035_v9 = vld [vmem:[%s24294_s6 + $0x2d4] ss:$24 sps:$4 sm:$0xff]  }
 0x51f   : > { %8682 = vmatprep.subr.bf16.mxu0 %v17966_v32  ;;  %v18038_v38 = vld [vmem:[%s24294_s6 + $0xc9c] ss:$24 sps:$4 sm:$0xff]   ;;  %v18033_v32 = vld [vmem:[%s24294_s6 + $0x2d0] ss:$24 sps:$4 sm:$0xff]  }
 0x521   : > { %7388 = vmatpush1.bf16.msra.mxu1 %v17961_v22  ;;  %v18036_v22 = vld [vmem:[%s24294_s6 + $0xc98] ss:$24 sps:$4 sm:$0xff]  }
 0x522   : > { %8683 = vmatpush1.bf16.msra.mxu0 %v17964_v36  ;;  %7389 = vmatprep.subr.bf16.mxu1 %v17969_v1  ;;  %v18041_v36 = vld [vmem:[%s24294_s6 + $0x304] ss:$24 sps:$4 sm:$0xff]  }
 0x523   : > { %8684 = vmatprep.subr.bf16.mxu0 %v17972_v3  ;;  %v18044_v1 = vld [vmem:[%s24294_s6 + $0xccc] ss:$24 sps:$4 sm:$0xff]   ;;  %v18039_v3 = vld [vmem:[%s24294_s6 + $0x300] ss:$24 sps:$4 sm:$0xff]  }
 0x525   : > { %7390 = vmatpush1.bf16.msra.mxu1 %v17967_v39  ;;  %v18042_v39 = vld [vmem:[%s24294_s6 + $0xcc8] ss:$24 sps:$4 sm:$0xff]  }
 0x526   : > { %8685 = vmatpush1.bf16.msra.mxu0 %v17970_v15  ;;  %7391 = vmatprep.subr.bf16.mxu1 %v17975_v42  ;;  %v21781_v15 = vrot.slane %v21100_v33, 1  ;;  %v18047_v42 = vld [vmem:[%s24294_s6 + $0x334] ss:$24 sps:$4 sm:$0xff]  }
 0x527   : > { %8686 = vmatprep.subr.bf16.mxu0 %v17978_v43  ;;  %v18050_v43 = vld [vmem:[%s24294_s6 + $0xcfc] ss:$24 sps:$4 sm:$0xff]  }
 0x529   : > { %7392 = vmatpush1.bf16.msra.mxu1 %v17973_v55  ;;  %v21792_v55 = vrot.slane %v21107_v63, 1 }
 0x52a   : > { %8687 = vmatpush1.bf16.msra.mxu0 %v17976_v11  ;;  %7393 = vmatprep.subr.bf16.mxu1 %v17981_v29  ;;  %v18045_v11 = vld [vmem:[%s24294_s6 + $0x330] ss:$24 sps:$4 sm:$0xff]  }
 0x52b   : > { %8688 = vmatprep.subr.bf16.mxu0 %v17984_v44  ;;  %v18048_v29 = vld [vmem:[%s24294_s6 + $0xcf8] ss:$24 sps:$4 sm:$0xff]   ;;  %v18053_v44 = vld [vmem:[%s24294_s6 + $0x364] ss:$24 sps:$4 sm:$0xff]  }
 0x52d   : > { %7394 = vmatpush1.bf16.msra.mxu1 %v17979_v47  ;;  %v18056_v47 = vld [vmem:[%s24294_s6 + $0xd2c] ss:$24 sps:$4 sm:$0xff]  }
 0x52e   : > { %8689 = vmatpush1.bf16.msra.mxu0 %v17982_v48  ;;  %7395 = vmatprep.subr.bf16.mxu1 %v17987_v14  ;;  %v18051_v48 = vld [vmem:[%s24294_s6 + $0x360] ss:$24 sps:$4 sm:$0xff]  }
 0x52f   : > { %8690 = vmatprep.subr.bf16.mxu0 %v17990_v0  ;;  %v18054_v14 = vld [vmem:[%s24294_s6 + $0xd28] ss:$24 sps:$4 sm:$0xff]   ;;  %v18059_v0 = vld [vmem:[%s24294_s6 + $0x394] ss:$24 sps:$4 sm:$0xff]  }
 0x531   : > { %7396 = vmatpush1.bf16.msra.mxu1 %v17985_v21  ;;  %v18062_v21 = vld [vmem:[%s24294_s6 + $0xd5c] ss:$24 sps:$4 sm:$0xff]  }
 0x532   : > { %8691 = vmatpush1.bf16.msra.mxu0 %v17988_v30  ;;  %7397 = vmatprep.subr.bf16.mxu1 %v17993_v7  ;;  %v18057_v30 = vld [vmem:[%s24294_s6 + $0x390] ss:$24 sps:$4 sm:$0xff]  }
 0x533   : > { %8692 = vmatprep.subr.bf16.mxu0 %v17996_v52  ;;  %v18060_v7 = vld [vmem:[%s24294_s6 + $0xd58] ss:$24 sps:$4 sm:$0xff]   ;;  %v18065_v52 = vld [vmem:[%s24294_s6 + $0x3c4] ss:$24 sps:$4 sm:$0xff]  }
 0x535   : > { %7398 = vmatpush1.bf16.msra.mxu1 %v17991_v53  ;;  %v18068_v53 = vld [vmem:[%s24294_s6 + $0xd8c] ss:$24 sps:$4 sm:$0xff]  }
 0x536   : > { %8693 = vmatpush1.bf16.msra.mxu0 %v17994_v54  ;;  %7399 = vmatprep.subr.bf16.mxu1 %v17999_v59  ;;  %v18063_v54 = vld [vmem:[%s24294_s6 + $0x3c0] ss:$24 sps:$4 sm:$0xff]  }
 0x537   : > { %8694 = vmatprep.subr.bf16.mxu0 %v18002_v60  ;;  %v18066_v59 = vld [vmem:[%s24294_s6 + $0xd88] ss:$24 sps:$4 sm:$0xff]   ;;  %v18071_v60 = vld [vmem:[%s24294_s6 + $0x3f4] ss:$24 sps:$4 sm:$0xff]  }
 0x539   : > { %7400 = vmatpush1.bf16.msra.mxu1 %v17997_v37  ;;  %v18074_v37 = vld [vmem:[%s24294_s6 + $0xdbc] ss:$24 sps:$4 sm:$0xff]  }
 0x53a   : > { %8695 = vmatpush1.bf16.msra.mxu0 %v18000_v31  ;;  %7401 = vmatprep.subr.bf16.mxu1 %v18005_v57  ;;  %v18069_v31 = vld [vmem:[%s24294_s6 + $0x3f0] ss:$24 sps:$4 sm:$0xff]  }
 0x53b   : > { %8696 = vmatprep.subr.bf16.mxu0 %v18008_v41  ;;  %v18072_v57 = vld [vmem:[%s24294_s6 + $0xdb8] ss:$24 sps:$4 sm:$0xff]   ;;  %v18077_v41 = vld [vmem:[%s24294_s6 + $0x424] ss:$24 sps:$4 sm:$0xff]  }
 0x53d   : > { %7402 = vmatpush1.bf16.msra.mxu1 %v18003_v20  ;;  %v18080_v20 = vld [vmem:[%s24294_s6 + $0xdec] ss:$24 sps:$4 sm:$0xff]  }
 0x53e   : > { %8697 = vmatpush1.bf16.msra.mxu0 %v18006_v4  ;;  %7403 = vmatprep.subr.bf16.mxu1 %v18011_v5  ;;  %v18075_v4 = vld [vmem:[%s24294_s6 + $0x420] ss:$24 sps:$4 sm:$0xff]  }
 0x53f   : > { %8698 = vmatprep.subr.bf16.mxu0 %v18014_v46  ;;  %v18078_v5 = vld [vmem:[%s24294_s6 + $0xde8] ss:$24 sps:$4 sm:$0xff]   ;;  %v18083_v46 = vld [vmem:[%s24294_s6 + $0x454] ss:$24 sps:$4 sm:$0xff]  }
 0x541   : > { %7404 = vmatpush1.bf16.msra.mxu1 %v18009_v8  ;;  %v18086_v8 = vld [vmem:[%s24294_s6 + $0xe1c] ss:$24 sps:$4 sm:$0xff]  }
 0x542   : > { %8699 = vmatpush1.bf16.msra.mxu0 %v18012_v56  ;;  %7405 = vmatprep.subr.bf16.mxu1 %v18017_v10  ;;  %v18081_v56 = vld [vmem:[%s24294_s6 + $0x450] ss:$24 sps:$4 sm:$0xff]  }
 0x543   : > { %8700 = vmatprep.subr.bf16.mxu0 %v18020_v12  ;;  %v18084_v10 = vld [vmem:[%s24294_s6 + $0xe18] ss:$24 sps:$4 sm:$0xff]   ;;  %v18089_v12 = vld [vmem:[%s24294_s6 + $0x484] ss:$24 sps:$4 sm:$0xff]  }
 0x545   : > { %7406 = vmatpush1.bf16.msra.mxu1 %v18015_v28  ;;  %v18092_v28 = vld [vmem:[%s24294_s6 + $0xe4c] ss:$24 sps:$4 sm:$0xff]  }
 0x546   : > { %8701 = vmatpush1.bf16.msra.mxu0 %v18018_v16  ;;  %7407 = vmatprep.subr.bf16.mxu1 %v18023_v23  ;;  %v18087_v16 = vld [vmem:[%s24294_s6 + $0x480] ss:$24 sps:$4 sm:$0xff]  }
 0x547   : > { %8702 = vmatprep.subr.bf16.mxu0 %v18026_v24  ;;  %v18090_v23 = vld [vmem:[%s24294_s6 + $0xe48] ss:$24 sps:$4 sm:$0xff]   ;;  %v18095_v24 = vld [vmem:[%s24294_s6 + $0x4b4] ss:$24 sps:$4 sm:$0xff]  }
 0x549   : > { %7408 = vmatpush1.bf16.msra.mxu1 %v18021_v25  ;;  %v18098_v25 = vld [vmem:[%s24294_s6 + $0xe7c] ss:$24 sps:$4 sm:$0xff]  }
 0x54a   : > { %8703 = vmatpush1.bf16.msra.mxu0 %v18024_v17  ;;  %7409 = vmatprep.subr.bf16.mxu1 %v18029_v40  ;;  %v18093_v17 = vld [vmem:[%s24294_s6 + $0x4b0] ss:$24 sps:$4 sm:$0xff]  }
 0x54b   : > { %8704 = vmatprep.subr.bf16.mxu0 %v18032_v27  ;;  %v18096_v40 = vld [vmem:[%s24294_s6 + $0xe78] ss:$24 sps:$4 sm:$0xff]   ;;  %v18101_v27 = vld [vmem:[%s24294_s6 + $0x14] ss:$24 sps:$4 sm:$0xff]  }
 0x54d   : > { %7410 = vmatpush1.bf16.msra.mxu1 %v18027_v26  ;;  %v18099_v26 = vld [vmem:[%s24294_s6 + $0x10] ss:$24 sps:$4 sm:$0xff]  }
 0x54e   : > { %8705 = vmatpush1.bf16.msra.mxu0 %v18030_v58  ;;  %7411 = vmatprep.subr.bf16.mxu1 %v18035_v9  ;;  %v18104_v58 = vld [vmem:[%s24294_s6 + $0x44] ss:$24 sps:$4 sm:$0xff]   ;;  %v21910_v9 = vrot.slane %v21103_v34, 1 }
 0x54f   : > { %8706 = vmatprep.subr.bf16.mxu0 %v18038_v38  ;;  %v18102_v38 = vld [vmem:[%s24294_s6 + $0x40] ss:$24 sps:$4 sm:$0xff]  }
 0x551   : > { %7412 = vmatpush1.bf16.msra.mxu1 %v18033_v32  ;;  %v18107_v32 = vld [vmem:[%s24294_s6 + $0x74] ss:$24 sps:$4 sm:$0xff]  }
 0x552   : > { %8707 = vmatpush1.bf16.msra.mxu0 %v18036_v22  ;;  %7424 = vmatprep.subr.bf16.mxu1 %v18041_v36  ;;  %v18105_v22 = vld [vmem:[%s24294_s6 + $0x70] ss:$24 sps:$4 sm:$0xff]   ;;  %v18110_v36 = vld [vmem:[%s24294_s6 + $0xa4] ss:$24 sps:$4 sm:$0xff]  }
 0x553   : > { %8719 = vmatprep.subr.bf16.mxu0 %v18044_v1  ;;  %v18113_v1 = vld [vmem:[%s24294_s6 + $0xd4] ss:$24 sps:$4 sm:$0xff]  }
 0x554   : > { %7414 = vmatmul.mubr.bf16.vlgmr.msra.gmra.mrb[32].mxu1 %v21100_v33 }
 0x555   : > { %8709 = vmatmul.mubr.bf16.vlgmr.msra.gmra.mrb[36].mxu0 %v21781_v15  ;;  %7425 = vmatpush1.bf16.msra.mxu1 %v18039_v3  ;;  %v18111_v3 = vld [vmem:[%s24294_s6 + $0xd0] ss:$24 sps:$4 sm:$0xff]  }
 0x556   : > { %15169 = vmatprep.mubr.msk.bf16.mxu1 %vm6337_vm9, %v21107_v63  ;;  %8720 = vmatpush1.bf16.msra.mxu0 %v18042_v39  ;;  %v18116_v39 = vld [vmem:[%s24294_s6 + $0x104] ss:$24 sps:$4 sm:$0xff]  }
 0x557   : > { %15485 = vmatprep.mubr.msk.bf16.mxu0 %vm6337_vm9, %v21792_v55  ;;  %7426 = vmatprep.subr.bf16.mxu1 %v18047_v42  ;;  %v18114_v42 = vld [vmem:[%s24294_s6 + $0x100] ss:$24 sps:$4 sm:$0xff]  }
 0x558   : > { %8721 = vmatprep.subr.bf16.mxu0 %v18050_v43  ;;  %v18119_v43 = vld [vmem:[%s24294_s6 + $0x134] ss:$24 sps:$4 sm:$0xff]  }
 0x559   : > { %7427 = vmatpush1.bf16.msra.mxu1 %v18045_v11  ;;  %v18117_v11 = vld [vmem:[%s24294_s6 + $0x130] ss:$24 sps:$4 sm:$0xff]  }
 0x55a   : > { %8722 = vmatpush1.bf16.msra.mxu0 %v18048_v29  ;;  %7428 = vmatprep.subr.bf16.mxu1 %v18053_v44  ;;  %v18122_v29 = vld [vmem:[%s24294_s6 + $0x164] ss:$24 sps:$4 sm:$0xff]   ;;  %v18120_v44 = vld [vmem:[%s24294_s6 + $0x160] ss:$24 sps:$4 sm:$0xff]  }
 0x55b   : > { %8723 = vmatprep.subr.bf16.mxu0 %v18056_v47  ;;  %v18125_v47 = vld [vmem:[%s24294_s6 + $0x194] ss:$24 sps:$4 sm:$0xff]  }
 0x55d   : > { %7429 = vmatpush1.bf16.msra.mxu1 %v18051_v48  ;;  %v18123_v48 = vld [vmem:[%s24294_s6 + $0x190] ss:$24 sps:$4 sm:$0xff]  }
 0x55e   : > { %8724 = vmatpush1.bf16.msra.mxu0 %v18054_v14  ;;  %7430 = vmatprep.subr.bf16.mxu1 %v18059_v0  ;;  %v18128_v14 = vld [vmem:[%s24294_s6 + $0x1c4] ss:$24 sps:$4 sm:$0xff]   ;;  %v18126_v0 = vld [vmem:[%s24294_s6 + $0x1c0] ss:$24 sps:$4 sm:$0xff]  }
 0x55f   : > { %8725 = vmatprep.subr.bf16.mxu0 %v18062_v21  ;;  %v18131_v21 = vld [vmem:[%s24294_s6 + $0x1f4] ss:$24 sps:$4 sm:$0xff]  }
 0x561   : > { %7431 = vmatpush1.bf16.msra.mxu1 %v18057_v30  ;;  %v18129_v30 = vld [vmem:[%s24294_s6 + $0x1f0] ss:$24 sps:$4 sm:$0xff]  }
 0x562   : > { %8726 = vmatpush1.bf16.msra.mxu0 %v18060_v7  ;;  %7432 = vmatprep.subr.bf16.mxu1 %v18065_v52  ;;  %v18134_v7 = vld [vmem:[%s24294_s6 + $0x224] ss:$24 sps:$4 sm:$0xff]   ;;  %v18132_v52 = vld [vmem:[%s24294_s6 + $0x220] ss:$24 sps:$4 sm:$0xff]  }
 0x563   : > { %8727 = vmatprep.subr.bf16.mxu0 %v18068_v53  ;;  %v18137_v53 = vld [vmem:[%s24294_s6 + $0x254] ss:$24 sps:$4 sm:$0xff]  }
 0x565   : > { %7433 = vmatpush1.bf16.msra.mxu1 %v18063_v54  ;;  %v18135_v54 = vld [vmem:[%s24294_s6 + $0x250] ss:$24 sps:$4 sm:$0xff]  }
 0x566   : > { %8728 = vmatpush1.bf16.msra.mxu0 %v18066_v59  ;;  %7434 = vmatprep.subr.bf16.mxu1 %v18071_v60  ;;  %v18140_v59 = vld [vmem:[%s24294_s6 + $0x284] ss:$24 sps:$4 sm:$0xff]   ;;  %v18138_v60 = vld [vmem:[%s24294_s6 + $0x280] ss:$24 sps:$4 sm:$0xff]  }
 0x567   : > { %8729 = vmatprep.subr.bf16.mxu0 %v18074_v37  ;;  %v18143_v37 = vld [vmem:[%s24294_s6 + $0x2b4] ss:$24 sps:$4 sm:$0xff]  }
 0x569   : > { %7435 = vmatpush1.bf16.msra.mxu1 %v18069_v31  ;;  %v18141_v31 = vld [vmem:[%s24294_s6 + $0x2b0] ss:$24 sps:$4 sm:$0xff]  }
 0x56a   : > { %8730 = vmatpush1.bf16.msra.mxu0 %v18072_v57  ;;  %7436 = vmatprep.subr.bf16.mxu1 %v18077_v41  ;;  %v18146_v57 = vld [vmem:[%s24294_s6 + $0x2e4] ss:$24 sps:$4 sm:$0xff]   ;;  %v18144_v41 = vld [vmem:[%s24294_s6 + $0x2e0] ss:$24 sps:$4 sm:$0xff]  }
 0x56b   : > { %8731 = vmatprep.subr.bf16.mxu0 %v18080_v20  ;;  %v18149_v20 = vld [vmem:[%s24294_s6 + $0x314] ss:$24 sps:$4 sm:$0xff]  }
 0x56d   : > { %7437 = vmatpush1.bf16.msra.mxu1 %v18075_v4  ;;  %v18147_v4 = vld [vmem:[%s24294_s6 + $0x310] ss:$24 sps:$4 sm:$0xff]  }
 0x56e   : > { %8732 = vmatpush1.bf16.msra.mxu0 %v18078_v5  ;;  %7438 = vmatprep.subr.bf16.mxu1 %v18083_v46  ;;  %v18152_v5 = vld [vmem:[%s24294_s6 + $0x344] ss:$24 sps:$4 sm:$0xff]   ;;  %v18150_v46 = vld [vmem:[%s24294_s6 + $0x340] ss:$24 sps:$4 sm:$0xff]  }
 0x56f   : > { %8733 = vmatprep.subr.bf16.mxu0 %v18086_v8  ;;  %v18155_v8 = vld [vmem:[%s24294_s6 + $0x374] ss:$24 sps:$4 sm:$0xff]  }
 0x571   : > { %7439 = vmatpush1.bf16.msra.mxu1 %v18081_v56  ;;  %v18153_v56 = vld [vmem:[%s24294_s6 + $0x370] ss:$24 sps:$4 sm:$0xff]  }
 0x572   : > { %8734 = vmatpush1.bf16.msra.mxu0 %v18084_v10  ;;  %7440 = vmatprep.subr.bf16.mxu1 %v18089_v12  ;;  %v18161_v10 = vld [vmem:[%s24294_s6 + $0x3d4] ss:$24 sps:$4 sm:$0xff]   ;;  %v18159_v12 = vld [vmem:[%s24294_s6 + $0x3d0] ss:$24 sps:$4 sm:$0xff]  }
 0x573   : > { %8735 = vmatprep.subr.bf16.mxu0 %v18092_v28  ;;  %v18164_v28 = vld [vmem:[%s24294_s6 + $0x404] ss:$24 sps:$4 sm:$0xff]  }
 0x575   : > { %7441 = vmatpush1.bf16.msra.mxu1 %v18087_v16  ;;  %v18162_v16 = vld [vmem:[%s24294_s6 + $0x400] ss:$24 sps:$4 sm:$0xff]  }
 0x576   : > { %8736 = vmatpush1.bf16.msra.mxu0 %v18090_v23  ;;  %7442 = vmatprep.subr.bf16.mxu1 %v18095_v24  ;;  %v18167_v23 = vld [vmem:[%s24294_s6 + $0x434] ss:$24 sps:$4 sm:$0xff]   ;;  %v18165_v24 = vld [vmem:[%s24294_s6 + $0x430] ss:$24 sps:$4 sm:$0xff]  }
 0x577   : > { %8737 = vmatprep.subr.bf16.mxu0 %v18098_v25  ;;  %v18170_v25 = vld [vmem:[%s24294_s6 + $0x464] ss:$24 sps:$4 sm:$0xff]  }
 0x579   : > { %7443 = vmatpush1.bf16.msra.mxu1 %v18093_v17  ;;  %v18168_v17 = vld [vmem:[%s24294_s6 + $0x460] ss:$24 sps:$4 sm:$0xff]  }
 0x57a   : > { %8738 = vmatpush1.bf16.msra.mxu0 %v18096_v40  ;;  %7553 = vmatprep.subr.bf16.mxu1 %v18101_v27  ;;  %v18173_v40 = vld [vmem:[%s24294_s6 + $0x494] ss:$24 sps:$4 sm:$0xff]   ;;  %v18171_v27 = vld [vmem:[%s24294_s6 + $0x490] ss:$24 sps:$4 sm:$0xff]  }
 0x57c   : > { %7457 = vmatmul.mubr.bf16.vlgmr.msra.gmra.mrb[32].mxu1 %v21103_v34 }
 0x57d   : > { %8752 = vmatmul.mubr.bf16.vlgmr.msra.gmra.mrb[36].mxu0 %v21910_v9  ;;  %7554 = vmatpush1.bf16.msra.mxu1 %v18099_v26  ;;  %v18176_v26 = vld [vmem:[%s24294_s6 + $0x4c4] ss:$24 sps:$4 sm:$0xff]  }
 0x57e   : > { %7585 = vmatprep.mubr.bf16.mxu1 %v21105_v35  ;;  %7555 = vmatprep.subr.bf16.mxu1 %v18104_v58  ;;  %v18108_v35 = vld [vmem:[%s24294_s6 + $0xa0] ss:$24 sps:$4 sm:$0xff]  }
 0x57f   : > { %9031 = vmatprep.mubr.bf16.mxu0 %v19069_v2  ;;  %v18174_v58 = vld [vmem:[%s24294_s6 + $0x4c0] ss:$24 sps:$4 sm:$0xff]  }
 0x581   : > { %7556 = vmatpush1.bf16.msra.mxu1 %v18102_v38  ;;  %v18179_v38 = vld [vmem:[%s24294_s6 + $0x9c4] ss:$24 sps:$4 sm:$0xff]  }
 0x582   : > { %7557 = vmatprep.subr.bf16.mxu1 %v18107_v32  ;;  %v18177_v32 = vld [vmem:[%s24294_s6 + $0x9c0] ss:$24 sps:$4 sm:$0xff]  }
 0x585   : > { %7558 = vmatpush1.bf16.msra.mxu1 %v18105_v22  ;;  %v18182_v22 = vld [vmem:[%s24294_s6 + $0x9f4] ss:$24 sps:$4 sm:$0xff]  }
 0x586   : > { %7559 = vmatprep.subr.bf16.mxu1 %v18110_v36  ;;  %v18180_v36 = vld [vmem:[%s24294_s6 + $0x9f0] ss:$24 sps:$4 sm:$0xff]  }
 0x589   : > { %7560 = vmatpush1.bf16.msra.mxu1 %v18108_v35  ;;  %v18185_v35 = vld [vmem:[%s24294_s6 + $0xa24] ss:$24 sps:$4 sm:$0xff]  }
 0x58a   : > { %7561 = vmatprep.subr.bf16.mxu1 %v18113_v1  ;;  %v18183_v1 = vld [vmem:[%s24294_s6 + $0xa20] ss:$24 sps:$4 sm:$0xff]  }
 0x58d   : > { %7562 = vmatpush1.bf16.msra.mxu1 %v18111_v3  ;;  %v18186_v3 = vld [vmem:[%s24294_s6 + $0xa50] ss:$24 sps:$4 sm:$0xff]  }
 0x58e   : > { %7563 = vmatprep.subr.bf16.mxu1 %v18116_v39  ;;  %v18191_v39 = vld [vmem:[%s24294_s6 + $0xa84] ss:$24 sps:$4 sm:$0xff]  }
 0x591   : > { %7564 = vmatpush1.bf16.msra.mxu1 %v18114_v42  ;;  %v18189_v42 = vld [vmem:[%s24294_s6 + $0xa80] ss:$24 sps:$4 sm:$0xff]  }
 0x592   : > { %7565 = vmatprep.subr.bf16.mxu1 %v18119_v43  ;;  %v18194_v43 = vld [vmem:[%s24294_s6 + $0xab4] ss:$24 sps:$4 sm:$0xff]  }
 0x595   : > { %7566 = vmatpush1.bf16.msra.mxu1 %v18117_v11  ;;  %v18192_v11 = vld [vmem:[%s24294_s6 + $0xab0] ss:$24 sps:$4 sm:$0xff]  }
 0x596   : > { %7567 = vmatprep.subr.bf16.mxu1 %v18122_v29  ;;  %v18197_v29 = vld [vmem:[%s24294_s6 + $0xae4] ss:$24 sps:$4 sm:$0xff]  }
 0x599   : > { %7568 = vmatpush1.bf16.msra.mxu1 %v18120_v44  ;;  %v18195_v44 = vld [vmem:[%s24294_s6 + $0xae0] ss:$24 sps:$4 sm:$0xff]  }
 0x59a   : > { %7569 = vmatprep.subr.bf16.mxu1 %v18125_v47  ;;  %v18200_v47 = vld [vmem:[%s24294_s6 + $0xb14] ss:$24 sps:$4 sm:$0xff]  }
 0x59d   : > { %7570 = vmatpush1.bf16.msra.mxu1 %v18123_v48  ;;  %v18198_v48 = vld [vmem:[%s24294_s6 + $0xb10] ss:$24 sps:$4 sm:$0xff]  }
 0x59e   : > { %7571 = vmatprep.subr.bf16.mxu1 %v18128_v14  ;;  %v18203_v14 = vld [vmem:[%s24294_s6 + $0xb44] ss:$24 sps:$4 sm:$0xff]  }
 0x5a1   : > { %7572 = vmatpush1.bf16.msra.mxu1 %v18126_v0  ;;  %v18201_v0 = vld [vmem:[%s24294_s6 + $0xb40] ss:$24 sps:$4 sm:$0xff]  }
 0x5a2   : > { %7573 = vmatprep.subr.bf16.mxu1 %v18131_v21  ;;  %v18206_v21 = vld [vmem:[%s24294_s6 + $0xb74] ss:$24 sps:$4 sm:$0xff]  }
 0x5a5   : > { %7574 = vmatpush1.bf16.msra.mxu1 %v18129_v30  ;;  %v18204_v30 = vld [vmem:[%s24294_s6 + $0xb70] ss:$24 sps:$4 sm:$0xff]  }
 0x5a6   : > { %7575 = vmatprep.subr.bf16.mxu1 %v18134_v7  ;;  %v18209_v7 = vld [vmem:[%s24294_s6 + $0xba4] ss:$24 sps:$4 sm:$0xff]  }
 0x5a9   : > { %7576 = vmatpush1.bf16.msra.mxu1 %v18132_v52  ;;  %v18207_v52 = vld [vmem:[%s24294_s6 + $0xba0] ss:$24 sps:$4 sm:$0xff]  }
 0x5aa   : > { %7577 = vmatprep.subr.bf16.mxu1 %v18137_v53  ;;  %v18212_v53 = vld [vmem:[%s24294_s6 + $0xbd4] ss:$24 sps:$4 sm:$0xff]  }
 0x5ad   : > { %7578 = vmatpush1.bf16.msra.mxu1 %v18135_v54  ;;  %v18210_v54 = vld [vmem:[%s24294_s6 + $0xbd0] ss:$24 sps:$4 sm:$0xff]  }
 0x5ae   : > { %7579 = vmatprep.subr.bf16.mxu1 %v18140_v59  ;;  %v18215_v59 = vld [vmem:[%s24294_s6 + $0xc04] ss:$24 sps:$4 sm:$0xff]  }
 0x5b1   : > { %7580 = vmatpush1.bf16.msra.mxu1 %v18138_v60  ;;  %v18213_v60 = vld [vmem:[%s24294_s6 + $0xc00] ss:$24 sps:$4 sm:$0xff]  }
 0x5b2   : > { %7581 = vmatprep.subr.bf16.mxu1 %v18143_v37  ;;  %v18218_v37 = vld [vmem:[%s24294_s6 + $0xc34] ss:$24 sps:$4 sm:$0xff]  }
 0x5b5   : > { %7582 = vmatpush1.bf16.msra.mxu1 %v18141_v31  ;;  %v18216_v31 = vld [vmem:[%s24294_s6 + $0xc30] ss:$24 sps:$4 sm:$0xff]  }
 0x5b6   : > { %7583 = vmatprep.subr.bf16.mxu1 %v18146_v57  ;;  %v18221_v57 = vld [vmem:[%s24294_s6 + $0xc64] ss:$24 sps:$4 sm:$0xff]  }
 0x5b9   : > { %7584 = vmatpush1.bf16.msra.mxu1 %v18144_v41  ;;  %v18219_v41 = vld [vmem:[%s24294_s6 + $0xc60] ss:$24 sps:$4 sm:$0xff]  }
 0x5ba   : > { %7596 = vmatprep.subr.bf16.mxu1 %v18149_v20  ;;  %v18224_v20 = vld [vmem:[%s24294_s6 + $0xc94] ss:$24 sps:$4 sm:$0xff]  }
 0x5bc   : > { %7586 = vmatmul.mubr.bf16.vlgmr.msra.gmra.mrb[36].mxu1 %v21100_v33  ;;  %v18158_v33 = vld [vmem:[%s24294_s6 + $0x3a4] ss:$24 sps:$4 sm:$0xff]  }
 0x5bd   : > { %7597 = vmatpush1.bf16.msra.mxu1 %v18147_v4  ;;  %15171 = vmatprep.mubr.msk.bf16.mxu1 %vm6337_vm9, %v21107_v63  ;;  %v18156_v63 = vld [vmem:[%s24294_s6 + $0x3a0] ss:$24 sps:$4 sm:$0xff]   ;;  %v18222_v4 = vld [vmem:[%s24294_s6 + $0xc90] ss:$24 sps:$4 sm:$0xff]  }
 0x5be   : > { %7598 = vmatprep.subr.bf16.mxu1 %v18152_v5  ;;  %v18227_v5 = vld [vmem:[%s24294_s6 + $0xcc4] ss:$24 sps:$4 sm:$0xff]  }
 0x5c1   : > { %7599 = vmatpush1.bf16.msra.mxu1 %v18150_v46  ;;  %v18225_v46 = vld [vmem:[%s24294_s6 + $0xcc0] ss:$24 sps:$4 sm:$0xff]  }
 0x5c2   : > { %7600 = vmatprep.subr.bf16.mxu1 %v18155_v8  ;;  %v18230_v8 = vld [vmem:[%s24294_s6 + $0xcf4] ss:$24 sps:$4 sm:$0xff]  }
 0x5c5   : > { %7601 = vmatpush1.bf16.msra.mxu1 %v18153_v56  ;;  %v18228_v56 = vld [vmem:[%s24294_s6 + $0xcf0] ss:$24 sps:$4 sm:$0xff]  }
 0x5c6   : > { %7602 = vmatprep.subr.bf16.mxu1 %v18158_v33  ;;  %v18233_v33 = vld [vmem:[%s24294_s6 + $0xd24] ss:$24 sps:$4 sm:$0xff]  }
 0x5c9   : > { %7603 = vmatpush1.bf16.msra.mxu1 %v18156_v63  ;;  %v18231_v63 = vld [vmem:[%s24294_s6 + $0xd20] ss:$24 sps:$4 sm:$0xff]  }
 0x5ca   : > { %7604 = vmatprep.subr.bf16.mxu1 %v18161_v10  ;;  %v18236_v10 = vld [vmem:[%s24294_s6 + $0xd54] ss:$24 sps:$4 sm:$0xff]  }
 0x5cd   : > { %7605 = vmatpush1.bf16.msra.mxu1 %v18159_v12  ;;  %v18234_v12 = vld [vmem:[%s24294_s6 + $0xd50] ss:$24 sps:$4 sm:$0xff]  }
 0x5ce   : > { %7606 = vmatprep.subr.bf16.mxu1 %v18164_v28  ;;  %v18239_v28 = vld [vmem:[%s24294_s6 + $0xd84] ss:$24 sps:$4 sm:$0xff]  }
 0x5d1   : > { %7607 = vmatpush1.bf16.msra.mxu1 %v18162_v16  ;;  %v18237_v16 = vld [vmem:[%s24294_s6 + $0xd80] ss:$24 sps:$4 sm:$0xff]  }
 0x5d2   : > { %7608 = vmatprep.subr.bf16.mxu1 %v18167_v23  ;;  %v18242_v23 = vld [vmem:[%s24294_s6 + $0xdb4] ss:$24 sps:$4 sm:$0xff]  }
 0x5d5   : > { %7609 = vmatpush1.bf16.msra.mxu1 %v18165_v24  ;;  %v18240_v24 = vld [vmem:[%s24294_s6 + $0xdb0] ss:$24 sps:$4 sm:$0xff]  }
 0x5d6   : > { %7610 = vmatprep.subr.bf16.mxu1 %v18170_v25  ;;  %v18245_v25 = vld [vmem:[%s24294_s6 + $0xde4] ss:$24 sps:$4 sm:$0xff]  }
 0x5d9   : > { %7611 = vmatpush1.bf16.msra.mxu1 %v18168_v17  ;;  %v18243_v17 = vld [vmem:[%s24294_s6 + $0xde0] ss:$24 sps:$4 sm:$0xff]  }
 0x5da   : > { %7612 = vmatprep.subr.bf16.mxu1 %v18173_v40  ;;  %v18248_v40 = vld [vmem:[%s24294_s6 + $0xe14] ss:$24 sps:$4 sm:$0xff]  }
 0x5dd   : > { %7613 = vmatpush1.bf16.msra.mxu1 %v18171_v27  ;;  %v18246_v27 = vld [vmem:[%s24294_s6 + $0xe10] ss:$24 sps:$4 sm:$0xff]  }
 0x5de   : > { %7614 = vmatprep.subr.bf16.mxu1 %v18176_v26  ;;  %v18251_v26 = vld [vmem:[%s24294_s6 + $0xe44] ss:$24 sps:$4 sm:$0xff]  }
 0x5e1   : > { %7615 = vmatpush1.bf16.msra.mxu1 %v18174_v58  ;;  %v18249_v58 = vld [vmem:[%s24294_s6 + $0xe40] ss:$24 sps:$4 sm:$0xff]  }
 0x5e2   : > { %8590 = vmatprep.subr.bf16.mxu1 %v18179_v38  ;;  %v18254_v38 = vld [vmem:[%s24294_s6 + $0xe74] ss:$24 sps:$4 sm:$0xff]  }
 0x5e4   : > { %7629 = vmatmul.mubr.bf16.vlgmr.msra.gmra.mrb[36].mxu1 %v21103_v34  ;;  %v18188_v34 = vld [vmem:[%s24294_s6 + $0xa54] ss:$24 sps:$4 sm:$0xff]  }
 0x5e5   : > { %8591 = vmatpush1.bf16.msra.mxu1 %v18177_v32  ;;  %8622 = vmatprep.mubr.bf16.mxu1 %v21590_v50  ;;  %v18252_v32 = vld [vmem:[%s24294_s6 + $0xe70] ss:$24 sps:$4 sm:$0xff]  }
 0x5e6   : > { %8592 = vmatprep.subr.bf16.mxu1 %v18182_v22  ;;  %v18257_v22 = vld [vmem:[%s24294_s6 + $0x9d4] ss:$24 sps:$4 sm:$0xff]  }
 0x5e9   : > { %8593 = vmatpush1.bf16.msra.mxu1 %v18180_v36  ;;  %v18255_v36 = vld [vmem:[%s24294_s6 + $0x9d0] ss:$24 sps:$4 sm:$0xff]  }
 0x5ea   : > { %8594 = vmatprep.subr.bf16.mxu1 %v18185_v35  ;;  %v22236_v35 = vld [vmem:[%s24295_s7] sm:$0x3f] }
 0x5ed   : > { %8595 = vmatpush1.bf16.msra.mxu1 %v18183_v1  ;;  %v18260_v1 = vld [vmem:[%s24294_s6 + $0xa04] ss:$24 sps:$4 sm:$0xff]  }
 0x5ee   : > { %8596 = vmatprep.subr.bf16.mxu1 %v18188_v34  ;;  %v8873_v34 = vrot.slane %v22236_v35, %v19459_v18 }
 0x5f1   : > { %8597 = vmatpush1.bf16.msra.mxu1 %v18186_v3  ;;  %v18258_v3 = vld [vmem:[%s24294_s6 + $0xa00] ss:$24 sps:$4 sm:$0xff]  }
 0x5f2   : > { %8598 = vmatprep.subr.bf16.mxu1 %v18191_v39  ;;  %v8877_v39 = vrot.slane %v22236_v35, %v1575_v19  ;;  %v18266_v19 = vld [vmem:[%s24294_s6 + $0xa64] ss:$24 sps:$4 sm:$0xff]  }
 0x5f5   : > { %8599 = vmatpush1.bf16.msra.mxu1 %v18189_v42  ;;  %v18263_v42 = vld [vmem:[%s24294_s6 + $0xa34] ss:$24 sps:$4 sm:$0xff]  }
 0x5f6   : > { %8600 = vmatprep.subr.bf16.mxu1 %v18194_v43 }
 0x5f9   : > { %8601 = vmatpush1.bf16.msra.mxu1 %v18192_v11 }
 0x5fa   : > { %8602 = vmatprep.subr.bf16.mxu1 %v18197_v29 }
 0x5fd   : > { %8603 = vmatpush1.bf16.msra.mxu1 %v18195_v44 }
 0x5fe   : > { %8604 = vmatprep.subr.bf16.mxu1 %v18200_v47 }
 0x601   : > { %8605 = vmatpush1.bf16.msra.mxu1 %v18198_v48 }
 0x602   : > { %8606 = vmatprep.subr.bf16.mxu1 %v18203_v14 }
 0x605   : > { %8607 = vmatpush1.bf16.msra.mxu1 %v18201_v0 }
 0x606   : > { %8608 = vmatprep.subr.bf16.mxu1 %v18206_v21 }
 0x609   : > { %8609 = vmatpush1.bf16.msra.mxu1 %v18204_v30 }
 0x60a   : > { %8610 = vmatprep.subr.bf16.mxu1 %v18209_v7 }
 0x60d   : > { %8611 = vmatpush1.bf16.msra.mxu1 %v18207_v52  ;;  %v18264_v52 = vld [vmem:[%s24294_s6 + $0xa60] ss:$24 sps:$4 sm:$0xff]  }
 0x60e   : > { %8612 = vmatprep.subr.bf16.mxu1 %v18212_v53 }
 0x611   : > { %8613 = vmatpush1.bf16.msra.mxu1 %v18210_v54  ;;  %v18269_v54 = vld [vmem:[%s24294_s6 + $0xa94] ss:$24 sps:$4 sm:$0xff]  }
 0x612   : > { %8614 = vmatprep.subr.bf16.mxu1 %v18215_v59 }
 0x615   : > { %8615 = vmatpush1.bf16.msra.mxu1 %v18213_v60 }
 0x616   : > { %8616 = vmatprep.subr.bf16.mxu1 %v18218_v37 }
 0x619   : > { %8617 = vmatpush1.bf16.msra.mxu1 %v18216_v31 }
 0x61a   : > { %8618 = vmatprep.subr.bf16.mxu1 %v18221_v57 }
 0x61d   : > { %8619 = vmatpush1.bf16.msra.mxu1 %v18219_v41 }
 0x61e   : > { %8620 = vmatprep.subr.bf16.mxu1 %v18224_v20  ;;  %v18267_v20 = vld [vmem:[%s24294_s6 + $0xa90] ss:$24 sps:$4 sm:$0xff]  }
 0x621   : > { %8621 = vmatpush1.bf16.msra.mxu1 %v18222_v4 }
 0x622   : > { %8633 = vmatprep.subr.bf16.mxu1 %v18227_v5 }
 0x624   : > { %8623 = vmatmul.mubr.bf16.vlgmr.msra.gmra.mrb[32].mxu1 %v21781_v15 }
 0x625   : > { %8634 = vmatpush1.bf16.msra.mxu1 %v18225_v46  ;;  %15484 = vmatprep.mubr.msk.bf16.mxu1 %vm6337_vm9, %v21792_v55 }
 0x626   : > { %8635 = vmatprep.subr.bf16.mxu1 %v18230_v8  ;;  %v18272_v8 = vld [vmem:[%s24294_s6 + $0xac4] ss:$24 sps:$4 sm:$0xff]  }
 0x629   : > { %8636 = vmatpush1.bf16.msra.mxu1 %v18228_v56 }
 0x62a   : > { %8637 = vmatprep.subr.bf16.mxu1 %v18233_v33 }
 0x62d   : > { %8638 = vmatpush1.bf16.msra.mxu1 %v18231_v63 }
 0x62e   : > { %8639 = vmatprep.subr.bf16.mxu1 %v18236_v10  ;;  %v18270_v10 = vld [vmem:[%s24294_s6 + $0xac0] ss:$24 sps:$4 sm:$0xff]  }
 0x631   : > { %8640 = vmatpush1.bf16.msra.mxu1 %v18234_v12  ;;  %v18275_v12 = vld [vmem:[%s24294_s6 + $0xaf4] ss:$24 sps:$4 sm:$0xff]  }
 0x632   : > { %8641 = vmatprep.subr.bf16.mxu1 %v18239_v28  ;;  %v18273_v28 = vld [vmem:[%s24294_s6 + $0xaf0] ss:$24 sps:$4 sm:$0xff]  }
 0x635   : > { %8642 = vmatpush1.bf16.msra.mxu1 %v18237_v16  ;;  %v18278_v16 = vld [vmem:[%s24294_s6 + $0xb24] ss:$24 sps:$4 sm:$0xff]  }
 0x636   : > { %8643 = vmatprep.subr.bf16.mxu1 %v18242_v23  ;;  %v18276_v23 = vld [vmem:[%s24294_s6 + $0xb20] ss:$24 sps:$4 sm:$0xff]  }
 0x639   : > { %8644 = vmatpush1.bf16.msra.mxu1 %v18240_v24  ;;  %v18281_v24 = vld [vmem:[%s24294_s6 + $0xb54] ss:$24 sps:$4 sm:$0xff]  }
 0x63a   : > { %8645 = vmatprep.subr.bf16.mxu1 %v18245_v25  ;;  %v18279_v25 = vld [vmem:[%s24294_s6 + $0xb50] ss:$24 sps:$4 sm:$0xff]  }
 0x63d   : > { %8646 = vmatpush1.bf16.msra.mxu1 %v18243_v17  ;;  %v18284_v17 = vld [vmem:[%s24294_s6 + $0xb84] ss:$24 sps:$4 sm:$0xff]  }
 0x63e   : > { %8647 = vmatprep.subr.bf16.mxu1 %v18248_v40  ;;  %v18282_v40 = vld [vmem:[%s24294_s6 + $0xb80] ss:$24 sps:$4 sm:$0xff]  }
 0x641   : > { %8648 = vmatpush1.bf16.msra.mxu1 %v18246_v27  ;;  %v18287_v27 = vld [vmem:[%s24294_s6 + $0xbb4] ss:$24 sps:$4 sm:$0xff]  }
 0x642   : > { %8649 = vmatprep.subr.bf16.mxu1 %v18251_v26  ;;  %v18285_v26 = vld [vmem:[%s24294_s6 + $0xbb0] ss:$24 sps:$4 sm:$0xff]  }
 0x645   : > { %8650 = vmatpush1.bf16.msra.mxu1 %v18249_v58  ;;  %v18290_v58 = vld [vmem:[%s24294_s6 + $0xbe4] ss:$24 sps:$4 sm:$0xff]  }
 0x646   : > { %8651 = vmatprep.subr.bf16.mxu1 %v18254_v38  ;;  %v18288_v38 = vld [vmem:[%s24294_s6 + $0xbe0] ss:$24 sps:$4 sm:$0xff]  }
 0x649   : > { %8652 = vmatpush1.bf16.msra.mxu1 %v18252_v32  ;;  %v18293_v32 = vld [vmem:[%s24294_s6 + $0xc14] ss:$24 sps:$4 sm:$0xff]  }
 0x64a   : > { %8762 = vmatprep.subr.bf16.mxu1 %v18257_v22  ;;  %v18291_v22 = vld [vmem:[%s24294_s6 + $0xc10] ss:$24 sps:$4 sm:$0xff]  }
 0x64c   : > { %8666 = vmatmul.mubr.bf16.vlgmr.msra.gmra.mrb[32].mxu1 %v21910_v9 }
 0x64d   : > { %8763 = vmatpush1.bf16.msra.mxu1 %v18255_v36  ;;  %8794 = vmatprep.mubr.bf16.mxu1 %v21590_v50  ;;  %v18261_v50 = vld [vmem:[%s24294_s6 + $0xa30] ss:$24 sps:$4 sm:$0xff]   ;;  %v18296_v36 = vld [vmem:[%s24294_s6 + $0xc44] ss:$24 sps:$4 sm:$0xff]  }
 0x64e   : > { %8764 = vmatprep.subr.bf16.mxu1 %v18260_v1  ;;  %v18294_v1 = vld [vmem:[%s24294_s6 + $0xc40] ss:$24 sps:$4 sm:$0xff]  }
 0x650   : > { %v8753_v43 = vpop.f32.mrb[36].mxu0 }
 0x651   : > { %v8894_v11 = vadd.f32 %v8873_v34, %v8753_v43  ;;  %v8755_v29 = vpop.f32.mrb[37].mxu0  ;;  %8765 = vmatpush1.bf16.msra.mxu1 %v18258_v3  ;;  %v18297_v3 = vld [vmem:[%s24294_s6 + $0xc70] ss:$24 sps:$4 sm:$0xff]   ;;  %v18305_v43 = vld [vmem:[%s24294_s6 + $0xcd4] ss:$24 sps:$4 sm:$0xff]  }
 0x652   : > { %v8895_v44 = vadd.f32 %v8877_v39, %v8755_v29  ;;  %v8757_v47 = vpop.f32.mrb[38].mxu0  ;;  %8766 = vmatprep.subr.bf16.mxu1 %v18263_v42  ;;  %v18300_v42 = vld [vmem:[%s24294_s6 + $0xca0] ss:$24 sps:$4 sm:$0xff]   ;;  %v18308_v29 = vld [vmem:[%s24294_s6 + $0xd04] ss:$24 sps:$4 sm:$0xff]  }
 0x653   : > { %v8906_v48 = vmax.f32 %v8894_v11, 0.0  ;;  %v8900_v14 = vadd.f32 %v8873_v34, %v8757_v47  ;;  %v8759_v0 = vpop.f32.mrb[39].mxu0  ;;  %v18299_v34 = vld [vmem:[%s24294_s6 + $0xc74] ss:$24 sps:$4 sm:$0xff]   ;;  %v18303_v11 = vld [vmem:[%s24294_s6 + $0xcd0] ss:$24 sps:$4 sm:$0xff]  }
 0x654   : > { %v8907_v21 = vmax.f32 %v8895_v44, 0.0  ;;  %v8901_v30 = vadd.f32 %v8877_v39, %v8759_v0  ;;  %v18302_v39 = vld [vmem:[%s24294_s6 + $0xca4] ss:$24 sps:$4 sm:$0xff]   ;;  %v18311_v44 = vld [vmem:[%s24294_s6 + $0xd34] ss:$24 sps:$4 sm:$0xff]  }
 0x655   : > { %v8912_v7 = vmax.f32 %v8900_v14, 0.0  ;;  %8767 = vmatpush1.bf16.msra.mxu1 %v18261_v50  ;;  %v8934_v59 = vrot.slane %v8906_v48, 1  ;;  %v18306_v50 = vld [vmem:[%s24294_s6 + $0xd00] ss:$24 sps:$4 sm:$0xff]   ;;  %v18309_v47 = vld [vmem:[%s24294_s6 + $0xd30] ss:$24 sps:$4 sm:$0xff]  }
 0x656   : > { %v8913_v53 = vmax.f32 %v8901_v30, 0.0  ;;  %8768 = vmatprep.subr.bf16.mxu1 %v18266_v19  ;;  %v8937_v37 = vrot.slane %v8907_v21, 1  ;;  %v18317_v19 = vld [vmem:[%s24294_s6 + $0xd94] ss:$24 sps:$4 sm:$0xff]   ;;  %v18320_v14 = vld [vmem:[%s24294_s6 + $0xdc4] ss:$24 sps:$4 sm:$0xff]  }
 0x657   : > { %v8935_v60 = vrot.slane %v8912_v7, 1  ;;  %v18318_v0 = vld [vmem:[%s24294_s6 + $0xdc0] ss:$24 sps:$4 sm:$0xff]   ;;  %v18321_v30 = vld [vmem:[%s24294_s6 + $0xdf0] ss:$24 sps:$4 sm:$0xff]  }
 0x658   : > { %v8938_v31 = vrot.slane %v8913_v53, 1 }
 0x659   : > { %v8936_v57 = vsel %vm1227_vm3, %v8934_v59, %v8935_v60  ;;  %v22267_v41 = vmax.f32 %v8912_v7, %v8935_v60  ;;  %8769 = vmatpush1.bf16.msra.mxu1 %v18264_v52  ;;  %v18326_v7 = vld [vmem:[%s24294_s6 + $0xe24] ss:$24 sps:$4 sm:$0xff]   ;;  %v18324_v52 = vld [vmem:[%s24294_s6 + $0xe20] ss:$24 sps:$4 sm:$0xff]  }
 0x65a   : > { %v22272_v4 = vmax.f32 %v8906_v48, %v8936_v57  ;;  %v8939_v5 = vsel %vm1227_vm3, %v8937_v37, %v8938_v31  ;;  %v22275_v46 = vmax.f32 %v8913_v53, %v8938_v31  ;;  %8770 = vmatprep.subr.bf16.mxu1 %v18269_v54  ;;  %v18315_v48 = vld [vmem:[%s24294_s6 + $0xd90] ss:$24 sps:$4 sm:$0xff]   ;;  %v18329_v53 = vld [vmem:[%s24294_s6 + $0xe54] ss:$24 sps:$4 sm:$0xff]   ;;  %v18332_v59 = vld [vmem:[%s24294_s6 + $0xe84] ss:$24 sps:$4 sm:$0xff]   ;;  %v8865_v37 = vrot.slane %v22236_v35, %v19529_v61 }
 0x65b   : > { %v22280_v56 = vmax.f32 %v8907_v21, %v8939_v5  ;;  %v18323_v21 = vld [vmem:[%s24294_s6 + $0xdf4] ss:$24 sps:$4 sm:$0xff]   ;;  %v18327_v54 = vld [vmem:[%s24294_s6 + $0xe50] ss:$24 sps:$4 sm:$0xff]   ;;  %v18330_v60 = vld [vmem:[%s24294_s6 + $0xe80] ss:$24 sps:$4 sm:$0xff]   ;;  %v8869_v57 = vrot.slane %v22236_v35, %v19532_v62 }
 0x65c   : > { %v8972_v33 = vpack.c.bf16 %v22267_v41, %v22272_v4  ;;  %v18336_v31 = vld [vmem:[%s24298_s10] ss:$12 sps:$4 sm:$0xff]   ;;  %v18344_v5 = vld [vmem:[%s24298_s10 + $0x1c] ss:$12 sps:$4 sm:$0xff]   ;;  %v18386_v4 = vld [vmem:[%s24298_s10 + $0xc4] ss:$12 sps:$4 sm:$0xff]  }
 0x65d   : > { %v8973_v63 = vpack.c.bf16 %v22275_v46, %v22280_v56  ;;  %8771 = vmatpush1.bf16.msra.mxu1 %v18267_v20  ;;  %v18338_v20 = vld [vmem:[%s24298_s10 + $0x4] ss:$12 sps:$4 sm:$0xff]   ;;  %v18378_v41 = vld [vmem:[%s24298_s10 + $0xa8] ss:$12 sps:$4 sm:$0xff]  }
 0x65e   : > { %8772 = vmatprep.subr.bf16.mxu1 %v18272_v8  ;;  %v8988_v46 = vand.u32 %v8972_v33, %v19502_v51  ;;  %v18372_v56 = vld [vmem:[%s24298_s10 + $0x90] ss:$12 sps:$4 sm:$0xff]   ;;  %v18384_v33 = vld [vmem:[%s24298_s10 + $0xc0] ss:$12 sps:$4 sm:$0xff]  }
 0x661   : > { %8773 = vmatpush1.bf16.msra.mxu1 %v18270_v10 }
 0x662   : > { %8774 = vmatprep.subr.bf16.mxu1 %v18275_v12  ;;  %v18342_v12 = vld [vmem:[%s24298_s10 + $0x18] ss:$12 sps:$4 sm:$0xff]  }
 0x665   : > { %8775 = vmatpush1.bf16.msra.mxu1 %v18273_v28 }
 0x666   : > { %8776 = vmatprep.subr.bf16.mxu1 %v18278_v16 }
 0x669   : > { %8777 = vmatpush1.bf16.msra.mxu1 %v18276_v23 }
 0x66a   : > { %8778 = vmatprep.subr.bf16.mxu1 %v18281_v24 }
 0x66d   : > { %8779 = vmatpush1.bf16.msra.mxu1 %v18279_v25 }
 0x66e   : > { %8780 = vmatprep.subr.bf16.mxu1 %v18284_v17  ;;  %v18350_v17 = vld [vmem:[%s24298_s10 + $0x34] ss:$12 sps:$4 sm:$0xff]  }
 0x671   : > { %8781 = vmatpush1.bf16.msra.mxu1 %v18282_v40 }
 0x672   : > { %8782 = vmatprep.subr.bf16.mxu1 %v18287_v27 }
 0x675   : > { %8783 = vmatpush1.bf16.msra.mxu1 %v18285_v26 }
 0x676   : > { %8784 = vmatprep.subr.bf16.mxu1 %v18290_v58  ;;  %v18348_v58 = vld [vmem:[%s24298_s10 + $0x30] ss:$12 sps:$4 sm:$0xff]  }
 0x679   : > { %8785 = vmatpush1.bf16.msra.mxu1 %v18288_v38 }
 0x67a   : > { %8786 = vmatprep.subr.bf16.mxu1 %v18293_v32 }
 0x67d   : > { %8787 = vmatpush1.bf16.msra.mxu1 %v18291_v22 }
 0x67e   : > { %8788 = vmatprep.subr.bf16.mxu1 %v18296_v36  ;;  %v18356_v36 = vld [vmem:[%s24298_s10 + $0x4c] ss:$12 sps:$4 sm:$0xff]  }
 0x681   : > { %8789 = vmatpush1.bf16.msra.mxu1 %v18294_v1 }
 0x682   : > { %8790 = vmatprep.subr.bf16.mxu1 %v18299_v34 }
 0x685   : > { %8791 = vmatpush1.bf16.msra.mxu1 %v18297_v3 }
 0x686   : > { %8792 = vmatprep.subr.bf16.mxu1 %v18302_v39 }
 0x689   : > { %8793 = vmatpush1.bf16.msra.mxu1 %v18300_v42  ;;  %v18354_v42 = vld [vmem:[%s24298_s10 + $0x48] ss:$12 sps:$4 sm:$0xff]  }
 0x68a   : > { %8805 = vmatprep.subr.bf16.mxu1 %v18305_v43 }
 0x68c   : > { %8795 = vmatmul.mubr.bf16.vlgmr.msra.gmra.mrb[36].mxu1 %v21781_v15  ;;  %v18314_v15 = vld [vmem:[%s24294_s6 + $0xd64] ss:$24 sps:$4 sm:$0xff]  }
 0x68d   : > { %8806 = vmatpush1.bf16.msra.mxu1 %v18303_v11  ;;  %15486 = vmatprep.mubr.msk.bf16.mxu1 %vm6337_vm9, %v21792_v55  ;;  %v18312_v55 = vld [vmem:[%s24294_s6 + $0xd60] ss:$24 sps:$4 sm:$0xff]  }
 0x68e   : > { %8807 = vmatprep.subr.bf16.mxu1 %v18308_v29 }
 0x691   : > { %8808 = vmatpush1.bf16.msra.mxu1 %v18306_v50 }
 0x692   : > { %8809 = vmatprep.subr.bf16.mxu1 %v18311_v44  ;;  %v18362_v44 = vld [vmem:[%s24298_s10 + $0x64] ss:$12 sps:$4 sm:$0xff]  }
 0x695   : > { %8810 = vmatpush1.bf16.msra.mxu1 %v18309_v47 }
 0x696   : > { %8811 = vmatprep.subr.bf16.mxu1 %v18314_v15 }
 0x699   : > { %8812 = vmatpush1.bf16.msra.mxu1 %v18312_v55  ;;  %v18360_v55 = vld [vmem:[%s24298_s10 + $0x60] ss:$12 sps:$4 sm:$0xff]  }
 0x69a   : > { %8813 = vmatprep.subr.bf16.mxu1 %v18317_v19 }
 0x69d   : > { %8814 = vmatpush1.bf16.msra.mxu1 %v18315_v48  ;;  %v18368_v48 = vld [vmem:[%s24298_s10 + $0x7c] ss:$12 sps:$4 sm:$0xff]  }
 0x69e   : > { %8815 = vmatprep.subr.bf16.mxu1 %v18320_v14 }
 0x6a1   : > { %8816 = vmatpush1.bf16.msra.mxu1 %v18318_v0  ;;  %v8991_v0 = vand.u32 %v8973_v63, %v19502_v51  ;;  %v18380_v63 = vld [vmem:[%s24298_s10 + $0xac] ss:$12 sps:$4 sm:$0xff]  }
 0x6a2   : > { %8817 = vmatprep.subr.bf16.mxu1 %v18323_v21  ;;  %v18366_v21 = vld [vmem:[%s24298_s10 + $0x78] ss:$12 sps:$4 sm:$0xff]  }
 0x6a5   : > { %8818 = vmatpush1.bf16.msra.mxu1 %v18321_v30  ;;  %v22464_v30 = vld [vmem:[%s24296_s8] sm:$0x7] }
 0x6a6   : > { %8819 = vmatprep.subr.bf16.mxu1 %v18326_v7  ;;  %v18374_v7 = vld [vmem:[%s24298_s10 + $0x94] ss:$12 sps:$4 sm:$0xff]  }
 0x6a9   : > { %8820 = vmatpush1.bf16.msra.mxu1 %v18324_v52  ;;  %v18392_v52 = vld [vmem:[%s24298_s10 + $0xdc] ss:$12 sps:$4 sm:$0xff]  }
 0x6aa   : > { %8821 = vmatprep.subr.bf16.mxu1 %v18329_v53  ;;  %v18390_v53 = vld [vmem:[%s24298_s10 + $0xd8] ss:$12 sps:$4 sm:$0xff]  }
 0x6ad   : > { %8822 = vmatpush1.bf16.msra.mxu1 %v18327_v54  ;;  %v18398_v54 = vld [vmem:[%s24298_s10 + $0xf4] ss:$12 sps:$4 sm:$0xff]  }
 0x6ae   : > { %8823 = vmatprep.subr.bf16.mxu1 %v18332_v59  ;;  %v18396_v59 = vld [vmem:[%s24298_s10 + $0xf0] ss:$12 sps:$4 sm:$0xff]  }
 0x6b1   : > { %8824 = vmatpush1.bf16.msra.mxu1 %v18330_v60  ;;  %v18404_v60 = vld [vmem:[%s24298_s10 + $0x10c] ss:$12 sps:$4 sm:$0xff]  }
 0x6b2   : > { %11134 = vmatprep.subr.bf16.mxu1 %v18338_v20  ;;  %v18416_v20 = vld [vmem:[%s24298_s10 + $0x13c] ss:$12 sps:$4 sm:$0xff]  }
 0x6b4   : > { %8838 = vmatmul.mubr.bf16.vlgmr.msra.gmra.mrb[36].mxu1 %v21910_v9 }
 0x6b5   : > { %11135 = vmatpush1.bf16.msra.mxu1 %v18336_v31  ;;  %v18410_v31 = vld [vmem:[%s24298_s10 + $0x124] ss:$12 sps:$4 sm:$0xff]  }
 0x6b6   : > { %11136 = vmatprep.subr.bf16.mxu1 %v18344_v5  ;;  %v18414_v5 = vld [vmem:[%s24298_s10 + $0x138] ss:$12 sps:$4 sm:$0xff]  }
 0x6b9   : > { %11137 = vmatpush1.bf16.msra.mxu1 %v18342_v12  ;;  %v8885_v12 = vrot.slane %v22236_v35, %v1583_v49 }
 0x6ba   : > { %11138 = vmatprep.subr.bf16.mxu1 %v18350_v17  ;;  %v18426_v17 = vld [vmem:[%s24298_s10 + $0x168] ss:$12 sps:$4 sm:$0xff]  }
 0x6bd   : > { %11139 = vmatpush1.bf16.msra.mxu1 %v18348_v58 }
 0x6be   : > { %11140 = vmatprep.subr.bf16.mxu1 %v18356_v36 }
 0x6c1   : > { %11141 = vmatpush1.bf16.msra.mxu1 %v18354_v42 }
 0x6c2   : > { %11142 = vmatprep.subr.bf16.mxu1 %v18362_v44 }
 0x6c5   : > { %11143 = vmatpush1.bf16.msra.mxu1 %v18360_v55  ;;  %v18333_v55 = vld [vmem:[%s24297_s9] ss:$12 sps:$4 sm:$0xff]  }
 0x6c6   : > { %11144 = vmatprep.subr.bf16.mxu1 %v18368_v48  ;;  %v18339_v48 = vld [vmem:[%s24297_s9 + $0x18] ss:$12 sps:$4 sm:$0xff]  }
 0x6c9   : > { %11145 = vmatpush1.bf16.msra.mxu1 %v18366_v21  ;;  %v18351_v21 = vld [vmem:[%s24297_s9 + $0x48] ss:$12 sps:$4 sm:$0xff]  }
 0x6ca   : > { %11146 = vmatprep.subr.bf16.mxu1 %v18374_v7  ;;  %v18357_v7 = vld [vmem:[%s24297_s9 + $0x60] ss:$12 sps:$4 sm:$0xff]  }
 0x6cd   : > { %11147 = vmatpush1.bf16.msra.mxu1 %v18372_v56  ;;  %v18363_v56 = vld [vmem:[%s24297_s9 + $0x78] ss:$12 sps:$4 sm:$0xff]  }
 0x6ce   : > { %11148 = vmatprep.subr.bf16.mxu1 %v18380_v63  ;;  %v18371_v63 = vld [vmem:[%s24297_s9 + $0x94] ss:$12 sps:$4 sm:$0xff]  }
 0x6d1   : > { %11149 = vmatpush1.bf16.msra.mxu1 %v18378_v41  ;;  %v18369_v41 = vld [vmem:[%s24297_s9 + $0x90] ss:$12 sps:$4 sm:$0xff]  }
 0x6d2   : > { %11150 = vmatprep.subr.bf16.mxu1 %v18386_v4  ;;  %v18377_v4 = vld [vmem:[%s24297_s9 + $0xac] ss:$12 sps:$4 sm:$0xff]  }
 0x6d5   : > { %11151 = vmatpush1.bf16.msra.mxu1 %v18384_v33  ;;  %v18375_v33 = vld [vmem:[%s24297_s9 + $0xa8] ss:$12 sps:$4 sm:$0xff]  }
 0x6d6   : > { %11152 = vmatprep.subr.bf16.mxu1 %v18392_v52  ;;  %v18383_v52 = vld [vmem:[%s24297_s9 + $0xc4] ss:$12 sps:$4 sm:$0xff]  }
 0x6d9   : > { %11153 = vmatpush1.bf16.msra.mxu1 %v18390_v53  ;;  %v18381_v53 = vld [vmem:[%s24297_s9 + $0xc0] ss:$12 sps:$4 sm:$0xff]  }
 0x6da   : > { %11154 = vmatprep.subr.bf16.mxu1 %v18398_v54  ;;  %v18389_v54 = vld [vmem:[%s24297_s9 + $0xdc] ss:$12 sps:$4 sm:$0xff]  }
 0x6dd   : > { %11155 = vmatpush1.bf16.msra.mxu1 %v18396_v59  ;;  %v18387_v59 = vld [vmem:[%s24297_s9 + $0xd8] ss:$12 sps:$4 sm:$0xff]  }
 0x6de   : > { %11156 = vmatprep.subr.bf16.mxu1 %v18404_v60  ;;  %v18395_v60 = vld [vmem:[%s24297_s9 + $0xf4] ss:$12 sps:$4 sm:$0xff]  }
 0x71f   : > { %v8667_v8 = vpop.f32.mrb[32].mxu1 }
 0x720   : > { %v8892_v9 = vadd.f32 %v8865_v37, %v8667_v8  ;;  %v8669_v10 = vpop.f32.mrb[33].mxu1  ;;  %v18422_v8 = vld [vmem:[%s24298_s10 + $0x154] ss:$12 sps:$4 sm:$0xff]  }
 0x721   : > { %v8893_v28 = vadd.f32 %v8869_v57, %v8669_v10  ;;  %v8671_v16 = vpop.f32.mrb[34].mxu1  ;;  %v8881_v10 = vrot.slane %v22236_v35, %v1579_v45  ;;  %v18434_v35 = vld [vmem:[%s24298_s10 + $0x184] ss:$12 sps:$4 sm:$0xff]  }
 0x722   : > { %v8904_v23 = vmax.f32 %v8892_v9, 0.0  ;;  %v8898_v24 = vadd.f32 %v8865_v37, %v8671_v16  ;;  %v8673_v25 = vpop.f32.mrb[35].mxu1  ;;  %v18402_v37 = vld [vmem:[%s24298_s10 + $0x108] ss:$12 sps:$4 sm:$0xff]   ;;  %v18420_v9 = vld [vmem:[%s24298_s10 + $0x150] ss:$12 sps:$4 sm:$0xff]  }
 0x723   : > { %v8905_v40 = vmax.f32 %v8893_v28, 0.0  ;;  %v8899_v27 = vadd.f32 %v8869_v57, %v8673_v25  ;;  %11157 = vmatpush1.bf16.msra.mxu1 %v18402_v37  ;;  %v18408_v57 = vld [vmem:[%s24298_s10 + $0x120] ss:$12 sps:$4 sm:$0xff]   ;;  %v18393_v37 = vld [vmem:[%s24297_s9 + $0xf0] ss:$12 sps:$4 sm:$0xff]  }
 0x724   : > { %v8910_v26 = vmax.f32 %v8898_v24, 0.0  ;;  %v8928_v32 = vrot.slane %v8904_v23, 1  ;;  %11158 = vmatprep.subr.bf16.mxu1 %v18410_v31  ;;  %v18401_v31 = vld [vmem:[%s24297_s9 + $0x10c] ss:$12 sps:$4 sm:$0xff]  }
 0x725   : > { %v8911_v38 = vmax.f32 %v8899_v27, 0.0  ;;  %v8931_v1 = vrot.slane %v8905_v40, 1 }
 0x726   : > { %v8929_v22 = vrot.slane %v8910_v26, 1 }
 0x727   : > { %v8932_v34 = vrot.slane %v8911_v38, 1  ;;  %11159 = vmatpush1.bf16.msra.mxu1 %v18408_v57  ;;  %v18399_v57 = vld [vmem:[%s24297_s9 + $0x108] ss:$12 sps:$4 sm:$0xff]  }
 0x728   : > { %v8930_v3 = vsel %vm1227_vm3, %v8928_v32, %v8929_v22  ;;  %v8964_v39 = vmax.f32 %v8910_v26, %v8929_v22  ;;  %11160 = vmatprep.subr.bf16.mxu1 %v18416_v20  ;;  %v18407_v20 = vld [vmem:[%s24297_s9 + $0x124] ss:$12 sps:$4 sm:$0xff]  }
 0x729   : > { %v8958_v43 = vmax.f32 %v8904_v23, %v8930_v3  ;;  %v8933_v11 = vsel %vm1227_vm3, %v8931_v1, %v8932_v34  ;;  %v8965_v29 = vmax.f32 %v8911_v38, %v8932_v34 }
 0x72a   : > { %v8959_v50 = vmax.f32 %v8905_v40, %v8933_v11  ;;  %v18428_v40 = vld [vmem:[%s24298_s10 + $0x16c] ss:$12 sps:$4 sm:$0xff]  }
 0x72b   : > { %v8970_v47 = vpack.c.bf16 %v8964_v39, %v8958_v43  ;;  %11161 = vmatpush1.bf16.msra.mxu1 %v18414_v5  ;;  %v18405_v5 = vld [vmem:[%s24297_s9 + $0x120] ss:$12 sps:$4 sm:$0xff]  }
 0x72c   : > { %v8971_v15 = vpack.c.bf16 %v8965_v29, %v8959_v50  ;;  %11162 = vmatprep.subr.bf16.mxu1 %v18422_v8  ;;  %v18413_v8 = vld [vmem:[%s24297_s9 + $0x13c] ss:$12 sps:$4 sm:$0xff]  }
 0x72d   : > { %v8982_v14 = vand.u32 %v8970_v47, %v19502_v51  ;;  %v18335_v47 = vld [vmem:[%s24297_s9 + $0x4] ss:$12 sps:$4 sm:$0xff]  }
 0x72e   : > { %v8985_v19 = vand.u32 %v8971_v15, %v19502_v51 }
 0x72f   : > { %11163 = vmatpush1.bf16.msra.mxu1 %v18420_v9  ;;  %v18411_v9 = vld [vmem:[%s24297_s9 + $0x138] ss:$12 sps:$4 sm:$0xff]  }
 0x730   : > { %8999 = vmatprep.subr.bf16.mxu0 %v8985_v19  ;;  %11164 = vmatprep.subr.bf16.mxu1 %v18428_v40  ;;  %v18341_v19 = vld [vmem:[%s24297_s9 + $0x1c] ss:$12 sps:$4 sm:$0xff]  }
 0x731   : > { %9000 = vmatpush1.bf16.msra.mxu0 %v8982_v14  ;;  %v18345_v14 = vld [vmem:[%s24297_s9 + $0x30] ss:$12 sps:$4 sm:$0xff]  }
 0x732   : > { %9040 = vmatprep.subr.bf16.mxu0 %v8991_v0  ;;  %v18353_v0 = vld [vmem:[%s24297_s9 + $0x4c] ss:$12 sps:$4 sm:$0xff]  }
 0x733   : > { %11165 = vmatpush1.bf16.msra.mxu1 %v18426_v17 }
 0x734   : > { %15487 = vmatmul.mubr.msk.bf16.vlgmr.msra.gmra.mrb[40].mxu0 %vm8977_vm10, %v22464_v30  ;;  %11175 = vmatprep.subr.bf16.mxu1 %v18434_v35  ;;  %v18435_v35 = vld [vmem:[%s24297_s9 + $0x198] ss:$12 sps:$4 sm:$0xff]  }
 0x735   : > { %9041 = vmatpush1.bf16.msra.mxu0 %v8988_v46  ;;  %9072 = vmatprep.mubr.bf16.mxu0 %v19069_v2  ;;  %v18365_v46 = vld [vmem:[%s24297_s9 + $0x7c] ss:$12 sps:$4 sm:$0xff]  }
 0x73c   : > { %15488 = vmatmul.mubr.msk.bf16.vlgmr.msra.gmra.mrb[44].mxu0 %vm8977_vm10, %v22464_v30 }
 0x73d   : > { %9113 = vmatprep.mubr.bf16.mxu0 %v19069_v2 }
 0x787   : > { %v8839_v28 = vpop.f32.mrb[36].mxu1 }
 0x788   : > { %v8896_v16 = vadd.f32 %v8881_v10, %v8839_v28  ;;  %v8841_v23 = vpop.f32.mrb[37].mxu1  ;;  %v18425_v28 = vld [vmem:[%s24297_s9 + $0x16c] ss:$12 sps:$4 sm:$0xff]  }
 0x789   : > { %v8897_v24 = vadd.f32 %v8885_v12, %v8841_v23  ;;  %v8843_v25 = vpop.f32.mrb[38].mxu1  ;;  %v18431_v23 = vld [vmem:[%s24297_s9 + $0x184] ss:$12 sps:$4 sm:$0xff]  }
 0x78a   : > { %v8908_v27 = vmax.f32 %v8896_v16, 0.0  ;;  %v8902_v26 = vadd.f32 %v8881_v10, %v8843_v25  ;;  %v8845_v45 = vpop.f32.mrb[39].mxu1  ;;  %v18419_v10 = vld [vmem:[%s24297_s9 + $0x154] ss:$12 sps:$4 sm:$0xff]  }
 0x78b   : > { %v8909_v58 = vmax.f32 %v8897_v24, 0.0  ;;  %v8903_v13 = vadd.f32 %v8885_v12, %v8845_v45  ;;  %v18417_v12 = vld [vmem:[%s24297_s9 + $0x150] ss:$12 sps:$4 sm:$0xff]   ;;  %v18423_v16 = vld [vmem:[%s24297_s9 + $0x168] ss:$12 sps:$4 sm:$0xff]  }
 0x78c   : > { %v8914_v49 = vmax.f32 %v8902_v26, 0.0  ;;  %v8940_v32 = vrot.slane %v8908_v27, 1  ;;  %v18432_v26 = vld [vmem:[%s24298_s10 + $0x180] ss:$12 sps:$4 sm:$0xff]  }
 0x78d   : > { %v8915_v38 = vmax.f32 %v8903_v13, 0.0  ;;  %v8943_v36 = vrot.slane %v8909_v58, 1  ;;  %v18437_v13 = vld [vmem:[%s24297_s9 + $0x19c] ss:$12 sps:$4 sm:$0xff]  }
 0x78e   : > { %v8941_v22 = vrot.slane %v8914_v49, 1 }
 0x78f   : > { %v8944_v1 = vrot.slane %v8915_v38, 1 }
 0x790   : > { %v8942_v34 = vsel %vm1227_vm3, %v8940_v32, %v8941_v22  ;;  %v8968_v3 = vmax.f32 %v8914_v49, %v8941_v22  ;;  %v18440_v49 = vld [vmem:[%s24298_s10 + $0x19c] ss:$12 sps:$4 sm:$0xff]   ;;  %v18443_v32 = vld [vmem:[%s24297_s9 + $0x1b4] ss:$12 sps:$4 sm:$0xff]  }
 0x791   : > { %v8962_v39 = vmax.f32 %v8908_v27, %v8942_v34  ;;  %v8945_v42 = vsel %vm1227_vm3, %v8943_v36, %v8944_v1  ;;  %v8969_v43 = vmax.f32 %v8915_v38, %v8944_v1  ;;  %v18429_v27 = vld [vmem:[%s24297_s9 + $0x180] ss:$12 sps:$4 sm:$0xff]   ;;  %v18438_v38 = vld [vmem:[%s24298_s10 + $0x198] ss:$12 sps:$4 sm:$0xff]   ;;  %v18441_v34 = vld [vmem:[%s24297_s9 + $0x1b0] ss:$12 sps:$4 sm:$0xff]  }
 0x792   : > { %v8963_v11 = vmax.f32 %v8909_v58, %v8945_v42  ;;  %v18446_v22 = vld [vmem:[%s24298_s10 + $0x1b4] ss:$12 sps:$4 sm:$0xff]  }
 0x793   : > { %v8974_v29 = vpack.c.bf16 %v8968_v3, %v8962_v39  ;;  %v18444_v3 = vld [vmem:[%s24298_s10 + $0x1b0] ss:$12 sps:$4 sm:$0xff]  }
 0x794   : > { %v8975_v50 = vpack.c.bf16 %v8969_v43, %v8963_v11  ;;  %v18449_v43 = vld [vmem:[%s24297_s9 + $0x1cc] ss:$12 sps:$4 sm:$0xff]  }
 0x795   : > { %v8994_v15 = vand.u32 %v8974_v29, %v19502_v51  ;;  %v18452_v11 = vld [vmem:[%s24298_s10 + $0x1cc] ss:$12 sps:$4 sm:$0xff]  }
 0x796   : > { %v8997_v44 = vand.u32 %v8975_v50, %v19502_v51  ;;  %v18347_v51 = vld [vmem:[%s24297_s9 + $0x34] ss:$12 sps:$4 sm:$0xff]  }
 0x797   : > { %v18447_v50 = vld [vmem:[%s24297_s9 + $0x1c8] ss:$12 sps:$4 sm:$0xff]  }
 0x798   : > { %9081 = vmatprep.subr.bf16.mxu0 %v8997_v44  ;;  %v18450_v44 = vld [vmem:[%s24298_s10 + $0x1c8] ss:$12 sps:$4 sm:$0xff]  }
 0x799   : > { %9082 = vmatpush1.bf16.msra.mxu0 %v8994_v15  ;;  %v18458_v15 = vld [vmem:[%s24298_s10 + $0x1e4] ss:$12 sps:$4 sm:$0xff]  }
 0x79a   : > { %10011 = vmatprep.subr.bf16.mxu0 %v18335_v47  ;;  %v18455_v47 = vld [vmem:[%s24297_s9 + $0x1e4] ss:$12 sps:$4 sm:$0xff]  }
 0x79c   : > { %15489 = vmatmul.mubr.msk.bf16.vlgmr.msra.gmra.mrb[48].mxu0 %vm8977_vm10, %v22464_v30  ;;  %v18359_v30 = vld [vmem:[%s24297_s9 + $0x64] ss:$12 sps:$4 sm:$0xff]  }
 0x79d   : > { %10012 = vmatpush1.bf16.msra.mxu0 %v18333_v55  ;;  %v18453_v55 = vld [vmem:[%s24297_s9 + $0x1e0] ss:$12 sps:$4 sm:$0xff]  }
 0x79e   : > { %10013 = vmatprep.subr.bf16.mxu0 %v18341_v19  ;;  %v18456_v19 = vld [vmem:[%s24298_s10 + $0x1e0] ss:$12 sps:$4 sm:$0xff]  }
 0x7a1   : > { %10014 = vmatpush1.bf16.msra.mxu0 %v18339_v48  ;;  %v18461_v48 = vld [vmem:[%s24297_s9 + $0x1fc] ss:$12 sps:$4 sm:$0xff]  }
 0x7a2   : > { %10015 = vmatprep.subr.bf16.mxu0 %v18347_v51  ;;  %v18464_v51 = vld [vmem:[%s24298_s10 + $0x1fc] ss:$12 sps:$4 sm:$0xff]  }
 0x7a5   : > { %10016 = vmatpush1.bf16.msra.mxu0 %v18345_v14  ;;  %v18459_v14 = vld [vmem:[%s24297_s9 + $0x1f8] ss:$12 sps:$4 sm:$0xff]  }
 0x7a6   : > { %10017 = vmatprep.subr.bf16.mxu0 %v18353_v0  ;;  %v18462_v0 = vld [vmem:[%s24298_s10 + $0x1f8] ss:$12 sps:$4 sm:$0xff]  }
 0x7a9   : > { %10018 = vmatpush1.bf16.msra.mxu0 %v18351_v21  ;;  %v18467_v21 = vld [vmem:[%s24297_s9 + $0x214] ss:$12 sps:$4 sm:$0xff]  }
 0x7aa   : > { %10019 = vmatprep.subr.bf16.mxu0 %v18359_v30  ;;  %v18470_v30 = vld [vmem:[%s24298_s10 + $0x214] ss:$12 sps:$4 sm:$0xff]  }
 0x7ad   : > { %10020 = vmatpush1.bf16.msra.mxu0 %v18357_v7  ;;  %v18465_v7 = vld [vmem:[%s24297_s9 + $0x210] ss:$12 sps:$4 sm:$0xff]  }
 0x7ae   : > { %10021 = vmatprep.subr.bf16.mxu0 %v18365_v46  ;;  %v18468_v46 = vld [vmem:[%s24298_s10 + $0x210] ss:$12 sps:$4 sm:$0xff]  }
 0x7b1   : > { %10022 = vmatpush1.bf16.msra.mxu0 %v18363_v56  ;;  %v18473_v56 = vld [vmem:[%s24297_s9 + $0x22c] ss:$12 sps:$4 sm:$0xff]  }
 0x7b2   : > { %10023 = vmatprep.subr.bf16.mxu0 %v18371_v63  ;;  %v18476_v63 = vld [vmem:[%s24298_s10 + $0x22c] ss:$12 sps:$4 sm:$0xff]  }
 0x7b5   : > { %10024 = vmatpush1.bf16.msra.mxu0 %v18369_v41  ;;  %v18471_v41 = vld [vmem:[%s24297_s9 + $0x228] ss:$12 sps:$4 sm:$0xff]  }
 0x7b6   : > { %10025 = vmatprep.subr.bf16.mxu0 %v18377_v4  ;;  %v18474_v4 = vld [vmem:[%s24298_s10 + $0x228] ss:$12 sps:$4 sm:$0xff]  }
 0x7b9   : > { %10026 = vmatpush1.bf16.msra.mxu0 %v18375_v33  ;;  %v18479_v33 = vld [vmem:[%s24297_s9 + $0x244] ss:$12 sps:$4 sm:$0xff]  }
 0x7ba   : > { %10027 = vmatprep.subr.bf16.mxu0 %v18383_v52  ;;  %v18482_v52 = vld [vmem:[%s24298_s10 + $0x244] ss:$12 sps:$4 sm:$0xff]  }
 0x7bd   : > { %10028 = vmatpush1.bf16.msra.mxu0 %v18381_v53  ;;  %v18477_v53 = vld [vmem:[%s24297_s9 + $0x240] ss:$12 sps:$4 sm:$0xff]  }
 0x7be   : > { %10029 = vmatprep.subr.bf16.mxu0 %v18389_v54  ;;  %v18480_v54 = vld [vmem:[%s24298_s10 + $0x240] ss:$12 sps:$4 sm:$0xff]  }
 0x7c1   : > { %10030 = vmatpush1.bf16.msra.mxu0 %v18387_v59  ;;  %v18485_v59 = vld [vmem:[%s24297_s9 + $0x25c] ss:$12 sps:$4 sm:$0xff]  }
 0x7c2   : > { %10031 = vmatprep.subr.bf16.mxu0 %v18395_v60  ;;  %v18488_v60 = vld [vmem:[%s24298_s10 + $0x25c] ss:$12 sps:$4 sm:$0xff]  }
 0x7c5   : > { %10032 = vmatpush1.bf16.msra.mxu0 %v18393_v37  ;;  %v18483_v37 = vld [vmem:[%s24297_s9 + $0x258] ss:$12 sps:$4 sm:$0xff]  }
 0x7c6   : > { %10033 = vmatprep.subr.bf16.mxu0 %v18401_v31  ;;  %v18486_v31 = vld [vmem:[%s24298_s10 + $0x258] ss:$12 sps:$4 sm:$0xff]  }
 0x7c9   : > { %10034 = vmatpush1.bf16.msra.mxu0 %v18399_v57  ;;  %v18491_v57 = vld [vmem:[%s24297_s9 + $0x274] ss:$12 sps:$4 sm:$0xff]  }
 0x7ca   : > { %10035 = vmatprep.subr.bf16.mxu0 %v18407_v20  ;;  %v18494_v20 = vld [vmem:[%s24298_s10 + $0x274] ss:$12 sps:$4 sm:$0xff]  }
 0x7cd   : > { %10036 = vmatpush1.bf16.msra.mxu0 %v18405_v5  ;;  %v18489_v5 = vld [vmem:[%s24297_s9 + $0x270] ss:$12 sps:$4 sm:$0xff]  }
 0x7ce   : > { %10037 = vmatprep.subr.bf16.mxu0 %v18413_v8  ;;  %v18492_v8 = vld [vmem:[%s24298_s10 + $0x270] ss:$12 sps:$4 sm:$0xff]  }
 0x7d1   : > { %10038 = vmatpush1.bf16.msra.mxu0 %v18411_v9  ;;  %v18497_v9 = vld [vmem:[%s24297_s9 + $0x28c] ss:$12 sps:$4 sm:$0xff]  }
 0x7d2   : > { %10039 = vmatprep.subr.bf16.mxu0 %v18419_v10  ;;  %v18500_v10 = vld [vmem:[%s24298_s10 + $0x28c] ss:$12 sps:$4 sm:$0xff]  }
 0x7d5   : > { %10040 = vmatpush1.bf16.msra.mxu0 %v18417_v12  ;;  %v18495_v12 = vld [vmem:[%s24297_s9 + $0x288] ss:$12 sps:$4 sm:$0xff]  }
 0x7d6   : > { %10041 = vmatprep.subr.bf16.mxu0 %v18425_v28  ;;  %v18498_v28 = vld [vmem:[%s24298_s10 + $0x288] ss:$12 sps:$4 sm:$0xff]  }
 0x7d9   : > { %10042 = vmatpush1.bf16.msra.mxu0 %v18423_v16  ;;  %v18503_v16 = vld [vmem:[%s24297_s9 + $0x2a4] ss:$12 sps:$4 sm:$0xff]  }
 0x7da   : > { %10052 = vmatprep.subr.bf16.mxu0 %v18431_v23  ;;  %v18506_v23 = vld [vmem:[%s24298_s10 + $0x2a4] ss:$12 sps:$4 sm:$0xff]  }
 0x807   : > { %v9033_v24 = vpop.f32.mrb[40].mxu0 }
 0x808   : > { %v9035_v25 = vpop.f32.mrb[41].mxu0  ;;  %v22658_v45 = vpack.c.bf16 %v9033_v24, %v9033_v24  ;;  %v18501_v24 = vld [vmem:[%s24297_s9 + $0x2a0] ss:$12 sps:$4 sm:$0xff]  }
 0x809   : > { %v22650_v17 = vpack.c.bf16 %v9035_v25, %v9035_v25  ;;  %v9037_v40 = vpop.f32.mrb[42].mxu0  ;;  %v18504_v25 = vld [vmem:[%s24298_s10 + $0x2a0] ss:$12 sps:$4 sm:$0xff]  }
 0x80a   : > { %v9038_v58 = vpop.f32.mrb[43].mxu0  ;;  %v18509_v40 = vld [vmem:[%s24297_s9 + $0x2bc] ss:$12 sps:$4 sm:$0xff]  }
 0x80b   : > { %10043 = vmatprep.mubr.bf16.mxu0 %v22650_v17  ;;  %11166 = vmatprep.mubr.bf16.mxu1 %v22650_v17  ;;  %v18510_v58 = vld [vmem:[%s24298_s10 + $0x2b8] ss:$12 sps:$4 sm:$0xff]  }
 0x80c   : > { %10044 = vmatmul.mubr.bf16.vlgmr.msra.gmra.mrb[52].mxu0 %v22658_v45  ;;  %11167 = vmatmul.mubr.bf16.vlgmr.msra.gmra.mrb[40].mxu1 %v22658_v45 }
 0x80d   : > { %10053 = vmatpush1.bf16.msra.mxu0 %v18429_v27  ;;  %11176 = vmatpush1.bf16.msra.mxu1 %v18432_v26  ;;  %v18512_v27 = vld [vmem:[%s24298_s10 + $0x2bc] ss:$12 sps:$4 sm:$0xff]   ;;  %v18507_v26 = vld [vmem:[%s24297_s9 + $0x2b8] ss:$12 sps:$4 sm:$0xff]  }
 0x80e   : > { %10054 = vmatprep.subr.bf16.mxu0 %v18437_v13  ;;  %11177 = vmatprep.subr.bf16.mxu1 %v18440_v49  ;;  %v18515_v13 = vld [vmem:[%s24297_s9 + $0x2d4] ss:$12 sps:$4 sm:$0xff]  }
 0x80f   : > { %v22682_v36 = vpop.f32.mrb[44].mxu0  ;;  %v18518_v49 = vld [vmem:[%s24298_s10 + $0x2d4] ss:$12 sps:$4 sm:$0xff]  }
 0x810   : > { %v9076_v1 = vpop.f32.mrb[45].mxu0 }
 0x811   : > { %10055 = vmatpush1.bf16.msra.mxu0 %v18435_v35  ;;  %11178 = vmatpush1.bf16.msra.mxu1 %v18438_v38  ;;  %v22690_v39 = vpack.c.bf16 %v9076_v1, %v9076_v1  ;;  %v9078_v42 = vpop.f32.mrb[46].mxu0  ;;  %v18513_v35 = vld [vmem:[%s24297_s9 + $0x2d0] ss:$12 sps:$4 sm:$0xff]   ;;  %v18519_v1 = vld [vmem:[%s24297_s9 + $0x2e8] ss:$12 sps:$4 sm:$0xff]  }
 0x812   : > { %10056 = vmatprep.subr.bf16.mxu0 %v18443_v32  ;;  %11179 = vmatprep.subr.bf16.mxu1 %v18446_v22  ;;  %v9079_v29 = vpop.f32.mrb[47].mxu0  ;;  %v18516_v38 = vld [vmem:[%s24298_s10 + $0x2d0] ss:$12 sps:$4 sm:$0xff]   ;;  %v18521_v32 = vld [vmem:[%s24297_s9 + $0x2ec] ss:$12 sps:$4 sm:$0xff]  }
 0x813   : > { %10084 = vmatprep.mubr.bf16.mxu0 %v22690_v39  ;;  %11207 = vmatprep.mubr.bf16.mxu1 %v22690_v39  ;;  %v18524_v22 = vld [vmem:[%s24298_s10 + $0x2ec] ss:$12 sps:$4 sm:$0xff]   ;;  %v18530_v42 = vld [vmem:[%s24298_s10 + $0x304] ss:$12 sps:$4 sm:$0xff]  }
 0x814   : > { %v18528_v29 = vld [vmem:[%s24298_s10 + $0x300] ss:$12 sps:$4 sm:$0xff]  }
 0x815   : > { %10057 = vmatpush1.bf16.msra.mxu0 %v18441_v34  ;;  %11180 = vmatpush1.bf16.msra.mxu1 %v18444_v3  ;;  %v18522_v34 = vld [vmem:[%s24298_s10 + $0x2e8] ss:$12 sps:$4 sm:$0xff]   ;;  %v18527_v3 = vld [vmem:[%s24297_s9 + $0x304] ss:$12 sps:$4 sm:$0xff]  }
 0x816   : > { %10058 = vmatprep.subr.bf16.mxu0 %v18449_v43  ;;  %11181 = vmatprep.subr.bf16.mxu1 %v18452_v11  ;;  %v22858_v43 = vpack.c.bf16 %v22682_v36, %v22682_v36  ;;  %v18525_v11 = vld [vmem:[%s24297_s9 + $0x300] ss:$12 sps:$4 sm:$0xff]   ;;  %v18536_v36 = vld [vmem:[%s24298_s10 + $0x31c] ss:$12 sps:$4 sm:$0xff]  }
 0x819   : > { %10059 = vmatpush1.bf16.msra.mxu0 %v18447_v50  ;;  %11182 = vmatpush1.bf16.msra.mxu1 %v18450_v44  ;;  %v18533_v50 = vld [vmem:[%s24297_s9 + $0x31c] ss:$12 sps:$4 sm:$0xff]   ;;  %v18531_v44 = vld [vmem:[%s24297_s9 + $0x318] ss:$12 sps:$4 sm:$0xff]  }
 0x81a   : > { %10060 = vmatprep.subr.bf16.mxu0 %v18455_v47  ;;  %11183 = vmatprep.subr.bf16.mxu1 %v18458_v15  ;;  %v18534_v47 = vld [vmem:[%s24298_s10 + $0x318] ss:$12 sps:$4 sm:$0xff]   ;;  %v18539_v15 = vld [vmem:[%s24297_s9 + $0x334] ss:$12 sps:$4 sm:$0xff]  }
 0x81d   : > { %10061 = vmatpush1.bf16.msra.mxu0 %v18453_v55  ;;  %11184 = vmatpush1.bf16.msra.mxu1 %v18456_v19  ;;  %v18542_v55 = vld [vmem:[%s24298_s10 + $0x334] ss:$12 sps:$4 sm:$0xff]   ;;  %v18537_v19 = vld [vmem:[%s24297_s9 + $0x330] ss:$12 sps:$4 sm:$0xff]  }
 0x81e   : > { %10062 = vmatprep.subr.bf16.mxu0 %v18461_v48  ;;  %11185 = vmatprep.subr.bf16.mxu1 %v18464_v51  ;;  %v18540_v48 = vld [vmem:[%s24298_s10 + $0x330] ss:$12 sps:$4 sm:$0xff]   ;;  %v18545_v51 = vld [vmem:[%s24297_s9 + $0x34c] ss:$12 sps:$4 sm:$0xff]  }
 0x821   : > { %10063 = vmatpush1.bf16.msra.mxu0 %v18459_v14  ;;  %11186 = vmatpush1.bf16.msra.mxu1 %v18462_v0  ;;  %v18548_v14 = vld [vmem:[%s24298_s10 + $0x34c] ss:$12 sps:$4 sm:$0xff]   ;;  %v18543_v0 = vld [vmem:[%s24297_s9 + $0x348] ss:$12 sps:$4 sm:$0xff]  }
 0x822   : > { %10064 = vmatprep.subr.bf16.mxu0 %v18467_v21  ;;  %11187 = vmatprep.subr.bf16.mxu1 %v18470_v30  ;;  %v18546_v21 = vld [vmem:[%s24298_s10 + $0x348] ss:$12 sps:$4 sm:$0xff]   ;;  %v18551_v30 = vld [vmem:[%s24297_s9 + $0x364] ss:$12 sps:$4 sm:$0xff]  }
 0x825   : > { %10065 = vmatpush1.bf16.msra.mxu0 %v18465_v7  ;;  %11188 = vmatpush1.bf16.msra.mxu1 %v18468_v46  ;;  %v18554_v7 = vld [vmem:[%s24298_s10 + $0x364] ss:$12 sps:$4 sm:$0xff]   ;;  %v18549_v46 = vld [vmem:[%s24297_s9 + $0x360] ss:$12 sps:$4 sm:$0xff]  }
 0x826   : > { %10066 = vmatprep.subr.bf16.mxu0 %v18473_v56  ;;  %11189 = vmatprep.subr.bf16.mxu1 %v18476_v63  ;;  %v18552_v56 = vld [vmem:[%s24298_s10 + $0x360] ss:$12 sps:$4 sm:$0xff]   ;;  %v18557_v63 = vld [vmem:[%s24297_s9 + $0x37c] ss:$12 sps:$4 sm:$0xff]  }
 0x829   : > { %10067 = vmatpush1.bf16.msra.mxu0 %v18471_v41  ;;  %11190 = vmatpush1.bf16.msra.mxu1 %v18474_v4  ;;  %v18560_v41 = vld [vmem:[%s24298_s10 + $0x37c] ss:$12 sps:$4 sm:$0xff]   ;;  %v18555_v4 = vld [vmem:[%s24297_s9 + $0x378] ss:$12 sps:$4 sm:$0xff]  }
 0x82a   : > { %10068 = vmatprep.subr.bf16.mxu0 %v18479_v33  ;;  %11191 = vmatprep.subr.bf16.mxu1 %v18482_v52  ;;  %v18558_v33 = vld [vmem:[%s24298_s10 + $0x378] ss:$12 sps:$4 sm:$0xff]   ;;  %v18563_v52 = vld [vmem:[%s24297_s9 + $0x394] ss:$12 sps:$4 sm:$0xff]  }
 0x82d   : > { %10069 = vmatpush1.bf16.msra.mxu0 %v18477_v53  ;;  %11192 = vmatpush1.bf16.msra.mxu1 %v18480_v54  ;;  %v18566_v53 = vld [vmem:[%s24298_s10 + $0x394] ss:$12 sps:$4 sm:$0xff]   ;;  %v18561_v54 = vld [vmem:[%s24297_s9 + $0x390] ss:$12 sps:$4 sm:$0xff]  }
 0x82e   : > { %10070 = vmatprep.subr.bf16.mxu0 %v18485_v59  ;;  %11193 = vmatprep.subr.bf16.mxu1 %v18488_v60  ;;  %v18564_v59 = vld [vmem:[%s24298_s10 + $0x390] ss:$12 sps:$4 sm:$0xff]   ;;  %v18569_v60 = vld [vmem:[%s24297_s9 + $0x3ac] ss:$12 sps:$4 sm:$0xff]  }
 0x831   : > { %10071 = vmatpush1.bf16.msra.mxu0 %v18483_v37  ;;  %11194 = vmatpush1.bf16.msra.mxu1 %v18486_v31  ;;  %v18572_v37 = vld [vmem:[%s24298_s10 + $0x3ac] ss:$12 sps:$4 sm:$0xff]   ;;  %v18567_v31 = vld [vmem:[%s24297_s9 + $0x3a8] ss:$12 sps:$4 sm:$0xff]  }
 0x832   : > { %10072 = vmatprep.subr.bf16.mxu0 %v18491_v57  ;;  %11195 = vmatprep.subr.bf16.mxu1 %v18494_v20  ;;  %v18570_v57 = vld [vmem:[%s24298_s10 + $0x3a8] ss:$12 sps:$4 sm:$0xff]   ;;  %v18575_v20 = vld [vmem:[%s24297_s9 + $0x3c4] ss:$12 sps:$4 sm:$0xff]  }
 0x835   : > { %10073 = vmatpush1.bf16.msra.mxu0 %v18489_v5  ;;  %11196 = vmatpush1.bf16.msra.mxu1 %v18492_v8  ;;  %v18578_v5 = vld [vmem:[%s24298_s10 + $0x3c4] ss:$12 sps:$4 sm:$0xff]   ;;  %v18573_v8 = vld [vmem:[%s24297_s9 + $0x3c0] ss:$12 sps:$4 sm:$0xff]  }
 0x836   : > { %10074 = vmatprep.subr.bf16.mxu0 %v18497_v9  ;;  %11197 = vmatprep.subr.bf16.mxu1 %v18500_v10  ;;  %v18576_v9 = vld [vmem:[%s24298_s10 + $0x3c0] ss:$12 sps:$4 sm:$0xff]   ;;  %v18581_v10 = vld [vmem:[%s24297_s9 + $0x3dc] ss:$12 sps:$4 sm:$0xff]  }
 0x839   : > { %10075 = vmatpush1.bf16.msra.mxu0 %v18495_v12  ;;  %11198 = vmatpush1.bf16.msra.mxu1 %v18498_v28  ;;  %v18584_v12 = vld [vmem:[%s24298_s10 + $0x3dc] ss:$12 sps:$4 sm:$0xff]   ;;  %v18579_v28 = vld [vmem:[%s24297_s9 + $0x3d8] ss:$12 sps:$4 sm:$0xff]  }
 0x83a   : > { %10076 = vmatprep.subr.bf16.mxu0 %v18503_v16  ;;  %11199 = vmatprep.subr.bf16.mxu1 %v18506_v23  ;;  %v18582_v16 = vld [vmem:[%s24298_s10 + $0x3d8] ss:$12 sps:$4 sm:$0xff]   ;;  %v18587_v23 = vld [vmem:[%s24297_s9 + $0x3f4] ss:$12 sps:$4 sm:$0xff]  }
 0x83d   : > { %10077 = vmatpush1.bf16.msra.mxu0 %v18501_v24  ;;  %11200 = vmatpush1.bf16.msra.mxu1 %v18504_v25  ;;  %v18590_v24 = vld [vmem:[%s24298_s10 + $0x3f4] ss:$12 sps:$4 sm:$0xff]  }
 0x83e   : > { %10078 = vmatprep.subr.bf16.mxu0 %v18509_v40  ;;  %11201 = vmatprep.subr.bf16.mxu1 %v18512_v27  ;;  %v18585_v27 = vld [vmem:[%s24297_s9 + $0x3f0] ss:$12 sps:$4 sm:$0xff]  }
 0x841   : > { %10079 = vmatpush1.bf16.msra.mxu0 %v18507_v26  ;;  %11202 = vmatpush1.bf16.msra.mxu1 %v18510_v58  ;;  %v18588_v26 = vld [vmem:[%s24298_s10 + $0x3f0] ss:$12 sps:$4 sm:$0xff]  }
 0x842   : > { %10080 = vmatprep.subr.bf16.mxu0 %v18515_v13  ;;  %11203 = vmatprep.subr.bf16.mxu1 %v18518_v49  ;;  %v18593_v49 = vld [vmem:[%s24297_s9 + $0x40c] ss:$12 sps:$4 sm:$0xff]  }
 0x845   : > { %10081 = vmatpush1.bf16.msra.mxu0 %v18513_v35  ;;  %11204 = vmatpush1.bf16.msra.mxu1 %v18516_v38  ;;  %v18596_v35 = vld [vmem:[%s24298_s10 + $0x40c] ss:$12 sps:$4 sm:$0xff]  }
 0x846   : > { %10082 = vmatprep.subr.bf16.mxu0 %v18521_v32  ;;  %11205 = vmatprep.subr.bf16.mxu1 %v18524_v22  ;;  %v18591_v32 = vld [vmem:[%s24297_s9 + $0x408] ss:$12 sps:$4 sm:$0xff]  }
 0x847   : > { %v18594_v22 = vld [vmem:[%s24298_s10 + $0x408] ss:$12 sps:$4 sm:$0xff]  }
 0x849   : > { %10083 = vmatpush1.bf16.msra.mxu0 %v18519_v1  ;;  %11206 = vmatpush1.bf16.msra.mxu1 %v18522_v34  ;;  %v18597_v1 = vld [vmem:[%s24297_s9 + $0xc8] ss:$12 sps:$4 sm:$0xff]  }
 0x84a   : > { %10093 = vmatprep.subr.bf16.mxu0 %v18527_v3  ;;  %11216 = vmatprep.subr.bf16.mxu1 %v18530_v42  ;;  %v18598_v3 = vld [vmem:[%s24297_s9 + $0x8] ss:$12 sps:$4 sm:$0xff]   ;;  %v18599_v42 = vld [vmem:[%s24297_s9 + $0xe0] ss:$12 sps:$4 sm:$0xff]  }
 0x84c   : > { %10085 = vmatmul.mubr.bf16.vlgmr.msra.gmra.mrb[52].mxu0 %v22858_v43  ;;  %11208 = vmatmul.mubr.bf16.vlgmr.msra.gmra.mrb[40].mxu1 %v22858_v43 }
 0x84d   : > { %10094 = vmatpush1.bf16.msra.mxu0 %v18525_v11  ;;  %11217 = vmatpush1.bf16.msra.mxu1 %v18528_v29  ;;  %v18600_v11 = vld [vmem:[%s24297_s9 + $0x20] ss:$12 sps:$4 sm:$0xff]   ;;  %v18601_v29 = vld [vmem:[%s24297_s9 + $0xf8] ss:$12 sps:$4 sm:$0xff]  }
 0x84e   : > { %10095 = vmatprep.subr.bf16.mxu0 %v18533_v50  ;;  %11218 = vmatprep.subr.bf16.mxu1 %v18536_v36  ;;  %v18602_v50 = vld [vmem:[%s24297_s9 + $0x38] ss:$12 sps:$4 sm:$0xff]   ;;  %v18603_v36 = vld [vmem:[%s24297_s9 + $0x110] ss:$12 sps:$4 sm:$0xff]  }
 0x851   : > { %10096 = vmatpush1.bf16.msra.mxu0 %v18531_v44  ;;  %11219 = vmatpush1.bf16.msra.mxu1 %v18534_v47  ;;  %v18604_v44 = vld [vmem:[%s24297_s9 + $0x50] ss:$12 sps:$4 sm:$0xff]   ;;  %v18605_v47 = vld [vmem:[%s24297_s9 + $0x128] ss:$12 sps:$4 sm:$0xff]  }
 0x852   : > { %10097 = vmatprep.subr.bf16.mxu0 %v18539_v15  ;;  %11220 = vmatprep.subr.bf16.mxu1 %v18542_v55  ;;  %v18606_v15 = vld [vmem:[%s24297_s9 + $0x68] ss:$12 sps:$4 sm:$0xff]   ;;  %v18607_v55 = vld [vmem:[%s24297_s9 + $0x140] ss:$12 sps:$4 sm:$0xff]  }
 0x855   : > { %10098 = vmatpush1.bf16.msra.mxu0 %v18537_v19  ;;  %11221 = vmatpush1.bf16.msra.mxu1 %v18540_v48  ;;  %v18608_v19 = vld [vmem:[%s24297_s9 + $0x80] ss:$12 sps:$4 sm:$0xff]   ;;  %v18609_v48 = vld [vmem:[%s24297_s9 + $0x158] ss:$12 sps:$4 sm:$0xff]  }
 0x856   : > { %10099 = vmatprep.subr.bf16.mxu0 %v18545_v51  ;;  %11222 = vmatprep.subr.bf16.mxu1 %v18548_v14  ;;  %v18610_v51 = vld [vmem:[%s24297_s9 + $0x98] ss:$12 sps:$4 sm:$0xff]   ;;  %v18611_v14 = vld [vmem:[%s24297_s9 + $0x170] ss:$12 sps:$4 sm:$0xff]  }
 0x859   : > { %10100 = vmatpush1.bf16.msra.mxu0 %v18543_v0  ;;  %11223 = vmatpush1.bf16.msra.mxu1 %v18546_v21  ;;  %v18612_v0 = vld [vmem:[%s24297_s9 + $0xb0] ss:$12 sps:$4 sm:$0xff]   ;;  %v18613_v21 = vld [vmem:[%s24297_s9 + $0x248] ss:$12 sps:$4 sm:$0xff]  }
 0x85a   : > { %10101 = vmatprep.subr.bf16.mxu0 %v18551_v30  ;;  %11224 = vmatprep.subr.bf16.mxu1 %v18554_v7  ;;  %v18614_v30 = vld [vmem:[%s24297_s9 + $0x188] ss:$12 sps:$4 sm:$0xff]   ;;  %v18615_v7 = vld [vmem:[%s24297_s9 + $0x260] ss:$12 sps:$4 sm:$0xff]  }
 0x85d   : > { %10102 = vmatpush1.bf16.msra.mxu0 %v18549_v46  ;;  %11225 = vmatpush1.bf16.msra.mxu1 %v18552_v56  ;;  %v18616_v46 = vld [vmem:[%s24297_s9 + $0x1a0] ss:$12 sps:$4 sm:$0xff]   ;;  %v18617_v56 = vld [vmem:[%s24297_s9 + $0x278] ss:$12 sps:$4 sm:$0xff]  }
 0x85e   : > { %10103 = vmatprep.subr.bf16.mxu0 %v18557_v63  ;;  %11226 = vmatprep.subr.bf16.mxu1 %v18560_v41  ;;  %v18618_v63 = vld [vmem:[%s24297_s9 + $0x1b8] ss:$12 sps:$4 sm:$0xff]   ;;  %v18619_v41 = vld [vmem:[%s24297_s9 + $0x290] ss:$12 sps:$4 sm:$0xff]  }
 0x861   : > { %10104 = vmatpush1.bf16.msra.mxu0 %v18555_v4  ;;  %11227 = vmatpush1.bf16.msra.mxu1 %v18558_v33  ;;  %v18620_v4 = vld [vmem:[%s24297_s9 + $0x1d0] ss:$12 sps:$4 sm:$0xff]   ;;  %v18621_v33 = vld [vmem:[%s24297_s9 + $0x2a8] ss:$12 sps:$4 sm:$0xff]  }
 0x862   : > { %10105 = vmatprep.subr.bf16.mxu0 %v18563_v52  ;;  %11228 = vmatprep.subr.bf16.mxu1 %v18566_v53  ;;  %v18622_v52 = vld [vmem:[%s24297_s9 + $0x1e8] ss:$12 sps:$4 sm:$0xff]   ;;  %v18623_v53 = vld [vmem:[%s24297_s9 + $0x2c0] ss:$12 sps:$4 sm:$0xff]  }
 0x865   : > { %10106 = vmatpush1.bf16.msra.mxu0 %v18561_v54  ;;  %11229 = vmatpush1.bf16.msra.mxu1 %v18564_v59  ;;  %v18624_v54 = vld [vmem:[%s24297_s9 + $0x200] ss:$12 sps:$4 sm:$0xff]   ;;  %v18625_v59 = vld [vmem:[%s24297_s9 + $0x2d8] ss:$12 sps:$4 sm:$0xff]  }
 0x866   : > { %10107 = vmatprep.subr.bf16.mxu0 %v18569_v60  ;;  %11230 = vmatprep.subr.bf16.mxu1 %v18572_v37  ;;  %v18626_v60 = vld [vmem:[%s24297_s9 + $0x218] ss:$12 sps:$4 sm:$0xff]   ;;  %v18627_v37 = vld [vmem:[%s24297_s9 + $0x2f0] ss:$12 sps:$4 sm:$0xff]  }
 0x869   : > { %10108 = vmatpush1.bf16.msra.mxu0 %v18567_v31  ;;  %11231 = vmatpush1.bf16.msra.mxu1 %v18570_v57  ;;  %v18628_v31 = vld [vmem:[%s24297_s9 + $0x230] ss:$12 sps:$4 sm:$0xff]   ;;  %v18629_v57 = vld [vmem:[%s24297_s9 + $0x308] ss:$12 sps:$4 sm:$0xff]  }
 0x86a   : > { %10109 = vmatprep.subr.bf16.mxu0 %v18575_v20  ;;  %11232 = vmatprep.subr.bf16.mxu1 %v18578_v5  ;;  %v18630_v20 = vld [vmem:[%s24297_s9 + $0x320] ss:$12 sps:$4 sm:$0xff]   ;;  %v18631_v5 = vld [vmem:[%s24297_s9 + $0x338] ss:$12 sps:$4 sm:$0xff]  }
 0x86d   : > { %10110 = vmatpush1.bf16.msra.mxu0 %v18573_v8  ;;  %11233 = vmatpush1.bf16.msra.mxu1 %v18576_v9  ;;  %v18632_v8 = vld [vmem:[%s24297_s9 + $0x350] ss:$12 sps:$4 sm:$0xff]   ;;  %v18633_v9 = vld [vmem:[%s24297_s9 + $0x368] ss:$12 sps:$4 sm:$0xff]  }
 0x86e   : > { %10111 = vmatprep.subr.bf16.mxu0 %v18581_v10  ;;  %11234 = vmatprep.subr.bf16.mxu1 %v18584_v12  ;;  %v18634_v10 = vld [vmem:[%s24297_s9 + $0x380] ss:$12 sps:$4 sm:$0xff]   ;;  %v18635_v12 = vld [vmem:[%s24297_s9 + $0x398] ss:$12 sps:$4 sm:$0xff]  }
 0x86f   : > { %v9115_v25 = vpop.f32.mrb[48].mxu0 }
 0x870   : > { %v9117_v40 = vpop.f32.mrb[49].mxu0  ;;  %v23009_v34 = vpack.c.bf16 %v9115_v25, %v9115_v25  ;;  %v18640_v25 = vld [vmem:[%s24297_s9 + $0x410] ss:$12 sps:$4 sm:$0xff]  }
 0x871   : > { %10112 = vmatpush1.bf16.msra.mxu0 %v18579_v28  ;;  %11235 = vmatpush1.bf16.msra.mxu1 %v18582_v16  ;;  %v22988_v58 = vpack.c.bf16 %v9117_v40, %v9117_v40  ;;  %v9119_v13 = vpop.f32.mrb[50].mxu0  ;;  %v18636_v28 = vld [vmem:[%s24297_s9 + $0x3b0] ss:$12 sps:$4 sm:$0xff]   ;;  %v18637_v16 = vld [vmem:[%s24297_s9 + $0x3c8] ss:$12 sps:$4 sm:$0xff]  }
 0x872   : > { %10113 = vmatprep.subr.bf16.mxu0 %v18587_v23  ;;  %11236 = vmatprep.subr.bf16.mxu1 %v18590_v24  ;;  %v9120_v38 = vpop.f32.mrb[51].mxu0  ;;  %v18638_v23 = vld [vmem:[%s24297_s9 + $0x3e0] ss:$12 sps:$4 sm:$0xff]   ;;  %v18639_v24 = vld [vmem:[%s24297_s9 + $0x3f8] ss:$12 sps:$4 sm:$0xff]  }
 0x873   : > { %15622 = vmatprep.mubr.msk.bf16.mxu0 %vm3261_vm8, %v22988_v58  ;;  %15756 = vmatprep.mubr.msk.bf16.mxu1 %vm3261_vm8, %v22988_v58  ;;  %v18641_v40 = vld [vmem:[%s24298_s10 + $0xc8] ss:$12 sps:$4 sm:$0xff]   ;;  %v18644_v13 = vld [vmem:[%s24298_s10 + $0x20] ss:$12 sps:$4 sm:$0xff]   ;;  %v18647_v38 = vld [vmem:[%s24298_s10 + $0x110] ss:$12 sps:$4 sm:$0xff]  }
 0x875   : > { %10114 = vmatpush1.bf16.msra.mxu0 %v18585_v27  ;;  %11237 = vmatpush1.bf16.msra.mxu1 %v18588_v26  ;;  %v18642_v27 = vld [vmem:[%s24298_s10 + $0x8] ss:$12 sps:$4 sm:$0xff]   ;;  %v18643_v26 = vld [vmem:[%s24298_s10 + $0xe0] ss:$12 sps:$4 sm:$0xff]  }
 0x876   : > { %10115 = vmatprep.subr.bf16.mxu0 %v18593_v49  ;;  %11238 = vmatprep.subr.bf16.mxu1 %v18596_v35  ;;  %v18645_v49 = vld [vmem:[%s24298_s10 + $0xf8] ss:$12 sps:$4 sm:$0xff]  }
 0x877   : > { %v18646_v35 = vld [vmem:[%s24298_s10 + $0x38] ss:$12 sps:$4 sm:$0xff]  }
 0x879   : > { %10116 = vmatpush1.bf16.msra.mxu0 %v18591_v32  ;;  %11239 = vmatpush1.bf16.msra.mxu1 %v18594_v22  ;;  %v18649_v32 = vld [vmem:[%s24298_s10 + $0x128] ss:$12 sps:$4 sm:$0xff]  }
 0x87a   : > { %16299 = vmatprep.subr.bf16.mxu0 %v18597_v1  ;;  %v18650_v22 = vld [vmem:[%s24298_s10 + $0x68] ss:$12 sps:$4 sm:$0xff]   ;;  %v18651_v1 = vld [vmem:[%s24298_s10 + $0x140] ss:$12 sps:$4 sm:$0xff]  }
 0x87c   : > { %10126 = vmatmul.mubr.bf16.vlgmr.msra.gmra.mrb[52].mxu0 %v23009_v34  ;;  %11249 = vmatmul.mubr.bf16.vlgmr.msra.gmra.mrb[40].mxu1 %v23009_v34 }
 0x87d   : > { %16300 = vmatpush3.bf16.msra.mxu0 %v18598_v3  ;;  %10166 = vmatprep.mubr.bf16.mxu0 %v22650_v17  ;;  %v18652_v3 = vld [vmem:[%s24298_s10 + $0x80] ss:$12 sps:$4 sm:$0xff]  }
 0x87e   : > { %16301 = vmatprep.subr.bf16.mxu0 %v18599_v42  ;;  %11963 = vmatprep.mubr.bf16.mxu1 %v19069_v2  ;;  %v18653_v42 = vld [vmem:[%s24298_s10 + $0x158] ss:$12 sps:$4 sm:$0xff]  }
 0x881   : > { %16302 = vmatpush3.bf16.msra.mxu0 %v18600_v11  ;;  %v18654_v11 = vld [vmem:[%s24298_s10 + $0x98] ss:$12 sps:$4 sm:$0xff]  }
 0x882   : > { %16303 = vmatprep.subr.bf16.mxu0 %v18601_v29  ;;  %v18655_v29 = vld [vmem:[%s24298_s10 + $0x170] ss:$12 sps:$4 sm:$0xff]  }
 0x885   : > { %16304 = vmatpush3.bf16.msra.mxu0 %v18602_v50  ;;  %v18656_v50 = vld [vmem:[%s24298_s10 + $0xb0] ss:$12 sps:$4 sm:$0xff]  }
 0x886   : > { %16305 = vmatprep.subr.bf16.mxu0 %v18603_v36  ;;  %v18657_v36 = vld [vmem:[%s24298_s10 + $0x248] ss:$12 sps:$4 sm:$0xff]  }
 0x889   : > { %16306 = vmatpush3.bf16.msra.mxu0 %v18604_v44  ;;  %v18658_v44 = vld [vmem:[%s24298_s10 + $0x188] ss:$12 sps:$4 sm:$0xff]  }
 0x88a   : > { %16307 = vmatprep.subr.bf16.mxu0 %v18605_v47  ;;  %v18659_v47 = vld [vmem:[%s24298_s10 + $0x260] ss:$12 sps:$4 sm:$0xff]  }
 0x88d   : > { %16308 = vmatpush3.bf16.msra.mxu0 %v18606_v15  ;;  %v18660_v15 = vld [vmem:[%s24298_s10 + $0x1a0] ss:$12 sps:$4 sm:$0xff]  }
 0x88e   : > { %16309 = vmatprep.subr.bf16.mxu0 %v18607_v55  ;;  %v18661_v55 = vld [vmem:[%s24298_s10 + $0x278] ss:$12 sps:$4 sm:$0xff]  }
 0x891   : > { %16310 = vmatpush3.bf16.msra.mxu0 %v18608_v19  ;;  %v18662_v19 = vld [vmem:[%s24298_s10 + $0x1b8] ss:$12 sps:$4 sm:$0xff]  }
 0x892   : > { %16311 = vmatprep.subr.bf16.mxu0 %v18609_v48  ;;  %v18665_v48 = vld [vmem:[%s24298_s10 + $0x2a8] ss:$12 sps:$4 sm:$0xff]  }
 0x895   : > { %16312 = vmatpush3.bf16.msra.mxu0 %v18610_v51  ;;  %v18666_v51 = vld [vmem:[%s24298_s10 + $0x1e8] ss:$12 sps:$4 sm:$0xff]  }
 0x896   : > { %16313 = vmatprep.subr.bf16.mxu0 %v18611_v14  ;;  %v18667_v14 = vld [vmem:[%s24298_s10 + $0x2c0] ss:$12 sps:$4 sm:$0xff]  }
 0x899   : > { %16314 = vmatpush3.bf16.msra.mxu0 %v18612_v0  ;;  %v18668_v0 = vld [vmem:[%s24298_s10 + $0x200] ss:$12 sps:$4 sm:$0xff]  }
 0x89a   : > { %16321 = vmatprep.subr.bf16.mxu0 %v18613_v21  ;;  %v18669_v21 = vld [vmem:[%s24298_s10 + $0x2d8] ss:$12 sps:$4 sm:$0xff]  }
 0x89c   : > { %10167 = vmatmul.mubr.bf16.vlgmr.msra.gmra.mrb[56].mxu0 %v22658_v45 }
 0x89d   : > { %16322 = vmatpush3.bf16.msra.mxu0 %v18614_v30  ;;  %10206 = vmatprep.mubr.bf16.mxu0 %v22690_v39  ;;  %v18670_v30 = vld [vmem:[%s24298_s10 + $0x218] ss:$12 sps:$4 sm:$0xff]  }
 0x89e   : > { %16323 = vmatprep.subr.bf16.mxu0 %v18615_v7  ;;  %v18671_v7 = vld [vmem:[%s24298_s10 + $0x2f0] ss:$12 sps:$4 sm:$0xff]  }
 0x8a1   : > { %16324 = vmatpush3.bf16.msra.mxu0 %v18616_v46  ;;  %v18672_v46 = vld [vmem:[%s24298_s10 + $0x230] ss:$12 sps:$4 sm:$0xff]  }
 0x8a2   : > { %16325 = vmatprep.subr.bf16.mxu0 %v18617_v56  ;;  %v18673_v56 = vld [vmem:[%s24298_s10 + $0x308] ss:$12 sps:$4 sm:$0xff]  }
 0x8a5   : > { %16326 = vmatpush3.bf16.msra.mxu0 %v18618_v63  ;;  %v18674_v63 = vld [vmem:[%s24298_s10 + $0x320] ss:$12 sps:$4 sm:$0xff]  }
 0x8a6   : > { %16327 = vmatprep.subr.bf16.mxu0 %v18619_v41  ;;  %v18675_v41 = vld [vmem:[%s24298_s10 + $0x338] ss:$12 sps:$4 sm:$0xff]  }
 0x8a9   : > { %16328 = vmatpush3.bf16.msra.mxu0 %v18620_v4  ;;  %v18678_v4 = vld [vmem:[%s24298_s10 + $0x380] ss:$12 sps:$4 sm:$0xff]  }
 0x8aa   : > { %16329 = vmatprep.subr.bf16.mxu0 %v18621_v33  ;;  %v18679_v33 = vld [vmem:[%s24298_s10 + $0x398] ss:$12 sps:$4 sm:$0xff]  }
 0x8ad   : > { %16330 = vmatpush3.bf16.msra.mxu0 %v18622_v52  ;;  %v18680_v52 = vld [vmem:[%s24298_s10 + $0x3b0] ss:$12 sps:$4 sm:$0xff]  }
 0x8ae   : > { %16331 = vmatprep.subr.bf16.mxu0 %v18623_v53  ;;  %v18681_v53 = vld [vmem:[%s24298_s10 + $0x3c8] ss:$12 sps:$4 sm:$0xff]  }
 0x8b1   : > { %16332 = vmatpush3.bf16.msra.mxu0 %v18624_v54  ;;  %v18682_v54 = vld [vmem:[%s24298_s10 + $0x3e0] ss:$12 sps:$4 sm:$0xff]  }
 0x8b2   : > { %16333 = vmatprep.subr.bf16.mxu0 %v18625_v59 }
 0x8b5   : > { %16334 = vmatpush3.bf16.msra.mxu0 %v18626_v60 }
 0x8b6   : > { %16335 = vmatprep.subr.bf16.mxu0 %v18627_v37 }
 0x8b9   : > { %16336 = vmatpush3.bf16.msra.mxu0 %v18628_v31 }
 0x8ba   : > { %10214 = vmatprep.subr.bf16.mxu0 %v19069_v2 }
 0x8bc   : > { %10207 = vmatmul.mubr.bf16.vlgmr.msra.gmra.mrb[60].mxu0 %v22858_v43 }
 0x8bd   : > { %10215 = vmatpush1.bf16.msra.mxu0 %v18629_v57  ;;  %15623 = vmatprep.mubr.msk.bf16.mxu0 %vm3261_vm8, %v22988_v58 }
 0x8be   : > { %10216 = vmatprep.subr.bf16.mxu0 %v19069_v2 }
 0x8c1   : > { %10217 = vmatpush1.bf16.msra.mxu0 %v18630_v20 }
 0x8c2   : > { %10218 = vmatprep.subr.bf16.mxu0 %v19069_v2 }
 0x8c5   : > { %10219 = vmatpush1.bf16.msra.mxu0 %v18631_v5 }
 0x8c6   : > { %10220 = vmatprep.subr.bf16.mxu0 %v19069_v2 }
 0x8c9   : > { %10221 = vmatpush1.bf16.msra.mxu0 %v18632_v8 }
 0x8ca   : > { %10222 = vmatprep.subr.bf16.mxu0 %v19069_v2 }
 0x8cd   : > { %10223 = vmatpush1.bf16.msra.mxu0 %v18633_v9  ;;  %v18683_v9 = vld [vmem:[%s24298_s10 + $0x3f8] ss:$12 sps:$4 sm:$0xff]  }
 0x8ce   : > { %10224 = vmatprep.subr.bf16.mxu0 %v19069_v2 }
 0x8d1   : > { %10225 = vmatpush1.bf16.msra.mxu0 %v18634_v10 }
 0x8d2   : > { %10226 = vmatprep.subr.bf16.mxu0 %v19069_v2 }
 0x8d5   : > { %10227 = vmatpush1.bf16.msra.mxu0 %v18635_v12 }
 0x8d6   : > { %10228 = vmatprep.subr.bf16.mxu0 %v19069_v2 }
 0x8d9   : > { %10229 = vmatpush1.bf16.msra.mxu0 %v18636_v28 }
 0x8da   : > { %10230 = vmatprep.subr.bf16.mxu0 %v19069_v2 }
 0x8dd   : > { %10231 = vmatpush1.bf16.msra.mxu0 %v18637_v16  ;;  %v18684_v16 = vld [vmem:[%s24298_s10 + $0x410] ss:$12 sps:$4 sm:$0xff]  }
 0x8de   : > { %10232 = vmatprep.subr.bf16.mxu0 %v19069_v2 }
 0x8e1   : > { %10233 = vmatpush1.bf16.msra.mxu0 %v18638_v23 }
 0x8e2   : > { %10234 = vmatprep.subr.bf16.mxu0 %v19069_v2 }
 0x8e5   : > { %10235 = vmatpush1.bf16.msra.mxu0 %v18639_v24  ;;  %v18687_v24 = vld [vmem:[%s24299_s11 + $0x1e4] ss:$12 sps:$4 sm:$0xff]  }
 0x8e6   : > { %10236 = vmatprep.subr.bf16.mxu0 %v19069_v2 }
 0x8e9   : > { %10237 = vmatpush1.bf16.msra.mxu0 %v18640_v25 }
 0x8ea   : > { %16343 = vmatprep.subr.bf16.mxu0 %v18641_v40  ;;  %v18685_v40 = vld [vmem:[%s24299_s11 + $0x1e0] ss:$12 sps:$4 sm:$0xff]  }
 0x8ec   : > { %10247 = vmatmul.mubr.bf16.vlgmr.msra.gmra.mrb[64].mxu0 %v23009_v34 }
 0x8ed   : > { %16344 = vmatpush3.bf16.msra.mxu0 %v18642_v27  ;;  %11289 = vmatprep.mubr.bf16.mxu0 %v22650_v17  ;;  %v18648_v17 = vld [vmem:[%s24298_s10 + $0x50] ss:$12 sps:$4 sm:$0xff]  }
 0x8ee   : > { %16345 = vmatprep.subr.bf16.mxu0 %v18643_v26  ;;  %v18690_v26 = vld [vmem:[%s24299_s11 + $0x1fc] ss:$12 sps:$4 sm:$0xff]  }
 0x8f1   : > { %16346 = vmatpush3.bf16.msra.mxu0 %v18644_v13 }
 0x8f2   : > { %16347 = vmatprep.subr.bf16.mxu0 %v18645_v49  ;;  %v18688_v49 = vld [vmem:[%s24299_s11 + $0x1f8] ss:$12 sps:$4 sm:$0xff]  }
 0x8f5   : > { %16348 = vmatpush3.bf16.msra.mxu0 %v18646_v35  ;;  %v18693_v35 = vld [vmem:[%s24299_s11 + $0x214] ss:$12 sps:$4 sm:$0xff]  }
 0x8f6   : > { %16349 = vmatprep.subr.bf16.mxu0 %v18647_v38  ;;  %v18691_v38 = vld [vmem:[%s24299_s11 + $0x210] ss:$12 sps:$4 sm:$0xff]  }
 0x8f9   : > { %16350 = vmatpush3.bf16.msra.mxu0 %v18648_v17  ;;  %v18694_v17 = vld [vmem:[%s24299_s11 + $0x228] ss:$12 sps:$4 sm:$0xff]  }
 0x8fa   : > { %16351 = vmatprep.subr.bf16.mxu0 %v18649_v32  ;;  %v18699_v32 = vld [vmem:[%s24299_s11 + $0x244] ss:$12 sps:$4 sm:$0xff]  }
 0x8fd   : > { %16352 = vmatpush3.bf16.msra.mxu0 %v18650_v22  ;;  %v18697_v22 = vld [vmem:[%s24299_s11 + $0x240] ss:$12 sps:$4 sm:$0xff]  }
 0x8fe   : > { %16353 = vmatprep.subr.bf16.mxu0 %v18651_v1  ;;  %v18702_v1 = vld [vmem:[%s24299_s11 + $0x25c] ss:$12 sps:$4 sm:$0xff]  }
 0x901   : > { %16354 = vmatpush3.bf16.msra.mxu0 %v18652_v3  ;;  %v18700_v3 = vld [vmem:[%s24299_s11 + $0x258] ss:$12 sps:$4 sm:$0xff]  }
 0x902   : > { %16355 = vmatprep.subr.bf16.mxu0 %v18653_v42  ;;  %v18705_v42 = vld [vmem:[%s24299_s11 + $0x274] ss:$12 sps:$4 sm:$0xff]  }
 0x905   : > { %16356 = vmatpush3.bf16.msra.mxu0 %v18654_v11 }
 0x906   : > { %16357 = vmatprep.subr.bf16.mxu0 %v18655_v29 }
 0x909   : > { %16358 = vmatpush3.bf16.msra.mxu0 %v18656_v50 }
 0x90a   : > { %16365 = vmatprep.subr.bf16.mxu0 %v18657_v36 }
 0x90c   : > { %11290 = vmatmul.mubr.bf16.vlgmr.msra.gmra.mrb[68].mxu0 %v22658_v45  ;;  %v18663_v45 = vld [vmem:[%s24298_s10 + $0x290] ss:$12 sps:$4 sm:$0xff]  }
 0x90d   : > { %16366 = vmatpush3.bf16.msra.mxu0 %v18658_v44  ;;  %11329 = vmatprep.mubr.bf16.mxu0 %v22690_v39  ;;  %v18664_v39 = vld [vmem:[%s24298_s10 + $0x1d0] ss:$12 sps:$4 sm:$0xff]  }
 0x90e   : > { %16367 = vmatprep.subr.bf16.mxu0 %v18659_v47  ;;  %v18703_v44 = vld [vmem:[%s24299_s11 + $0x270] ss:$12 sps:$4 sm:$0xff]  }
 0x911   : > { %16368 = vmatpush3.bf16.msra.mxu0 %v18660_v15  ;;  %v18708_v15 = vld [vmem:[%s24299_s11 + $0x28c] ss:$12 sps:$4 sm:$0xff]  }
 0x912   : > { %16369 = vmatprep.subr.bf16.mxu0 %v18661_v55  ;;  %v18706_v55 = vld [vmem:[%s24299_s11 + $0x288] ss:$12 sps:$4 sm:$0xff]  }
 0x915   : > { %16370 = vmatpush3.bf16.msra.mxu0 %v18662_v19  ;;  %v18711_v19 = vld [vmem:[%s24299_s11 + $0x2a4] ss:$12 sps:$4 sm:$0xff]  }
 0x916   : > { %16371 = vmatprep.subr.bf16.mxu0 %v18663_v45  ;;  %v18709_v45 = vld [vmem:[%s24299_s11 + $0x2a0] ss:$12 sps:$4 sm:$0xff]  }
 0x919   : > { %16372 = vmatpush3.bf16.msra.mxu0 %v18664_v39  ;;  %v18714_v39 = vld [vmem:[%s24299_s11 + $0x2bc] ss:$12 sps:$4 sm:$0xff]  }
 0x91a   : > { %16373 = vmatprep.subr.bf16.mxu0 %v18665_v48  ;;  %v18712_v48 = vld [vmem:[%s24299_s11 + $0x2b8] ss:$12 sps:$4 sm:$0xff]  }
 0x91d   : > { %16374 = vmatpush3.bf16.msra.mxu0 %v18666_v51  ;;  %v18717_v51 = vld [vmem:[%s24299_s11 + $0x2d4] ss:$12 sps:$4 sm:$0xff]  }
 0x91e   : > { %16375 = vmatprep.subr.bf16.mxu0 %v18667_v14  ;;  %v18715_v14 = vld [vmem:[%s24299_s11 + $0x2d0] ss:$12 sps:$4 sm:$0xff]  }
 0x921   : > { %16376 = vmatpush3.bf16.msra.mxu0 %v18668_v0  ;;  %v18720_v0 = vld [vmem:[%s24299_s11 + $0x2ec] ss:$12 sps:$4 sm:$0xff]  }
 0x922   : > { %16377 = vmatprep.subr.bf16.mxu0 %v18669_v21  ;;  %v18755_v21 = vld [vmem:[%s24299_s11 + $0x360] ss:$12 sps:$4 sm:$0xff]  }
 0x925   : > { %16378 = vmatpush3.bf16.msra.mxu0 %v18670_v30  ;;  %v18757_v30 = vld [vmem:[%s24299_s11 + $0x364] ss:$12 sps:$4 sm:$0xff]  }
 0x926   : > { %16379 = vmatprep.subr.bf16.mxu0 %v18671_v7  ;;  %v18718_v7 = vld [vmem:[%s24299_s11 + $0x2e8] ss:$12 sps:$4 sm:$0xff]   ;;  %11931 = vmatprep.subr.bf16.mxu1 %v18757_v30 }
 0x927   : > { %11932 = vmatpush1.bf16.msra.mxu1 %v18755_v21 }
 0x929   : > { %16380 = vmatpush3.bf16.msra.mxu0 %v18672_v46  ;;  %v18723_v46 = vld [vmem:[%s24299_s11 + $0x304] ss:$12 sps:$4 sm:$0xff]  }
 0x92a   : > { %11337 = vmatprep.subr.bf16.mxu0 %v19069_v2 }
 0x92c   : > { %11330 = vmatmul.mubr.bf16.vlgmr.msra.gmra.mrb[72].mxu0 %v22858_v43  ;;  %v18676_v43 = vld [vmem:[%s24298_s10 + $0x350] ss:$12 sps:$4 sm:$0xff]  }
 0x92d   : > { %11338 = vmatpush1.bf16.msra.mxu0 %v18673_v56  ;;  %15757 = vmatprep.mubr.msk.bf16.mxu0 %vm3261_vm8, %v22988_v58  ;;  %v18677_v58 = vld [vmem:[%s24298_s10 + $0x368] ss:$12 sps:$4 sm:$0xff]   ;;  %v18721_v56 = vld [vmem:[%s24299_s11 + $0x300] ss:$12 sps:$4 sm:$0xff]  }
 0x92e   : > { %11339 = vmatprep.subr.bf16.mxu0 %v19069_v2 }
 0x931   : > { %11340 = vmatpush1.bf16.msra.mxu0 %v18674_v63  ;;  %v18726_v63 = vld [vmem:[%s24299_s11 + $0x31c] ss:$12 sps:$4 sm:$0xff]  }
 0x932   : > { %11341 = vmatprep.subr.bf16.mxu0 %v19069_v2 }
 0x935   : > { %11342 = vmatpush1.bf16.msra.mxu0 %v18675_v41  ;;  %v18724_v41 = vld [vmem:[%s24299_s11 + $0x318] ss:$12 sps:$4 sm:$0xff]  }
 0x936   : > { %11343 = vmatprep.subr.bf16.mxu0 %v19069_v2 }
 0x939   : > { %11344 = vmatpush1.bf16.msra.mxu0 %v18676_v43 }
 0x93a   : > { %11345 = vmatprep.subr.bf16.mxu0 %v19069_v2 }
 0x93d   : > { %11346 = vmatpush1.bf16.msra.mxu0 %v18677_v58  ;;  %v18729_v58 = vld [vmem:[%s24299_s11 + $0x334] ss:$12 sps:$4 sm:$0xff]  }
 0x93e   : > { %11347 = vmatprep.subr.bf16.mxu0 %v19069_v2 }
 0x941   : > { %11348 = vmatpush1.bf16.msra.mxu0 %v18678_v4 }
 0x942   : > { %11349 = vmatprep.subr.bf16.mxu0 %v19069_v2 }
 0x945   : > { %11350 = vmatpush1.bf16.msra.mxu0 %v18679_v33 }
 0x946   : > { %11351 = vmatprep.subr.bf16.mxu0 %v19069_v2 }
 0x949   : > { %11352 = vmatpush1.bf16.msra.mxu0 %v18680_v52 }
 0x94a   : > { %11353 = vmatprep.subr.bf16.mxu0 %v19069_v2 }
 0x94d   : > { %11354 = vmatpush1.bf16.msra.mxu0 %v18681_v53 }
 0x94e   : > { %11355 = vmatprep.subr.bf16.mxu0 %v19069_v2 }
 0x94f   : > { %v10127_v59 = vpop.f32.mrb[52].mxu0  ;;  %v11250_v60 = vpop.f32.mrb[40].mxu1 }
 0x950   : > { %v23304_v37 = vmax.f32 %v10127_v59, %v11250_v60  ;;  %v10129_v31 = vpop.f32.mrb[53].mxu0  ;;  %v11252_v57 = vpop.f32.mrb[41].mxu1  ;;  %v18732_v60 = vld [vmem:[%s24299_s11 + $0x34c] ss:$12 sps:$4 sm:$0xff]  }
 0x951   : > { %v11378_v20 = vmax.f32 %v10129_v31, %v11252_v57  ;;  %v10131_v5 = vpop.f32.mrb[54].mxu0  ;;  %v11254_v8 = vpop.f32.mrb[42].mxu1  ;;  %11356 = vmatpush1.bf16.msra.mxu0 %v18682_v54  ;;  %v18727_v54 = vld [vmem:[%s24299_s11 + $0x330] ss:$12 sps:$4 sm:$0xff]   ;;  %v18730_v57 = vld [vmem:[%s24299_s11 + $0x348] ss:$12 sps:$4 sm:$0xff]  }
 0x952   : > { %v10132_v10 = vpop.f32.mrb[55].mxu0  ;;  %v11255_v12 = vpop.f32.mrb[43].mxu1  ;;  %11357 = vmatprep.subr.bf16.mxu0 %v19069_v2  ;;  %v23414_v43 = vpack.c.bf16 %v23304_v37, %v23304_v37  ;;  %v18733_v5 = vld [vmem:[%s24299_s11 + $0x2a8] ss:$12 sps:$4 sm:$0xff]  }
 0x953   : > { %v23310_v28 = vpack.c.bf16 %v11378_v20, %v11378_v20  ;;  %v18735_v12 = vld [vmem:[%s24299_s11 + $0x2c0] ss:$12 sps:$4 sm:$0xff]  }
 0x954   : > { %v11547_v37 = vshll.u32 %v23414_v43, 16  ;;  %v11545_v8 = vshrl.u32 %v23414_v43, 16 }
 0x955   : > { %11358 = vmatpush1.bf16.msra.mxu0 %v18683_v9  ;;  %v11554_v23 = vshll.u32 %v23310_v28, 16  ;;  %v11552_v27 = vshrl.u32 %v23310_v28, 16  ;;  %v18734_v9 = vld [vmem:[%s24299_s11 + $0x1e8] ss:$12 sps:$4 sm:$0xff]  }
 0x956   : > { %11359 = vmatprep.subr.bf16.mxu0 %v19069_v2  ;;  %v11549_v20 = vrot.slane %v11547_v37, 1 }
 0x957   : > { %v11556_v25 = vrot.slane %v11554_v23, 1  ;;  %v18737_v23 = vld [vmem:[%s24299_s11 + $0x2d8] ss:$12 sps:$4 sm:$0xff]  }
 0x958   : > { %v11550_v10 = vor.u32 %v11549_v20, %v11545_v8 }
 0x959   : > { %11360 = vmatpush1.bf16.msra.mxu0 %v18684_v16  ;;  %v23327_v13 = vor.u32 %v11556_v25, %v11552_v27  ;;  %v18736_v16 = vld [vmem:[%s24299_s11 + $0x200] ss:$12 sps:$4 sm:$0xff]   ;;  %v18739_v25 = vld [vmem:[%s24299_s11 + $0x2f0] ss:$12 sps:$4 sm:$0xff]   ;;  %v18741_v27 = vld [vmem:[%s24299_s11 + $0x308] ss:$12 sps:$4 sm:$0xff]  }
 0x95a   : > { %11890 = vmatprep.subr.bf16.mxu0 %v18687_v24  ;;  %v18738_v24 = vld [vmem:[%s24299_s11 + $0x218] ss:$12 sps:$4 sm:$0xff]  }
 0x95c   : > { %11370 = vmatmul.mubr.bf16.vlgmr.msra.gmra.mrb[76].mxu0 %v23009_v34  ;;  %v18696_v34 = vld [vmem:[%s24299_s11 + $0x22c] ss:$12 sps:$4 sm:$0xff]  }
 0x95d   : > { %11891 = vmatpush1.bf16.msra.mxu0 %v18685_v40  ;;  %11922 = vmatprep.mubr.bf16.mxu0 %v23327_v13  ;;  %v18740_v40 = vld [vmem:[%s24299_s11 + $0x230] ss:$12 sps:$4 sm:$0xff]  }
 0x95e   : > { %11892 = vmatprep.subr.bf16.mxu0 %v18690_v26  ;;  %v18742_v26 = vld [vmem:[%s24299_s11 + $0x248] ss:$12 sps:$4 sm:$0xff]  }
 0x961   : > { %11893 = vmatpush1.bf16.msra.mxu0 %v18688_v49  ;;  %v18744_v49 = vld [vmem:[%s24299_s11 + $0x260] ss:$12 sps:$4 sm:$0xff]  }
 0x962   : > { %11894 = vmatprep.subr.bf16.mxu0 %v18693_v35  ;;  %v18745_v35 = vld [vmem:[%s24299_s11 + $0x338] ss:$12 sps:$4 sm:$0xff]  }
 0x965   : > { %11895 = vmatpush1.bf16.msra.mxu0 %v18691_v38  ;;  %v18763_v38 = vld [vmem:[%s24299_s11 + $0x37c] ss:$12 sps:$4 sm:$0xff]  }
 0x966   : > { %11896 = vmatprep.subr.bf16.mxu0 %v18696_v34  ;;  %v18761_v34 = vld [vmem:[%s24299_s11 + $0x378] ss:$12 sps:$4 sm:$0xff]   ;;  %11933 = vmatprep.subr.bf16.mxu1 %v18763_v38  ;;  %v18787_v38 = vld [vmem:[%s24299_s11 + $0x140] ss:$12 sps:$4 sm:$0xff]  }
 0x967   : > { %11934 = vmatpush1.bf16.msra.mxu1 %v18761_v34  ;;  %v18786_v34 = vld [vmem:[%s24299_s11 + $0x3b0] ss:$12 sps:$4 sm:$0xff]  }
 0x969   : > { %11897 = vmatpush1.bf16.msra.mxu0 %v18694_v17  ;;  %v18746_v17 = vld [vmem:[%s24299_s11 + $0x278] ss:$12 sps:$4 sm:$0xff]  }
 0x96a   : > { %11898 = vmatprep.subr.bf16.mxu0 %v18699_v32  ;;  %v18747_v32 = vld [vmem:[%s24299_s11 + $0x350] ss:$12 sps:$4 sm:$0xff]  }
 0x96d   : > { %11899 = vmatpush1.bf16.msra.mxu0 %v18697_v22  ;;  %v18769_v22 = vld [vmem:[%s24299_s11 + $0x394] ss:$12 sps:$4 sm:$0xff]  }
 0x96e   : > { %11900 = vmatprep.subr.bf16.mxu0 %v18702_v1  ;;  %v18767_v1 = vld [vmem:[%s24299_s11 + $0x390] ss:$12 sps:$4 sm:$0xff]   ;;  %11935 = vmatprep.subr.bf16.mxu1 %v18769_v22  ;;  %v18792_v22 = vld [vmem:[%s24299_s11 + $0x158] ss:$12 sps:$4 sm:$0xff]  }
 0x96f   : > { %v16315_v11 = vpop.f32.mrb[56].mxu0  ;;  %11936 = vmatpush1.bf16.msra.mxu1 %v18767_v1  ;;  %v18789_v1 = vld [vmem:[%s24299_s11] ss:$12 sps:$4 sm:$0xff]  }
 0x970   : > { %v16316_v29 = vpop.f32.mrb[57].mxu0 }
 0x971   : > { %v16317_v50 = vadd.f32 %v16316_v29, %v16315_v11  ;;  %v16318_v36 = vpop.f32.mrb[58].mxu0  ;;  %11901 = vmatpush1.bf16.msra.mxu0 %v18700_v3  ;;  %v18748_v3 = vld [vmem:[%s24299_s11 + $0x290] ss:$12 sps:$4 sm:$0xff]   ;;  %v18772_v11 = vld [vmem:[%s24299_s11 + $0x3a8] ss:$12 sps:$4 sm:$0xff]  }
 0x972   : > { %v16319_v47 = vpop.f32.mrb[59].mxu0  ;;  %11902 = vmatprep.subr.bf16.mxu0 %v18705_v42  ;;  %v18751_v42 = vld [vmem:[%s24299_s11 + $0x184] ss:$12 sps:$4 sm:$0xff]   ;;  %v18774_v29 = vld [vmem:[%s24299_s11 + $0x3ac] ss:$12 sps:$4 sm:$0xff]  }
 0x973   : > { %11937 = vmatprep.subr.bf16.mxu1 %v18774_v29  ;;  %v18754_v36 = vld [vmem:[%s24299_s11 + $0x19c] ss:$12 sps:$4 sm:$0xff]   ;;  %v18760_v47 = vld [vmem:[%s24299_s11 + $0x1b4] ss:$12 sps:$4 sm:$0xff]   ;;  %v18794_v29 = vld [vmem:[%s24299_s11 + $0x18] ss:$12 sps:$4 sm:$0xff]  }
 0x974   : > { %11938 = vmatpush1.bf16.msra.mxu1 %v18772_v11  ;;  %v18797_v11 = vld [vmem:[%s24299_s11 + $0x170] ss:$12 sps:$4 sm:$0xff]  }
 0x975   : > { %11903 = vmatpush1.bf16.msra.mxu0 %v18703_v44  ;;  %16602 = vmatprep.subr.bf16.mxu1 %v19070_v6  ;;  %v18752_v44 = vld [vmem:[%s24299_s11 + $0x198] ss:$12 sps:$4 sm:$0xff]  }
 0x976   : > { %11904 = vmatprep.subr.bf16.mxu0 %v18708_v15 }
 0x979   : > { %11905 = vmatpush1.bf16.msra.mxu0 %v18706_v55 }
 0x97a   : > { %11906 = vmatprep.subr.bf16.mxu0 %v18711_v19 }
 0x97d   : > { %11907 = vmatpush1.bf16.msra.mxu0 %v18709_v45 }
 0x97e   : > { %11908 = vmatprep.subr.bf16.mxu0 %v18714_v39  ;;  %v18758_v39 = vld [vmem:[%s24299_s11 + $0x1b0] ss:$12 sps:$4 sm:$0xff]  }
 0x981   : > { %11909 = vmatpush1.bf16.msra.mxu0 %v18712_v48 }
 0x982   : > { %11910 = vmatprep.subr.bf16.mxu0 %v18717_v51  ;;  %v18766_v51 = vld [vmem:[%s24299_s11 + $0x1cc] ss:$12 sps:$4 sm:$0xff]  }
 0x985   : > { %11911 = vmatpush1.bf16.msra.mxu0 %v18715_v14  ;;  %v18764_v14 = vld [vmem:[%s24299_s11 + $0x1c8] ss:$12 sps:$4 sm:$0xff]  }
 0x986   : > { %11912 = vmatprep.subr.bf16.mxu0 %v18720_v0  ;;  %v18770_v0 = vld [vmem:[%s24299_s11 + $0xc8] ss:$12 sps:$4 sm:$0xff]  }
 0x989   : > { %11913 = vmatpush1.bf16.msra.mxu0 %v18718_v7 }
 0x98a   : > { %11914 = vmatprep.subr.bf16.mxu0 %v18723_v46 }
 0x98d   : > { %11915 = vmatpush1.bf16.msra.mxu0 %v18721_v56 }
 0x98e   : > { %11916 = vmatprep.subr.bf16.mxu0 %v18726_v63 }
 0x98f   : > { %v16337_v4 = vpop.f32.mrb[60].mxu0 }
 0x990   : > { %v16338_v33 = vpop.f32.mrb[61].mxu0 }
 0x991   : > { %v16339_v52 = vadd.f32 %v16338_v33, %v16337_v4  ;;  %v16340_v53 = vpop.f32.mrb[62].mxu0  ;;  %11917 = vmatpush1.bf16.msra.mxu0 %v18724_v41 }
 0x992   : > { %v16341_v59 = vpop.f32.mrb[63].mxu0  ;;  %11918 = vmatprep.subr.bf16.mxu0 %v18729_v58 }
 0x993   : > { %v23426_v31 = vadd.f32 %v16339_v52, %v16317_v50  ;;  %v18749_v50 = vld [vmem:[%s24299_s11 + $0x180] ss:$12 sps:$4 sm:$0xff]  }
 0x995   : > { %11919 = vmatpush1.bf16.msra.mxu0 %v18727_v54 }
 0x996   : > { %11920 = vmatprep.subr.bf16.mxu0 %v18732_v60 }
 0x999   : > { %11921 = vmatpush1.bf16.msra.mxu0 %v18730_v57  ;;  %v18771_v57 = vld [vmem:[%s24299_s11 + $0x8] ss:$12 sps:$4 sm:$0xff]  }
 0x99a   : > { %16387 = vmatprep.subr.bf16.mxu0 %v18733_v5  ;;  %v18775_v5 = vld [vmem:[%s24299_s11 + $0xe0] ss:$12 sps:$4 sm:$0xff]  }
 0x99c   : > { %11923 = vmatmul.mubr.bf16.vlgmr.msra.gmra.mrb[80].mxu0 %v11550_v10 }
 0x99d   : > { %16388 = vmatpush3.bf16.msra.mxu0 %v18734_v9  ;;  %12004 = vmatprep.mubr.bf16.mxu0 %v23327_v13  ;;  %v18743_v13 = vld [vmem:[%s24299_s11 + $0x320] ss:$12 sps:$4 sm:$0xff]  }
 0x99e   : > { %16389 = vmatprep.subr.bf16.mxu0 %v18735_v12  ;;  %v18776_v9 = vld [vmem:[%s24299_s11 + $0x20] ss:$12 sps:$4 sm:$0xff]  }
 0x9a1   : > { %16390 = vmatpush3.bf16.msra.mxu0 %v18736_v16  ;;  %v18778_v16 = vld [vmem:[%s24299_s11 + $0xf8] ss:$12 sps:$4 sm:$0xff]  }
 0x9a2   : > { %16391 = vmatprep.subr.bf16.mxu0 %v18737_v23  ;;  %v18777_v23 = vld [vmem:[%s24299_s11 + $0x368] ss:$12 sps:$4 sm:$0xff]  }
 0x9a5   : > { %16392 = vmatpush3.bf16.msra.mxu0 %v18738_v24 }
 0x9a6   : > { %16393 = vmatprep.subr.bf16.mxu0 %v18739_v25  ;;  %v18779_v25 = vld [vmem:[%s24299_s11 + $0x38] ss:$12 sps:$4 sm:$0xff]  }
 0x9a9   : > { %16394 = vmatpush3.bf16.msra.mxu0 %v18740_v40  ;;  %v18781_v40 = vld [vmem:[%s24299_s11 + $0x110] ss:$12 sps:$4 sm:$0xff]  }
 0x9aa   : > { %16395 = vmatprep.subr.bf16.mxu0 %v18741_v27  ;;  %v18780_v27 = vld [vmem:[%s24299_s11 + $0x380] ss:$12 sps:$4 sm:$0xff]  }
 0x9ad   : > { %16396 = vmatpush3.bf16.msra.mxu0 %v18742_v26  ;;  %v18782_v26 = vld [vmem:[%s24299_s11 + $0x50] ss:$12 sps:$4 sm:$0xff]  }
 0x9ae   : > { %16397 = vmatprep.subr.bf16.mxu0 %v18743_v13  ;;  %v18784_v13 = vld [vmem:[%s24299_s11 + $0x128] ss:$12 sps:$4 sm:$0xff]  }
 0x9b1   : > { %16398 = vmatpush3.bf16.msra.mxu0 %v18744_v49  ;;  %v18783_v49 = vld [vmem:[%s24299_s11 + $0x398] ss:$12 sps:$4 sm:$0xff]  }
 0x9b2   : > { %16399 = vmatprep.subr.bf16.mxu0 %v18745_v35  ;;  %v18785_v35 = vld [vmem:[%s24299_s11 + $0x68] ss:$12 sps:$4 sm:$0xff]  }
 0x9b5   : > { %16400 = vmatpush3.bf16.msra.mxu0 %v18746_v17  ;;  %v18791_v17 = vld [vmem:[%s24299_s11 + $0x4] ss:$12 sps:$4 sm:$0xff]  }
 0x9b6   : > { %16401 = vmatprep.subr.bf16.mxu0 %v18747_v32  ;;  %v18788_v32 = vld [vmem:[%s24299_s11 + $0x80] ss:$12 sps:$4 sm:$0xff]  }
 0x9b9   : > { %16402 = vmatpush3.bf16.msra.mxu0 %v18748_v3  ;;  %v18796_v3 = vld [vmem:[%s24299_s11 + $0x1c] ss:$12 sps:$4 sm:$0xff]  }
 0x9ba   : > { %12415 = vmatprep.subr.bf16.mxu0 %v18751_v42  ;;  %v18793_v42 = vld [vmem:[%s24299_s11 + $0x98] ss:$12 sps:$4 sm:$0xff]  }
 0x9bc   : > { %12005 = vmatmul.mubr.bf16.vlgmr.msra.gmra.mrb[84].mxu0 %v11550_v10 }
 0x9bd   : > { %12416 = vmatpush1.bf16.msra.mxu0 %v18749_v50  ;;  %12447 = vmatprep.mubr.bf16.mxu0 %v19069_v2  ;;  %v18801_v50 = vld [vmem:[%s24299_s11 + $0x34] ss:$12 sps:$4 sm:$0xff]  }
 0x9be   : > { %12417 = vmatprep.subr.bf16.mxu0 %v18754_v36  ;;  %v18798_v36 = vld [vmem:[%s24299_s11 + $0xb0] ss:$12 sps:$4 sm:$0xff]  }
 0x9bf   : > { %v10248_v15 = vpop.f32.mrb[64].mxu0 }
 0x9c0   : > { %v10249_v55 = vadd.f32 %v10248_v15, %v23426_v31  ;;  %v10250_v19 = vpop.f32.mrb[65].mxu0  ;;  %v18802_v15 = vld [vmem:[%s24299_s11 + $0x188] ss:$12 sps:$4 sm:$0xff]  }
 0x9c1   : > { %v10251_v45 = vpop.f32.mrb[66].mxu0  ;;  %12418 = vmatpush1.bf16.msra.mxu0 %v18752_v44  ;;  %v18799_v44 = vld [vmem:[%s24299_s11 + $0x30] ss:$12 sps:$4 sm:$0xff]  }
 0x9c2   : > { %v10252_v48 = vpop.f32.mrb[67].mxu0  ;;  %12419 = vmatprep.subr.bf16.mxu0 %v18760_v47  ;;  %v18805_v47 = vld [vmem:[%s24299_s11 + $0x4c] ss:$12 sps:$4 sm:$0xff]   ;;  %v18809_v19 = vld [vmem:[%s24299_s11 + $0x64] ss:$12 sps:$4 sm:$0xff]  }
 0x9c3   : > { %v18806_v45 = vld [vmem:[%s24299_s11 + $0x1a0] ss:$12 sps:$4 sm:$0xff]   ;;  %v18813_v48 = vld [vmem:[%s24299_s11 + $0x7c] ss:$12 sps:$4 sm:$0xff]  }
 0x9c5   : > { %12420 = vmatpush1.bf16.msra.mxu0 %v18758_v39  ;;  %v18807_v39 = vld [vmem:[%s24299_s11 + $0x60] ss:$12 sps:$4 sm:$0xff]  }
 0x9c6   : > { %12421 = vmatprep.subr.bf16.mxu0 %v18766_v51  ;;  %v18810_v51 = vld [vmem:[%s24299_s11 + $0x1b8] ss:$12 sps:$4 sm:$0xff]  }
 0x9c9   : > { %12422 = vmatpush1.bf16.msra.mxu0 %v18764_v14  ;;  %v18811_v14 = vld [vmem:[%s24299_s11 + $0x78] ss:$12 sps:$4 sm:$0xff]  }
 0x9ca   : > { %16414 = vmatprep.subr.bf16.mxu0 %v18770_v0  ;;  %v18817_v0 = vld [vmem:[%s24299_s11 + $0x94] ss:$12 sps:$4 sm:$0xff]  }
 0x9df   : > { %v16359_v21 = vpop.f32.mrb[68].mxu0 }
 0x9e0   : > { %v16360_v30 = vpop.f32.mrb[69].mxu0 }
 0x9e1   : > { %v16361_v7 = vadd.f32 %v16360_v30, %v16359_v21  ;;  %v16362_v46 = vpop.f32.mrb[70].mxu0  ;;  %v18814_v21 = vld [vmem:[%s24299_s11 + $0x1d0] ss:$12 sps:$4 sm:$0xff]  }
 0x9e2   : > { %v16363_v56 = vpop.f32.mrb[71].mxu0  ;;  %v18820_v30 = vld [vmem:[%s24299_s11 + $0x544] ss:$12 sps:$4 sm:$0xff]   ;;  %v18823_v46 = vld [vmem:[%s24299_s11 + $0xac] ss:$12 sps:$4 sm:$0xff]  }
 0x9e3   : > { %v18818_v56 = vld [vmem:[%s24299_s11 + $0x540] ss:$12 sps:$4 sm:$0xff]  }
 0x9ff   : > { %v16381_v63 = vpop.f32.mrb[72].mxu0 }
 0xa00   : > { %v16382_v41 = vpop.f32.mrb[73].mxu0 }
 0xa01   : > { %v16383_v58 = vadd.f32 %v16382_v41, %v16381_v63  ;;  %v16384_v4 = vpop.f32.mrb[74].mxu0  ;;  %v18826_v63 = vld [vmem:[%s24299_s11 + $0x55c] ss:$12 sps:$4 sm:$0xff]  }
 0xa02   : > { %v16385_v33 = vpop.f32.mrb[75].mxu0  ;;  %v18821_v41 = vld [vmem:[%s24299_s11 + $0xa8] ss:$12 sps:$4 sm:$0xff]   ;;  %v18824_v4 = vld [vmem:[%s24299_s11 + $0x558] ss:$12 sps:$4 sm:$0xff]  }
 0xa03   : > { %v11332_v52 = vadd.f32 %v16383_v58, %v16361_v7  ;;  %v18815_v7 = vld [vmem:[%s24299_s11 + $0x90] ss:$12 sps:$4 sm:$0xff]   ;;  %v18832_v33 = vld [vmem:[%s24299_s11 + $0x574] ss:$12 sps:$4 sm:$0xff]  }
 0xa04   : > { %v18829_v58 = vld [vmem:[%s24299_s11 + $0xc4] ss:$12 sps:$4 sm:$0xff]  }
 0xa2f   : > { %v11371_v53 = vpop.f32.mrb[76].mxu0 }
 0xa30   : > { %v11372_v54 = vadd.f32 %v11371_v53, %v11332_v52  ;;  %v11373_v59 = vpop.f32.mrb[77].mxu0  ;;  %v18827_v52 = vld [vmem:[%s24299_s11 + $0xc0] ss:$12 sps:$4 sm:$0xff]   ;;  %v18835_v53 = vld [vmem:[%s24299_s11 + $0xdc] ss:$12 sps:$4 sm:$0xff]  }
 0xa31   : > { %v11374_v60 = vpop.f32.mrb[78].mxu0  ;;  %v18833_v59 = vld [vmem:[%s24299_s11 + $0xd8] ss:$12 sps:$4 sm:$0xff]  }
 0xa32   : > { %v11379_v37 = vmax.f32 %v10249_v55, %v11372_v54  ;;  %v11375_v31 = vpop.f32.mrb[79].mxu0  ;;  %v18803_v55 = vld [vmem:[%s24299_s11 + $0x48] ss:$12 sps:$4 sm:$0xff]   ;;  %v18838_v54 = vld [vmem:[%s24299_s11 + $0x58c] ss:$12 sps:$4 sm:$0xff]  }
 0xa33   : > { %v18841_v60 = vld [vmem:[%s24299_s11 + $0xf4] ss:$12 sps:$4 sm:$0xff]  }
 0xa34   : > { %v23532_v20 = vpack.c.bf16 %v11379_v37, %v11379_v37  ;;  %v18836_v31 = vld [vmem:[%s24299_s11 + $0x588] ss:$12 sps:$4 sm:$0xff]  }
 0xa36   : > { %15960 = vmatmul.mubr.msk.bf16.vlgmr.msra.gmra.mrb[88].mxu0 %vm3261_vm8, %v23532_v20  ;;  %v11561_v8 = vshll.u32 %v23532_v20, 16  ;;  %v11559_v10 = vshrl.u32 %v23532_v20, 16 }
 0xa37   : > { %16415 = vmatpush3.bf16.msra.mxu0 %v18771_v57  ;;  %12488 = vmatprep.mubr.bf16.mxu0 %v23310_v28 }
 0xa38   : > { %16416 = vmatprep.subr.bf16.mxu0 %v18775_v5  ;;  %v11563_v12 = vrot.slane %v11561_v8, 1  ;;  %v18842_v5 = vld [vmem:[%s24299_s11 + $0x488] ss:$12 sps:$4 sm:$0xff]  }
 0xa3a   : > { %v11564_v24 = vor.u32 %v11563_v12, %v11559_v10  ;;  %v18846_v12 = vld [vmem:[%s24299_s11 + $0x10c] ss:$12 sps:$4 sm:$0xff]  }
 0xa3b   : > { %16417 = vmatpush3.bf16.msra.mxu0 %v18776_v9  ;;  %v18839_v9 = vld [vmem:[%s24299_s11 + $0xf0] ss:$12 sps:$4 sm:$0xff]  }
 0xa3c   : > { %15898 = vmatmul.mubr.msk.bf16.vlgmr.msra.gmra.mrb[44].mxu1 %vm3261_vm8, %v11564_v24  ;;  %16418 = vmatprep.subr.bf16.mxu0 %v18778_v16  ;;  %v18843_v16 = vld [vmem:[%s24299_s11 + $0x3c8] ss:$12 sps:$4 sm:$0xff]  }
 0xa3d   : > { %16603 = vmatpush3.bf16.msra.mxu1 %v18777_v23  ;;  %16610 = vmatprep.mubr.msk.bf16.mxu1 %vm19071_vm4, %v19070_v6  ;;  %v12622_v23 = vrot.slane %v23532_v20, 1 }
 0xa3e   : > { %16604 = vmatprep.subr.bf16.mxu1 %v19070_v6 }
 0xa3f   : > { %16419 = vmatpush3.bf16.msra.mxu0 %v18779_v25  ;;  %v12621_v25 = vrot.slane %v23310_v28, 1 }
 0xa40   : > { %16420 = vmatprep.subr.bf16.mxu0 %v18781_v40  ;;  %v18844_v40 = vld [vmem:[%s24299_s11 + $0x108] ss:$12 sps:$4 sm:$0xff]  }
 0xa41   : > { %16605 = vmatpush3.bf16.msra.mxu1 %v18780_v27  ;;  %v18851_v27 = vld [vmem:[%s24299_s11 + $0x124] ss:$12 sps:$4 sm:$0xff]  }
 0xa42   : > { %16606 = vmatprep.subr.bf16.mxu1 %v19070_v6 }
 0xa43   : > { %16421 = vmatpush3.bf16.msra.mxu0 %v18782_v26  ;;  %v18848_v26 = vld [vmem:[%s24299_s11 + $0x3e0] ss:$12 sps:$4 sm:$0xff]  }
 0xa44   : > { %16422 = vmatprep.subr.bf16.mxu0 %v18784_v13  ;;  %v18849_v13 = vld [vmem:[%s24299_s11 + $0x120] ss:$12 sps:$4 sm:$0xff]  }
 0xa45   : > { %16607 = vmatpush3.bf16.msra.mxu1 %v18783_v49  ;;  %v18856_v49 = vld [vmem:[%s24299_s11 + $0x13c] ss:$12 sps:$4 sm:$0xff]  }
 0xa46   : > { %16608 = vmatprep.subr.bf16.mxu1 %v19070_v6 }
 0xa47   : > { %16423 = vmatpush3.bf16.msra.mxu0 %v18785_v35  ;;  %v18853_v35 = vld [vmem:[%s24299_s11 + $0x3f8] ss:$12 sps:$4 sm:$0xff]  }
 0xa48   : > { %16424 = vmatprep.subr.bf16.mxu0 %v18787_v38  ;;  %v18857_v38 = vld [vmem:[%s24299_s11 + $0x4d0] ss:$12 sps:$4 sm:$0xff]  }
 0xa49   : > { %16609 = vmatpush3.bf16.msra.mxu1 %v18786_v34  ;;  %v18854_v34 = vld [vmem:[%s24299_s11 + $0x138] ss:$12 sps:$4 sm:$0xff]  }
 0xa4a   : > { %12374 = vmatprep.subr.bf16.mxu1 %v18791_v17  ;;  %v18861_v17 = vld [vmem:[%s24299_s11 + $0x154] ss:$12 sps:$4 sm:$0xff]  }
 0xa4b   : > { %16425 = vmatpush3.bf16.msra.mxu0 %v18788_v32  ;;  %v18858_v32 = vld [vmem:[%s24299_s11 + $0x410] ss:$12 sps:$4 sm:$0xff]  }
 0xa4c   : > { %16611 = vmatmul.mubr.msk.bf16.vlgmr.msra.gmra.mrb[48].mxu1 %vm3261_vm8, %v11564_v24  ;;  %16426 = vmatprep.subr.bf16.mxu0 %v18792_v22  ;;  %v18847_v24 = vld [vmem:[%s24299_s11 + $0x4a0] ss:$12 sps:$4 sm:$0xff]   ;;  %v18862_v22 = vld [vmem:[%s24299_s11 + $0x4e8] ss:$12 sps:$4 sm:$0xff]  }
 0xa4d   : > { %12375 = vmatpush1.bf16.msra.mxu1 %v18789_v1  ;;  %12406 = vmatprep.mubr.bf16.mxu1 %v23310_v28  ;;  %v18852_v28 = vld [vmem:[%s24299_s11 + $0x4b8] ss:$12 sps:$4 sm:$0xff]   ;;  %v18859_v1 = vld [vmem:[%s24299_s11 + $0x150] ss:$12 sps:$4 sm:$0xff]  }
 0xa4e   : > { %12376 = vmatprep.subr.bf16.mxu1 %v18796_v3  ;;  %v18866_v3 = vld [vmem:[%s24299_s11 + $0x16c] ss:$12 sps:$4 sm:$0xff]  }
 0xa4f   : > { %16427 = vmatpush3.bf16.msra.mxu0 %v18793_v42  ;;  %v18863_v42 = vld [vmem:[%s24299_s11 + $0x428] ss:$12 sps:$4 sm:$0xff]  }
 0xa50   : > { %16428 = vmatprep.subr.bf16.mxu0 %v18797_v11  ;;  %v18867_v11 = vld [vmem:[%s24299_s11 + $0x500] ss:$12 sps:$4 sm:$0xff]  }
 0xa51   : > { %12377 = vmatpush1.bf16.msra.mxu1 %v18794_v29  ;;  %v18864_v29 = vld [vmem:[%s24299_s11 + $0x168] ss:$12 sps:$4 sm:$0xff]  }
 0xa52   : > { %12378 = vmatprep.subr.bf16.mxu1 %v18801_v50  ;;  %v18871_v50 = vld [vmem:[%s24299_s11 + $0x3c4] ss:$12 sps:$4 sm:$0xff]  }
 0xa53   : > { %16429 = vmatpush3.bf16.msra.mxu0 %v18798_v36  ;;  %v18868_v36 = vld [vmem:[%s24299_s11 + $0x440] ss:$12 sps:$4 sm:$0xff]  }
 0xa54   : > { %16614 = vmatprep.subr.bf16.mxu0 %v19070_v6 }
 0xa55   : > { %12379 = vmatpush1.bf16.msra.mxu1 %v18799_v44  ;;  %v18872_v44 = vld [vmem:[%s24299_s11 + $0x518] ss:$12 sps:$4 sm:$0xff]  }
 0xa56   : > { %12489 = vmatmul.mubr.bf16.vlgmr.msra.gmra.mrb[92].mxu0 %v23414_v43  ;;  %12380 = vmatprep.subr.bf16.mxu1 %v18805_v47  ;;  %v18869_v47 = vld [vmem:[%s24299_s11 + $0x3c0] ss:$12 sps:$4 sm:$0xff]  }
 0xa57   : > { %16615 = vmatpush3.bf16.msra.mxu0 %v18802_v15  ;;  %16622 = vmatprep.mubr.msk.bf16.mxu0 %vm19071_vm4, %v19070_v6  ;;  %v18876_v15 = vld [vmem:[%s24299_s11 + $0x3dc] ss:$12 sps:$4 sm:$0xff]  }
 0xa58   : > { %16616 = vmatprep.subr.bf16.mxu0 %v19070_v6 }
 0xa59   : > { %12381 = vmatpush1.bf16.msra.mxu1 %v18803_v55  ;;  %v18873_v55 = vld [vmem:[%s24299_s11 + $0x458] ss:$12 sps:$4 sm:$0xff]  }
 0xa5a   : > { %12382 = vmatprep.subr.bf16.mxu1 %v18809_v19  ;;  %v18877_v19 = vld [vmem:[%s24299_s11 + $0x530] ss:$12 sps:$4 sm:$0xff]  }
 0xa5b   : > { %16617 = vmatpush3.bf16.msra.mxu0 %v18806_v45  ;;  %v18874_v45 = vld [vmem:[%s24299_s11 + $0x3d8] ss:$12 sps:$4 sm:$0xff]  }
 0xa5c   : > { %16618 = vmatprep.subr.bf16.mxu0 %v19070_v6 }
 0xa5d   : > { %12383 = vmatpush1.bf16.msra.mxu1 %v18807_v39  ;;  %v18881_v39 = vld [vmem:[%s24299_s11 + $0x3f4] ss:$12 sps:$4 sm:$0xff]  }
 0xa5e   : > { %12384 = vmatprep.subr.bf16.mxu1 %v18813_v48 }
 0xa5f   : > { %16619 = vmatpush3.bf16.msra.mxu0 %v18810_v51  ;;  %v18878_v51 = vld [vmem:[%s24299_s11 + $0x470] ss:$12 sps:$4 sm:$0xff]  }
 0xa60   : > { %16620 = vmatprep.subr.bf16.mxu0 %v19070_v6 }
 0xa61   : > { %12385 = vmatpush1.bf16.msra.mxu1 %v18811_v14 }
 0xa62   : > { %12386 = vmatprep.subr.bf16.mxu1 %v18817_v0 }
 0xa63   : > { %16621 = vmatpush3.bf16.msra.mxu0 %v18814_v21 }
 0xa64   : > { %12989 = vmatprep.subr.bf16.mxu0 %v18820_v30  ;;  %v18879_v30 = vld [vmem:[%s24299_s11 + $0x3f0] ss:$12 sps:$4 sm:$0xff]  }
 0xa65   : > { %12387 = vmatpush1.bf16.msra.mxu1 %v18815_v7 }
 0xa66   : > { %16623 = vmatmul.mubr.msk.bf16.vlgmr.msra.gmra.mrb[96].mxu0 %vm3261_vm8, %v23532_v20  ;;  %12388 = vmatprep.subr.bf16.mxu1 %v18823_v46  ;;  %v18885_v46 = vld [vmem:[%s24299_s11 + $0x40c] ss:$12 sps:$4 sm:$0xff]   ;;  %v18906_v20 = vld [vmem:[%s24299_s11 + $0x49c] ss:$12 sps:$4 sm:$0xff]  }
 0xa67   : > { %12990 = vmatpush1.bf16.msra.mxu0 %v18818_v56  ;;  %13021 = vmatprep.mubr.bf16.mxu0 %v19069_v2  ;;  %v18830_v2 = vld [vmem:[%s24299_s11 + $0x570] ss:$12 sps:$4 sm:$0xff]   ;;  %v18882_v56 = vld [vmem:[%s24299_s11 + $0x548] ss:$12 sps:$4 sm:$0xff]  }
 0xa68   : > { %12991 = vmatprep.subr.bf16.mxu0 %v18826_v63  ;;  %v12620_v63 = vrot.slane %v23414_v43, 1 }
 0xa69   : > { %12389 = vmatpush1.bf16.msra.mxu1 %v18821_v41  ;;  %v18883_v41 = vld [vmem:[%s24299_s11 + $0x408] ss:$12 sps:$4 sm:$0xff]  }
 0xa6a   : > { %12390 = vmatprep.subr.bf16.mxu1 %v18829_v58  ;;  %v18889_v58 = vld [vmem:[%s24299_s11 + $0x424] ss:$12 sps:$4 sm:$0xff]  }
 0xa6b   : > { %12992 = vmatpush1.bf16.msra.mxu0 %v18824_v4  ;;  %v18886_v4 = vld [vmem:[%s24299_s11 + $0x560] ss:$12 sps:$4 sm:$0xff]  }
 0xa6c   : > { %12993 = vmatprep.subr.bf16.mxu0 %v18832_v33  ;;  %v18887_v33 = vld [vmem:[%s24299_s11 + $0x420] ss:$12 sps:$4 sm:$0xff]  }
 0xa6d   : > { %12391 = vmatpush1.bf16.msra.mxu1 %v18827_v52  ;;  %v18893_v52 = vld [vmem:[%s24299_s11 + $0x43c] ss:$12 sps:$4 sm:$0xff]  }
 0xa6e   : > { %12392 = vmatprep.subr.bf16.mxu1 %v18835_v53  ;;  %v18890_v53 = vld [vmem:[%s24299_s11 + $0x578] ss:$12 sps:$4 sm:$0xff]  }
 0xa6f   : > { %12994 = vmatpush1.bf16.msra.mxu0 %v18830_v2  ;;  %v23707_v37 = vpop.f32.mrb[80].mxu0  ;;  %v18891_v2 = vld [vmem:[%s24299_s11 + $0x438] ss:$12 sps:$4 sm:$0xff]  }
 0xa70   : > { %v23712_v57 = vpop.f32.mrb[81].mxu0  ;;  %12995 = vmatprep.subr.bf16.mxu0 %v18838_v54  ;;  %v18897_v54 = vld [vmem:[%s24299_s11 + $0x454] ss:$12 sps:$4 sm:$0xff]  }
 0xa71   : > { %12393 = vmatpush1.bf16.msra.mxu1 %v18833_v59  ;;  %v11928_v8 = vpop.f32.mrb[82].mxu0  ;;  %v18894_v59 = vld [vmem:[%s24299_s11 + $0x590] ss:$12 sps:$4 sm:$0xff]  }
 0xa72   : > { %v11929_v10 = vpop.f32.mrb[83].mxu0  ;;  %12394 = vmatprep.subr.bf16.mxu1 %v18841_v60  ;;  %v18895_v60 = vld [vmem:[%s24299_s11 + $0x450] ss:$12 sps:$4 sm:$0xff]  }
 0xa73   : > { %12996 = vmatpush1.bf16.msra.mxu0 %v18836_v31  ;;  %v18900_v31 = vld [vmem:[%s24299_s11 + $0x46c] ss:$12 sps:$4 sm:$0xff]   ;;  %v18903_v8 = vld [vmem:[%s24299_s11 + $0x484] ss:$12 sps:$4 sm:$0xff]  }
 0xa74   : > { %16441 = vmatprep.subr.bf16.mxu0 %v18842_v5  ;;  %v18898_v5 = vld [vmem:[%s24299_s11 + $0x468] ss:$12 sps:$4 sm:$0xff]   ;;  %v18904_v10 = vld [vmem:[%s24299_s11 + $0x498] ss:$12 sps:$4 sm:$0xff]  }
 0xa75   : > { %12395 = vmatpush1.bf16.msra.mxu1 %v18839_v9  ;;  %v18901_v9 = vld [vmem:[%s24299_s11 + $0x480] ss:$12 sps:$4 sm:$0xff]  }
 0xa76   : > { %16102 = vmatmul.mubr.msk.bf16.vlgmr.msra.gmra.mrb[100].mxu0 %vm3261_vm8, %v12622_v23  ;;  %12396 = vmatprep.subr.bf16.mxu1 %v18846_v12  ;;  %v18909_v12 = vld [vmem:[%s24299_s11 + $0x4b4] ss:$12 sps:$4 sm:$0xff]  }
 0xa77   : > { %16442 = vmatpush3.bf16.msra.mxu0 %v18843_v16  ;;  %13062 = vmatprep.mubr.bf16.mxu0 %v12621_v25  ;;  %v18907_v16 = vld [vmem:[%s24299_s11 + $0x4b0] ss:$12 sps:$4 sm:$0xff]  }
 0xa78   : > { %16443 = vmatprep.subr.bf16.mxu0 %v18847_v24  ;;  %v18910_v24 = vld [vmem:[%s24299_s11 + $0x4c8] ss:$12 sps:$4 sm:$0xff]  }
 0xa79   : > { %12397 = vmatpush1.bf16.msra.mxu1 %v18844_v40  ;;  %v18913_v40 = vld [vmem:[%s24299_s11 + $0x4e0] ss:$12 sps:$4 sm:$0xff]  }
 0xa7a   : > { %12398 = vmatprep.subr.bf16.mxu1 %v18851_v27  ;;  %v18918_v27 = vld [vmem:[%s24299_s11 + $0x4fc] ss:$12 sps:$4 sm:$0xff]  }
 0xa7b   : > { %16444 = vmatpush3.bf16.msra.mxu0 %v18848_v26  ;;  %v18916_v26 = vld [vmem:[%s24299_s11 + $0x4f8] ss:$12 sps:$4 sm:$0xff]  }
 0xa7c   : > { %16445 = vmatprep.subr.bf16.mxu0 %v18852_v28  ;;  %v18921_v28 = vld [vmem:[%s24299_s11 + $0x514] ss:$12 sps:$4 sm:$0xff]  }
 0xa7d   : > { %12399 = vmatpush1.bf16.msra.mxu1 %v18849_v13  ;;  %v18919_v13 = vld [vmem:[%s24299_s11 + $0x510] ss:$12 sps:$4 sm:$0xff]  }
 0xa7e   : > { %12400 = vmatprep.subr.bf16.mxu1 %v18856_v49  ;;  %v18924_v49 = vld [vmem:[%s24299_s11 + $0x52c] ss:$12 sps:$4 sm:$0xff]  }
 0xa7f   : > { %16446 = vmatpush3.bf16.msra.mxu0 %v18853_v35  ;;  %v18922_v35 = vld [vmem:[%s24299_s11 + $0x528] ss:$12 sps:$4 sm:$0xff]  }
 0xa80   : > { %16447 = vmatprep.subr.bf16.mxu0 %v18857_v38  ;;  %v18925_v38 = vld [vmem:[%s24301_s13 + $0x140] sm:$0xff]  }
 0xa81   : > { %12401 = vmatpush1.bf16.msra.mxu1 %v18854_v34  ;;  %v18926_v34 = vld [vmem:[%s24301_s13 + $0x148] sm:$0xff]  }
 0xa82   : > { %12402 = vmatprep.subr.bf16.mxu1 %v18861_v17  ;;  %v18927_v17 = vld [vmem:[%s24301_s13 + $0x150] sm:$0xff]  }
 0xa83   : > { %16448 = vmatpush3.bf16.msra.mxu0 %v18858_v32  ;;  %v18929_v32 = vld [vmem:[%s24301_s13 + $0x160] sm:$0xff]  }
 0xa84   : > { %16449 = vmatprep.subr.bf16.mxu0 %v18862_v22  ;;  %v18930_v22 = vld [vmem:[%s24301_s13 + $0x168] sm:$0xff]  }
 0xa85   : > { %12403 = vmatpush1.bf16.msra.mxu1 %v18859_v1  ;;  %v18931_v1 = vld [vmem:[%s24301_s13 + $0x170] sm:$0xff]  }
 0xa86   : > { %12404 = vmatprep.subr.bf16.mxu1 %v18866_v3  ;;  %v18932_v3 = vld [vmem:[%s24301_s13 + $0x178] sm:$0xff]  }
 0xa87   : > { %16450 = vmatpush3.bf16.msra.mxu0 %v18863_v42 }
 0xa88   : > { %16451 = vmatprep.subr.bf16.mxu0 %v18867_v11 }
 0xa89   : > { %12405 = vmatpush1.bf16.msra.mxu1 %v18864_v29 }
 0xa8a   : > { %12948 = vmatprep.subr.bf16.mxu1 %v18871_v50  ;;  %v18935_v50 = vld [vmem:[%s24301_s13 + $0x100] sm:$0xff]  }
 0xa8b   : > { %16452 = vmatpush3.bf16.msra.mxu0 %v18868_v36 }
 0xa8c   : > { %12407 = vmatmul.mubr.bf16.vlgmr.msra.gmra.mrb[52].mxu1 %v23414_v43  ;;  %16453 = vmatprep.subr.bf16.mxu0 %v18872_v44  ;;  %v18928_v43 = vld [vmem:[%s24301_s13 + $0x158] sm:$0xff]   ;;  %v18936_v44 = vld [vmem:[%s24301_s13 + $0xc0] sm:$0xff]  }
 0xa8d   : > { %12949 = vmatpush1.bf16.msra.mxu1 %v18869_v47  ;;  %12980 = vmatprep.mubr.bf16.mxu1 %v12621_v25  ;;  %v18915_v25 = vld [vmem:[%s24299_s11 + $0x4e4] ss:$12 sps:$4 sm:$0xff]  }
 0xa8e   : > { %12950 = vmatprep.subr.bf16.mxu1 %v18876_v15  ;;  %v18938_v15 = vld [vmem:[%s24301_s13 + $0x108] sm:$0xff]  }
 0xa8f   : > { %16454 = vmatpush3.bf16.msra.mxu0 %v18873_v55  ;;  %v16403_v48 = vpop.f32.mrb[84].mxu0 }
 0xa90   : > { %v16404_v14 = vpop.f32.mrb[85].mxu0  ;;  %16455 = vmatprep.subr.bf16.mxu0 %v18877_v19 }
 0xa91   : > { %v23816_v0 = vadd.f32 %v16404_v14, %v16403_v48  ;;  %12951 = vmatpush1.bf16.msra.mxu1 %v18874_v45  ;;  %v16406_v21 = vpop.f32.mrb[86].mxu0  ;;  %v18939_v45 = vld [vmem:[%s24301_s13 + $0xc8] sm:$0xff]   ;;  %v18941_v14 = vld [vmem:[%s24301_s13 + $0x110] sm:$0xff]  }
 0xa92   : > { %v16407_v7 = vpop.f32.mrb[87].mxu0  ;;  %12952 = vmatprep.subr.bf16.mxu1 %v18881_v39  ;;  %v18942_v21 = vld [vmem:[%s24301_s13 + $0xd0] sm:$0xff]  }
 0xa93   : > { %16456 = vmatpush3.bf16.msra.mxu0 %v18878_v51  ;;  %v18948_v7 = vld [vmem:[%s24301_s13 + $0xe0] sm:$0xff]  }
 0xa94   : > { %16626 = vmatprep.subr.bf16.mxu0 %v19070_v6 }
 0xa95   : > { %12953 = vmatpush1.bf16.msra.mxu1 %v18879_v30  ;;  %v18947_v30 = vld [vmem:[%s24301_s13 + $0x120] sm:$0xff]  }
 0xa96   : > { %13063 = vmatmul.mubr.bf16.vlgmr.msra.gmra.mrb[104].mxu0 %v12620_v63  ;;  %12954 = vmatprep.subr.bf16.mxu1 %v18885_v46 }
 0xa97   : > { %16627 = vmatpush3.bf16.msra.mxu0 %v18882_v56  ;;  %16634 = vmatprep.mubr.msk.bf16.mxu0 %vm19071_vm4, %v19070_v6 }
 0xa98   : > { %16628 = vmatprep.subr.bf16.mxu0 %v19070_v6 }
 0xa99   : > { %12955 = vmatpush1.bf16.msra.mxu1 %v18883_v41  ;;  %v18950_v41 = vld [vmem:[%s24301_s13 + $0x128] sm:$0xff]  }
 0xa9a   : > { %12956 = vmatprep.subr.bf16.mxu1 %v18889_v58 }
 0xa9b   : > { %16629 = vmatpush3.bf16.msra.mxu0 %v18886_v4  ;;  %v18951_v4 = vld [vmem:[%s24301_s13 + $0xe8] sm:$0xff]  }
 0xa9c   : > { %16630 = vmatprep.subr.bf16.mxu0 %v19070_v6 }
 0xa9d   : > { %12957 = vmatpush1.bf16.msra.mxu1 %v18887_v33 }
 0xa9e   : > { %12958 = vmatprep.subr.bf16.mxu1 %v18893_v52  ;;  %v18953_v52 = vld [vmem:[%s24301_s13 + $0x130] sm:$0xff]  }
 0xa9f   : > { %16631 = vmatpush3.bf16.msra.mxu0 %v18890_v53  ;;  %v18956_v53 = vld [vmem:[%s24301_s13 + $0x138] sm:$0xff]  }
 0xaa0   : > { %16632 = vmatprep.subr.bf16.mxu0 %v19070_v6 }
 0xaa1   : > { %12959 = vmatpush1.bf16.msra.mxu1 %v18891_v2 }
 0xaa2   : > { %12960 = vmatprep.subr.bf16.mxu1 %v18897_v54  ;;  %v18957_v54 = vld [vmem:[%s24301_s13 + $0xf8] sm:$0xff]  }
 0xaa3   : > { %16633 = vmatpush3.bf16.msra.mxu0 %v18894_v59 }
 0xaa4   : > { %16638 = vmatprep.subr.bf16.mxu0 %v19070_v6 }
 0xaa5   : > { %12961 = vmatpush1.bf16.msra.mxu1 %v18895_v60 }
 0xaa6   : > { %16635 = vmatmul.mubr.msk.bf16.vlgmr.msra.gmra.mrb[108].mxu0 %vm3261_vm8, %v12622_v23  ;;  %12962 = vmatprep.subr.bf16.mxu1 %v18900_v31  ;;  %v18912_v23 = vld [vmem:[%s24299_s11 + $0x4cc] ss:$12 sps:$4 sm:$0xff]  }
 0xaa7   : > { %16654 = vmatprep.mubr.msk.bf16.mxu0 %vm19071_vm4, %v19070_v6  ;;  %16639 = vmatpush3.bf16.msra.mxu0 %v18925_v38 }
 0xaa8   : > { %16640 = vmatprep.subr.bf16.mxu0 %v19070_v6 }
 0xaa9   : > { %12963 = vmatpush1.bf16.msra.mxu1 %v18898_v5 }
 0xaaa   : > { %12964 = vmatprep.subr.bf16.mxu1 %v18903_v8  ;;  %v18959_v8 = vld [vmem:[%s24301_s13 + $0x40] sm:$0xff]  }
 0xaab   : > { %16641 = vmatpush3.bf16.msra.mxu0 %v18926_v34 }
 0xaac   : > { %16642 = vmatprep.subr.bf16.mxu0 %v19070_v6 }
 0xaad   : > { %12965 = vmatpush1.bf16.msra.mxu1 %v18901_v9 }
 0xaae   : > { %12966 = vmatprep.subr.bf16.mxu1 %v18906_v20 }
 0xaaf   : > { %16643 = vmatpush3.bf16.msra.mxu0 %v18927_v17 }
 0xab0   : > { %16644 = vmatprep.subr.bf16.mxu0 %v19070_v6 }
 0xab1   : > { %12967 = vmatpush1.bf16.msra.mxu1 %v18904_v10 }
 0xab2   : > { %12968 = vmatprep.subr.bf16.mxu1 %v18909_v12 }
 0xab3   : > { %16645 = vmatpush3.bf16.msra.mxu0 %v18928_v43 }
 0xab4   : > { %16646 = vmatprep.subr.bf16.mxu0 %v19070_v6 }
 0xab5   : > { %12969 = vmatpush1.bf16.msra.mxu1 %v18907_v16 }
 0xab6   : > { %12970 = vmatprep.subr.bf16.mxu1 %v18912_v23 }
 0xab7   : > { %16647 = vmatpush3.bf16.msra.mxu0 %v18929_v32 }
 0xab8   : > { %16648 = vmatprep.subr.bf16.mxu0 %v19070_v6 }
 0xab9   : > { %12971 = vmatpush1.bf16.msra.mxu1 %v18910_v24 }
 0xaba   : > { %12972 = vmatprep.subr.bf16.mxu1 %v18915_v25 }
 0xabb   : > { %16649 = vmatpush3.bf16.msra.mxu0 %v18930_v22 }
 0xabc   : > { %16650 = vmatprep.subr.bf16.mxu0 %v19070_v6 }
 0xabd   : > { %12973 = vmatpush1.bf16.msra.mxu1 %v18913_v40 }
 0xabe   : > { %12974 = vmatprep.subr.bf16.mxu1 %v18918_v27 }
 0xabf   : > { %16651 = vmatpush3.bf16.msra.mxu0 %v18931_v1 }
 0xac0   : > { %16652 = vmatprep.subr.bf16.mxu0 %v19070_v6 }
 0xac1   : > { %12975 = vmatpush1.bf16.msra.mxu1 %v18916_v26 }
 0xac2   : > { %12976 = vmatprep.subr.bf16.mxu1 %v18921_v28 }
 0xac3   : > { %16653 = vmatpush3.bf16.msra.mxu0 %v18932_v3 }
 0xac4   : > { %16658 = vmatprep.subr.bf16.mxu0 %v19070_v6 }
 0xac5   : > { %12977 = vmatpush1.bf16.msra.mxu1 %v18919_v13 }
 0xac6   : > { %12978 = vmatprep.subr.bf16.mxu1 %v18924_v49 }
 0xac9   : > { %12979 = vmatpush1.bf16.msra.mxu1 %v18922_v35 }
 0xaca   : > { %16468 = vmatprep.subr.bf16.mxu1 %v18935_v50 }
 0xacc   : > { %12981 = vmatmul.mubr.bf16.vlgmr.msra.gmra.mrb[56].mxu1 %v12620_v63 }
 0xacd   : > { %16469 = vmatpush3.bf16.msra.mxu1 %v18936_v44 }
 0xace   : > { %16470 = vmatprep.subr.bf16.mxu1 %v18938_v15 }
 0xad1   : > { %16471 = vmatpush3.bf16.msra.mxu1 %v18939_v45 }
 0xad2   : > { %16472 = vmatprep.subr.bf16.mxu1 %v18941_v14  ;;  %v18940_v14 = vld [vmem:[%s24301_s13 + $0x98] sm:$0xff]  }
 0xad5   : > { %16473 = vmatpush3.bf16.msra.mxu1 %v18942_v21  ;;  %v18943_v21 = vld [vmem:[%s24301_s13 + $0xa0] sm:$0xff]  }
 0xb09   : > { %v23960_v42 = vpop.f32.mrb[88].mxu0 }
 0xb0a   : > { %v23962_v11 = vpop.f32.mrb[89].mxu0 }
 0xb0b   : > { %v12453_v29 = vpop.f32.mrb[90].mxu0 }
 0xb0c   : > { %v12454_v36 = vpop.f32.mrb[91].mxu0  ;;  %v13113_v29 = vld [vmem:[%s24300_s12] sm:$0x7] }
 0xb0d   : > { %v13126_v44 = vrot.slane %v13113_v29, %v19459_v18  ;;  %v18934_v18 = vld [vmem:[%s24301_s13 + $0x88] sm:$0xff]  }
 0xb0f   : > { %v11965_v47 = vpop.f32.mrb[44].mxu1 }
 0xb10   : > { %v11966_v55 = vadd.f32 %v11965_v47, %v23707_v37  ;;  %v11967_v19 = vpop.f32.mrb[45].mxu1  ;;  %v18944_v37 = vld [vmem:[%s24301_s13 + $0x118] sm:$0xff]  }
 0xb11   : > { %v11968_v39 = vadd.f32 %v11967_v19, %v23712_v57  ;;  %v11969_v48 = vpop.f32.mrb[46].mxu1  ;;  %v18945_v57 = vld [vmem:[%s24301_s13 + $0xd8] sm:$0xff]   ;;  %16474 = vmatprep.subr.bf16.mxu1 %v18944_v37  ;;  %v18946_v37 = vld [vmem:[%s24301_s13 + $0xa8] sm:$0xff]  }
 0xb12   : > { %v11970_v51 = vpop.f32.mrb[47].mxu1  ;;  %16475 = vmatpush3.bf16.msra.mxu1 %v18945_v57  ;;  %v18949_v57 = vld [vmem:[%s24301_s13 + $0xb0] sm:$0xff]  }
 0xb13   : > { %16476 = vmatprep.subr.bf16.mxu1 %v18947_v30  ;;  %v18937_v51 = vld [vmem:[%s24301_s13 + $0x90] sm:$0xff]  }
 0xb16   : > { %16477 = vmatpush3.bf16.msra.mxu1 %v18948_v7  ;;  %v18952_v7 = vld [vmem:[%s24301_s13 + $0xb8] sm:$0xff]  }
 0xb17   : > { %16478 = vmatprep.subr.bf16.mxu1 %v18950_v41 }
 0xb1a   : > { %16479 = vmatpush3.bf16.msra.mxu1 %v18951_v4 }
 0xb1b   : > { %16480 = vmatprep.subr.bf16.mxu1 %v18953_v52 }
 0xb1f   : > { %v12046_v46 = vpop.f32.mrb[48].mxu1 }
 0xb20   : > { %v12047_v56 = vadd.f32 %v23816_v0, %v12046_v46  ;;  %v16612_v63 = vpop.f32.mrb[49].mxu1  ;;  %v18954_v0 = vld [vmem:[%s24301_s13 + $0xf0] sm:$0xff]  }
 0xb21   : > { %v12049_v58 = vpop.f32.mrb[50].mxu1  ;;  %16481 = vmatpush3.bf16.msra.mxu1 %v18954_v0 }
 0xb22   : > { %v16613_v33 = vpop.f32.mrb[51].mxu1  ;;  %16482 = vmatprep.subr.bf16.mxu1 %v18956_v53  ;;  %v13122_v58 = vrot.slane %v13113_v29, %v19532_v62  ;;  %v18955_v53 = vld [vmem:[%s24301_s13 + $0x200] sm:$0xff]   ;;  %v18958_v62 = vld [vmem:[%s24301_s13 + $0x208] sm:$0xff]  }
 0xb25   : > { %16483 = vmatpush3.bf16.msra.mxu1 %v18957_v54 }
 0xb26   : > { %16499 = vmatprep.subr.bf16.mxu1 %v18959_v8  ;;  %v18960_v8 = vld [vmem:[%s24301_s13] sm:$0xff]  }
 0xb29   : > { %v16430_v2 = vpop.f32.mrb[92].mxu0 }
 0xb2a   : > { %v16431_v59 = vpop.f32.mrb[93].mxu0 }
 0xb2b   : > { %v16432_v60 = vadd.f32 %v16431_v59, %v16430_v2  ;;  %v16433_v31 = vpop.f32.mrb[94].mxu0 }
 0xb2c   : > { %v16434_v5 = vpop.f32.mrb[95].mxu0 }
 0xb2d   : > { %v12491_v9 = vadd.f32 %v16432_v60, %v12047_v56  ;;  %v13118_v56 = vrot.slane %v13113_v29, %v19529_v61  ;;  %v18982_v29 = vld [vmem:[%s24301_s13 + $0x180] sm:$0xff]  }
 0xb39   : > { %v12530_v20 = vpop.f32.mrb[96].mxu0 }
 0xb3a   : > { %v12531_v10 = vadd.f32 %v12530_v20, %v12491_v9  ;;  %v16624_v12 = vpop.f32.mrb[97].mxu0  ;;  %v18961_v9 = vld [vmem:[%s24301_s13 + $0x210] sm:$0xff]  }
 0xb3b   : > { %v12533_v16 = vpop.f32.mrb[98].mxu0  ;;  %v18963_v12 = vld [vmem:[%s24301_s13 + $0x8] sm:$0xff]  }
 0xb3c   : > { %v16625_v23 = vpop.f32.mrb[99].mxu0  ;;  %v18964_v16 = vld [vmem:[%s24301_s13 + $0x218] sm:$0xff]  }
 0xb3d   : > { %v18965_v23 = vld [vmem:[%s24301_s13 + $0x50] sm:$0xff]  }
 0xb49   : > { %v13023_v24 = vpop.f32.mrb[100].mxu0 }
 0xb4a   : > { %v13025_v25 = vpop.f32.mrb[101].mxu0 }
 0xb4b   : > { %v13027_v40 = vpop.f32.mrb[102].mxu0 }
 0xb4c   : > { %v13028_v27 = vpop.f32.mrb[103].mxu0  ;;  %v18968_v40 = vld [vmem:[%s24301_s13 + $0x58] sm:$0xff]  }
 0xb4d   : > { %v18969_v27 = vld [vmem:[%s24301_s13 + $0x18] sm:$0xff]  }
 0xb5f   : > { %v12408_v26 = vpop.f32.mrb[52].mxu1 }
 0xb60   : > { %v12409_v28 = vadd.f32 %v12408_v26, %v11966_v55  ;;  %v12410_v13 = vpop.f32.mrb[53].mxu1  ;;  %v18970_v26 = vld [vmem:[%s24301_s13 + $0x228] sm:$0xff]  }
 0xb61   : > { %v12411_v49 = vadd.f32 %v12410_v13, %v11968_v39  ;;  %v12412_v35 = vpop.f32.mrb[54].mxu1  ;;  %v18933_v39 = vld [vmem:[%s24301_s13 + $0x80] sm:$0xff]  }
 0xb62   : > { %v12450_v38 = vadd.f32 %v23960_v42, %v12409_v28  ;;  %v12413_v34 = vpop.f32.mrb[55].mxu1  ;;  %v18971_v28 = vld [vmem:[%s24301_s13 + $0x60] sm:$0xff]   ;;  %v18974_v35 = vld [vmem:[%s24301_s13 + $0x68] sm:$0xff]  }
 0xb63   : > { %v12452_v17 = vadd.f32 %v23962_v11, %v12411_v49  ;;  %v18972_v13 = vld [vmem:[%s24301_s13 + $0x20] sm:$0xff]   ;;  %v18973_v49 = vld [vmem:[%s24301_s13 + $0x230] sm:$0xff]   ;;  %v18976_v34 = vld [vmem:[%s24301_s13 + $0x238] sm:$0xff]  }
 0xb69   : > { %v16457_v43 = vpop.f32.mrb[104].mxu0 }
 0xb6a   : > { %v16458_v32 = vpop.f32.mrb[105].mxu0 }
 0xb6b   : > { %v16459_v22 = vadd.f32 %v16458_v32, %v16457_v43  ;;  %v16460_v1 = vpop.f32.mrb[106].mxu0  ;;  %v18978_v43 = vld [vmem:[%s24301_s13 + $0x30] sm:$0xff]  }
 0xb6c   : > { %v16461_v3 = vpop.f32.mrb[107].mxu0  ;;  %v18980_v1 = vld [vmem:[%s24301_s13 + $0x38] sm:$0xff]  }
 0xb6d   : > { %v18981_v3 = vld [vmem:[%s24301_s13 + $0x1c0] sm:$0xff]  }
 0xb79   : > { %v13104_v50 = vpop.f32.mrb[108].mxu0 }
 0xb7a   : > { %v13105_v36 = vadd.f32 %v16459_v22, %v13104_v50  ;;  %v16636_v47 = vpop.f32.mrb[109].mxu0  ;;  %v18979_v22 = vld [vmem:[%s24301_s13 + $0x78] sm:$0xff]   ;;  %v18983_v50 = vld [vmem:[%s24301_s13 + $0x1c8] sm:$0xff]  }
 0xb7b   : > { %v13107_v15 = vpop.f32.mrb[110].mxu0  ;;  %v18985_v47 = vld [vmem:[%s24301_s13 + $0x1d0] sm:$0xff]  }
 0xb7c   : > { %v13112_v55 = vadd.f32 %v13105_v36, %v12531_v10  ;;  %v16637_v42 = vpop.f32.mrb[111].mxu0  ;;  %v18962_v10 = vld [vmem:[%s24301_s13 + $0x48] sm:$0xff]   ;;  %v18986_v15 = vld [vmem:[%s24301_s13 + $0x190] sm:$0xff]  }
 0xb7d   : > { %v18988_v42 = vld [vmem:[%s24301_s13 + $0x198] sm:$0xff]  }
 0xb7e   : > { %v13132_v19 = vadd.f32 %v13126_v44, %v13112_v55  ;;  %v18984_v44 = vld [vmem:[%s24301_s13 + $0x188] sm:$0xff]   ;;  %v18987_v55 = vld [vmem:[%s24301_s13 + $0x1d8] sm:$0xff]  }
 0xb80   : > { %v13135_v45 = vmax.f32 %v13132_v19, 0.0  ;;  %v18989_v19 = vld [vmem:[%s24301_s13 + $0x1e0] sm:$0xff]  }
 0xb82   : > { %v24024_v11 = vpack.c.bf16 %v13135_v45, %v13135_v45  ;;  %v18990_v45 = vld [vmem:[%s24301_s13 + $0x1a0] sm:$0xff]  }
 0xb84   : > { %v13243_v48 = vshrl.u32 %v24024_v11, 16  ;;  %v13750_v32 = vrot.slane %v24024_v11, 1 }
 0xb86   : > { %16655 = vmatmul.mubr.bf16.vlgmr.msra.gmra.mrb[112].mxu0 %v13243_v48  ;;  %v18993_v48 = vld [vmem:[%s24301_s13 + $0x1f0] sm:$0xff]  }
 0xb87   : > { %16659 = vmatpush3.bf16.msra.mxu0 %v18933_v39  ;;  %16674 = vmatprep.mubr.msk.bf16.mxu0 %vm19071_vm4, %v19070_v6  ;;  %v18992_v39 = vld [vmem:[%s24301_s13 + $0x1a8] sm:$0xff]  }
 0xb88   : > { %16660 = vmatprep.subr.bf16.mxu0 %v19070_v6 }
 0xb8b   : > { %16661 = vmatpush3.bf16.msra.mxu0 %v18934_v18  ;;  %v18994_v18 = vld [vmem:[%s24301_s13 + $0x1b0] sm:$0xff]  }
 0xb8c   : > { %16662 = vmatprep.subr.bf16.mxu0 %v19070_v6 }
 0xb8f   : > { %16663 = vmatpush3.bf16.msra.mxu0 %v18937_v51  ;;  %v18995_v51 = vld [vmem:[%s24301_s13 + $0x1f8] sm:$0xff]  }
 0xb90   : > { %16664 = vmatprep.subr.bf16.mxu0 %v19070_v6 }
 0xb93   : > { %16665 = vmatpush3.bf16.msra.mxu0 %v18940_v14  ;;  %v18996_v14 = vld [vmem:[%s24301_s13 + $0x1b8] sm:$0xff]  }
 0xb94   : > { %16666 = vmatprep.subr.bf16.mxu0 %v19070_v6 }
 0xb97   : > { %16667 = vmatpush3.bf16.msra.mxu0 %v18943_v21 }
 0xb98   : > { %16668 = vmatprep.subr.bf16.mxu0 %v19070_v6 }
 0xb9b   : > { %16669 = vmatpush3.bf16.msra.mxu0 %v18946_v37  ;;  %v18997_v37 = vld [vmem:[%s24303_s15] sm:$0xff]  }
 0xb9c   : > { %16670 = vmatprep.subr.bf16.mxu0 %v19070_v6 }
 0xb9f   : > { %16671 = vmatpush3.bf16.msra.mxu0 %v18949_v57  ;;  %v12982_v30 = vpop.f32.mrb[56].mxu1  ;;  %v18998_v57 = vld [vmem:[%s24303_s15 + $0x8] sm:$0xff]  }
 0xba0   : > { %v13024_v46 = vadd.f32 %v13023_v24, %v12982_v30  ;;  %v12984_v63 = vpop.f32.mrb[57].mxu1  ;;  %16672 = vmatprep.subr.bf16.mxu0 %v19070_v6  ;;  %v18966_v24 = vld [vmem:[%s24301_s13 + $0x10] sm:$0xff]  }
 0xba1   : > { %v13026_v41 = vadd.f32 %v13025_v25, %v12984_v63  ;;  %v12986_v4 = vpop.f32.mrb[58].mxu1  ;;  %v18967_v25 = vld [vmem:[%s24301_s13 + $0x220] sm:$0xff]   ;;  %v18999_v30 = vld [vmem:[%s24303_s15 + $0x10] sm:$0xff]  }
 0xba2   : > { %v13110_v33 = vadd.f32 %v13024_v46, %v12450_v38  ;;  %v12987_v52 = vpop.f32.mrb[59].mxu1  ;;  %v18975_v38 = vld [vmem:[%s24301_s13 + $0x28] sm:$0xff]   ;;  %v19001_v46 = vld [vmem:[%s24303_s15 + $0x20] sm:$0xff]   ;;  %v19003_v63 = vld [vmem:[%s24303_s15 + $0x30] sm:$0xff]  }
 0xba3   : > { %v13111_v0 = vadd.f32 %v13026_v41, %v12452_v17  ;;  %16673 = vmatpush3.bf16.msra.mxu0 %v18952_v7  ;;  %v18977_v17 = vld [vmem:[%s24301_s13 + $0x70] sm:$0xff]   ;;  %v19000_v7 = vld [vmem:[%s24303_s15 + $0x18] sm:$0xff]  }
 0xba4   : > { %v13130_v2 = vadd.f32 %v13118_v56, %v13110_v33  ;;  %16678 = vmatprep.subr.bf16.mxu0 %v19070_v6  ;;  %v19002_v56 = vld [vmem:[%s24303_s15 + $0x28] sm:$0xff]   ;;  %v19004_v41 = vld [vmem:[%s24303_s15 + $0x38] sm:$0xff]  }
 0xba5   : > { %v13131_v54 = vadd.f32 %v13122_v58, %v13111_v0 }
 0xba6   : > { %v13133_v61 = vmax.f32 %v13130_v2, 0.0  ;;  %16675 = vmatmul.mubr.bf16.vlgmr.msra.gmra.mrb[116].mxu0 %v24024_v11  ;;  %v18991_v11 = vld [vmem:[%s24301_s13 + $0x1e8] sm:$0xff]  }
 0xba7   : > { %v13134_v59 = vmax.f32 %v13131_v54, 0.0  ;;  %16679 = vmatpush3.bf16.msra.mxu0 %v18955_v53  ;;  %16694 = vmatprep.mubr.msk.bf16.mxu0 %vm19071_vm4, %v19070_v6 }
 0xba8   : > { %v24072_v60 = vpack.c.bf16 %v13133_v61, %v13133_v61  ;;  %16680 = vmatprep.subr.bf16.mxu0 %v19070_v6 }
 0xba9   : > { %v24075_v31 = vpack.c.bf16 %v13134_v59, %v13134_v59 }
 0xbaa   : > { %v13237_v20 = vshrl.u32 %v24072_v60, 16  ;;  %v13748_v21 = vrot.slane %v24072_v60, 1 }
 0xbab   : > { %16681 = vmatpush3.bf16.msra.mxu0 %v18958_v62  ;;  %v13240_v5 = vshrl.u32 %v24075_v31, 16  ;;  %v13749_v36 = vrot.slane %v24075_v31, 1 }
 0xbac   : > { %16682 = vmatprep.subr.bf16.mxu0 %v19070_v6 }
 0xbad   : > { %13424 = vmatprep.mubr.bf16.mxu1 %v13240_v5 }
 0xbae   : > { %13425 = vmatmul.mubr.bf16.vlgmr.msra.gmra.mrb[60].mxu1 %v13237_v20 }
 0xbaf   : > { %16500 = vmatpush3.bf16.msra.mxu1 %v18960_v8  ;;  %16683 = vmatpush3.bf16.msra.mxu0 %v18961_v9 }
 0xbb0   : > { %13648 = vmatprep.mubr.bf16.mxu1 %v24075_v31  ;;  %16501 = vmatprep.subr.bf16.mxu1 %v18962_v10 }
 0xbb1   : > { %16684 = vmatprep.subr.bf16.mxu0 %v19070_v6 }
 0xbb3   : > { %16502 = vmatpush3.bf16.msra.mxu1 %v18963_v12  ;;  %16685 = vmatpush3.bf16.msra.mxu0 %v18964_v16 }
 0xbb4   : > { %16503 = vmatprep.subr.bf16.mxu1 %v18965_v23  ;;  %16686 = vmatprep.subr.bf16.mxu0 %v19070_v6 }
 0xbb7   : > { %16504 = vmatpush3.bf16.msra.mxu1 %v18966_v24  ;;  %16687 = vmatpush3.bf16.msra.mxu0 %v18967_v25 }
 0xbb8   : > { %16505 = vmatprep.subr.bf16.mxu1 %v18968_v40  ;;  %16688 = vmatprep.subr.bf16.mxu0 %v19070_v6 }
 0xbbb   : > { %16506 = vmatpush3.bf16.msra.mxu1 %v18969_v27  ;;  %16689 = vmatpush3.bf16.msra.mxu0 %v18970_v26 }
 0xbbc   : > { %16507 = vmatprep.subr.bf16.mxu1 %v18971_v28  ;;  %16690 = vmatprep.subr.bf16.mxu0 %v19070_v6 }
 0xbbf   : > { %16508 = vmatpush3.bf16.msra.mxu1 %v18972_v13  ;;  %16691 = vmatpush3.bf16.msra.mxu0 %v18973_v49 }
 0xbc0   : > { %16509 = vmatprep.subr.bf16.mxu1 %v18974_v35  ;;  %16692 = vmatprep.subr.bf16.mxu0 %v19070_v6 }
 0xbc3   : > { %16510 = vmatpush3.bf16.msra.mxu1 %v18975_v38  ;;  %16693 = vmatpush3.bf16.msra.mxu0 %v18976_v34  ;;  %v13979_v38 = vld [vmem:[%s24302_s14] sm:$0x1] }
 0xbc4   : > { %16511 = vmatprep.subr.bf16.mxu1 %v18977_v17 }
 0xbc6   : > { %16695 = vmatmul.mubr.bf16.vlgmr.msra.gmra.mrb[120].mxu0 %v13750_v32 }
 0xbc7   : > { %16512 = vmatpush3.bf16.msra.mxu1 %v18978_v43 }
 0xbc8   : > { %16513 = vmatprep.subr.bf16.mxu1 %v18979_v22  ;;  %v13999_v22 = vld [vmem:[%s24304_s16] sm:$0x1] }
 0xbcb   : > { %16514 = vmatpush3.bf16.msra.mxu1 %v18980_v1 }
 0xbcc   : > { %16530 = vmatprep.subr.bf16.mxu1 %v18981_v3 }
 0xbce   : > { %13649 = vmatmul.mubr.bf16.vlgmr.msra.gmra.mrb[64].mxu1 %v24072_v60 }
 0xbcf   : > { %16531 = vmatpush3.bf16.msra.mxu1 %v18982_v29  ;;  %13930 = vmatprep.mubr.bf16.mxu1 %v13749_v36 }
 0xbd0   : > { %16532 = vmatprep.subr.bf16.mxu1 %v18983_v50 }
 0xbd3   : > { %16533 = vmatpush3.bf16.msra.mxu1 %v18984_v44 }
 0xbd4   : > { %16534 = vmatprep.subr.bf16.mxu1 %v18985_v47 }
 0xbd7   : > { %16535 = vmatpush3.bf16.msra.mxu1 %v18986_v15 }
 0xbd8   : > { %16536 = vmatprep.subr.bf16.mxu1 %v18987_v55 }
 0xbdb   : > { %16537 = vmatpush3.bf16.msra.mxu1 %v18988_v42 }
 0xbdc   : > { %16538 = vmatprep.subr.bf16.mxu1 %v18989_v19 }
 0xbdf   : > { %16539 = vmatpush3.bf16.msra.mxu1 %v18990_v45 }
 0xbe0   : > { %16540 = vmatprep.subr.bf16.mxu1 %v18991_v11 }
 0xbe3   : > { %16541 = vmatpush3.bf16.msra.mxu1 %v18992_v39 }
 0xbe4   : > { %16542 = vmatprep.subr.bf16.mxu1 %v18993_v48 }
 0xbe7   : > { %16543 = vmatpush3.bf16.msra.mxu1 %v18994_v18 }
 0xbe8   : > { %16544 = vmatprep.subr.bf16.mxu1 %v18995_v51 }
 0xbeb   : > { %16545 = vmatpush3.bf16.msra.mxu1 %v18996_v14 }
 0xbec   : > { %16698 = vmatprep.subr.bf16.mxu1 %v19070_v6 }
 0xbee   : > { %13931 = vmatmul.mubr.bf16.vlgmr.msra.gmra.mrb[68].mxu1 %v13748_v21 }
 0xbef   : > { %16714 = vmatprep.mubr.msk.bf16.mxu1 %vm19071_vm4, %v19070_v6  ;;  %16699 = vmatpush3.bf16.msra.mxu1 %v18997_v37 }
 0xbf0   : > { %16700 = vmatprep.subr.bf16.mxu1 %v19070_v6 }
 0xbf3   : > { %16701 = vmatpush3.bf16.msra.mxu1 %v18998_v57 }
 0xbf4   : > { %16702 = vmatprep.subr.bf16.mxu1 %v19070_v6 }
 0xbf7   : > { %16703 = vmatpush3.bf16.msra.mxu1 %v18999_v30 }
 0xbf8   : > { %16704 = vmatprep.subr.bf16.mxu1 %v19070_v6 }
 0xbfb   : > { %16705 = vmatpush3.bf16.msra.mxu1 %v19000_v7 }
 0xbfc   : > { %16706 = vmatprep.subr.bf16.mxu1 %v19070_v6 }
 0xbff   : > { %16707 = vmatpush3.bf16.msra.mxu1 %v19001_v46 }
 0xc00   : > { %16708 = vmatprep.subr.bf16.mxu1 %v19070_v6 }
 0xc03   : > { %16709 = vmatpush3.bf16.msra.mxu1 %v19002_v56 }
 0xc04   : > { %16710 = vmatprep.subr.bf16.mxu1 %v19070_v6 }
 0xc07   : > { %16711 = vmatpush3.bf16.msra.mxu1 %v19003_v63 }
 0xc08   : > { %16712 = vmatprep.subr.bf16.mxu1 %v19070_v6 }
 0xc0b   : > { %16713 = vmatpush3.bf16.msra.mxu1 %v19004_v41 }
 0xc59   : > { %v13466_v58 = vpop.f32.mrb[112].mxu0 }
 0xc5a   : > { %v16656_v4 = vpop.f32.mrb[113].mxu0 }
 0xc5b   : > { %v13469_v33 = vpop.f32.mrb[114].mxu0 }
 0xc5c   : > { %v16657_v52 = vpop.f32.mrb[115].mxu0 }
 0xc79   : > { %v13690_v0 = vpop.f32.mrb[116].mxu0 }
 0xc7a   : > { %v16676_v53 = vpop.f32.mrb[117].mxu0 }
 0xc7b   : > { %v13693_v2 = vpop.f32.mrb[118].mxu0 }
 0xc7c   : > { %v16677_v54 = vpop.f32.mrb[119].mxu0 }
 0xc81   : > { %v16484_v61 = vpop.f32.mrb[60].mxu1 }
 0xc82   : > { %v16485_v59 = vpop.f32.mrb[61].mxu1 }
 0xc83   : > { %v16486_v62 = vadd.f32 %v16485_v59, %v16484_v61  ;;  %v16487_v60 = vpop.f32.mrb[62].mxu1 }
 0xc84   : > { %v16488_v31 = vpop.f32.mrb[63].mxu1 }
 0xc85   : > { %v13467_v5 = vadd.f32 %v16486_v62, %v13466_v58 }
 0xc99   : > { %v13972_v6 = vpop.f32.mrb[120].mxu0 }
 0xc9a   : > { %v16696_v8 = vpop.f32.mrb[121].mxu0 }
 0xc9b   : > { %v13975_v9 = vpop.f32.mrb[122].mxu0 }
 0xc9c   : > { %v16697_v20 = vpop.f32.mrb[123].mxu0 }
 0xca1   : > { %v16515_v10 = vpop.f32.mrb[64].mxu1 }
 0xca2   : > { %v16516_v12 = vpop.f32.mrb[65].mxu1 }
 0xca3   : > { %v16517_v16 = vadd.f32 %v16516_v12, %v16515_v10  ;;  %v16518_v23 = vpop.f32.mrb[66].mxu1 }
 0xca4   : > { %v16519_v24 = vpop.f32.mrb[67].mxu1 }
 0xca5   : > { %v13651_v25 = vadd.f32 %v16517_v16, %v13467_v5 }
 0xca7   : > { %v13691_v40 = vadd.f32 %v13690_v0, %v13651_v25 }
 0xcc1   : > { %v16546_v27 = vpop.f32.mrb[68].mxu1 }
 0xcc2   : > { %v16547_v26 = vpop.f32.mrb[69].mxu1 }
 0xcc3   : > { %v16548_v28 = vadd.f32 %v16547_v26, %v16546_v27  ;;  %v16549_v13 = vpop.f32.mrb[70].mxu1 }
 0xcc4   : > { %v16550_v49 = vpop.f32.mrb[71].mxu1 }
 0xcc5   : > { %v13973_v35 = vadd.f32 %v16548_v28, %v13972_v6 }
 0xcc7   : > { %v13978_v34 = vadd.f32 %v13973_v35, %v13691_v40 }
 0xcc9   : > { %v13980_v17 = vadd.f32 %v13979_v38, %v13978_v34 }
 0xccb   : > { %v13981_v43 = vmax.f32 %v13980_v17, 0.0 }
 0xccd   : > { %v13982_v32 = vpack.c.bf16 %v13981_v43, %v13981_v43 }
 0xccf   : > { %16715 = vmatmul.mubr.bf16.vlgmr.msra.gmra.mrb[72].mxu1 %v13982_v32 }
 0xda2   : > { %v14082_v1 = vpop.f32.mrb[72].mxu1 }
 0xda3   : > { %v14083_v3 = vadd.f32 %v14082_v1, %v13999_v22  ;;  %v16716_v29 = vpop.f32.mrb[73].mxu1 }
 0xda4   : > { %v14085_v50 = vpop.f32.mrb[74].mxu1 }
 0xda5   : > { %v14088_v36 = vmax.f32 %v14083_v3, 0.0  ;;  %v16717_v44 = vpop.f32.mrb[75].mxu1 }
 0xda7   : > { %14089 = vst [vmem:[%s540_s2] sm:$0x1] %v14088_v36 }
 0xda8   : > { %19018 = shalt.err (!%p19015_p3)
}
 0xda9   : > { %s19019_s26 = scalar_lea.hbm %s24246_s24, 16  ;;  %s19023_s2 = scalar_lea.hbm %s24305_s17, 32 }
 0xdaa   : > { %p19020_p4 = scmp.ne.s32.totalorder %s24246_s24, %s19019_s26  ;;  %p19024_p9 = scmp.lt.u32.totalorder %s24246_s24, %s24305_s17 }
 0xdab   : > { %p19025_p10 = scmp.lt.u32.totalorder %s19023_s2, %s19019_s26  ;;  %p19027_p12 = scmp.lt.u32.totalorder %s19019_s26, %s24246_s24 }
 0xdac   : > { %p19021_p7 = pnand %p19020_p4, %p19202_p5 }
 0xdad   : > { %p19026_p11 = por %p19025_p10, %p19024_p9 }
 0xdae   : > { %p19022_p8 = pneg %p19021_p7 }
 0xdaf   : > { %p19028_p13 = por %p19027_p12, %p19026_p11 }
 0xdb1   : > { %p19029_p0 = pnand %p19028_p13, %p19022_p8 }
 0xdb3   : > { %19032 = shalt.err (!%p19029_p0)
}
 0xdb4   : > { %16901 = dma.vmem_to_hbm [thread:$0]  (%p19202_p5), %s24248_s3, 16, %s24246_s24, %s14091_s20  }
 0xdb5 PF: > { %s24327_s28 = sld [smem:[#allocation5_spill]]  ;;  %p16907_p1 = scmp.ge.s32.totalorder %s19067_s27, 2 }
 0xdb7   : > { %p16904_p2 = pnand %p16907_p1, %p19206_p6 }
 0xdbb   : > { %s14115_s18 = sand.u32 1, %s24327_s28  }
 0xdbc   : > { %s14116_s0 = scalar_lea.sflag [#allocation3], %s14115_s18 }
 0xdbd   : > { %19050 = dma.done.wait (!%p16904_p2), %s14116_s0, 16  }
 0xdbe   : > { %19052 = vsyncadd (!%p16904_p2), %s14116_s0, 4294967280  ;;  %s24329_s27 = sld [smem:[#allocation7_spill]]  ;;  %s24330_s26 = sld [smem:[#allocation6_spill]] }
 0xdbf   : > { %s24331_s21 = sld [smem:[#allocation8_spill]]  ;;  %s24332_s24 = smov %s19059_s25 }
 0xdc4   : > { %p27_p3 = scmp.ge.s32.totalorder %s24329_s27, 4   ;;  %s24333_s25 = smov %s24330_s26 }
 0xdc5   : > { %s24334_s26 = smov %s24331_s21 }
 0xdc6   :  { %29 = sbr.rel (!%p27_p3) target bundleno = 8 (0x8), region = 131 }
 0xdcd   :  { %14120 = vsyncpa [#allocation3], 1 }
 0xdce   :  { %14122 = vsyncpa [#allocation3 + $0x1], 1 }

</bundles_post_ra>
